<compile_context>
chip_gen: v5e
topology: v5e:2x2
jax: 0.10.0
libtpu: 0.0.40
codegen_flags: <defaults>
</compile_context>

<pallas_src>
import functools

import jax
import jax.numpy as jnp
from jax.experimental import pallas as pl
from jax.experimental.pallas import tpu as pltpu

LANE = 128


def _round_up(x, m):
    return (x + m - 1) // m * m


def _double_conv_kernel(x_ref, w1_ref, b1_ref, w2_ref, b2_ref, o_ref, mid_ref):
    # x_ref : (1, H, W, C1p)       padded NHWC input, one batch element
    # w1_ref: (3, 3*C1p, C2p)      conv1 weights, dx merged into K
    # b1_ref: (1, C2p)
    # w2_ref: (3, 3*C2p, C2p)      conv2 weights, dx merged into K
    # b2_ref: (1, C2p)
    # o_ref : (1, Ho2, Wo2, C2p)   Ho2 = H-4, Wo2 = W-4
    # mid_ref: VMEM scratch (Ho1, Wo1, C2p) f32, Ho1 = H-2, Wo1 = W-2
    _, H, W, C1 = x_ref.shape
    _, Ho2, Wo2, C2 = o_ref.shape
    Ho1, Wo1, _ = mid_ref.shape

    x = x_ref[0]                                          # (H, W, C1)

    # ---- conv1 + ReLU: 3 matmuls, each K = 3*C1 -------------------------
    acc1 = jnp.zeros((Ho1 * Wo1, C2), jnp.float32)
    for dy in range(3):
        rows = x[dy:dy + Ho1]                             # (Ho1, W, C1)
        win = jnp.concatenate(
            [rows[:, 0:Wo1], rows[:, 1:Wo1 + 1], rows[:, 2:Wo1 + 2]],
            axis=-1)                                      # (Ho1, Wo1, 3*C1)
        acc1 = acc1 + jnp.dot(
            win.reshape(Ho1 * Wo1, 3 * C1), w1_ref[dy],
            preferred_element_type=jnp.float32)
    acc1 = acc1 + b1_ref[0].astype(jnp.float32)
    mid_ref[...] = jnp.maximum(acc1, 0.0).reshape(Ho1, Wo1, C2)

    # ---- conv2 + ReLU directly on the VMEM intermediate -----------------
    mid = mid_ref[...]                                    # (Ho1, Wo1, C2) f32
    acc2 = jnp.zeros((Ho2 * Wo2, C2), jnp.float32)
    for dy in range(3):
        rows = mid[dy:dy + Ho2]                           # (Ho2, Wo1, C2)
        win = jnp.concatenate(
            [rows[:, 0:Wo2], rows[:, 1:Wo2 + 1], rows[:, 2:Wo2 + 2]],
            axis=-1)                                      # (Ho2, Wo2, 3*C2)
        acc2 = acc2 + jnp.dot(
            win.reshape(Ho2 * Wo2, 3 * C2).astype(w2_ref.dtype), w2_ref[dy],
            preferred_element_type=jnp.float32)
    acc2 = acc2 + b2_ref[0].astype(jnp.float32)
    o_ref[...] = (jnp.maximum(acc2, 0.0)
                  .reshape(1, Ho2, Wo2, C2)
                  .astype(o_ref.dtype))


def _to_slabs(w, b, cin_p, cout_p):
    """(3,3,Cin,Cout)/(1,Cout) -> lane-padded (3, 3*cin_p, cout_p)/(1, cout_p)."""
    kh, kw, cin, cout = w.shape
    w_p = jnp.pad(w, ((0, 0), (0, 0), (0, cin_p - cin), (0, cout_p - cout)))
    b_p = jnp.pad(b, ((0, 0), (0, cout_p - cout)))
    return w_p.reshape(kh, kw * cin_p, cout_p), b_p


@functools.partial(jax.jit, static_argnames=("compute_dtype",))
def double_conv2d(x_nchw, params, compute_dtype=None):
    """DoubleConv2d forward pass. Input/output are NCHW like PyTorch.

    compute_dtype: optional matmul-operand dtype (e.g. jnp.bfloat16 on
    v6e/v7x). Accumulation, bias add and ReLU always stay float32.
    """
    w1, b1, w2, b2 = params                               # w: (3,3,Cin,Cout)
    N, Cin, H, W = x_nchw.shape
    Cout = w1.shape[-1]
    c1p = _round_up(Cin, LANE)
    c2p = _round_up(Cout, LANE)
    Ho1, Wo1 = H - 2, W - 2
    Ho2, Wo2 = H - 4, W - 4

    x = jnp.transpose(x_nchw, (0, 2, 3, 1))               # NCHW -> NHWC
    x = jnp.pad(x, ((0, 0), (0, 0), (0, 0), (0, c1p - Cin)))
    w1p, b1p = _to_slabs(w1, b1, c1p, c2p)
    w2p, b2p = _to_slabs(w2, b2, c2p, c2p)
    if compute_dtype is not None:
        x = x.astype(compute_dtype)
        w1p = w1p.astype(compute_dtype)
        w2p = w2p.astype(compute_dtype)

    out_p = pl.pallas_call(
        _double_conv_kernel,
        out_shape=jax.ShapeDtypeStruct((N, Ho2, Wo2, c2p), x_nchw.dtype),
        grid=(N,),
        in_specs=[
            pl.BlockSpec((1, H, W, c1p), lambda n: (n, 0, 0, 0)),
            pl.BlockSpec((3, 3 * c1p, c2p), lambda n: (0, 0, 0)),
            pl.BlockSpec((1, c2p), lambda n: (0, 0)),
            pl.BlockSpec((3, 3 * c2p, c2p), lambda n: (0, 0, 0)),
            pl.BlockSpec((1, c2p), lambda n: (0, 0)),
        ],
        out_specs=pl.BlockSpec((1, Ho2, Wo2, c2p), lambda n: (n, 0, 0, 0)),
        scratch_shapes=[pltpu.VMEM((Ho1, Wo1, c2p), jnp.float32)],
        compiler_params=pltpu.CompilerParams(
            dimension_semantics=("parallel",)),
    )(x, w1p, b1p, w2p, b2p)

    out = out_p[..., :Cout]                               # drop lane padding
    return jnp.transpose(out, (0, 3, 1, 2))               # NHWC -> NCHW


def init_params(key, input_channel, output_channel, dtype=jnp.float32):
    """Deterministic synthetic init. PyTorch weight layout is (Cout,Cin,kh,kw);
    we store (kh, kw, Cin, Cout) for the kernel."""
    k1, k2, k3, k4 = jax.random.split(key, 4)
    fan1 = input_channel * 9
    fan2 = output_channel * 9
    w1 = jax.random.normal(k1, (3, 3, input_channel, output_channel), dtype) / jnp.sqrt(fan1)
    b1 = 0.01 * jax.random.normal(k2, (1, output_channel), dtype)
    w2 = jax.random.normal(k3, (3, 3, output_channel, output_channel), dtype) / jnp.sqrt(fan2)
    b2 = 0.01 * jax.random.normal(k4, (1, output_channel), dtype)
    return w1, b1, w2, b2


if __name__ == "__main__":
    key = jax.random.PRNGKey(0)
    kx, kp = jax.random.split(key)

    N, Cin, H, W = 2, 4, 16, 16
    Cout = 8

    x = jax.random.normal(kx, (N, Cin, H, W), jnp.float32)   # NCHW input
    params = init_params(kp, Cin, Cout)

    out = double_conv2d(x, params)
    out = jax.block_until_ready(out)

    assert out.shape == (N, Cout, H - 4, W - 4), out.shape
    assert bool(jnp.all(out >= 0.0)), "ReLU output must be non-negative"

    # Reference check against plain-JAX conv (same semantics as nn.Conv2d, valid padding).
    def ref_conv(x_nchw, w, b):
        w_oihw = jnp.transpose(w, (3, 2, 0, 1))               # (3,3,Cin,Cout) -> OIHW
        y = jax.lax.conv_general_dilated(
            x_nchw, w_oihw, window_strides=(1, 1), padding="VALID",
            dimension_numbers=("NCHW", "OIHW", "NCHW"))
        return jnp.maximum(y + b[0][None, :, None, None], 0.0)

    w1, b1, w2, b2 = params
    ref = ref_conv(ref_conv(x, w1, b1), w2, b2)
    err = float(jnp.max(jnp.abs(out - ref)))
    assert jnp.allclose(out, ref, atol=1e-4, rtol=1e-4), err

    print("KERNEL_OK")
</pallas_src>

<mosaic_0001>
module attributes {stable_mosaic.version = 11 : i64} {
  func.func @_double_conv_kernel(%arg0: i32, %arg1: memref<1x16x16x128xf32, #tpu.memory_space<vmem>>, %arg2: memref<3x384x128xf32, #tpu.memory_space<vmem>>, %arg3: memref<1x128xf32, #tpu.memory_space<vmem>>, %arg4: memref<3x384x128xf32, #tpu.memory_space<vmem>>, %arg5: memref<1x128xf32, #tpu.memory_space<vmem>>, %arg6: memref<1x12x12x128xf32, #tpu.memory_space<vmem>>, %arg7: memref<14x14x128xf32, #tpu.memory_space<vmem>>) attributes {dimension_semantics = [#tpu.dimension_semantics<parallel>], iteration_bounds = array<i64: 2>, scalar_prefetch = 0 : i64, scratch_operands = 1 : i64, tpu.core_type = #tpu.core_type<tc>, window_params = [{transform_indices = @transform_0, window_bounds = array<i64: 1, 16, 16, 128>}, {pipeline_mode = #tpu.pipeline_mode<synchronous>, transform_indices = @transform_1, window_bounds = array<i64: 3, 384, 128>}, {pipeline_mode = #tpu.pipeline_mode<synchronous>, transform_indices = @transform_2, window_bounds = array<i64: 1, 128>}, {pipeline_mode = #tpu.pipeline_mode<synchronous>, transform_indices = @transform_3, window_bounds = array<i64: 3, 384, 128>}, {pipeline_mode = #tpu.pipeline_mode<synchronous>, transform_indices = @transform_4, window_bounds = array<i64: 1, 128>}, {transform_indices = @transform_5, window_bounds = array<i64: 1, 12, 12, 128>}]} {
    %c0 = arith.constant 0 : index
    %c0_0 = arith.constant 0 : index
    %c0_1 = arith.constant 0 : index
    %c0_2 = arith.constant 0 : index
    %0 = vector.load %arg1[%c0, %c0_0, %c0_1, %c0_2] : memref<1x16x16x128xf32, #tpu.memory_space<vmem>>, vector<1x16x16x128xf32>
    %1 = vector.shape_cast %0 : vector<1x16x16x128xf32> to vector<16x16x128xf32>
    %cst = arith.constant 0.000000e+00 : f32
    %2 = vector.broadcast %cst : f32 to vector<196x128xf32>
    %3 = vector.extract_strided_slice %1 {offsets = [0, 0, 0], sizes = [14, 16, 128], strides = [1, 1, 1]} : vector<16x16x128xf32> to vector<14x16x128xf32>
    %4 = vector.extract_strided_slice %3 {offsets = [0, 0, 0], sizes = [14, 14, 128], strides = [1, 1, 1]} : vector<14x16x128xf32> to vector<14x14x128xf32>
    %5 = vector.extract_strided_slice %3 {offsets = [0, 1, 0], sizes = [14, 14, 128], strides = [1, 1, 1]} : vector<14x16x128xf32> to vector<14x14x128xf32>
    %6 = vector.extract_strided_slice %3 {offsets = [0, 2, 0], sizes = [14, 14, 128], strides = [1, 1, 1]} : vector<14x16x128xf32> to vector<14x14x128xf32>
    %7 = tpu.concatenate %4, %5, %6 in 2 : vector<14x14x128xf32>, vector<14x14x128xf32>, vector<14x14x128xf32> -> vector<14x14x384xf32>
    %8 = vector.shape_cast %7 : vector<14x14x384xf32> to vector<196x384xf32>
    %c0_3 = arith.constant 0 : index
    %c0_4 = arith.constant 0 : index
    %c0_5 = arith.constant 0 : index
    %9 = vector.load %arg2[%c0_3, %c0_4, %c0_5] : memref<3x384x128xf32, #tpu.memory_space<vmem>>, vector<1x384x128xf32>
    %10 = vector.shape_cast %9 : vector<1x384x128xf32> to vector<384x128xf32>
    %cst_6 = arith.constant dense<0.000000e+00> : vector<196x128xf32>
    %11 = tpu.matmul %8, %10, %cst_6 {dimension_numbers = #tpu.dot_dimension_numbers<[1], [0], [0], [1], [0, 0, 1, 1], [], []>} : vector<196x384xf32>, vector<384x128xf32>, vector<196x128xf32> -> vector<196x128xf32>
    %12 = arith.addf %2, %11 : vector<196x128xf32>
    %13 = vector.extract_strided_slice %1 {offsets = [1, 0, 0], sizes = [14, 16, 128], strides = [1, 1, 1]} : vector<16x16x128xf32> to vector<14x16x128xf32>
    %14 = vector.extract_strided_slice %13 {offsets = [0, 0, 0], sizes = [14, 14, 128], strides = [1, 1, 1]} : vector<14x16x128xf32> to vector<14x14x128xf32>
    %15 = vector.extract_strided_slice %13 {offsets = [0, 1, 0], sizes = [14, 14, 128], strides = [1, 1, 1]} : vector<14x16x128xf32> to vector<14x14x128xf32>
    %16 = vector.extract_strided_slice %13 {offsets = [0, 2, 0], sizes = [14, 14, 128], strides = [1, 1, 1]} : vector<14x16x128xf32> to vector<14x14x128xf32>
    %17 = tpu.concatenate %14, %15, %16 in 2 : vector<14x14x128xf32>, vector<14x14x128xf32>, vector<14x14x128xf32> -> vector<14x14x384xf32>
    %18 = vector.shape_cast %17 : vector<14x14x384xf32> to vector<196x384xf32>
    %c1 = arith.constant 1 : index
    %c0_7 = arith.constant 0 : index
    %c0_8 = arith.constant 0 : index
    %19 = vector.load %arg2[%c1, %c0_7, %c0_8] : memref<3x384x128xf32, #tpu.memory_space<vmem>>, vector<1x384x128xf32>
    %20 = vector.shape_cast %19 : vector<1x384x128xf32> to vector<384x128xf32>
    %cst_9 = arith.constant dense<0.000000e+00> : vector<196x128xf32>
    %21 = tpu.matmul %18, %20, %cst_9 {dimension_numbers = #tpu.dot_dimension_numbers<[1], [0], [0], [1], [0, 0, 1, 1], [], []>} : vector<196x384xf32>, vector<384x128xf32>, vector<196x128xf32> -> vector<196x128xf32>
    %22 = arith.addf %12, %21 : vector<196x128xf32>
    %23 = vector.extract_strided_slice %1 {offsets = [2, 0, 0], sizes = [14, 16, 128], strides = [1, 1, 1]} : vector<16x16x128xf32> to vector<14x16x128xf32>
    %24 = vector.extract_strided_slice %23 {offsets = [0, 0, 0], sizes = [14, 14, 128], strides = [1, 1, 1]} : vector<14x16x128xf32> to vector<14x14x128xf32>
    %25 = vector.extract_strided_slice %23 {offsets = [0, 1, 0], sizes = [14, 14, 128], strides = [1, 1, 1]} : vector<14x16x128xf32> to vector<14x14x128xf32>
    %26 = vector.extract_strided_slice %23 {offsets = [0, 2, 0], sizes = [14, 14, 128], strides = [1, 1, 1]} : vector<14x16x128xf32> to vector<14x14x128xf32>
    %27 = tpu.concatenate %24, %25, %26 in 2 : vector<14x14x128xf32>, vector<14x14x128xf32>, vector<14x14x128xf32> -> vector<14x14x384xf32>
    %28 = vector.shape_cast %27 : vector<14x14x384xf32> to vector<196x384xf32>
    %c2 = arith.constant 2 : index
    %c0_10 = arith.constant 0 : index
    %c0_11 = arith.constant 0 : index
    %29 = vector.load %arg2[%c2, %c0_10, %c0_11] : memref<3x384x128xf32, #tpu.memory_space<vmem>>, vector<1x384x128xf32>
    %30 = vector.shape_cast %29 : vector<1x384x128xf32> to vector<384x128xf32>
    %cst_12 = arith.constant dense<0.000000e+00> : vector<196x128xf32>
    %31 = tpu.matmul %28, %30, %cst_12 {dimension_numbers = #tpu.dot_dimension_numbers<[1], [0], [0], [1], [0, 0, 1, 1], [], []>} : vector<196x384xf32>, vector<384x128xf32>, vector<196x128xf32> -> vector<196x128xf32>
    %32 = arith.addf %22, %31 : vector<196x128xf32>
    %c0_13 = arith.constant 0 : index
    %c0_14 = arith.constant 0 : index
    %33 = vector.load %arg3[%c0_13, %c0_14] : memref<1x128xf32, #tpu.memory_space<vmem>>, vector<1x128xf32>
    %34 = vector.shape_cast %33 : vector<1x128xf32> to vector<128xf32>
    %35 = vector.shape_cast %34 : vector<128xf32> to vector<1x128xf32>
    %36 = vector.broadcast %35 : vector<1x128xf32> to vector<196x128xf32>
    %37 = arith.addf %32, %36 : vector<196x128xf32>
    %cst_15 = arith.constant 0.000000e+00 : f32
    %38 = vector.broadcast %cst_15 : f32 to vector<196x128xf32>
    %39 = arith.maximumf %37, %38 : vector<196x128xf32>
    %40 = vector.shape_cast %39 : vector<196x128xf32> to vector<14x14x128xf32>
    %c0_16 = arith.constant 0 : index
    %c0_17 = arith.constant 0 : index
    %c0_18 = arith.constant 0 : index
    %41 = vector.load %arg7[%c0_16, %c0_17, %c0_18] : memref<14x14x128xf32, #tpu.memory_space<vmem>>, vector<14x14x128xf32>
    tpu.vector_store %arg7[%c0_16, %c0_17, %c0_18], %40 {strides = array<i32>} : memref<14x14x128xf32, #tpu.memory_space<vmem>>, vector<14x14x128xf32>,
    %c0_19 = arith.constant 0 : index
    %c0_20 = arith.constant 0 : index
    %c0_21 = arith.constant 0 : index
    %42 = vector.load %arg7[%c0_19, %c0_20, %c0_21] : memref<14x14x128xf32, #tpu.memory_space<vmem>>, vector<14x14x128xf32>
    %cst_22 = arith.constant 0.000000e+00 : f32
    %43 = vector.broadcast %cst_22 : f32 to vector<144x128xf32>
    %44 = vector.extract_strided_slice %42 {offsets = [0, 0, 0], sizes = [12, 14, 128], strides = [1, 1, 1]} : vector<14x14x128xf32> to vector<12x14x128xf32>
    %45 = vector.extract_strided_slice %44 {offsets = [0, 0, 0], sizes = [12, 12, 128], strides = [1, 1, 1]} : vector<12x14x128xf32> to vector<12x12x128xf32>
    %46 = vector.extract_strided_slice %44 {offsets = [0, 1, 0], sizes = [12, 12, 128], strides = [1, 1, 1]} : vector<12x14x128xf32> to vector<12x12x128xf32>
    %47 = vector.extract_strided_slice %44 {offsets = [0, 2, 0], sizes = [12, 12, 128], strides = [1, 1, 1]} : vector<12x14x128xf32> to vector<12x12x128xf32>
    %48 = tpu.concatenate %45, %46, %47 in 2 : vector<12x12x128xf32>, vector<12x12x128xf32>, vector<12x12x128xf32> -> vector<12x12x384xf32>
    %49 = vector.shape_cast %48 : vector<12x12x384xf32> to vector<144x384xf32>
    %c0_23 = arith.constant 0 : index
    %c0_24 = arith.constant 0 : index
    %c0_25 = arith.constant 0 : index
    %50 = vector.load %arg4[%c0_23, %c0_24, %c0_25] : memref<3x384x128xf32, #tpu.memory_space<vmem>>, vector<1x384x128xf32>
    %51 = vector.shape_cast %50 : vector<1x384x128xf32> to vector<384x128xf32>
    %cst_26 = arith.constant dense<0.000000e+00> : vector<144x128xf32>
    %52 = tpu.matmul %49, %51, %cst_26 {dimension_numbers = #tpu.dot_dimension_numbers<[1], [0], [0], [1], [0, 0, 1, 1], [], []>} : vector<144x384xf32>, vector<384x128xf32>, vector<144x128xf32> -> vector<144x128xf32>
    %53 = arith.addf %43, %52 : vector<144x128xf32>
    %54 = vector.extract_strided_slice %42 {offsets = [1, 0, 0], sizes = [12, 14, 128], strides = [1, 1, 1]} : vector<14x14x128xf32> to vector<12x14x128xf32>
    %55 = vector.extract_strided_slice %54 {offsets = [0, 0, 0], sizes = [12, 12, 128], strides = [1, 1, 1]} : vector<12x14x128xf32> to vector<12x12x128xf32>
    %56 = vector.extract_strided_slice %54 {offsets = [0, 1, 0], sizes = [12, 12, 128], strides = [1, 1, 1]} : vector<12x14x128xf32> to vector<12x12x128xf32>
    %57 = vector.extract_strided_slice %54 {offsets = [0, 2, 0], sizes = [12, 12, 128], strides = [1, 1, 1]} : vector<12x14x128xf32> to vector<12x12x128xf32>
    %58 = tpu.concatenate %55, %56, %57 in 2 : vector<12x12x128xf32>, vector<12x12x128xf32>, vector<12x12x128xf32> -> vector<12x12x384xf32>
    %59 = vector.shape_cast %58 : vector<12x12x384xf32> to vector<144x384xf32>
    %c1_27 = arith.constant 1 : index
    %c0_28 = arith.constant 0 : index
    %c0_29 = arith.constant 0 : index
    %60 = vector.load %arg4[%c1_27, %c0_28, %c0_29] : memref<3x384x128xf32, #tpu.memory_space<vmem>>, vector<1x384x128xf32>
    %61 = vector.shape_cast %60 : vector<1x384x128xf32> to vector<384x128xf32>
    %cst_30 = arith.constant dense<0.000000e+00> : vector<144x128xf32>
    %62 = tpu.matmul %59, %61, %cst_30 {dimension_numbers = #tpu.dot_dimension_numbers<[1], [0], [0], [1], [0, 0, 1, 1], [], []>} : vector<144x384xf32>, vector<384x128xf32>, vector<144x128xf32> -> vector<144x128xf32>
    %63 = arith.addf %53, %62 : vector<144x128xf32>
    %64 = vector.extract_strided_slice %42 {offsets = [2, 0, 0], sizes = [12, 14, 128], strides = [1, 1, 1]} : vector<14x14x128xf32> to vector<12x14x128xf32>
    %65 = vector.extract_strided_slice %64 {offsets = [0, 0, 0], sizes = [12, 12, 128], strides = [1, 1, 1]} : vector<12x14x128xf32> to vector<12x12x128xf32>
    %66 = vector.extract_strided_slice %64 {offsets = [0, 1, 0], sizes = [12, 12, 128], strides = [1, 1, 1]} : vector<12x14x128xf32> to vector<12x12x128xf32>
    %67 = vector.extract_strided_slice %64 {offsets = [0, 2, 0], sizes = [12, 12, 128], strides = [1, 1, 1]} : vector<12x14x128xf32> to vector<12x12x128xf32>
    %68 = tpu.concatenate %65, %66, %67 in 2 : vector<12x12x128xf32>, vector<12x12x128xf32>, vector<12x12x128xf32> -> vector<12x12x384xf32>
    %69 = vector.shape_cast %68 : vector<12x12x384xf32> to vector<144x384xf32>
    %c2_31 = arith.constant 2 : index
    %c0_32 = arith.constant 0 : index
    %c0_33 = arith.constant 0 : index
    %70 = vector.load %arg4[%c2_31, %c0_32, %c0_33] : memref<3x384x128xf32, #tpu.memory_space<vmem>>, vector<1x384x128xf32>
    %71 = vector.shape_cast %70 : vector<1x384x128xf32> to vector<384x128xf32>
    %cst_34 = arith.constant dense<0.000000e+00> : vector<144x128xf32>
    %72 = tpu.matmul %69, %71, %cst_34 {dimension_numbers = #tpu.dot_dimension_numbers<[1], [0], [0], [1], [0, 0, 1, 1], [], []>} : vector<144x384xf32>, vector<384x128xf32>, vector<144x128xf32> -> vector<144x128xf32>
    %73 = arith.addf %63, %72 : vector<144x128xf32>
    %c0_35 = arith.constant 0 : index
    %c0_36 = arith.constant 0 : index
    %74 = vector.load %arg5[%c0_35, %c0_36] : memref<1x128xf32, #tpu.memory_space<vmem>>, vector<1x128xf32>
    %75 = vector.shape_cast %74 : vector<1x128xf32> to vector<128xf32>
    %76 = vector.shape_cast %75 : vector<128xf32> to vector<1x128xf32>
    %77 = vector.broadcast %76 : vector<1x128xf32> to vector<144x128xf32>
    %78 = arith.addf %73, %77 : vector<144x128xf32>
    %cst_37 = arith.constant 0.000000e+00 : f32
    %79 = vector.broadcast %cst_37 : f32 to vector<144x128xf32>
    %80 = arith.maximumf %78, %79 : vector<144x128xf32>
    %81 = vector.shape_cast %80 : vector<144x128xf32> to vector<1x12x12x128xf32>
    %c0_38 = arith.constant 0 : index
    %c0_39 = arith.constant 0 : index
    %c0_40 = arith.constant 0 : index
    %c0_41 = arith.constant 0 : index
    %82 = vector.load %arg6[%c0_38, %c0_39, %c0_40, %c0_41] : memref<1x12x12x128xf32, #tpu.memory_space<vmem>>, vector<1x12x12x128xf32>
    tpu.vector_store %arg6[%c0_38, %c0_39, %c0_40, %c0_41], %81 {strides = array<i32>} : memref<1x12x12x128xf32, #tpu.memory_space<vmem>>, vector<1x12x12x128xf32>,
    return
  }
  func.func @transform_0(%arg0: i32) -> (i32, i32, i32, i32) {
    %c0_i32 = arith.constant 0 : i32
    %c0_i32_0 = arith.constant 0 : i32
    %c0_i32_1 = arith.constant 0 : i32
    %c0_i32_2 = arith.constant 0 : i32
    return %arg0, %c0_i32, %c0_i32_0, %c0_i32_1 : i32, i32, i32, i32
  }
  func.func @transform_1(%arg0: i32) -> (i32, i32, i32) {
    %c0_i32 = arith.constant 0 : i32
    %c0_i32_0 = arith.constant 0 : i32
    %c0_i32_1 = arith.constant 0 : i32
    %c0_i32_2 = arith.constant 0 : i32
    return %c0_i32, %c0_i32_0, %c0_i32_1 : i32, i32, i32
  }
  func.func @transform_2(%arg0: i32) -> (i32, i32) {
    %c0_i32 = arith.constant 0 : i32
    %c0_i32_0 = arith.constant 0 : i32
    %c0_i32_1 = arith.constant 0 : i32
    return %c0_i32, %c0_i32_0 : i32, i32
  }
  func.func @transform_3(%arg0: i32) -> (i32, i32, i32) {
    %c0_i32 = arith.constant 0 : i32
    %c0_i32_0 = arith.constant 0 : i32
    %c0_i32_1 = arith.constant 0 : i32
    %c0_i32_2 = arith.constant 0 : i32
    return %c0_i32, %c0_i32_0, %c0_i32_1 : i32, i32, i32
  }
  func.func @transform_4(%arg0: i32) -> (i32, i32) {
    %c0_i32 = arith.constant 0 : i32
    %c0_i32_0 = arith.constant 0 : i32
    %c0_i32_1 = arith.constant 0 : i32
    return %c0_i32, %c0_i32_0 : i32, i32
  }
  func.func @transform_5(%arg0: i32) -> (i32, i32, i32, i32) {
    %c0_i32 = arith.constant 0 : i32
    %c0_i32_0 = arith.constant 0 : i32
    %c0_i32_1 = arith.constant 0 : i32
    %c0_i32_2 = arith.constant 0 : i32
    return %arg0, %c0_i32, %c0_i32_0, %c0_i32_1 : i32, i32, i32, i32
  }
}

</mosaic_0001>

<bundles_post_ra>
// kernel: double_conv2d.1
= control target key start
LH: loop header
LB: loop body
LE: loop exit
PB: predicated region body
PF: predicated region fallthrough
CT: control target
= control target key end

     0   :  { %s5013_s18 = smov 0   ;;  %s9220_s0 = inlined_call_operand.vmem [shape: f32[2,16,16,128], index: 0, kind: input, shape index: {}]   ;;  %s9221_s1 = inlined_call_operand.vmem [shape: f32[3,384,128], index: 1, kind: input, shape index: {}]   ;;  %s9222_s2 = inlined_call_operand.vmem [shape: f32[1,128], index: 2, kind: input, shape index: {}]   ;;  %s9223_s3 = inlined_call_operand.vmem [shape: f32[3,384,128], index: 3, kind: input, shape index: {}]   ;;  %s9224_s4 = inlined_call_operand.vmem [shape: f32[1,128], index: 4, kind: input, shape index: {}]   ;;  %s9225_s5 = inlined_call_operand.vmem [shape: f32[2,12,12,128], index: 5, kind: output, shape index: {}]  }
   0x1 LB: > { %s4710_s19 = sadd.s32 4294967295, %s4981_s18   ;;  %p4714_p0 = scmp.ge.s32.totalorder %s4981_s18, 1  ;;  %s4981_s18 = sphi %s5013_s18, %s15_s18  }
   0x2   : > { %p187_p1 = scmp.lt.s32.totalorder %s4981_s18, 3 }
   0x4   : > { %p188_p2 = pnand %p4714_p0, %p187_p1 }
   0x6   : > { %191 = sbr.rel (%p188_p2) target bundleno = 1477 (0x5c5), region = 40 }
   0xb   : > { %v4733_v0 = vld [vmem:[%s9221_s1 + $0x1f8] sm:$0xff]  ;;  %v4732_v2 = vld [vmem:[%s9221_s1 + $0x1f0] sm:$0xff]  ;;  %p215_p3 = scmp.lt.s32.totalorder %s4710_s19, 1  ;;  %v4731_v4 = vld [vmem:[%s9221_s1 + $0x1e8] sm:$0xff]  ;;  %vm285_vm0 = vcmask 1046528   ;;  %vm328_vm1 = vcmask 1045504  }
   0xc   : > { %v4749_v1 = vld [vmem:[%s9221_s1 + $0x278] sm:$0xff]  ;;  %1081 = vmatpush.msra.mxu0 %v4733_v0  ;;  %v4748_v3 = vld [vmem:[%s9221_s1 + $0x270] sm:$0xff]  ;;  %v4747_v5 = vld [vmem:[%s9221_s1 + $0x268] sm:$0xff]  ;;  %vm427_vm2 = vcmask 1041408   ;;  %vm429_vm3 = vcmask 1043456   ;;  %vm431_vm4 = vcmask 1043458  }
   0xd   : > { %1173 = vmatpush.msra.mxu1 %v4749_v1  ;;  %s10053_s19 = smov (!%p215_p3, %s4710_s19), 1  ;;  %4913 = vmatpush.msra.mxu3 %v4749_v1  ;;  %v4730_v6 = vld [vmem:[%s9221_s1 + $0x1e0] sm:$0xff]  ;;  %v4729_v8 = vld [vmem:[%s9221_s1 + $0x1d8] sm:$0xff]  ;;  %v4728_v10 = vld [vmem:[%s9221_s1 + $0x1d0] sm:$0xff]  ;;  %vm433_vm5 = vcmask 1045506   ;;  %vm436_vm6 = vcmask 1045508  }
   0xe   : > { %1082 = vmatpush.msra.mxu0 %v4732_v2  ;;  %v4746_v7 = vld [vmem:[%s9221_s1 + $0x260] sm:$0xff]  ;;  %s4912_s11 = sshll.u32 %s10053_s19, 8  ;;  %v4745_v9 = vld [vmem:[%s9221_s1 + $0x258] sm:$0xff]  ;;  %v4744_v11 = vld [vmem:[%s9221_s1 + $0x250] sm:$0xff]  ;;  %s4961_s17 = smul.u32 192, %s10053_s19 }
   0xf   : > { %1174 = vmatpush.msra.mxu1 %v4748_v3  ;;  %4914 = vmatpush.msra.mxu3 %v4748_v3  ;;  %s5063_s24 = scalar_lea.vmem %s9220_s0, %s4912_s11  ;;  %v4727_v12 = vld [vmem:[%s9221_s1 + $0x1c8] sm:$0xff]  ;;  %v5074_v14 = vld [vmem:[%s9221_s1 + $0x2f8] sm:$0xff]  ;;  %v5079_v15 = vld [vmem:[%s9221_s1 + $0x2f0] sm:$0xff] }
  0x10   : > { %1083 = vmatpush.msra.mxu0 %v4731_v4  ;;  %v4743_v13 = vld [vmem:[%s9221_s1 + $0x248] sm:$0xff]  ;;  %v227_v16 = vld [vmem:[%s5063_s24 + $0x10] sm:$0xff]  ;;  %v5083_v17 = vld [vmem:[%s5063_s24 + $0x18] sm:$0xff]  ;;  %4929 = vmatpush.msra.mxu2 %v5074_v14  ;;  %s9160_s22 = scalar_lea.vmem %s9225_s5, %s4961_s17 }
  0x11   : > { %1175 = vmatpush.msra.mxu1 %v4747_v5  ;;  %4915 = vmatpush.msra.mxu3 %v4747_v5  ;;  %v4726_v18 = vld [vmem:[%s9221_s1 + $0x1c0] sm:$0xff]  ;;  %v289_v20 = vrot.slane %v227_v16, 1  ;;  %v290_v21 = vrot.slane %v5083_v17, 1  ;;  %v332_v22 = vrot.slane %v227_v16, 2  ;;  %v333_v23 = vrot.slane %v5083_v17, 2  ;;  %v5097_v24 = vld [vmem:[%s9221_s1 + $0x2e8] sm:$0xff] }
  0x12   : > { %1084 = vmatpush.msra.mxu0 %v4730_v6  ;;  %v4742_v19 = vld [vmem:[%s9221_s1 + $0x240] sm:$0xff]  ;;  %v4725_v26 = vld [vmem:[%s9221_s1 + $0x1b8] sm:$0xff]  ;;  %4931 = vmatpush.msra.mxu2 %v5079_v15  ;;  %v5112_v30 = vld [vmem:[%s5063_s24 + $0x28] sm:$0xff] }
  0x13   : > { %1176 = vmatpush.msra.mxu1 %v4746_v7  ;;  %4916 = vmatpush.msra.mxu3 %v4746_v7  ;;  %v5100_v25 = vld [vmem:[%s5063_s24 + $0x20] sm:$0xff]  ;;  %v4741_v27 = vld [vmem:[%s9221_s1 + $0x238] sm:$0xff]  ;;  %v291_v28 = vsel %vm285_vm0, %v289_v20, %v290_v21  ;;  %v334_v29 = vsel %vm328_vm1, %v332_v22, %v333_v23  ;;  %v293_v35 = vrot.slane %v5112_v30, 1  ;;  %v4724_v36 = vld [vmem:[%s9221_s1 + $0x1b0] sm:$0xff]  ;;  %v336_v39 = vrot.slane %v5112_v30, 2 }
  0x14   : > { %1085 = vmatpush.msra.mxu0 %v4729_v8  ;;  %v375_v31 = vrot.slane %v291_v28, 6  ;;  %v376_v32 = vrot.slane %v334_v29, 4  ;;  %v5117_v33 = vld [vmem:[%s9221_s1 + $0x2e0] sm:$0xff]  ;;  %v292_v34 = vrot.slane %v5100_v25, 1  ;;  %v5127_v37 = vld [vmem:[%s9221_s1 + $0x230] sm:$0xff]  ;;  %4933 = vmatpush.msra.mxu2 %v5097_v24  ;;  %v335_v38 = vrot.slane %v5100_v25, 2 }
  0x15   : > { %1177 = vmatpush.msra.mxu1 %v4745_v9  ;;  %4917 = vmatpush.msra.mxu3 %v4745_v9  ;;  %v377_v40 = vrot.slane %v290_v21, 6  ;;  %v4723_v41 = vld [vmem:[%s9221_s1 + $0x1a8] sm:$0xff]  ;;  %v5146_v46 = vld [vmem:[%s9221_s1 + $0x2d8] sm:$0xff]  ;;  %v378_v47 = vrot.slane %v333_v23, 4  ;;  %v5162_v52 = vld [vmem:[%s9221_s1 + $0x2d0] sm:$0xff]  ;;  %v381_v23 = vrot.slane %v293_v35, 6 }
  0x16   : > { %1086 = vmatpush.msra.mxu0 %v4728_v10  ;;  %v5138_v42 = vld [vmem:[%s9221_s1 + $0x228] sm:$0xff]  ;;  %v451_v43 = vsel %vm427_vm2, %v227_v16, %v375_v31  ;;  %v453_v44 = vsel %vm431_vm4, %v227_v16, %v375_v31  ;;  %v456_v45 = vsel %vm436_vm6, %v227_v16, %v375_v31  ;;  %v459_v51 = vsel %vm328_vm1, %v375_v31, %v227_v16  ;;  %v5165_v53 = vld [vmem:[%s5063_s24 + $0x30] sm:$0xff]  ;;  %v4722_v58 = vld [vmem:[%s9221_s1 + $0x1a0] sm:$0xff] }
  0x17   : > { %1178 = vmatpush.msra.mxu1 %v4744_v11  ;;  %4918 = vmatpush.msra.mxu3 %v4744_v11  ;;  %v5149_v48 = vsel %vm429_vm3, %v451_v43, %v376_v32  ;;  %v5152_v49 = vsel %vm433_vm5, %v453_v44, %v376_v32  ;;  %v5155_v50 = vsel %vm429_vm3, %v376_v32, %v456_v45  ;;  %v5183_v59 = vld [vmem:[%s9221_s1 + $0x220] sm:$0xff]  ;;  %v5191_v63 = vld [vmem:[%s5063_s24 + $0x38] sm:$0xff]  ;;  %v5203_v3 = vld [vmem:[%s9221_s1 + $0x2c8] sm:$0xff]  ;;  %v295_v9 = vrot.slane %v5165_v53, 1 }
  0x18   : > { %1087 = vmatpush.msra.mxu0 %v4727_v12  ;;  %4935 = vmatpush.msra.mxu2 %v5117_v33  ;;  %v9230_v54 = vrot.slane %v5152_v49, 2  ;;  %v9229_v55 = vrot.slane %v5155_v50, 4  ;;  %v5171_v56 = vsel %vm433_vm5, %v376_v32, %v459_v51  ;;  %826 = vst [vmem:[#allocation1] ss:$4 sm:$0xff] %v5149_v48  ;;  %v294_v57 = vsel %vm285_vm0, %v292_v34, %v293_v35  ;;  %v4721_v4 = vld [vmem:[%s9221_s1 + $0x198] sm:$0xff]  ;;  %v4719_v31 = vld [vmem:[%s9221_s1 + $0x188] sm:$0xff] }
  0x19   : > { %1179 = vmatpush.msra.mxu1 %v4743_v13  ;;  %4919 = vmatpush.msra.mxu3 %v4743_v13  ;;  %v9228_v60 = vrot.slane %v5171_v56, 6  ;;  %v337_v61 = vsel %vm328_vm1, %v335_v38, %v336_v39  ;;  %v379_v62 = vrot.slane %v294_v57, 6  ;;  %v462_v1 = vsel %vm427_vm2, %v5083_v17, %v377_v40  ;;  %v5211_v5 = vld [vmem:[%s9221_s1 + $0x218] sm:$0xff]  ;;  %v5237_v13 = vld [vmem:[%s9221_s1 + $0x2c0] sm:$0xff]  ;;  %v5278_v32 = vld [vmem:[%s9221_s1 + $0x208] sm:$0xff] }
  0x1a   : > { %1088 = vmatpush.msra.mxu0 %v4726_v18  ;;  %4937 = vmatpush.msra.mxu2 %v5146_v46  ;;  %828 = vst [vmem:[#allocation1 + $0x1] ss:$4 sm:$0xff] %v9230_v54  ;;  %v380_v0 = vrot.slane %v337_v61, 4  ;;  %v464_v2 = vsel %vm431_vm4, %v5083_v17, %v377_v40  ;;  %v5217_v6 = vsel %vm429_vm3, %v462_v1, %v378_v47  ;;  %v296_v16 = vrot.slane %v5191_v63, 1  ;;  %v5246_v18 = vld [vmem:[%s9221_s1 + $0x210] sm:$0xff]  ;;  %v5269_v28 = vld [vmem:[%s9221_s1 + $0x2b8] sm:$0xff] }
  0x1b   : > { %1180 = vmatpush.msra.mxu1 %v4742_v19  ;;  %4920 = vmatpush.msra.mxu3 %v4742_v19  ;;  %830 = vst [vmem:[#allocation1 + $0x2] ss:$4 sm:$0xff] %v9229_v55  ;;  %v5220_v7 = vsel %vm433_vm5, %v464_v2, %v378_v47  ;;  %v467_v8 = vsel %vm436_vm6, %v5083_v17, %v377_v40  ;;  %v4720_v17 = vld [vmem:[%s9221_s1 + $0x190] sm:$0xff]  ;;  %v338_v29 = vrot.slane %v5165_v53, 2  ;;  %v382_v34 = vrot.slane %v336_v39, 4  ;;  %v4718_v39 = vld [vmem:[%s9221_s1 + $0x180] sm:$0xff] }
  0x1c   : > { %1089 = vmatpush.msra.mxu0 %v4725_v26  ;;  %4939 = vmatpush.msra.mxu2 %v5162_v52  ;;  %832 = vst [vmem:[#allocation1 + $0x3] ss:$4 sm:$0xff] %v9228_v60  ;;  %v9227_v10 = vrot.slane %v5220_v7, 2  ;;  %v5230_v11 = vsel %vm429_vm3, %v378_v47, %v467_v8  ;;  %v470_v12 = vsel %vm427_vm2, %v5100_v25, %v379_v62  ;;  %v5306_v40 = vld [vmem:[%s9221_s1 + $0x200] sm:$0xff]  ;;  %v5323_v57 = vld [vmem:[%s9221_s1 + $0x2a8] sm:$0xff]  ;;  %v5545_v55 = vld [vmem:[%s5063_s24 + $0x70] sm:$0xff] }
  0x1d   : > { %1181 = vmatpush.msra.mxu1 %v4741_v27  ;;  %4921 = vmatpush.msra.mxu3 %v4741_v27  ;;  %v9226_v19 = vrot.slane %v5230_v11, 4  ;;  %v5250_v20 = vsel %vm429_vm3, %v470_v12, %v380_v0  ;;  %v472_v21 = vsel %vm431_vm4, %v5100_v25, %v379_v62  ;;  %v475_v22 = vsel %vm436_vm6, %v5100_v25, %v379_v62  ;;  %v5329_v61 = vld [vmem:[%s5063_s24 + $0x40] sm:$0xff]  ;;  %v5548_v54 = vld [vmem:[%s5063_s24 + $0x78] sm:$0xff] }
  0x1e   : > { %1090 = vmatpush.msra.mxu0 %v4724_v36  ;;  %834 = vst [vmem:[#allocation1 + $0x20] ss:$4 sm:$0xff] %v5217_v6  ;;  %4941 = vmatpush.msra.mxu2 %v5203_v3  ;;  %v473_v26 = vsel %vm433_vm5, %v472_v21, %v380_v0  ;;  %v478_v27 = vsel %vm328_vm1, %v379_v62, %v5100_v25  ;;  %v5294_v36 = vld [vmem:[%s9221_s1 + $0x2b0] sm:$0xff]  ;;  %v298_v21 = vrot.slane %v5329_v61, 1 }
  0x1f   : > { %1182 = vmatpush.msra.mxu1 %v5127_v37  ;;  %836 = vst [vmem:[#allocation1 + $0x21] ss:$4 sm:$0xff] %v9227_v10  ;;  %v476_v25 = vsel %vm429_vm3, %v380_v0, %v475_v22  ;;  %4922 = vmatpush.msra.mxu3 %v5127_v37  ;;  %v5288_v35 = vrot.slane %v473_v26, 2  ;;  %v297_v38 = vsel %vm285_vm0, %v295_v9, %v296_v16  ;;  %v339_v37 = vrot.slane %v5191_v63, 2 }
  0x20   : > { %1091 = vmatpush.msra.mxu0 %v4723_v41  ;;  %838 = vst [vmem:[#allocation1 + $0x22] ss:$4 sm:$0xff] %v9226_v19  ;;  %4943 = vmatpush.msra.mxu2 %v5237_v13  ;;  %v479_v41 = vsel %vm433_vm5, %v380_v0, %v478_v27  ;;  %v383_v43 = vrot.slane %v297_v38, 6  ;;  %v483_v44 = vsel %vm431_vm4, %v5112_v30, %v381_v23  ;;  %v5316_v47 = vrot.slane %v476_v25, 4 }
  0x21   : > { %1183 = vmatpush.msra.mxu1 %v5138_v42  ;;  %840 = vst [vmem:[#allocation1 + $0x23] ss:$4 sm:$0xff] %v5250_v20  ;;  %v486_v45 = vsel %vm436_vm6, %v5112_v30, %v381_v23  ;;  %4923 = vmatpush.msra.mxu3 %v5138_v42  ;;  %v481_v51 = vsel %vm427_vm2, %v5112_v30, %v381_v23  ;;  %v5332_v42 = vld [vmem:[%s5063_s24 + $0x48] sm:$0xff]  ;;  %v5342_v8 = vrot.slane %v479_v41, 6  ;;  %v5361_v23 = vld [vmem:[%s9221_s1 + $0x298] sm:$0xff] }
  0x22   : > { %1092 = vmatpush.msra.mxu0 %v4722_v58  ;;  %4945 = vmatpush.msra.mxu2 %v5269_v28  ;;  %v340_v58 = vsel %vm328_vm1, %v338_v29, %v339_v37  ;;  %v484_v30 = vsel %vm433_vm5, %v483_v44, %v382_v34  ;;  %v487_v1 = vsel %vm429_vm3, %v382_v34, %v486_v45  ;;  %v299_v22 = vrot.slane %v5332_v42, 1 }
  0x23   : > { %1184 = vmatpush.msra.mxu1 %v5183_v59  ;;  %v841_v62 = vld.sshfl [vmem:[#allocation1] sm:$0xff pattern:$0x73625140]  ;;  %v5334_v0 = vld.sshfl [vmem:[#allocation1 + $0x10] sm:$0xff pattern:$0x73625140]  ;;  %v491_v2 = vsel %vm431_vm4, %v5165_v53, %v383_v43  ;;  %v5345_v12 = vsel %vm429_vm3, %v481_v51, %v382_v34  ;;  %v489_v29 = vsel %vm427_vm2, %v5165_v53, %v383_v43  ;;  %4924 = vmatpush.msra.mxu3 %v5183_v59 }
  0x24   : > { %1093 = vmatpush.msra.mxu0 %v4721_v4  ;;  %4947 = vmatpush.msra.mxu2 %v5294_v36  ;;  %v842_v4 = vld.sshfl [vmem:[#allocation1 + $0x8] sm:$0xff pattern:$0x73625140]  ;;  %v384_v9 = vrot.slane %v340_v58, 4  ;;  %v5363_v26 = vrot.slane %v484_v30, 2  ;;  %v5365_v27 = vrot.slane %v487_v1, 4  ;;  %v494_v41 = vsel %vm436_vm6, %v5165_v53, %v383_v43 }
  0x25   : > { %1185 = vmatpush.msra.mxu1 %v5211_v5  ;;  %847 = vst [vmem:[#allocation1] ss:$4 sm:$0xff] %v5288_v35  ;;  %v300_v44 = vsel %vm285_vm0, %v298_v21, %v299_v22  ;;  %v5387_v59 = vld [vmem:[%s9221_s1 + $0x290] sm:$0xff]  ;;  %v341_v58 = vrot.slane %v5329_v61, 2  ;;  %4925 = vmatpush.msra.mxu3 %v5211_v5  ;;  %v386_v30 = vrot.slane %v339_v37, 4 }
  0x26   : > { %1094 = vmatpush.msra.mxu0 %v4720_v17  ;;  %v5351_v17 = vld [vmem:[%s9221_s1 + $0x2a0] sm:$0xff]  ;;  %848 = vst [vmem:[#allocation1 + $0x1] ss:$4 sm:$0xff] %v5316_v47  ;;  %4949 = vmatpush.msra.mxu2 %v5323_v57  ;;  %v5390_v45 = vsel %vm429_vm3, %v489_v29, %v384_v9  ;;  %v495_v1 = vsel %vm429_vm3, %v384_v9, %v494_v41  ;;  %v387_v5 = vrot.slane %v300_v44, 6  ;;  %v5440_v41 = vld [vmem:[%s5063_s24 + $0x50] sm:$0xff]  ;;  %v5443_v44 = vld [vmem:[%s5063_s24 + $0x58] sm:$0xff] }
  0x27   : > { %1186 = vmatpush.msra.mxu1 %v5246_v18  ;;  %849 = vst [vmem:[#allocation1 + $0x2] ss:$4 sm:$0xff] %v5342_v8  ;;  %4926 = vmatpush.msra.mxu3 %v5246_v18  ;;  %v5424_v18 = vld [vmem:[%s9221_s1 + $0x280] sm:$0xff]  ;;  %v344_v60 = vrot.slane %v5440_v41, 2 }
  0x28   : > { %1095 = vmatpush.msra.mxu0 %v4719_v31  ;;  %v492_v31 = vsel %vm433_vm5, %v491_v2, %v384_v9  ;;  %v844_v25 = vld.sshfl [vmem:[#allocation1 + $0x20] sm:$0xff pattern:$0x73625140]  ;;  %v5370_v34 = vld.sshfl [vmem:[#allocation1 + $0x30] sm:$0xff pattern:$0x73625140]  ;;  %4951 = vmatpush.msra.mxu2 %v5351_v17 }
  0x29   : > { %1187 = vmatpush.msra.mxu1 %v5278_v32  ;;  %v845_v38 = vld.sshfl [vmem:[#allocation1 + $0x28] sm:$0xff pattern:$0x73625140]  ;;  %850 = vst [vmem:[#allocation1 + $0x3] ss:$4 sm:$0xff] %v5345_v12  ;;  %v5392_v51 = vrot.slane %v492_v31, 2  ;;  %4927 = vmatpush.msra.mxu3 %v5278_v32 }
  0x2a   : > { %1096 = vmatpush.msra.mxu0 %v4718_v39  ;;  %v385_v39 = vrot.slane %v296_v16, 6  ;;  %v497_v16 = vsel %vm328_vm1, %v383_v43, %v5165_v53  ;;  %4953 = vmatpush.msra.mxu2 %v5361_v23  ;;  %851 = vst [vmem:[#allocation1 + $0x20] ss:$4 sm:$0xff] %v5363_v26  ;;  %v5409_v53 = vld [vmem:[%s9221_s1 + $0x288] sm:$0xff]  ;;  %v389_v32 = vrot.slane %v299_v22, 6 }
  0x2b   : > { %1188 = vmatpush.msra.mxu1 %v5306_v40  ;;  %1097 = vmatmul.f32.vlgmr.msra.gmra.mxu0 %v841_v62  ;;  %v342_v62 = vrot.slane %v5332_v42, 2  ;;  %852 = vst [vmem:[#allocation1 + $0x21] ss:$4 sm:$0xff] %v5365_v27  ;;  %v498_v43 = vsel %vm433_vm5, %v384_v9, %v497_v16  ;;  %v5428_v9 = vrot.slane %v495_v1, 4 }
  0x2c   : > { %1189 = vmatmul.f32.vlgmr.msra.gmra.mxu1 %v842_v4  ;;  %1265 = vmatpush.msrb.mxu0 %v5074_v14  ;;  %v502_v2 = vsel %vm431_vm4, %v5191_v63, %v385_v39  ;;  %853 = vst [vmem:[#allocation1 + $0x22] ss:$4 sm:$0xff] %v5390_v45  ;;  %v505_v4 = vsel %vm436_vm6, %v5191_v63, %v385_v39  ;;  %v5434_v31 = vrot.slane %v498_v43, 6 }
  0x2d   : > { %4955 = vmatpush.msra.mxu2 %v5387_v59  ;;  %v343_v37 = vsel %vm328_vm1, %v341_v58, %v342_v62  ;;  %854 = vst [vmem:[#allocation1 + $0x23] ss:$4 sm:$0xff] %v5392_v51  ;;  %v500_v21 = vsel %vm427_vm2, %v5191_v63, %v385_v39  ;;  %v506_v39 = vsel %vm429_vm3, %v386_v30, %v505_v4 }
  0x2e   : > { %1266 = vmatpush.msrb.mxu0 %v5079_v15  ;;  %v388_v29 = vrot.slane %v343_v37, 4  ;;  %v513_v58 = vsel %vm436_vm6, %v5329_v61, %v387_v5  ;;  %v5454_v43 = vsel %vm429_vm3, %v500_v21, %v386_v30  ;;  %4928 = vmatpush.msra.mxu3 %v5306_v40  ;;  %v508_v37 = vsel %vm427_vm2, %v5329_v61, %v387_v5 }
  0x2f   : > { %4957 = vmatpush.msra.mxu2 %v5409_v53  ;;  %v301_v21 = vrot.slane %v5440_v41, 1 }
  0x30   : > { %1267 = vmatpush.msrb.mxu0 %v5097_v24  ;;  %v855_v16 = vld.sshfl [vmem:[#allocation1] sm:$0xff pattern:$0x73625140]  ;;  %v856_v63 = vld.sshfl [vmem:[#allocation1 + $0x8] sm:$0xff pattern:$0x73625140]  ;;  %4930 = vmatpush.msrb.mxu3 %v5074_v14  ;;  %v514_v40 = vsel %vm429_vm3, %v388_v29, %v513_v58  ;;  %v516_v58 = vsel %vm328_vm1, %v387_v5, %v5329_v61 }
  0x31   : > { %4959 = vmatpush.msra.mxu2 %v5424_v18  ;;  %v5451_v1 = vld.sshfl [vmem:[#allocation1 + $0x10] sm:$0xff pattern:$0x73625140]  ;;  %v5486_v10 = vrot.slane %v514_v40, 4  ;;  %v5515_v40 = vld [vmem:[%s5063_s24 + $0x60] sm:$0xff] }
  0x32   : > { %1268 = vmatpush.msrb.mxu0 %v5117_v33  ;;  %9453 = vst [vmem:[#allocation3_spill] sm:$0xff] %v5451_v1  ;;  %4932 = vmatpush.msrb.mxu3 %v5079_v15  ;;  %v345_v15 = vrot.slane %v5443_v44, 2 }
  0x33   : > { %1100 = vmatmul.f32.gmra.mxu0 %v844_v25  ;;  %v503_v25 = vsel %vm433_vm5, %v502_v2, %v386_v30  ;;  %861 = vst [vmem:[#allocation1] ss:$4 sm:$0xff] %v5428_v9  ;;  %v5468_v30 = vrot.slane %v506_v39, 4 }
  0x34   : > { %1192 = vmatmul.f32.gmra.mxu1 %v845_v38  ;;  %v510_v38 = vsel %vm431_vm4, %v5329_v61, %v387_v5  ;;  %1269 = vmatpush.msrb.mxu0 %v5146_v46  ;;  %v5457_v2 = vrot.slane %v503_v25, 2  ;;  %862 = vst [vmem:[#allocation1 + $0x1] ss:$4 sm:$0xff] %v5434_v31  ;;  %v302_v25 = vrot.slane %v5443_v44, 1  ;;  %v517_v61 = vsel %vm433_vm5, %v388_v29, %v516_v58 }
  0x35   : > { %v511_v4 = vsel %vm433_vm5, %v510_v38, %v388_v29  ;;  %v858_v22 = vld.sshfl [vmem:[#allocation1 + $0x20] sm:$0xff pattern:$0x73625140]  ;;  %v5473_v19 = vld.sshfl [vmem:[#allocation1 + $0x30] sm:$0xff pattern:$0x73625140]  ;;  %v5479_v38 = vsel %vm429_vm3, %v508_v37, %v388_v29  ;;  %4934 = vmatpush.msrb.mxu3 %v5097_v24  ;;  %v521_v5 = vsel %vm431_vm4, %v5332_v42, %v389_v32  ;;  %v524_v24 = vsel %vm436_vm6, %v5332_v42, %v389_v32 }
  0x36   : > { %1270 = vmatpush.msrb.mxu0 %v5162_v52  ;;  %9454 = vst [vmem:[#allocation4_spill] sm:$0xff] %v5473_v19  ;;  %v859_v14 = vld.sshfl [vmem:[#allocation1 + $0x28] sm:$0xff pattern:$0x73625140]  ;;  %v5481_v39 = vrot.slane %v511_v4, 2  ;;  %v519_v29 = vsel %vm427_vm2, %v5332_v42, %v389_v32 }
  0x37   : > { %863 = vst [vmem:[#allocation1 + $0x2] ss:$4 sm:$0xff] %v5454_v43  ;;  %4936 = vmatpush.msrb.mxu3 %v5117_v33  ;;  %v5511_v33 = vrot.slane %v517_v61, 6 }
  0x38   : > { %1271 = vmatpush.msrb.mxu0 %v5203_v3  ;;  %9455 = vst [vmem:[#allocation5_spill] sm:$0xff] %v5481_v39 }
  0x39   : > { %864 = vst [vmem:[#allocation1 + $0x3] ss:$4 sm:$0xff] %v5457_v2  ;;  %4938 = vmatpush.msrb.mxu3 %v5146_v46 }
  0x3a   : > { %9456 = vst [vmem:[#allocation6_spill] sm:$0xff] %v5486_v10  ;;  %1272 = vmatpush.msrb.mxu0 %v5237_v13 }
  0x3b   : > { %1103 = vmatmul.f32.gmra.mxu0 %v855_v16  ;;  %v390_v16 = vrot.slane %v342_v62, 4  ;;  %865 = vst [vmem:[#allocation1 + $0x20] ss:$4 sm:$0xff] %v5468_v30  ;;  %v346_v62 = vsel %vm328_vm1, %v344_v60, %v345_v15  ;;  %4940 = vmatpush.msrb.mxu3 %v5162_v52  ;;  %v304_v52 = vrot.slane %v5515_v40, 1 }
  0x3c   : > { %1195 = vmatmul.f32.gmra.mxu1 %v856_v63  ;;  %v303_v63 = vsel %vm285_vm0, %v301_v21, %v302_v25  ;;  %866 = vst [vmem:[#allocation1 + $0x21] ss:$4 sm:$0xff] %v5479_v38  ;;  %1273 = vmatpush.msrb.mxu0 %v5269_v28  ;;  %v5518_v21 = vld [vmem:[%s5063_s24 + $0x68] sm:$0xff]  ;;  %v392_v58 = vrot.slane %v346_v62, 4  ;;  %v394_v62 = vrot.slane %v345_v15, 4 }
  0x3d   : > { %867 = vst [vmem:[#allocation1 + $0x22] ss:$4 sm:$0xff] %v5481_v39  ;;  %v391_v37 = vrot.slane %v303_v63, 6  ;;  %v522_v4 = vsel %vm433_vm5, %v521_v5, %v390_v16  ;;  %v525_v60 = vsel %vm429_vm3, %v390_v16, %v524_v24  ;;  %v5524_v46 = vsel %vm429_vm3, %v519_v29, %v390_v16  ;;  %4942 = vmatpush.msrb.mxu3 %v5203_v3 }
  0x3e   : > { %868 = vst [vmem:[#allocation1 + $0x23] ss:$4 sm:$0xff] %v5486_v10  ;;  %1274 = vmatpush.msrb.mxu0 %v5294_v36  ;;  %v5530_v24 = vrot.slane %v522_v4, 2  ;;  %v347_v16 = vrot.slane %v5515_v40, 2  ;;  %v348_v29 = vrot.slane %v5518_v21, 2  ;;  %v393_v4 = vrot.slane %v302_v25, 6 }
  0x3f   : > { %9457 = vst [vmem:[#allocation7_spill] sm:$0xff] %v5511_v33  ;;  %v529_v63 = vsel %vm431_vm4, %v5440_v41, %v391_v37  ;;  %v532_v61 = vsel %vm436_vm6, %v5440_v41, %v391_v37  ;;  %4944 = vmatpush.msrb.mxu3 %v5237_v13  ;;  %v9462_v15 = vrot.slane %v5518_v21, 1 }
  0x40   : > { %1275 = vmatpush.msrb.mxu0 %v5323_v57  ;;  %v869_v42 = vld.sshfl [vmem:[#allocation1] sm:$0xff pattern:$0x73625140]  ;;  %v870_v32 = vld.sshfl [vmem:[#allocation1 + $0x8] sm:$0xff pattern:$0x73625140]  ;;  %v530_v3 = vsel %vm433_vm5, %v529_v63, %v392_v58  ;;  %v543_v13 = vsel %vm436_vm6, %v5443_v44, %v393_v4 }
  0x41   : > { %9458 = vst [vmem:[#allocation8_spill] sm:$0xff] %v5524_v46  ;;  %v871_v5 = vld.sshfl [vmem:[#allocation1 + $0x10] sm:$0xff pattern:$0x73625140]  ;;  %v306_v63 = vsel %vm285_vm0, %v304_v52, %v9462_v15  ;;  %4946 = vmatpush.msrb.mxu3 %v5269_v28  ;;  %v9236_v52 = vrot.slane %v5548_v54, 1  ;;  %v544_v15 = vsel %vm429_vm3, %v394_v62, %v543_v13 }
  0x42   : > { %9459 = vst [vmem:[#allocation9_spill] sm:$0xff] %v5530_v24  ;;  %1276 = vmatpush.msrb.mxu0 %v5351_v17  ;;  %1293 = vmatmul.f32.vlgmr.msra.gmra.mxu2 %v871_v5  ;;  %v533_v5 = vsel %vm429_vm3, %v392_v58, %v532_v61  ;;  %v5563_v61 = vrot.slane %v530_v3, 2  ;;  %v349_v3 = vsel %vm328_vm1, %v347_v16, %v348_v29 }
  0x43   : > { %1106 = vmatmul.f32.gmra.mxu0 %v858_v22  ;;  %v527_v22 = vsel %vm427_vm2, %v5440_v41, %v391_v37  ;;  %875 = vst [vmem:[#allocation1] ss:$4 sm:$0xff] %v5511_v33  ;;  %4948 = vmatpush.msrb.mxu3 %v5294_v36 }
  0x44   : > { %1198 = vmatmul.f32.gmra.mxu1 %v859_v14  ;;  %v5538_v14 = vrot.slane %v525_v60, 4  ;;  %876 = vst [vmem:[#allocation1 + $0x1] ss:$4 sm:$0xff] %v5524_v46  ;;  %v535_v60 = vsel %vm328_vm1, %v391_v37, %v5440_v41  ;;  %v5555_v33 = vsel %vm429_vm3, %v527_v22, %v392_v58  ;;  %1277 = vmatpush.msrb.mxu0 %v5361_v23  ;;  %v5567_v41 = vrot.slane %v533_v5, 4 }
  0x45   : > { %v872_v19 = vld.sshfl [vmem:[#allocation1 + $0x20] sm:$0xff pattern:$0x73625140]  ;;  %v873_v1 = vld.sshfl [vmem:[#allocation1 + $0x28] sm:$0xff pattern:$0x73625140]  ;;  %v536_v25 = vsel %vm433_vm5, %v392_v58, %v535_v60  ;;  %v540_v37 = vsel %vm431_vm4, %v5443_v44, %v393_v4  ;;  %v538_v60 = vsel %vm427_vm2, %v5443_v44, %v393_v4  ;;  %4950 = vmatpush.msrb.mxu3 %v5323_v57 }
  0x46   : > { %9460 = vst [vmem:[#allocation10_spill] sm:$0xff] %v5538_v14  ;;  %v874_v46 = vld.sshfl [vmem:[#allocation1 + $0x30] sm:$0xff pattern:$0x73625140]  ;;  %v307_v58 = vrot.slane %v5545_v55, 1  ;;  %v5576_v22 = vrot.slane %v536_v25, 6  ;;  %v541_v28 = vsel %vm433_vm5, %v540_v37, %v394_v62  ;;  %1278 = vmatpush.msrb.mxu0 %v5387_v59  ;;  %v5597_v36 = vsel %vm429_vm3, %v538_v60, %v394_v62 }
  0x47   : > { %9461 = vst [vmem:[#allocation11_spill] sm:$0xff] %v5555_v33  ;;  %v395_v5 = vrot.slane %v306_v63, 6  ;;  %v396_v44 = vrot.slane %v349_v3, 4  ;;  %v5599_v4 = vrot.slane %v541_v28, 2  ;;  %4952 = vmatpush.msrb.mxu3 %v5351_v17  ;;  %v9469_v62 = vrot.slane %v5518_v21, 1 }
  0x48   : > { %877 = vst [vmem:[#allocation1 + $0x2] ss:$4 sm:$0xff] %v5530_v24  ;;  %v309_v16 = vsel %vm285_vm0, %v307_v58, %v9236_v52  ;;  %1279 = vmatpush.msrb.mxu0 %v5409_v53  ;;  %v398_v3 = vrot.slane %v348_v29, 4 }
  0x49   : > { %9463 = vst [vmem:[#allocation12_spill] sm:$0xff] %v5563_v61  ;;  %v546_v37 = vsel %vm427_vm2, %v5515_v40, %v395_v5  ;;  %v397_v58 = vrot.slane %v9469_v62, 6  ;;  %v399_v60 = vrot.slane %v309_v16, 6  ;;  %v548_v28 = vsel %vm431_vm4, %v5515_v40, %v395_v5  ;;  %4954 = vmatpush.msrb.mxu3 %v5361_v23  ;;  %v5625_v16 = vld [vmem:[%s5063_s24 + $0x80] sm:$0xff]  ;;  %v5628_v62 = vld [vmem:[%s5063_s24 + $0x88] sm:$0xff] }
  0x4a   : > { %878 = vst [vmem:[#allocation1 + $0x3] ss:$4 sm:$0xff] %v5538_v14  ;;  %1296 = vmatmul.f32.gmra.mxu2 %v874_v46  ;;  %v5601_v46 = vrot.slane %v544_v15, 4  ;;  %1280 = vmatpush.msrb.mxu0 %v5424_v18  ;;  %v551_v17 = vsel %vm436_vm6, %v5515_v40, %v395_v5  ;;  %v5619_v15 = vsel %vm429_vm3, %v546_v37, %v396_v44 }
  0x4b   : > { %9464 = vst [vmem:[#allocation13_spill] sm:$0xff] %v5567_v41  ;;  %1109 = vmatmul.f32.gmra.mxu0 %v869_v42  ;;  %v350_v42 = vrot.slane %v5545_v55, 2  ;;  %v549_v29 = vsel %vm433_vm5, %v548_v28, %v396_v44  ;;  %4956 = vmatpush.msrb.mxu3 %v5387_v59  ;;  %v559_v37 = vsel %vm431_vm4, %v5518_v21, %v397_v58  ;;  %v310_v59 = vrot.slane %v5625_v16, 1 }
  0x4c   : > { %9465 = vst [vmem:[#allocation14_spill] sm:$0xff] %v5576_v22  ;;  %1201 = vmatmul.f32.gmra.mxu1 %v870_v32  ;;  %v9235_v32 = vrot.slane %v5548_v54, 2 }
  0x4d   : > { %879 = vst [vmem:[#allocation1 + $0x20] ss:$4 sm:$0xff] %v5555_v33  ;;  %4958 = vmatpush.msrb.mxu3 %v5409_v53 }
  0x4e   : > { %880 = vst [vmem:[#allocation1 + $0x21] ss:$4 sm:$0xff] %v5563_v61  ;;  %v352_v57 = vsel %vm328_vm1, %v350_v42, %v9235_v32  ;;  %v552_v42 = vsel %vm429_vm3, %v396_v44, %v551_v17  ;;  %v5631_v32 = vrot.slane %v549_v29, 2  ;;  %v562_v29 = vsel %vm436_vm6, %v5518_v21, %v397_v58 }
  0x4f   : > { %881 = vst [vmem:[#allocation1 + $0x22] ss:$4 sm:$0xff] %v5567_v41  ;;  %v5633_v23 = vrot.slane %v552_v42, 4  ;;  %4960 = vmatpush.msrb.mxu3 %v5424_v18  ;;  %v563_v53 = vsel %vm429_vm3, %v398_v3, %v562_v29  ;;  %v565_v18 = vsel %vm427_vm2, %v5545_v55, %v399_v60 }
  0x50   : > { %882 = vst [vmem:[#allocation1 + $0x23] ss:$4 sm:$0xff] %v5576_v22 }
  0x51   : > { %9466 = vst [vmem:[#allocation15_spill] sm:$0xff] %v5597_v36  ;;  %v883_v25 = vld.sshfl [vmem:[#allocation1] sm:$0xff pattern:$0x73625140] }
  0x52   : > { %9467 = vst [vmem:[#allocation16_spill] sm:$0xff] %v5599_v4  ;;  %v884_v63 = vld.sshfl [vmem:[#allocation1 + $0x8] sm:$0xff pattern:$0x73625140] }
  0x53   : > { %9468 = vst [vmem:[#allocation17_spill] sm:$0xff] %v5601_v46  ;;  %v885_v13 = vld.sshfl [vmem:[#allocation1 + $0x10] sm:$0xff pattern:$0x73625140]  ;;  %1112 = vmatmul.f32.gmra.mxu0 %v872_v19  ;;  %v554_v19 = vsel %vm328_vm1, %v395_v5, %v5515_v40  ;;  %v9241_v5 = vrot.slane %v5628_v62, 1 }
  0x54   : > { %889 = vst [vmem:[#allocation1] ss:$4 sm:$0xff] %v5597_v36  ;;  %1204 = vmatmul.f32.gmra.mxu1 %v873_v1  ;;  %v557_v1 = vsel %vm427_vm2, %v5518_v21, %v397_v58  ;;  %1299 = vmatmul.f32.gmra.mxu2 %v885_v13  ;;  %v555_v52 = vsel %vm433_vm5, %v396_v44, %v554_v19  ;;  %v400_v13 = vrot.slane %v352_v57, 4  ;;  %v5678_v57 = vrot.slane %v563_v53, 4 }
  0x55   : > { %9470 = vst [vmem:[#allocation18_spill] sm:$0xff] %v5619_v15  ;;  %v5646_v40 = vrot.slane %v555_v52, 6  ;;  %v560_v21 = vsel %vm433_vm5, %v559_v37, %v398_v3  ;;  %v567_v44 = vsel %vm431_vm4, %v5545_v55, %v399_v60  ;;  %v353_v52 = vrot.slane %v5625_v16, 2 }
  0x56   : > { %890 = vst [vmem:[#allocation1 + $0x1] ss:$4 sm:$0xff] %v5599_v4  ;;  %v312_v58 = vsel %vm285_vm0, %v310_v59, %v9241_v5  ;;  %v5668_v19 = vrot.slane %v560_v21, 2  ;;  %v9476_v37 = vrot.slane %v5548_v54, 1  ;;  %v573_v59 = vsel %vm328_vm1, %v399_v60, %v5545_v55  ;;  %v5685_v21 = vld [vmem:[%s5063_s24 + $0x98] sm:$0xff]  ;;  %v5763_v4 = vld [vmem:[%s5063_s24 + $0xa0] sm:$0xff] }
  0x57   : > { %891 = vst [vmem:[#allocation1 + $0x2] ss:$4 sm:$0xff] %v5601_v46  ;;  %v886_v28 = vld.sshfl [vmem:[#allocation1 + $0x20] sm:$0xff pattern:$0x73625140]  ;;  %v5652_v46 = vsel %vm429_vm3, %v557_v1, %v398_v3  ;;  %v568_v3 = vsel %vm433_vm5, %v567_v44, %v400_v13  ;;  %v5674_v1 = vld [vmem:[%s5063_s24 + $0x90] sm:$0xff]  ;;  %v5693_v53 = vsel %vm429_vm3, %v565_v18, %v400_v13 }
  0x58   : > { %9471 = vst [vmem:[#allocation19_spill] sm:$0xff] %v5631_v32  ;;  %v887_v17 = vld.sshfl [vmem:[#allocation1 + $0x28] sm:$0xff pattern:$0x73625140]  ;;  %v401_v29 = vrot.slane %v9476_v37, 6  ;;  %v9478_v44 = vrot.slane %v5628_v62, 2 }
  0x59   : > { %9472 = vst [vmem:[#allocation20_spill] sm:$0xff] %v5633_v23  ;;  %v888_v42 = vld.sshfl [vmem:[#allocation1 + $0x30] sm:$0xff pattern:$0x73625140]  ;;  %v5695_v37 = vrot.slane %v568_v3, 2 }
  0x5a   : > { %892 = vst [vmem:[#allocation1 + $0x3] ss:$4 sm:$0xff] %v5619_v15  ;;  %v355_v5 = vsel %vm328_vm1, %v353_v52, %v9478_v44  ;;  %v313_v52 = vrot.slane %v5674_v1, 1  ;;  %v581_v3 = vsel %vm436_vm6, %v5548_v54, %v401_v29 }
  0x5b   : > { %9473 = vst [vmem:[#allocation21_spill] sm:$0xff] %v5646_v40  ;;  %1115 = vmatmul.f32.gmra.mxu0 %v883_v25  ;;  %v570_v25 = vsel %vm436_vm6, %v5545_v55, %v399_v60  ;;  %v9481_v55 = vrot.slane %v5548_v54, 2  ;;  %v5705_v18 = vrot.slane %v355_v5, 4 }
  0x5c   : > { %9474 = vst [vmem:[#allocation22_spill] sm:$0xff] %v5652_v46  ;;  %1207 = vmatmul.f32.gmra.mxu1 %v884_v63  ;;  %1302 = vmatmul.f32.gmra.mxu2 %v888_v42  ;;  %v571_v42 = vsel %vm429_vm3, %v400_v13, %v570_v25 }
  0x5d   : > { %893 = vst [vmem:[#allocation1 + $0x20] ss:$4 sm:$0xff] %v5631_v32  ;;  %v402_v60 = vrot.slane %v9481_v55, 4  ;;  %v574_v32 = vsel %vm433_vm5, %v400_v13, %v573_v59  ;;  %v5714_v44 = vrot.slane %v571_v42, 4  ;;  %v576_v13 = vsel %vm427_vm2, %v5548_v54, %v401_v29 }
  0x5e   : > { %894 = vst [vmem:[#allocation1 + $0x21] ss:$4 sm:$0xff] %v5633_v23  ;;  %v5718_v59 = vrot.slane %v574_v32, 6  ;;  %v356_v55 = vrot.slane %v5674_v1, 2 }
  0x5f   : > { %895 = vst [vmem:[#allocation1 + $0x22] ss:$4 sm:$0xff] %v5646_v40  ;;  %v5690_v40 = vrot.slane %v312_v58, 6 }
  0x60   : > { %896 = vst [vmem:[#allocation1 + $0x23] ss:$4 sm:$0xff] %v5652_v46 }
  0x61   : > { %9475 = vst [vmem:[#allocation23_spill] sm:$0xff] %v5668_v19  ;;  %v897_v63 = vld.sshfl [vmem:[#allocation1] sm:$0xff pattern:$0x73625140]  ;;  %v586_v25 = vsel %vm431_vm4, %v5625_v16, %v5690_v40  ;;  %v584_v58 = vsel %vm427_vm2, %v5625_v16, %v5690_v40 }
  0x62   : > { %9477 = vst [vmem:[#allocation24_spill] sm:$0xff] %v5678_v57  ;;  %v898_v46 = vld.sshfl [vmem:[#allocation1 + $0x8] sm:$0xff pattern:$0x73625140] }
  0x63   : > { %9479 = vst [vmem:[#allocation25_spill] sm:$0xff] %v5693_v53  ;;  %v899_v23 = vld.sshfl [vmem:[#allocation1 + $0x10] sm:$0xff pattern:$0x73625140]  ;;  %1118 = vmatmul.f32.gmra.mxu0 %v886_v28  ;;  %v587_v28 = vsel %vm433_vm5, %v586_v25, %v5705_v18 }
  0x64   : > { %9480 = vst [vmem:[#allocation26_spill] sm:$0xff] %v5695_v37  ;;  %1210 = vmatmul.f32.gmra.mxu1 %v887_v17  ;;  %1305 = vmatmul.f32.gmra.mxu2 %v899_v23  ;;  %v5732_v17 = vsel %vm429_vm3, %v576_v13, %v402_v60 }
  0x65   : > { %903 = vst [vmem:[#allocation1] ss:$4 sm:$0xff] %v5668_v19 }
  0x66   : > { %904 = vst [vmem:[#allocation1 + $0x1] ss:$4 sm:$0xff] %v5678_v57  ;;  %v9484_v57 = vrot.slane %v5685_v21, 1 }
  0x67   : > { %905 = vst [vmem:[#allocation1 + $0x2] ss:$4 sm:$0xff] %v5693_v53  ;;  %v900_v5 = vld.sshfl [vmem:[#allocation1 + $0x20] sm:$0xff pattern:$0x73625140]  ;;  %v582_v53 = vsel %vm429_vm3, %v402_v60, %v581_v3  ;;  %v578_v3 = vsel %vm431_vm4, %v5548_v54, %v401_v29  ;;  %v5748_v29 = vrot.slane %v587_v28, 2 }
  0x68   : > { %906 = vst [vmem:[#allocation1 + $0x3] ss:$4 sm:$0xff] %v5695_v37  ;;  %v589_v37 = vsel %vm436_vm6, %v5625_v16, %v5690_v40  ;;  %v901_v42 = vld.sshfl [vmem:[#allocation1 + $0x28] sm:$0xff pattern:$0x73625140]  ;;  %v315_v19 = vsel %vm285_vm0, %v313_v52, %v9484_v57  ;;  %v5740_v57 = vrot.slane %v582_v53, 4  ;;  %v579_v13 = vsel %vm433_vm5, %v578_v3, %v402_v60 }
  0x69   : > { %9482 = vst [vmem:[#allocation27_spill] sm:$0xff] %v5714_v44  ;;  %v902_v32 = vld.sshfl [vmem:[#allocation1 + $0x30] sm:$0xff pattern:$0x73625140]  ;;  %v590_v23 = vsel %vm429_vm3, %v5705_v18, %v589_v37  ;;  %v9487_v52 = vrot.slane %v5685_v21, 2  ;;  %v407_v54 = vrot.slane %v315_v19, 6  ;;  %v5754_v53 = vsel %vm429_vm3, %v584_v58, %v5705_v18 }
  0x6a   : > { %9483 = vst [vmem:[#allocation28_spill] sm:$0xff] %v5718_v59  ;;  %v5766_v19 = vld [vmem:[%s5063_s24 + $0xa8] sm:$0xff]  ;;  %v5769_v60 = vrot.slane %v579_v13, 2  ;;  %v316_v28 = vrot.slane %v5763_v4, 1  ;;  %v9492_v13 = vrot.slane %v5628_v62, 1 }
  0x6b   : > { %9485 = vst [vmem:[#allocation29_spill] sm:$0xff] %v5732_v17  ;;  %v358_v25 = vsel %vm328_vm1, %v356_v55, %v9487_v52  ;;  %1121 = vmatmul.f32.gmra.mxu0 %v897_v63  ;;  %v605_v58 = vsel %vm431_vm4, %v5674_v1, %v407_v54  ;;  %v317_v3 = vrot.slane %v5766_v19, 1  ;;  %v611_v52 = vsel %vm328_vm1, %v407_v54, %v5674_v1 }
  0x6c   : > { %907 = vst [vmem:[#allocation1 + $0x20] ss:$4 sm:$0xff] %v5714_v44  ;;  %v408_v55 = vrot.slane %v358_v25, 4  ;;  %1213 = vmatmul.f32.gmra.mxu1 %v898_v46  ;;  %1308 = vmatmul.f32.gmra.mxu2 %v902_v32  ;;  %v603_v46 = vsel %vm427_vm2, %v5674_v1, %v407_v54  ;;  %v359_v25 = vrot.slane %v5763_v4, 2  ;;  %v360_v32 = vrot.slane %v5766_v19, 2 }
  0x6d   : > { %9486 = vst [vmem:[#allocation30_spill] sm:$0xff] %v5740_v57 }
  0x6e   : > { %908 = vst [vmem:[#allocation1 + $0x21] ss:$4 sm:$0xff] %v5718_v59  ;;  %v5760_v59 = vrot.slane %v590_v23, 4  ;;  %v608_v23 = vsel %vm436_vm6, %v5674_v1, %v407_v54  ;;  %v606_v63 = vsel %vm433_vm5, %v605_v58, %v408_v55  ;;  %v592_v58 = vsel %vm328_vm1, %v5690_v40, %v5625_v16 }
  0x6f   : > { %9488 = vst [vmem:[#allocation31_spill] sm:$0xff] %v5748_v29  ;;  %v5756_v44 = vld.sshfl [vmem:[#allocation1] sm:$0xff pattern:$0x73625140]  ;;  %v612_v1 = vsel %vm433_vm5, %v408_v55, %v611_v52  ;;  %v9495_v54 = vrot.slane %v5628_v62, 2 }
  0x70   : > { %909 = vst [vmem:[#allocation1 + $0x22] ss:$4 sm:$0xff] %v5732_v17  ;;  %v5758_v37 = vld.sshfl [vmem:[#allocation1 + $0x8] sm:$0xff pattern:$0x73625140]  ;;  %v361_v17 = vsel %vm328_vm1, %v359_v25, %v360_v32 }
  0x71   : > { %9489 = vst [vmem:[#allocation32_spill] sm:$0xff] %v5754_v53  ;;  %v913_v15 = vld.sshfl [vmem:[#allocation1 + $0x10] sm:$0xff pattern:$0x73625140]  ;;  %v5830_v25 = vrot.slane %v361_v17, 4 }
  0x72   : > { %9490 = vst [vmem:[#allocation33_spill] sm:$0xff] %v5760_v59 }
  0x73   : > { %917 = vst [vmem:[#allocation1] ss:$4 sm:$0xff] %v5740_v57  ;;  %v5796_v57 = vsel %vm429_vm3, %v603_v46, %v408_v55  ;;  %1124 = vmatmul.f32.gmra.mxu0 %v900_v5  ;;  %v593_v5 = vsel %vm433_vm5, %v5705_v18, %v592_v58 }
  0x74   : > { %9491 = vst [vmem:[#allocation34_spill] sm:$0xff] %v5769_v60  ;;  %1216 = vmatmul.f32.gmra.mxu1 %v901_v42  ;;  %1311 = vmatmul.f32.gmra.mxu2 %v913_v15  ;;  %v5821_v42 = vrot.slane %v612_v1, 6  ;;  %v5836_v15 = vrot.slane %v593_v5, 6 }
  0x75   : > { %918 = vst [vmem:[#allocation1 + $0x1] ss:$4 sm:$0xff] %v5754_v53  ;;  %v318_v53 = vsel %vm285_vm0, %v316_v28, %v317_v3  ;;  %v5806_v28 = vld [vmem:[%s5063_s24 + $0xb0] sm:$0xff] }
  0x76   : > { %919 = vst [vmem:[#allocation1 + $0x2] ss:$4 sm:$0xff] %v5748_v29  ;;  %v405_v29 = vrot.slane %v9492_v13, 6  ;;  %v406_v13 = vrot.slane %v9495_v54, 4  ;;  %v5809_v16 = vrot.slane %v318_v53, 6  ;;  %v5826_v53 = vld [vmem:[%s5063_s24 + $0xb8] sm:$0xff] }
  0x77   : > { %920 = vst [vmem:[#allocation1 + $0x3] ss:$4 sm:$0xff] %v5760_v59  ;;  %v609_v59 = vsel %vm429_vm3, %v408_v55, %v608_v23  ;;  %v319_v52 = vrot.slane %v5806_v28, 1 }
  0x78   : > { %910 = vst [vmem:[#allocation1 + $0x23] ss:$4 sm:$0xff] %v5769_v60  ;;  %v5798_v60 = vrot.slane %v606_v63, 2  ;;  %v5803_v23 = vrot.slane %v609_v59, 4  ;;  %v597_v40 = vsel %vm431_vm4, %v5628_v62, %v405_v29  ;;  %v600_v59 = vsel %vm436_vm6, %v5628_v62, %v405_v29 }
  0x79   : > { %9493 = vst [vmem:[#allocation35_spill] sm:$0xff] %v5796_v57  ;;  %v595_v54 = vsel %vm427_vm2, %v5628_v62, %v405_v29  ;;  %v598_v18 = vsel %vm433_vm5, %v597_v40, %v406_v13  ;;  %v601_v58 = vsel %vm429_vm3, %v406_v13, %v600_v59  ;;  %v624_v17 = vsel %vm431_vm4, %v5763_v4, %v5809_v16 }
  0x7a   : > { %9494 = vst [vmem:[#allocation36_spill] sm:$0xff] %v5798_v60  ;;  %v627_v62 = vsel %vm436_vm6, %v5763_v4, %v5809_v16  ;;  %v630_v40 = vsel %vm328_vm1, %v5809_v16, %v5763_v4  ;;  %v5852_v5 = vsel %vm429_vm3, %v595_v54, %v406_v13  ;;  %v5854_v59 = vrot.slane %v598_v18, 2 }
  0x7b   : > { %9496 = vst [vmem:[#allocation37_spill] sm:$0xff] %v5803_v23  ;;  %v5860_v22 = vrot.slane %v601_v58, 4  ;;  %1127 = vmatmul.f32.gmra.mxu0 %v5756_v44  ;;  %v628_v13 = vsel %vm429_vm3, %v5830_v25, %v627_v62  ;;  %v362_v54 = vrot.slane %v5806_v28, 2  ;;  %v631_v18 = vsel %vm433_vm5, %v5830_v25, %v630_v40 }
  0x7c   : > { %9497 = vst [vmem:[#allocation38_spill] sm:$0xff] %v5821_v42  ;;  %1219 = vmatmul.f32.gmra.mxu1 %v5758_v37  ;;  %v9503_v44 = vrot.slane %v5685_v21, 2  ;;  %v5878_v58 = vrot.slane %v360_v32, 4 }
  0x7d   : > { %9498 = vst [vmem:[#allocation39_spill] sm:$0xff] %v5836_v15 }
  0x7e   : > { %v5813_v46 = vld.sshfl [vmem:[#allocation1] sm:$0xff pattern:$0x73625140]  ;;  %v5815_v55 = vld.sshfl [vmem:[#allocation1 + $0x8] sm:$0xff pattern:$0x73625140] }
  0x7f   : > { %v5823_v63 = vld.sshfl [vmem:[#allocation1 + $0x10] sm:$0xff pattern:$0x73625140]  ;;  %v914_v1 = vld.sshfl [vmem:[#allocation1 + $0x20] sm:$0xff pattern:$0x73625140] }
  0x80   : > { %931 = vst [vmem:[#allocation1] ss:$4 sm:$0xff] %v5796_v57  ;;  %v320_v57 = vrot.slane %v5826_v53, 1  ;;  %v915_v29 = vld.sshfl [vmem:[#allocation1 + $0x28] sm:$0xff pattern:$0x73625140] }
  0x81   : > { %932 = vst [vmem:[#allocation1 + $0x1] ss:$4 sm:$0xff] %v5798_v60  ;;  %v9501_v60 = vrot.slane %v5685_v21, 1  ;;  %v916_v41 = vld.sshfl [vmem:[#allocation1 + $0x30] sm:$0xff pattern:$0x73625140] }
  0x82   : > { %933 = vst [vmem:[#allocation1 + $0x2] ss:$4 sm:$0xff] %v5803_v23  ;;  %v5856_v23 = vrot.slane %v317_v3, 6  ;;  %v321_v3 = vsel %vm285_vm0, %v319_v52, %v320_v57  ;;  %v410_v37 = vrot.slane %v9503_v44, 4  ;;  %1314 = vmatmul.f32.gmra.mxu2 %v916_v41  ;;  %v5892_v44 = vrot.slane %v631_v18, 6 }
  0x83   : > { %934 = vst [vmem:[#allocation1 + $0x3] ss:$4 sm:$0xff] %v5821_v42  ;;  %v409_v36 = vrot.slane %v9501_v60, 6  ;;  %v625_v42 = vsel %vm433_vm5, %v624_v17, %v5830_v25  ;;  %v363_v60 = vrot.slane %v5826_v53, 2  ;;  %v5888_v40 = vrot.slane %v321_v3, 6  ;;  %1130 = vmatmul.f32.gmra.mxu0 %v914_v1 }
  0x84   : > { %9499 = vst [vmem:[#allocation40_spill] sm:$0xff] %v5852_v5  ;;  %v5880_v17 = vrot.slane %v625_v42, 2  ;;  %v633_v52 = vsel %vm427_vm2, %v5766_v19, %v5856_v23  ;;  %v5906_v18 = vrot.slane %v320_v57, 6  ;;  %1222 = vmatmul.f32.gmra.mxu1 %v915_v29  ;;  %v5927_v57 = vld [vmem:[%s5063_s24 + $0xc8] sm:$0xff]  ;;  %v622_v29 = vsel %vm427_vm2, %v5763_v4, %v5809_v16 }
  0x85   : > { %9500 = vst [vmem:[#allocation41_spill] sm:$0xff] %v5854_v59  ;;  %v616_v62 = vsel %vm431_vm4, %v5685_v21, %v409_v36  ;;  %v619_v41 = vsel %vm436_vm6, %v5685_v21, %v409_v36  ;;  %v614_v3 = vsel %vm427_vm2, %v5685_v21, %v409_v36  ;;  %v5916_v33 = vrot.slane %v363_v60, 4  ;;  %v5924_v21 = vld [vmem:[%s5063_s24 + $0xc0] sm:$0xff] }
  0x86   : > { %9502 = vst [vmem:[#allocation42_spill] sm:$0xff] %v5860_v22  ;;  %v620_v61 = vsel %vm429_vm3, %v410_v37, %v619_v41  ;;  %v646_v36 = vsel %vm436_vm6, %v5806_v28, %v5888_v40  ;;  %v322_v16 = vrot.slane %v5924_v21, 1 }
  0x87   : > { %921 = vst [vmem:[#allocation1 + $0x20] ss:$4 sm:$0xff] %v5836_v15 }
  0x88   : > { %922 = vst [vmem:[#allocation1 + $0x21] ss:$4 sm:$0xff] %v5852_v5  ;;  %v5890_v5 = vrot.slane %v628_v13, 4  ;;  %v617_v13 = vsel %vm433_vm5, %v616_v62, %v410_v37 }
  0x89   : > { %923 = vst [vmem:[#allocation1 + $0x22] ss:$4 sm:$0xff] %v5854_v59  ;;  %v364_v59 = vsel %vm328_vm1, %v362_v54, %v363_v60  ;;  %v5932_v1 = vrot.slane %v617_v13, 2  ;;  %v5941_v60 = vrot.slane %v620_v61, 4  ;;  %v323_v13 = vrot.slane %v5927_v57, 1 }
  0x8a   : > { %9504 = vst [vmem:[#allocation43_spill] sm:$0xff] %v5880_v17  ;;  %v5896_v32 = vld.sshfl [vmem:[#allocation1] sm:$0xff pattern:$0x73625140]  ;;  %v5914_v54 = vrot.slane %v364_v59, 4  ;;  %v649_v59 = vsel %vm328_vm1, %v5888_v40, %v5806_v28  ;;  %1317 = vmatmul.f32.gmra.mxu2 %v5823_v63  ;;  %v5953_v61 = vsel %vm429_vm3, %v622_v29, %v5830_v25  ;;  %v638_v25 = vsel %vm436_vm6, %v5766_v19, %v5856_v23 }
  0x8b   : > { %924 = vst [vmem:[#allocation1 + $0x23] ss:$4 sm:$0xff] %v5860_v22  ;;  %v5898_v42 = vld.sshfl [vmem:[#allocation1 + $0x8] sm:$0xff pattern:$0x73625140]  ;;  %v5910_v22 = vsel %vm429_vm3, %v633_v52, %v5878_v58  ;;  %v5930_v52 = vsel %vm429_vm3, %v614_v3, %v410_v37  ;;  %v654_v37 = vsel %vm431_vm4, %v5826_v53, %v5906_v18  ;;  %v643_v29 = vsel %vm431_vm4, %v5806_v28, %v5888_v40 }
  0x8c   : > { %9505 = vst [vmem:[#allocation44_spill] sm:$0xff] %v5890_v5  ;;  %v5901_v15 = vld.sshfl [vmem:[#allocation1 + $0x10] sm:$0xff pattern:$0x73625140]  ;;  %v647_v4 = vsel %vm429_vm3, %v5914_v54, %v646_v36  ;;  %v650_v63 = vsel %vm433_vm5, %v5914_v54, %v649_v59  ;;  %v635_v36 = vsel %vm431_vm4, %v5766_v19, %v5856_v23  ;;  %1133 = vmatmul.f32.gmra.mxu0 %v5813_v46 }
  0x8d   : > { %9506 = vst [vmem:[#allocation45_spill] sm:$0xff] %v5892_v44  ;;  %v5971_v59 = vrot.slane %v647_v4, 4  ;;  %1225 = vmatmul.f32.gmra.mxu1 %v5815_v55  ;;  %v5981_v19 = vrot.slane %v650_v63, 6  ;;  %v324_v23 = vsel %vm285_vm0, %v322_v16, %v323_v13  ;;  %v636_v4 = vsel %vm433_vm5, %v635_v36, %v5878_v58 }
  0x8e   : > { %9507 = vst [vmem:[#allocation46_spill] sm:$0xff] %v5910_v22  ;;  %v644_v46 = vsel %vm433_vm5, %v643_v29, %v5914_v54  ;;  %v421_v36 = vrot.slane %v323_v13, 6  ;;  %v6021_v13 = vld [vmem:[%s5063_s24 + $0xe8] sm:$0xff] }
  0x8f   : > { %945 = vst [vmem:[#allocation1] ss:$4 sm:$0xff] %v5880_v17  ;;  %v655_v17 = vsel %vm433_vm5, %v654_v37, %v5916_v33  ;;  %v639_v37 = vsel %vm429_vm3, %v5878_v58, %v638_v25  ;;  %v6004_v58 = vrot.slane %v636_v4, 2 }
  0x90   : > { %946 = vst [vmem:[#allocation1 + $0x1] ss:$4 sm:$0xff] %v5890_v5  ;;  %v652_v5 = vsel %vm427_vm2, %v5826_v53, %v5906_v18  ;;  %v5999_v16 = vrot.slane %v655_v17, 2  ;;  %v6009_v29 = vrot.slane %v639_v37, 4  ;;  %v6014_v17 = vrot.slane %v644_v46, 2 }
  0x91   : > { %947 = vst [vmem:[#allocation1 + $0x2] ss:$4 sm:$0xff] %v5892_v44  ;;  %v366_v44 = vrot.slane %v5927_v57, 2  ;;  %v5997_v55 = vsel %vm429_vm3, %v652_v5, %v5916_v33  ;;  %v641_v5 = vsel %vm427_vm2, %v5806_v28, %v5888_v40  ;;  %v673_v37 = vsel %vm431_vm4, %v5927_v57, %v421_v36  ;;  %v6034_v40 = vld [vmem:[%s5063_s24 + $0xd8] sm:$0xff] }
  0x92   : > { %9508 = vst [vmem:[#allocation47_spill] sm:$0xff] %v5930_v52  ;;  %v928_v62 = vld.sshfl [vmem:[#allocation1 + $0x20] sm:$0xff pattern:$0x73625140]  ;;  %v6038_v46 = vsel %vm429_vm3, %v641_v5, %v5914_v54  ;;  %v676_v5 = vsel %vm436_vm6, %v5927_v57, %v421_v36 }
  0x93   : > { %9509 = vst [vmem:[#allocation48_spill] sm:$0xff] %v5932_v1  ;;  %v929_v41 = vld.sshfl [vmem:[#allocation1 + $0x28] sm:$0xff pattern:$0x73625140] }
  0x94   : > { %948 = vst [vmem:[#allocation1 + $0x3] ss:$4 sm:$0xff] %v5910_v22  ;;  %v930_v3 = vld.sshfl [vmem:[#allocation1 + $0x30] sm:$0xff pattern:$0x73625140]  ;;  %v365_v22 = vrot.slane %v5924_v21, 2  ;;  %1136 = vmatmul.f32.gmra.mxu0 %v928_v62 }
  0x95   : > { %9510 = vst [vmem:[#allocation49_spill] sm:$0xff] %v5941_v60  ;;  %1320 = vmatmul.f32.gmra.mxu2 %v930_v3  ;;  %v6018_v3 = vld [vmem:[%s5063_s24 + $0xe0] sm:$0xff]  ;;  %1228 = vmatmul.f32.gmra.mxu1 %v929_v41 }
  0x96   : > { %9511 = vst [vmem:[#allocation50_spill] sm:$0xff] %v5953_v61  ;;  %v748_v62 = vrot.slane %v6018_v3, 1 }
  0x97   : > { %935 = vst [vmem:[#allocation1 + $0x20] ss:$4 sm:$0xff] %v5930_v52  ;;  %v367_v52 = vsel %vm328_vm1, %v365_v22, %v366_v44  ;;  %v419_v22 = vrot.slane %v324_v23, 6  ;;  %v422_v23 = vrot.slane %v366_v44, 4 }
  0x98   : > { %936 = vst [vmem:[#allocation1 + $0x21] ss:$4 sm:$0xff] %v5932_v1  ;;  %v6007_v25 = vrot.slane %v367_v52, 4  ;;  %v6026_v52 = vld [vmem:[%s5063_s24 + $0xd0] sm:$0xff] }
  0x99   : > { %937 = vst [vmem:[#allocation1 + $0x22] ss:$4 sm:$0xff] %v5941_v60  ;;  %v668_v4 = vsel %vm328_vm1, %v419_v22, %v5924_v21  ;;  %v674_v54 = vsel %vm433_vm5, %v673_v37, %v422_v23  ;;  %v326_v37 = vrot.slane %v6034_v40, 1  ;;  %v368_v24 = vrot.slane %v6026_v52, 2 }
  0x9a   : > { %9512 = vst [vmem:[#allocation51_spill] sm:$0xff] %v5971_v59 }
  0x9b   : > { %938 = vst [vmem:[#allocation1 + $0x23] ss:$4 sm:$0xff] %v5953_v61  ;;  %v5986_v60 = vld.sshfl [vmem:[#allocation1] sm:$0xff pattern:$0x73625140]  ;;  %v677_v61 = vsel %vm429_vm3, %v422_v23, %v676_v5  ;;  %v9338_v5 = vrot.slane %v6021_v13, 2 }
  0x9c   : > { %9513 = vst [vmem:[#allocation52_spill] sm:$0xff] %v5981_v19  ;;  %v5988_v1 = vld.sshfl [vmem:[#allocation1 + $0x8] sm:$0xff pattern:$0x73625140]  ;;  %1139 = vmatmul.f32.gmra.mxu0 %v5896_v32 }
  0x9d   : > { %9514 = vst [vmem:[#allocation53_spill] sm:$0xff] %v5997_v55  ;;  %v6001_v63 = vld.sshfl [vmem:[#allocation1 + $0x10] sm:$0xff pattern:$0x73625140]  ;;  %1323 = vmatmul.f32.gmra.mxu2 %v5901_v15  ;;  %1231 = vmatmul.f32.gmra.mxu1 %v5898_v42 }
  0x9e   : > { %9515 = vst [vmem:[#allocation54_spill] sm:$0xff] %v5999_v16 }
  0x9f   : > { %959 = vst [vmem:[#allocation1] ss:$4 sm:$0xff] %v5971_v59  ;;  %v669_v59 = vsel %vm433_vm5, %v6007_v25, %v668_v4  ;;  %v325_v4 = vrot.slane %v6026_v52, 1 }
  0xa0   : > { %9516 = vst [vmem:[#allocation55_spill] sm:$0xff] %v6004_v58 }
  0xa1   : > { %960 = vst [vmem:[#allocation1 + $0x1] ss:$4 sm:$0xff] %v5981_v19  ;;  %v662_v19 = vsel %vm431_vm4, %v5924_v21, %v419_v22 }
  0xa2   : > { %9517 = vst [vmem:[#allocation56_spill] sm:$0xff] %v6009_v29  ;;  %v6031_v28 = vld.sshfl [vmem:[#allocation1 + $0x20] sm:$0xff pattern:$0x73625140]  ;;  %v663_v14 = vsel %vm433_vm5, %v662_v19, %v6007_v25  ;;  %v369_v19 = vrot.slane %v6034_v40, 2 }
  0xa3   : > { %9518 = vst [vmem:[#allocation57_spill] sm:$0xff] %v6014_v17  ;;  %v944_v44 = vld.sshfl [vmem:[#allocation1 + $0x30] sm:$0xff pattern:$0x73625140] }
  0xa4   : > { %961 = vst [vmem:[#allocation1 + $0x2] ss:$4 sm:$0xff] %v5997_v55  ;;  %v6040_v55 = vld.sshfl [vmem:[#allocation1 + $0x28] sm:$0xff pattern:$0x73625140]  ;;  %1142 = vmatmul.f32.gmra.mxu0 %v6031_v28 }
  0xa5   : > { %962 = vst [vmem:[#allocation1 + $0x3] ss:$4 sm:$0xff] %v5999_v16  ;;  %v657_v16 = vsel %vm436_vm6, %v5826_v53, %v5906_v18  ;;  %v665_v53 = vsel %vm436_vm6, %v5924_v21, %v419_v22  ;;  %v671_v18 = vsel %vm427_vm2, %v5927_v57, %v421_v36  ;;  %v751_v57 = vrot.slane %v6018_v3, 2  ;;  %1326 = vmatmul.f32.gmra.mxu2 %v944_v44 }
  0xa6   : > { %9519 = vst [vmem:[#allocation58_spill] sm:$0xff] %v6038_v46  ;;  %v658_v41 = vsel %vm429_vm3, %v5916_v33, %v657_v16  ;;  %v666_v15 = vsel %vm429_vm3, %v6007_v25, %v665_v53  ;;  %v9523_v33 = vrot.slane %v6021_v13, 1  ;;  %v660_v53 = vsel %vm427_vm2, %v5924_v21, %v419_v22  ;;  %1234 = vmatmul.f32.gmra.mxu1 %v6040_v55 }
  0xa7   : > { %949 = vst [vmem:[#allocation1 + $0x20] ss:$4 sm:$0xff] %v6004_v58  ;;  %v6064_v58 = vrot.slane %v669_v59, 6  ;;  %v6080_v59 = vsel %vm429_vm3, %v671_v18, %v422_v23  ;;  %v6093_v23 = vrot.slane %v677_v61, 4  ;;  %v6101_v18 = vrot.slane %v663_v14, 2 }
  0xa8   : > { %950 = vst [vmem:[#allocation1 + $0x21] ss:$4 sm:$0xff] %v6009_v29  ;;  %v6069_v29 = vrot.slane %v674_v54, 2  ;;  %v750_v16 = vsel %vm285_vm0, %v748_v62, %v9523_v33  ;;  %v425_v62 = vrot.slane %v326_v37, 6  ;;  %v6110_v61 = vsel %vm429_vm3, %v660_v53, %v6007_v25 }
  0xa9   : > { %951 = vst [vmem:[#allocation1 + $0x22] ss:$4 sm:$0xff] %v6038_v46  ;;  %v6105_v33 = vrot.slane %v750_v16, 6  ;;  %v753_v32 = vsel %vm328_vm1, %v751_v57, %v9338_v5  ;;  %v370_v14 = vsel %vm328_vm1, %v368_v24, %v369_v19 }
  0xaa   : > { %9520 = vst [vmem:[#allocation59_spill] sm:$0xff] %v6064_v58  ;;  %v692_v25 = vsel %vm431_vm4, %v6034_v40, %v425_v62  ;;  %v424_v57 = vrot.slane %v370_v14, 4  ;;  %v690_v16 = vsel %vm427_vm2, %v6034_v40, %v425_v62 }
  0xab   : > { %952 = vst [vmem:[#allocation1 + $0x23] ss:$4 sm:$0xff] %v6014_v17  ;;  %v327_v17 = vsel %vm285_vm0, %v325_v4, %v326_v37  ;;  %v6103_v4 = vrot.slane %v666_v15, 4  ;;  %v426_v37 = vrot.slane %v369_v19, 4  ;;  %v758_v15 = vsel %vm427_vm2, %v6018_v3, %v6105_v33 }
  0xac   : > { %9521 = vst [vmem:[#allocation60_spill] sm:$0xff] %v6069_v29  ;;  %v6073_v36 = vld.sshfl [vmem:[#allocation1] sm:$0xff pattern:$0x73625140]  ;;  %v423_v21 = vrot.slane %v327_v17, 6  ;;  %v6124_v17 = vrot.slane %v753_v32, 4  ;;  %1145 = vmatmul.f32.gmra.mxu0 %v5986_v60  ;;  %v760_v60 = vsel %vm431_vm4, %v6018_v3, %v6105_v33 }
  0xad   : > { %v968_v46 = vld.sshfl [vmem:[#allocation1 + $0x8] sm:$0xff pattern:$0x73625140]  ;;  %9522 = vst [vmem:[#allocation61_spill] sm:$0xff] %v6080_v59  ;;  %v693_v19 = vsel %vm433_vm5, %v692_v25, %v426_v37  ;;  %v6154_v28 = vsel %vm429_vm3, %v690_v16, %v426_v37  ;;  %1329 = vmatmul.f32.gmra.mxu2 %v6001_v63 }
  0xae   : > { %v6085_v54 = vld.sshfl [vmem:[#allocation1 + $0x10] sm:$0xff pattern:$0x73625140]  ;;  %1243 = vmatmul.f32.vlgmr.msra.gmra.mxu3 %v968_v46  ;;  %9524 = vst [vmem:[#allocation62_spill] sm:$0xff] %v6093_v23  ;;  %v6098_v46 = vrot.slane %v658_v41, 4  ;;  %v681_v24 = vsel %vm431_vm4, %v6026_v52, %v423_v21  ;;  %v684_v44 = vsel %vm436_vm6, %v6026_v52, %v423_v21  ;;  %v6143_v53 = vsel %vm429_vm3, %v758_v15, %v6124_v17 }
  0xaf   : > { %973 = vst [vmem:[#allocation1] ss:$4 sm:$0xff] %v6064_v58  ;;  %v679_v32 = vsel %vm427_vm2, %v6026_v52, %v423_v21  ;;  %v682_v14 = vsel %vm433_vm5, %v681_v24, %v424_v57  ;;  %v687_v5 = vsel %vm328_vm1, %v423_v21, %v6026_v52  ;;  %v685_v25 = vsel %vm429_vm3, %v424_v57, %v684_v44 }
  0xb0   : > { %9525 = vst [vmem:[#allocation63_spill] sm:$0xff] %v6098_v46  ;;  %v6156_v55 = vrot.slane %v693_v19, 2  ;;  %v695_v15 = vsel %vm436_vm6, %v6034_v40, %v425_v62  ;;  %v688_v52 = vsel %vm433_vm5, %v424_v57, %v687_v5  ;;  %v6166_v21 = vsel %vm429_vm3, %v679_v32, %v424_v57  ;;  %1237 = vmatmul.f32.gmra.mxu1 %v5988_v1  ;;  %v6192_v19 = vld [vmem:[%s5063_s24 + $0x8] sm:$0xff] }
  0xb1   : > { %974 = vst [vmem:[#allocation1 + $0x1] ss:$4 sm:$0xff] %v6080_v59  ;;  %v6168_v24 = vrot.slane %v682_v14, 2  ;;  %v6170_v44 = vrot.slane %v685_v25, 4  ;;  %v696_v40 = vsel %vm429_vm3, %v426_v37, %v695_v15  ;;  %v6178_v5 = vrot.slane %v688_v52, 6  ;;  %v6189_v37 = vld [vmem:[%s5063_s24] sm:$0xff] }
  0xb2   : > { %9526 = vst [vmem:[#allocation64_spill] sm:$0xff] %v6103_v4  ;;  %v6115_v42 = vld.sshfl [vmem:[#allocation1 + $0x20] sm:$0xff pattern:$0x73625140]  ;;  %v6182_v57 = vrot.slane %v696_v40, 4  ;;  %v763_v1 = vsel %vm436_vm6, %v6018_v3, %v6105_v33  ;;  %v286_v32 = vrot.slane %v6189_v37, 1  ;;  %v6211_v52 = vsel %vm433_vm5, %v760_v60, %v6124_v17 }
  0xb3   : > { %975 = vst [vmem:[#allocation1 + $0x2] ss:$4 sm:$0xff] %v6069_v29  ;;  %v6117_v22 = vld.sshfl [vmem:[#allocation1 + $0x28] sm:$0xff pattern:$0x73625140]  ;;  %v9534_v25 = vrot.slane %v6021_v13, 1 }
  0xb4   : > { %v958_v41 = vld.sshfl [vmem:[#allocation1 + $0x30] sm:$0xff pattern:$0x73625140]  ;;  %976 = vst [vmem:[#allocation1 + $0x3] ss:$4 sm:$0xff] %v6093_v23  ;;  %v9536_v40 = vrot.slane %v6021_v13, 2  ;;  %1148 = vmatmul.f32.gmra.mxu0 %v6115_v42 }
  0xb5   : > { %963 = vst [vmem:[#allocation1 + $0x20] ss:$4 sm:$0xff] %v6098_v46  ;;  %1332 = vmatmul.f32.gmra.mxu2 %v958_v41  ;;  %v756_v15 = vrot.slane %v9534_v25, 6  ;;  %v766_v41 = vsel %vm328_vm1, %v6105_v33, %v6018_v3  ;;  %v713_v25 = vld [vmem:[%s9221_s1 + $0x78] sm:$0xff]  ;;  %v712_v3 = vld [vmem:[%s9221_s1 + $0x70] sm:$0xff]  ;;  %v711_v33 = vld [vmem:[%s9221_s1 + $0x68] sm:$0xff] }
  0xb6   : > { %964 = vst [vmem:[#allocation1 + $0x21] ss:$4 sm:$0xff] %v6110_v61  ;;  %v6232_v60 = vsel %vm433_vm5, %v6124_v17, %v766_v41  ;;  %1612 = vmatpush.msra.mxu3 %v713_v25 }
  0xb7   : > { %965 = vst [vmem:[#allocation1 + $0x22] ss:$4 sm:$0xff] %v6101_v18  ;;  %v771_v14 = vsel %vm431_vm4, %v6021_v13, %v756_v15  ;;  %v769_v41 = vsel %vm427_vm2, %v6021_v13, %v756_v15 }
  0xb8   : > { %966 = vst [vmem:[#allocation1 + $0x23] ss:$4 sm:$0xff] %v6103_v4  ;;  %1240 = vmatmul.f32.gmra.mxu1 %v6117_v22  ;;  %1613 = vmatpush.msra.mxu3 %v712_v3 }
  0xb9   : > { %9527 = vst [vmem:[#allocation65_spill] sm:$0xff] %v6143_v53 }
  0xba   : > { %9528 = vst [vmem:[#allocation66_spill] sm:$0xff] %v6154_v28  ;;  %1614 = vmatpush.msra.mxu3 %v711_v33  ;;  %v708_v33 = vld [vmem:[%s9221_s1 + $0x50] sm:$0xff] }
  0xbb   : > { %v6150_v23 = vld.sshfl [vmem:[#allocation1] sm:$0xff pattern:$0x73625140]  ;;  %9529 = vst [vmem:[#allocation67_spill] sm:$0xff] %v6156_v55 }
  0xbc   : > { %v982_v29 = vld.sshfl [vmem:[#allocation1 + $0x8] sm:$0xff pattern:$0x73625140]  ;;  %v6161_v59 = vld.sshfl [vmem:[#allocation1 + $0x10] sm:$0xff pattern:$0x73625140]  ;;  %1151 = vmatmul.f32.gmra.mxu0 %v6073_v36 }
  0xbd   : > { %990 = vst [vmem:[#allocation1 + $0x3] ss:$4 sm:$0xff] %v6143_v53  ;;  %v6217_v53 = vsel %vm429_vm3, %v6124_v17, %v763_v1  ;;  %v774_v1 = vsel %vm436_vm6, %v6021_v13, %v756_v15  ;;  %1335 = vmatmul.f32.gmra.mxu2 %v6085_v54  ;;  %v710_v17 = vld [vmem:[%s9221_s1 + $0x60] sm:$0xff]  ;;  %v9542_v13 = vrot.slane %v6192_v19, 2 }
  0xbe   : > { %9530 = vst [vmem:[#allocation68_spill] sm:$0xff] %v6166_v21  ;;  %1615 = vmatpush.msra.mxu3 %v710_v17  ;;  %v707_v17 = vld [vmem:[%s9221_s1 + $0x48] sm:$0xff] }
  0xbf   : > { %9531 = vst [vmem:[#allocation69_spill] sm:$0xff] %v6170_v44  ;;  %v6174_v63 = vld.sshfl [vmem:[#allocation1 + $0x20] sm:$0xff pattern:$0x73625140] }
  0xc0   : > { %987 = vst [vmem:[#allocation1] ss:$4 sm:$0xff] %v6154_v28  ;;  %v971_v62 = vld.sshfl [vmem:[#allocation1 + $0x28] sm:$0xff pattern:$0x73625140] }
  0xc1   : > { %v6176_v16 = vld.sshfl [vmem:[#allocation1 + $0x30] sm:$0xff pattern:$0x73625140]  ;;  %1246 = vmatmul.f32.gmra.mxu3 %v971_v62  ;;  %9532 = vst [vmem:[#allocation70_spill] sm:$0xff] %v6178_v5  ;;  %v757_v62 = vrot.slane %v9536_v40, 4  ;;  %v9539_v40 = vrot.slane %v6192_v19, 1 }
  0xc2   : > { %988 = vst [vmem:[#allocation1 + $0x1] ss:$4 sm:$0xff] %v6156_v55 }
  0xc3   : > { %9533 = vst [vmem:[#allocation71_spill] sm:$0xff] %v6182_v57  ;;  %v6250_v25 = vsel %vm433_vm5, %v771_v14, %v757_v62  ;;  %v6268_v54 = vsel %vm429_vm3, %v769_v41, %v757_v62  ;;  %v6286_v41 = vpop.f32.mrf.mxu0 }
  0xc4   : > { %977 = vst [vmem:[#allocation1 + $0x20] ss:$4 sm:$0xff] %v6166_v21  ;;  %1154 = vmatmul.f32.gmra.mxu0 %v6174_v63  ;;  %v703_v63 = vld [vmem:[%s9221_s1 + $0x28] sm:$0xff] }
  0xc5   : > { %978 = vst [vmem:[#allocation1 + $0x21] ss:$4 sm:$0xff] %v6168_v24  ;;  %1338 = vmatmul.f32.gmra.mxu2 %v6176_v16 }
  0xc6   : > { %979 = vst [vmem:[#allocation1 + $0x22] ss:$4 sm:$0xff] %v6170_v44  ;;  %v9545_v44 = vrot.slane %v6217_v53, 4 }
  0xc7   : > { %980 = vst [vmem:[#allocation1 + $0x23] ss:$4 sm:$0xff] %v6178_v5 }
  0xc8   : > { %989 = vst [vmem:[#allocation1 + $0x2] ss:$4 sm:$0xff] %v6182_v57  ;;  %v288_v57 = vsel %vm285_vm0, %v286_v32, %v9539_v40  ;;  %v6257_v40 = vsel %vm429_vm3, %v757_v62, %v774_v1  ;;  %v9356_v32 = vrot.slane %v6250_v25, 2  ;;  %v9544_v1 = vrot.slane %v6211_v52, 2  ;;  %v709_v62 = vld [vmem:[%s9221_s1 + $0x58] sm:$0xff] }
  0xc9   : > { %9535 = vst [vmem:[#allocation72_spill] sm:$0xff] %v6211_v52  ;;  %1249 = vmatmul.f32.gmra.mxu3 %v982_v29  ;;  %v329_v29 = vrot.slane %v6189_v37, 2  ;;  %v371_v15 = vrot.slane %v288_v57, 6  ;;  %v9359_v5 = vrot.slane %v6257_v40, 4  ;;  %v9576_v52 = vld [vmem:[#allocation17_spill] sm:$0xff] }
  0xca   : > { %9537 = vst [vmem:[#allocation73_spill] sm:$0xff] %v6217_v53  ;;  %1616 = vmatpush.msra.mxu3 %v709_v62 }
  0xcb   : > { %9538 = vst [vmem:[#allocation74_spill] sm:$0xff] %v6232_v60  ;;  %v331_v14 = vsel %vm328_vm1, %v329_v29, %v9542_v13  ;;  %v9546_v29 = vrot.slane %v6232_v60, 6  ;;  %v440_v36 = vsel %vm328_vm1, %v371_v15, %v6189_v37  ;;  %v428_v62 = vsel %vm427_vm2, %v6189_v37, %v371_v15  ;;  %v744_v60 = vld [vmem:[%s9221_s1 + $0x170] sm:$0xff] }
  0xcc   : > { %9540 = vst [vmem:[#allocation75_spill] sm:$0xff] %v6250_v25  ;;  %v372_v57 = vrot.slane %v331_v14, 4  ;;  %1617 = vmatpush.msra.mxu3 %v708_v33  ;;  %1157 = vmatmul.f32.gmra.mxu0 %v6150_v23 }
  0xcd   : > { %9541 = vst [vmem:[#allocation76_spill] sm:$0xff] %v6257_v40  ;;  %1341 = vmatmul.f32.gmra.mxu2 %v6161_v59  ;;  %v700_v59 = vld [vmem:[%s9221_s1 + $0x10] sm:$0xff] }
  0xce   : > { %v6244_v55 = vld.sshfl [vmem:[#allocation1 + $0x20] sm:$0xff pattern:$0x73625140]  ;;  %v6253_v22 = vld.sshfl [vmem:[#allocation1 + $0x30] sm:$0xff pattern:$0x73625140]  ;;  %1618 = vmatpush.msra.mxu3 %v707_v17 }
  0xcf   : > { %v985_v42 = vld.sshfl [vmem:[#allocation1 + $0x28] sm:$0xff pattern:$0x73625140]  ;;  %v6265_v3 = vld.sshfl [vmem:[#allocation1] sm:$0xff pattern:$0x73625140] }
  0xd0   : > { %9543 = vst [vmem:[#allocation77_spill] sm:$0xff] %v6268_v54  ;;  %v6273_v28 = vld.sshfl [vmem:[#allocation1 + $0x10] sm:$0xff pattern:$0x73625140] }
  0xd1   : > { %991 = vst [vmem:[#allocation1 + $0x20] ss:$4 sm:$0xff] %v9544_v1  ;;  %1252 = vmatmul.f32.gmra.mxu3 %v985_v42  ;;  %v996_v13 = vld.sshfl [vmem:[#allocation1 + $0x8] sm:$0xff pattern:$0x73625140]  ;;  %v437_v42 = vsel %vm436_vm6, %v6189_v37, %v371_v15 }
  0xd2   : > { %992 = vst [vmem:[#allocation1 + $0x21] ss:$4 sm:$0xff] %v9545_v44  ;;  %v432_v44 = vsel %vm431_vm4, %v6189_v37, %v371_v15  ;;  %v438_v1 = vsel %vm429_vm3, %v372_v57, %v437_v42  ;;  %v430_v42 = vsel %vm429_vm3, %v428_v62, %v372_v57  ;;  %v705_v37 = vld [vmem:[%s9221_s1 + $0x38] sm:$0xff]  ;;  %v704_v15 = vld [vmem:[%s9221_s1 + $0x30] sm:$0xff] }
  0xd3   : > { %993 = vst [vmem:[#allocation1 + $0x22] ss:$4 sm:$0xff] %v9546_v29  ;;  %v434_v14 = vsel %vm433_vm5, %v432_v44, %v372_v57  ;;  %v706_v29 = vld [vmem:[%s9221_s1 + $0x40] sm:$0xff]  ;;  %v439_v40 = vrot.slane %v438_v1, 4  ;;  %v6314_v44 = vpop.f32.mrf.mxu0 }
  0xd4   : > { %994 = vst [vmem:[#allocation1 + $0x23] ss:$4 sm:$0xff] %v6268_v54  ;;  %v435_v25 = vrot.slane %v434_v14, 2  ;;  %1619 = vmatpush.msra.mxu3 %v706_v29  ;;  %v699_v29 = vld [vmem:[%s9221_s1 + $0x8] sm:$0xff]  ;;  %1160 = vmatmul.f32.gmra.mxu0 %v6244_v55  ;;  %v745_v54 = vld [vmem:[%s9221_s1 + $0x178] sm:$0xff] }
  0xd5   : > { %1001 = vst [vmem:[#allocation1] ss:$4 sm:$0xff] %v9356_v32  ;;  %v441_v32 = vsel %vm433_vm5, %v372_v57, %v440_v36  ;;  %1344 = vmatmul.f32.gmra.mxu2 %v6253_v22  ;;  %1796 = vmatpush.msrb.mxu1 %v745_v54 }
  0xd6   : > { %1002 = vst [vmem:[#allocation1 + $0x1] ss:$4 sm:$0xff] %v9359_v5  ;;  %v442_v5 = vrot.slane %v441_v32, 6  ;;  %1620 = vmatpush.msra.mxu3 %v705_v37  ;;  %v702_v32 = vld [vmem:[%s9221_s1 + $0x20] sm:$0xff] }
  0xd7   : > { %9547 = vst [vmem:[#allocation78_spill] sm:$0xff] %v6314_v44  ;;  %1797 = vmatpush.msrb.mxu1 %v744_v60  ;;  %v9577_v44 = vld [vmem:[#allocation18_spill] sm:$0xff] }
  0xd8   : > { %1621 = vmatpush.msra.mxu3 %v704_v15  ;;  %v742_v60 = vld [vmem:[%s9221_s1 + $0x160] sm:$0xff] }
  0xd9   : > { %1255 = vmatmul.f32.gmra.mxu3 %v996_v13 }
  0xda   : > { %1622 = vmatpush.msra.mxu3 %v703_v63 }
  0xdb   : > { %v6312_v33 = vld.sshfl [vmem:[#allocation1 + $0x20] sm:$0xff pattern:$0x73625140]  ;;  %v999_v16 = vld.sshfl [vmem:[#allocation1 + $0x28] sm:$0xff pattern:$0x73625140]  ;;  %v6341_v57 = vpop.f32.mrf.mxu0 }
  0xdc   : > { %v6318_v17 = vld.sshfl [vmem:[#allocation1 + $0x30] sm:$0xff pattern:$0x73625140]  ;;  %9548 = vst [vmem:[#allocation79_spill] sm:$0xff] %v6341_v57  ;;  %1623 = vmatpush.msra.mxu3 %v702_v32  ;;  %1163 = vmatmul.f32.gmra.mxu0 %v6265_v3  ;;  %v9557_v3 = vrot.slane %v5230_v11, 4 }
  0xdd   : > { %v6326_v13 = vld.sshfl [vmem:[#allocation1] sm:$0xff pattern:$0x73625140]  ;;  %v1004_v36 = vld.sshfl [vmem:[#allocation1 + $0x8] sm:$0xff pattern:$0x73625140] }
  0xde   : > { %v6328_v14 = vld.sshfl [vmem:[#allocation1 + $0x10] sm:$0xff pattern:$0x73625140]  ;;  %1371 = vst [vmem:[#allocation1 + $0x23] ss:$4 sm:$0xff] %v5149_v48  ;;  %v701_v48 = vld [vmem:[%s9221_s1 + $0x18] sm:$0xff] }
  0xdf   : > { %1357 = vst [vmem:[#allocation1] ss:$4 sm:$0xff] %v430_v42  ;;  %1624 = vmatpush.msra.mxu3 %v701_v48  ;;  %v9551_v48 = vrot.slane %v5152_v49, 2 }
  0xe0   : > { %1359 = vst [vmem:[#allocation1 + $0x1] ss:$4 sm:$0xff] %v435_v25  ;;  %v9549_v25 = vrot.slane %v6192_v19, 1 }
  0xe1   : > { %1361 = vst [vmem:[#allocation1 + $0x2] ss:$4 sm:$0xff] %v439_v40  ;;  %1258 = vmatmul.f32.gmra.mxu3 %v999_v16  ;;  %v698_v16 = vld [vmem:[%s9221_s1] sm:$0xff] }
  0xe2   : > { %1363 = vst [vmem:[#allocation1 + $0x3] ss:$4 sm:$0xff] %v442_v5  ;;  %v373_v40 = vrot.slane %v9549_v25, 6  ;;  %v9550_v5 = vrot.slane %v6192_v19, 2  ;;  %1625 = vmatpush.msra.mxu3 %v700_v59  ;;  %v9553_v25 = vrot.slane %v5155_v50, 4 }
  0xe3   : > { %v6372_v59 = vpop.f32.mrf.mxu0 }
  0xe4   : > { %v374_v1 = vrot.slane %v9550_v5, 4  ;;  %v445_v23 = vsel %vm431_vm4, %v6192_v19, %v373_v40  ;;  %v448_v62 = vsel %vm436_vm6, %v6192_v19, %v373_v40  ;;  %v443_v22 = vsel %vm427_vm2, %v6192_v19, %v373_v40  ;;  %1626 = vmatpush.msra.mxu3 %v699_v29  ;;  %9552 = vst [vmem:[#allocation80_spill] sm:$0xff] %v6372_v59  ;;  %v9572_v59 = vld [vmem:[#allocation15_spill] sm:$0xff] }
  0xe5   : > { %v9554_v5 = vrot.slane %v5171_v56, 6  ;;  %1166 = vmatmul.f32.gmra.mxu0 %v6312_v33 }
  0xe6   : > { %v446_v37 = vsel %vm433_vm5, %v445_v23, %v374_v1  ;;  %v449_v32 = vsel %vm429_vm3, %v374_v1, %v448_v62  ;;  %1627 = vmatpush.msra.mxu3 %v698_v16  ;;  %v444_v19 = vsel %vm429_vm3, %v443_v22, %v374_v1 }
  0xe7   : > { %v447_v40 = vrot.slane %v446_v37, 2  ;;  %v450_v29 = vrot.slane %v449_v32, 4  ;;  %1365 = vst [vmem:[#allocation1 + $0x20] ss:$4 sm:$0xff] %v444_v19 }
  0xe9   : > { %v6362_v42 = vld.sshfl [vmem:[#allocation1 + $0x8] sm:$0xff pattern:$0x73625140]  ;;  %v1372_v15 = vld.sshfl [vmem:[#allocation1] sm:$0xff pattern:$0x73625140]  ;;  %1261 = vmatmul.f32.gmra.mxu3 %v1004_v36 }
  0xea   : > { %v6367_v63 = vld.sshfl [vmem:[#allocation1 + $0x10] sm:$0xff pattern:$0x73625140]  ;;  %1367 = vst [vmem:[#allocation1 + $0x21] ss:$4 sm:$0xff] %v447_v40 }
  0xeb   : > { %1378 = vst [vmem:[#allocation1] ss:$4 sm:$0xff] %v9551_v48  ;;  %v6382_v49 = vpop.f32.mrf.mxu0  ;;  %v9563_v40 = vld [vmem:[#allocation8_spill] sm:$0xff] }
  0xec   : > { %1379 = vst [vmem:[#allocation1 + $0x1] ss:$4 sm:$0xff] %v9553_v25 }
  0xed   : > { %1380 = vst [vmem:[#allocation1 + $0x2] ss:$4 sm:$0xff] %v9554_v5  ;;  %1169 = vmatmul.f32.gmra.mxu0 %v6326_v13  ;;  %v9564_v5 = vld [vmem:[#allocation9_spill] sm:$0xff] }
  0xee   : > { %1381 = vst [vmem:[#allocation1 + $0x3] ss:$4 sm:$0xff] %v5217_v6 }
  0xef   : > { %1369 = vst [vmem:[#allocation1 + $0x22] ss:$4 sm:$0xff] %v450_v29  ;;  %v9565_v29 = vld [vmem:[#allocation10_spill] sm:$0xff] }
  0xf0   : > { %9555 = vst [vmem:[#allocation81_spill] sm:$0xff] %v6382_v49  ;;  %v9571_v49 = vld [vmem:[#allocation14_spill] sm:$0xff] }
  0xf1   : > { %1347 = vmatmul.f32.vlgmr.msrb.gmra.mxu3 %v6273_v28  ;;  %v9556_v28 = vrot.slane %v5220_v7, 2 }
  0xf3   : > { %v6400_v23 = vpop.f32.mrf.mxu0 }
  0xf4   : > { %9558 = vst [vmem:[#allocation82_spill] sm:$0xff] %v6400_v23  ;;  %v9570_v23 = vld [vmem:[#allocation13_spill] sm:$0xff] }
  0xf5   : > { %v6385_v50 = vld.sshfl [vmem:[#allocation1 + $0x8] sm:$0xff pattern:$0x73625140]  ;;  %v1386_v55 = vld.sshfl [vmem:[#allocation1] sm:$0xff pattern:$0x73625140]  ;;  %1281 = vmatmul.f32.vlgmr.msrb.gmra.mxu0 %v5334_v0 }
  0xf6   : > { %v6387_v36 = vld.sshfl [vmem:[#allocation1 + $0x10] sm:$0xff pattern:$0x73625140]  ;;  %v1375_v56 = vld.sshfl [vmem:[#allocation1 + $0x20] sm:$0xff pattern:$0x73625140] }
  0xf7   : > { %1392 = vst [vmem:[#allocation1] ss:$4 sm:$0xff] %v5316_v47  ;;  %v6390_v1 = vld.sshfl [vmem:[#allocation1 + $0x28] sm:$0xff pattern:$0x73625140] }
  0xf8   : > { %v6392_v6 = vld.sshfl [vmem:[#allocation1 + $0x30] sm:$0xff pattern:$0x73625140]  ;;  %1393 = vst [vmem:[#allocation1 + $0x1] ss:$4 sm:$0xff] %v5342_v8  ;;  %v9562_v0 = vld [vmem:[#allocation7_spill] sm:$0xff] }
  0xf9   : > { %1382 = vst [vmem:[#allocation1 + $0x20] ss:$4 sm:$0xff] %v9556_v28  ;;  %1350 = vmatmul.f32.gmra.mxu3 %v6318_v17 }
  0xfa   : > { %1383 = vst [vmem:[#allocation1 + $0x21] ss:$4 sm:$0xff] %v9557_v3 }
  0xfb   : > { %1384 = vst [vmem:[#allocation1 + $0x22] ss:$4 sm:$0xff] %v5250_v20  ;;  %v6408_v7 = vpop.f32.mrf.mxu0 }
  0xfc   : > { %1385 = vst [vmem:[#allocation1 + $0x23] ss:$4 sm:$0xff] %v5288_v35 }
  0xfd   : > { %1394 = vst [vmem:[#allocation1 + $0x2] ss:$4 sm:$0xff] %v5345_v12  ;;  %1284 = vmatmul.f32.gmra.mxu0 %v5370_v34  ;;  %v9567_v34 = vld [vmem:[#allocation3_spill] sm:$0xff] }
  0xfe   : > { %1395 = vst [vmem:[#allocation1 + $0x3] ss:$4 sm:$0xff] %v5363_v26 }
  0xff   : > { %9559 = vst [vmem:[#allocation83_spill] sm:$0xff] %v6408_v7  ;;  %v9569_v7 = vld [vmem:[#allocation12_spill] sm:$0xff] }
 0x101   : > { %1353 = vmatmul.f32.gmra.mxu3 %v6328_v14 }
 0x103   : > { %v6411_v11 = vld.sshfl [vmem:[#allocation1 + $0x28] sm:$0xff pattern:$0x73625140]  ;;  %v1389_v17 = vld.sshfl [vmem:[#allocation1 + $0x20] sm:$0xff pattern:$0x73625140]  ;;  %v6425_v13 = vpop.f32.mrf.mxu0 }
 0x104   : > { %v6413_v62 = vld.sshfl [vmem:[#allocation1 + $0x30] sm:$0xff pattern:$0x73625140]  ;;  %9560 = vst [vmem:[#allocation84_spill] sm:$0xff] %v6425_v13 }
 0x105   : > { %1396 = vst [vmem:[#allocation1 + $0x20] ss:$4 sm:$0xff] %v5365_v27  ;;  %v6417_v33 = vld.sshfl [vmem:[#allocation1 + $0x8] sm:$0xff pattern:$0x73625140]  ;;  %1287 = vmatmul.f32.gmra.mxu0 %v9567_v34  ;;  %v728_v34 = vld [vmem:[%s9221_s1 + $0xf0] sm:$0xff] }
 0x106   : > { %1397 = vst [vmem:[#allocation1 + $0x21] ss:$4 sm:$0xff] %v5390_v45  ;;  %v6420_v16 = vld.sshfl [vmem:[#allocation1 + $0x10] sm:$0xff pattern:$0x73625140] }
 0x107   : > { %1398 = vst [vmem:[#allocation1 + $0x22] ss:$4 sm:$0xff] %v5392_v51  ;;  %v1400_v14 = vld.sshfl [vmem:[#allocation1] sm:$0xff pattern:$0x73625140] }
 0x108   : > { %1399 = vst [vmem:[#allocation1 + $0x23] ss:$4 sm:$0xff] %v5428_v9 }
 0x109   : > { %1406 = vst [vmem:[#allocation1] ss:$4 sm:$0xff] %v5434_v31  ;;  %1628 = vmatmul.f32.vlgmr.msra.gmra.mxu3 %v1372_v15 }
 0x10a   : > { %1407 = vst [vmem:[#allocation1 + $0x1] ss:$4 sm:$0xff] %v5454_v43 }
 0x10b   : > { %1408 = vst [vmem:[#allocation1 + $0x2] ss:$4 sm:$0xff] %v5457_v2  ;;  %v6438_v15 = vpop.f32.mrf.mxu0 }
 0x10c   : > { %1409 = vst [vmem:[#allocation1 + $0x3] ss:$4 sm:$0xff] %v5468_v30 }
 0x10d   : > { %9561 = vst [vmem:[#allocation85_spill] sm:$0xff] %v6438_v15 }
 0x10f   : > { %v6430_v22 = vld.sshfl [vmem:[#allocation1 + $0x28] sm:$0xff pattern:$0x73625140]  ;;  %v6432_v37 = vld.sshfl [vmem:[#allocation1 + $0x20] sm:$0xff pattern:$0x73625140] }
 0x110   : > { %v6434_v32 = vld.sshfl [vmem:[#allocation1 + $0x30] sm:$0xff pattern:$0x73625140] }
 0x111   : > { %1410 = vst [vmem:[#allocation1 + $0x20] ss:$4 sm:$0xff] %v5479_v38  ;;  %1631 = vmatmul.f32.gmra.mxu3 %v1375_v56  ;;  %v9566_v56 = vld [vmem:[#allocation11_spill] sm:$0xff] }
 0x112   : > { %1411 = vst [vmem:[#allocation1 + $0x21] ss:$4 sm:$0xff] %v5481_v39  ;;  %v9632_v39 = vld [vmem:[#allocation52_spill] sm:$0xff] }
 0x113   : > { %1412 = vst [vmem:[#allocation1 + $0x22] ss:$4 sm:$0xff] %v5486_v10  ;;  %v6443_v48 = vld.sshfl [vmem:[#allocation1 + $0x8] sm:$0xff pattern:$0x73625140]  ;;  %v6454_v28 = vpop.f32.mrf.mxu0 }
 0x114   : > { %1413 = vst [vmem:[#allocation1 + $0x23] ss:$4 sm:$0xff] %v9562_v0  ;;  %v6445_v25 = vld.sshfl [vmem:[#allocation1] sm:$0xff pattern:$0x73625140] }
 0x115   : > { %v6447_v19 = vld.sshfl [vmem:[#allocation1 + $0x10] sm:$0xff pattern:$0x73625140]  ;;  %9568 = vst [vmem:[#allocation3_spill] sm:$0xff] %v6454_v28 }
 0x116   : > { %1420 = vst [vmem:[#allocation1] ss:$4 sm:$0xff] %v9563_v40  ;;  %v9573_v28 = vld [vmem:[#allocation4_spill] sm:$0xff]  ;;  %v9594_v40 = vld [vmem:[#allocation30_spill] sm:$0xff] }
 0x117   : > { %1421 = vst [vmem:[#allocation1 + $0x1] ss:$4 sm:$0xff] %v9564_v5  ;;  %1290 = vmatmul.f32.gmra.mxu0 %v9573_v28  ;;  %v726_v28 = vld [vmem:[%s9221_s1 + $0xe0] sm:$0xff]  ;;  %v4813_v5 = vld [vmem:[%s9221_s1 + $0x478] sm:$0xff] }
 0x118   : > { %1422 = vst [vmem:[#allocation1 + $0x2] ss:$4 sm:$0xff] %v9565_v29  ;;  %v9593_v29 = vld [vmem:[#allocation34_spill] sm:$0xff] }
 0x119   : > { %1423 = vst [vmem:[#allocation1 + $0x3] ss:$4 sm:$0xff] %v9566_v56  ;;  %1634 = vmatmul.f32.gmra.mxu3 %v1386_v55  ;;  %v729_v55 = vld [vmem:[%s9221_s1 + $0xf8] sm:$0xff] }
 0x11a   : > { %1704 = vmatpush.msra.mxu0 %v729_v55  ;;  %v743_v55 = vld [vmem:[%s9221_s1 + $0x168] sm:$0xff]  ;;  %v717_v56 = vld [vmem:[%s9221_s1 + $0x98] sm:$0xff] }
 0x11b   : > { %v6456_v3 = vld.sshfl [vmem:[#allocation1 + $0x28] sm:$0xff pattern:$0x73625140]  ;;  %v6458_v15 = vld.sshfl [vmem:[#allocation1 + $0x20] sm:$0xff pattern:$0x73625140]  ;;  %v6479_v57 = vpop.f32.mrf.mxu0  ;;  %1798 = vmatpush.msrb.mxu1 %v743_v55 }
 0x11c   : > { %v6460_v13 = vld.sshfl [vmem:[#allocation1 + $0x30] sm:$0xff pattern:$0x73625140]  ;;  %1705 = vmatpush.msra.mxu0 %v728_v34  ;;  %9574 = vst [vmem:[#allocation4_spill] sm:$0xff] %v6479_v57 }
 0x11d   : > { %1424 = vst [vmem:[#allocation1 + $0x20] ss:$4 sm:$0xff] %v9569_v7  ;;  %v9575_v57 = vld [vmem:[#allocation16_spill] sm:$0xff]  ;;  %1799 = vmatpush.msrb.mxu1 %v742_v60  ;;  %v739_v60 = vld [vmem:[%s9221_s1 + $0x148] sm:$0xff]  ;;  %v9587_v7 = vld [vmem:[#allocation26_spill] sm:$0xff] }
 0x11e   : > { %1425 = vst [vmem:[#allocation1 + $0x21] ss:$4 sm:$0xff] %v9570_v23  ;;  %v721_v23 = vld [vmem:[%s9221_s1 + $0xb8] sm:$0xff] }
 0x11f   : > { %1426 = vst [vmem:[#allocation1 + $0x22] ss:$4 sm:$0xff] %v9571_v49  ;;  %v9582_v49 = vld [vmem:[#allocation22_spill] sm:$0xff] }
 0x120   : > { %1427 = vst [vmem:[#allocation1 + $0x23] ss:$4 sm:$0xff] %v9572_v59  ;;  %v6490_v34 = vld.sshfl [vmem:[#allocation1] sm:$0xff pattern:$0x73625140]  ;;  %v725_v59 = vld [vmem:[%s9221_s1 + $0xd8] sm:$0xff] }
 0x121   : > { %1637 = vmatmul.f32.gmra.mxu3 %v1389_v17  ;;  %v727_v17 = vld [vmem:[%s9221_s1 + $0xe8] sm:$0xff]  ;;  %v6494_v53 = vld.sshfl [vmem:[#allocation1 + $0x10] sm:$0xff pattern:$0x73625140] }
 0x122   : > { %1706 = vmatpush.msra.mxu0 %v727_v17  ;;  %v6492_v54 = vld.sshfl [vmem:[#allocation1 + $0x8] sm:$0xff pattern:$0x73625140]  ;;  %v724_v17 = vld [vmem:[%s9221_s1 + $0xd0] sm:$0xff] }
 0x123   : > { %1434 = vst [vmem:[#allocation1] ss:$4 sm:$0xff] %v9575_v57  ;;  %v9578_v57 = vld [vmem:[#allocation19_spill] sm:$0xff]  ;;  %v6515_v55 = vpop.f32.mrf.mxu0 }
 0x124   : > { %1707 = vmatpush.msra.mxu0 %v726_v28  ;;  %1435 = vst [vmem:[#allocation1 + $0x1] ss:$4 sm:$0xff] %v9576_v52  ;;  %v723_v28 = vld [vmem:[%s9221_s1 + $0xc8] sm:$0xff]  ;;  %v9581_v52 = vld [vmem:[#allocation21_spill] sm:$0xff] }
 0x125   : > { %1436 = vst [vmem:[#allocation1 + $0x2] ss:$4 sm:$0xff] %v9577_v44  ;;  %v740_v44 = vld [vmem:[%s9221_s1 + $0x150] sm:$0xff] }
 0x126   : > { %1437 = vst [vmem:[#allocation1 + $0x3] ss:$4 sm:$0xff] %v9578_v57  ;;  %1708 = vmatpush.msra.mxu0 %v725_v59  ;;  %v722_v59 = vld [vmem:[%s9221_s1 + $0xc0] sm:$0xff] }
 0x127   : > { %9579 = vst [vmem:[#allocation86_spill] sm:$0xff] %v6515_v55  ;;  %v6530_v57 = vld.sshfl [vmem:[#allocation1 + $0x30] sm:$0xff pattern:$0x73625140] }
 0x128   : > { %1709 = vmatpush.msra.mxu0 %v724_v17  ;;  %v6526_v17 = vld.sshfl [vmem:[#allocation1 + $0x20] sm:$0xff pattern:$0x73625140]  ;;  %v9580_v55 = vld [vmem:[#allocation20_spill] sm:$0xff] }
 0x129   : > { %1640 = vmatmul.f32.gmra.mxu3 %v1400_v14  ;;  %v741_v14 = vld [vmem:[%s9221_s1 + $0x158] sm:$0xff] }
 0x12a   : > { %1800 = vmatpush.msrb.mxu1 %v741_v14  ;;  %1710 = vmatpush.msra.mxu0 %v723_v28  ;;  %v6528_v14 = vld.sshfl [vmem:[#allocation1 + $0x28] sm:$0xff pattern:$0x73625140]  ;;  %v720_v28 = vld [vmem:[%s9221_s1 + $0xb0] sm:$0xff] }
 0x12b   : > { %1438 = vst [vmem:[#allocation1 + $0x20] ss:$4 sm:$0xff] %v9580_v55  ;;  %v9586_v55 = vld [vmem:[#allocation25_spill] sm:$0xff] }
 0x12c   : > { %1801 = vmatpush.msrb.mxu1 %v740_v44  ;;  %1711 = vmatpush.msra.mxu0 %v722_v59  ;;  %1439 = vst [vmem:[#allocation1 + $0x21] ss:$4 sm:$0xff] %v9581_v52  ;;  %v738_v44 = vld [vmem:[%s9221_s1 + $0x140] sm:$0xff]  ;;  %v9583_v59 = vld [vmem:[#allocation23_spill] sm:$0xff]  ;;  %v736_v52 = vld [vmem:[%s9221_s1 + $0x130] sm:$0xff] }
 0x12d   : > { %1440 = vst [vmem:[#allocation1 + $0x22] ss:$4 sm:$0xff] %v9582_v49  ;;  %v6552_v49 = vpop.f32.mrf.mxu0 }
 0x12e   : > { %1802 = vmatpush.msrb.mxu1 %v739_v60  ;;  %1441 = vst [vmem:[#allocation1 + $0x23] ss:$4 sm:$0xff] %v9583_v59  ;;  %1712 = vmatpush.msra.mxu0 %v721_v23  ;;  %v719_v60 = vld [vmem:[%s9221_s1 + $0xa8] sm:$0xff]  ;;  %v718_v23 = vld [vmem:[%s9221_s1 + $0xa0] sm:$0xff] }
 0x12f   : > { %9584 = vst [vmem:[#allocation87_spill] sm:$0xff] %v6552_v49  ;;  %v6567_v59 = vld.sshfl [vmem:[#allocation1 + $0x10] sm:$0xff pattern:$0x73625140] }
 0x130   : > { %1803 = vmatpush.msrb.mxu1 %v738_v44  ;;  %1713 = vmatpush.msra.mxu0 %v720_v28  ;;  %v735_v44 = vld [vmem:[%s9221_s1 + $0x128] sm:$0xff]  ;;  %v6563_v28 = vld.sshfl [vmem:[#allocation1] sm:$0xff pattern:$0x73625140]  ;;  %v9585_v49 = vld [vmem:[#allocation24_spill] sm:$0xff] }
 0x131   : > { %1643 = vmatmul.f32.gmra.mxu3 %v6432_v37  ;;  %v737_v37 = vld [vmem:[%s9221_s1 + $0x138] sm:$0xff] }
 0x132   : > { %1804 = vmatpush.msrb.mxu1 %v737_v37  ;;  %1714 = vmatpush.msra.mxu0 %v719_v60  ;;  %v6565_v37 = vld.sshfl [vmem:[#allocation1 + $0x8] sm:$0xff pattern:$0x73625140]  ;;  %v734_v60 = vld [vmem:[%s9221_s1 + $0x120] sm:$0xff] }
 0x133   : > { %1448 = vst [vmem:[#allocation1] ss:$4 sm:$0xff] %v9585_v49 }
 0x134   : > { %1805 = vmatpush.msrb.mxu1 %v736_v52  ;;  %1715 = vmatpush.msra.mxu0 %v718_v23  ;;  %1449 = vst [vmem:[#allocation1 + $0x1] ss:$4 sm:$0xff] %v9586_v55  ;;  %v4797_v52 = vld [vmem:[%s9221_s1 + $0x3f8] sm:$0xff]  ;;  %v6582_v23 = vpop.f32.mrf.mxu3  ;;  %v715_v55 = vld [vmem:[%s9221_s1 + $0x88] sm:$0xff] }
 0x135   : > { %1450 = vst [vmem:[#allocation1 + $0x2] ss:$4 sm:$0xff] %v9587_v7  ;;  %2315 = vmatpush.msrb.mxu3 %v4797_v52  ;;  %v733_v7 = vld [vmem:[%s9221_s1 + $0x118] sm:$0xff]  ;;  %v6594_v49 = vpop.f32.mrf.mxu0  ;;  %v714_v52 = vld [vmem:[%s9221_s1 + $0x80] sm:$0xff] }
 0x136   : > { %1806 = vmatpush.msrb.mxu1 %v735_v44  ;;  %9588 = vst [vmem:[#allocation88_spill] sm:$0xff] %v6582_v23  ;;  %v9589_v44 = vld [vmem:[#allocation27_spill] sm:$0xff]  ;;  %1716 = vmatpush.msra.mxu0 %v717_v56  ;;  %v732_v56 = vld [vmem:[%s9221_s1 + $0x110] sm:$0xff] }
 0x137   : > { %1451 = vst [vmem:[#allocation1 + $0x3] ss:$4 sm:$0xff] %v9589_v44  ;;  %v6607_v23 = vld.sshfl [vmem:[#allocation1 + $0x28] sm:$0xff pattern:$0x73625140] }
 0x138   : > { %1807 = vmatpush.msrb.mxu1 %v734_v60  ;;  %9590 = vst [vmem:[#allocation89_spill] sm:$0xff] %v6594_v49  ;;  %v731_v60 = vld [vmem:[%s9221_s1 + $0x108] sm:$0xff]  ;;  %v6609_v44 = vld.sshfl [vmem:[#allocation1 + $0x30] sm:$0xff pattern:$0x73625140] }
 0x139   : > { %1646 = vmatmul.f32.gmra.mxu3 %v6445_v25  ;;  %v716_v25 = vld [vmem:[%s9221_s1 + $0x90] sm:$0xff] }
 0x13a   : > { %1717 = vmatpush.msra.mxu0 %v716_v25  ;;  %1808 = vmatpush.msrb.mxu1 %v733_v7  ;;  %v6605_v25 = vld.sshfl [vmem:[#allocation1 + $0x20] sm:$0xff pattern:$0x73625140]  ;;  %v9591_v49 = vld [vmem:[#allocation28_spill] sm:$0xff]  ;;  %v9592_v7 = vld [vmem:[#allocation29_spill] sm:$0xff] }
 0x13b   : > { %1452 = vst [vmem:[#allocation1 + $0x20] ss:$4 sm:$0xff] %v9591_v49  ;;  %v9611_v49 = vld [vmem:[#allocation38_spill] sm:$0xff] }
 0x13c   : > { %1718 = vmatpush.msra.mxu0 %v715_v55  ;;  %1809 = vmatpush.msrb.mxu1 %v732_v56  ;;  %1453 = vst [vmem:[#allocation1 + $0x21] ss:$4 sm:$0xff] %v9592_v7  ;;  %v730_v55 = vld [vmem:[%s9221_s1 + $0x100] sm:$0xff]  ;;  %v9610_v7 = vld [vmem:[#allocation37_spill] sm:$0xff] }
 0x13d   : > { %1454 = vst [vmem:[#allocation1 + $0x22] ss:$4 sm:$0xff] %v9593_v29 }
 0x13e   : > { %1719 = vmatpush.msra.mxu0 %v714_v52  ;;  %1810 = vmatpush.msrb.mxu1 %v731_v60  ;;  %1455 = vst [vmem:[#allocation1 + $0x23] ss:$4 sm:$0xff] %v9594_v40  ;;  %v4796_v52 = vld [vmem:[%s9221_s1 + $0x3f0] sm:$0xff]  ;;  %v6631_v60 = vld.sshfl [vmem:[#allocation1] sm:$0xff pattern:$0x73625140] }
 0x13f   : > { %1720 = vmatmul.f32.vlgmr.msra.gmra.mxu0 %v6362_v42  ;;  %2316 = vmatpush.msrb.mxu3 %v4796_v52  ;;  %v6633_v29 = vld.sshfl [vmem:[#allocation1 + $0x8] sm:$0xff pattern:$0x73625140]  ;;  %v6635_v40 = vld.sshfl [vmem:[#allocation1 + $0x10] sm:$0xff pattern:$0x73625140] }
 0x140   : > { %2407 = vmatpush.msrb.mxu0 %v4813_v5  ;;  %1811 = vmatpush.msrb.mxu1 %v730_v55  ;;  %v9597_v42 = vld [vmem:[#allocation32_spill] sm:$0xff]  ;;  %v9598_v5 = vld [vmem:[#allocation31_spill] sm:$0xff]  ;;  %v9599_v55 = vld [vmem:[#allocation33_spill] sm:$0xff] }
 0x141   : > { %1649 = vmatmul.f32.gmra.mxu3 %v6458_v15  ;;  %1812 = vmatmul.f32.vlgmr.msrb.gmra.mxu1 %v6367_v63  ;;  %v6626_v15 = vpop.f32.mrf.mxu0  ;;  %1462 = vst [vmem:[#allocation1] ss:$4 sm:$0xff] %v9597_v42  ;;  %v9600_v63 = vld [vmem:[#allocation39_spill] sm:$0xff] }
 0x142   : > { %9596 = vst [vmem:[#allocation91_spill] sm:$0xff] %v6626_v15  ;;  %v4812_v15 = vld [vmem:[%s9221_s1 + $0x470] sm:$0xff] }
 0x143   : > { %1463 = vst [vmem:[#allocation1 + $0x1] ss:$4 sm:$0xff] %v9598_v5  ;;  %2408 = vmatpush.msrb.mxu0 %v4812_v15  ;;  %v4795_v15 = vld [vmem:[%s9221_s1 + $0x3e8] sm:$0xff] }
 0x144   : > { %v6623_v56 = vpop.f32.mrf.mxu3  ;;  %1464 = vst [vmem:[#allocation1 + $0x2] ss:$4 sm:$0xff] %v9599_v55  ;;  %2317 = vmatpush.msrb.mxu3 %v4795_v15 }
 0x145   : > { %9595 = vst [vmem:[#allocation90_spill] sm:$0xff] %v6623_v56  ;;  %v6651_v42 = vld.sshfl [vmem:[#allocation1 + $0x20] sm:$0xff pattern:$0x73625140] }
 0x146   : > { %1465 = vst [vmem:[#allocation1 + $0x3] ss:$4 sm:$0xff] %v9600_v63  ;;  %v6653_v55 = vld.sshfl [vmem:[#allocation1 + $0x28] sm:$0xff pattern:$0x73625140]  ;;  %v9603_v63 = vld [vmem:[#allocation40_spill] sm:$0xff] }
 0x147   : > { %1723 = vmatmul.f32.gmra.mxu0 %v6390_v1  ;;  %v9604_v1 = vld [vmem:[#allocation41_spill] sm:$0xff] }
 0x149   : > { %1652 = vmatmul.f32.gmra.mxu3 %v6490_v34  ;;  %1815 = vmatmul.f32.gmra.mxu1 %v6392_v6  ;;  %v6646_v52 = vpop.f32.mrf.mxu0  ;;  %v6655_v34 = vld.sshfl [vmem:[#allocation1 + $0x30] sm:$0xff pattern:$0x73625140]  ;;  %v6660_v6 = vpop.f32.mrf.mxu1 }
 0x14a   : > { %9602 = vst [vmem:[#allocation93_spill] sm:$0xff] %v6646_v52  ;;  %v9606_v52 = vld [vmem:[#allocation35_spill] sm:$0xff] }
 0x14b   : > { %1466 = vst [vmem:[#allocation1 + $0x20] ss:$4 sm:$0xff] %v9603_v63 }
 0x14c   : > { %v6643_v56 = vpop.f32.mrf.mxu3  ;;  %1467 = vst [vmem:[#allocation1 + $0x21] ss:$4 sm:$0xff] %v9604_v1 }
 0x14d   : > { %9601 = vst [vmem:[#allocation92_spill] sm:$0xff] %v6643_v56  ;;  %v9605_v56 = vld [vmem:[#allocation42_spill] sm:$0xff] }
 0x14e   : > { %1468 = vst [vmem:[#allocation1 + $0x22] ss:$4 sm:$0xff] %v9605_v56  ;;  %v6673_v56 = vld.sshfl [vmem:[#allocation1 + $0x8] sm:$0xff pattern:$0x73625140] }
 0x14f   : > { %1469 = vst [vmem:[#allocation1 + $0x23] ss:$4 sm:$0xff] %v9606_v52  ;;  %1726 = vmatmul.f32.gmra.mxu0 %v6385_v50  ;;  %v6675_v63 = vld.sshfl [vmem:[#allocation1] sm:$0xff pattern:$0x73625140]  ;;  %v9609_v52 = vld [vmem:[#allocation36_spill] sm:$0xff] }
 0x150   : > { %v9612_v50 = vld [vmem:[#allocation47_spill] sm:$0xff] }
 0x151   : > { %1655 = vmatmul.f32.gmra.mxu3 %v6526_v17  ;;  %1818 = vmatmul.f32.gmra.mxu1 %v6387_v36  ;;  %v6671_v1 = vpop.f32.mrf.mxu0  ;;  %v6677_v17 = vld.sshfl [vmem:[#allocation1 + $0x10] sm:$0xff pattern:$0x73625140]  ;;  %v4811_v36 = vld [vmem:[%s9221_s1 + $0x468] sm:$0xff]  ;;  %v6688_v15 = vpop.f32.mrf.mxu1 }
 0x152   : > { %9608 = vst [vmem:[#allocation95_spill] sm:$0xff] %v6671_v1  ;;  %2409 = vmatpush.msrb.mxu0 %v4811_v36  ;;  %v9616_v36 = vld [vmem:[#allocation49_spill] sm:$0xff] }
 0x153   : > { %1476 = vst [vmem:[#allocation1] ss:$4 sm:$0xff] %v9609_v52 }
 0x154   : > { %v6668_v5 = vpop.f32.mrf.mxu3  ;;  %1477 = vst [vmem:[#allocation1 + $0x1] ss:$4 sm:$0xff] %v9610_v7 }
 0x155   : > { %9607 = vst [vmem:[#allocation94_spill] sm:$0xff] %v6668_v5 }
 0x156   : > { %1478 = vst [vmem:[#allocation1 + $0x2] ss:$4 sm:$0xff] %v9611_v49  ;;  %v6700_v49 = vld.sshfl [vmem:[#allocation1 + $0x28] sm:$0xff pattern:$0x73625140] }
 0x157   : > { %1479 = vst [vmem:[#allocation1 + $0x3] ss:$4 sm:$0xff] %v9612_v50  ;;  %1729 = vmatmul.f32.gmra.mxu0 %v6411_v11  ;;  %v6698_v50 = vld.sshfl [vmem:[#allocation1 + $0x20] sm:$0xff pattern:$0x73625140]  ;;  %v9615_v11 = vld [vmem:[#allocation48_spill] sm:$0xff] }
 0x158   : > { %9613 = vst [vmem:[#allocation96_spill] sm:$0xff] %v6688_v15  ;;  %v6702_v7 = vld.sshfl [vmem:[#allocation1 + $0x30] sm:$0xff pattern:$0x73625140]  ;;  %v9617_v15 = vld [vmem:[#allocation50_spill] sm:$0xff] }
 0x159   : > { %1658 = vmatmul.f32.gmra.mxu3 %v6563_v28  ;;  %1821 = vmatmul.f32.gmra.mxu1 %v6413_v62  ;;  %v6693_v1 = vpop.f32.mrf.mxu0  ;;  %v4794_v28 = vld [vmem:[%s9221_s1 + $0x3e0] sm:$0xff]  ;;  %1480 = vst [vmem:[#allocation1 + $0x20] ss:$4 sm:$0xff] %v9615_v11  ;;  %v9618_v62 = vld [vmem:[#allocation43_spill] sm:$0xff] }
 0x15a   : > { %9614 = vst [vmem:[#allocation97_spill] sm:$0xff] %v6693_v1  ;;  %2318 = vmatpush.msrb.mxu3 %v4794_v28  ;;  %v4810_v11 = vld [vmem:[%s9221_s1 + $0x460] sm:$0xff] }
 0x15b   : > { %1481 = vst [vmem:[#allocation1 + $0x21] ss:$4 sm:$0xff] %v9616_v36  ;;  %2410 = vmatpush.msrb.mxu0 %v4810_v11  ;;  %v9622_v36 = vld [vmem:[#allocation45_spill] sm:$0xff] }
 0x15c   : > { %v6690_v5 = vpop.f32.mrf.mxu3  ;;  %1482 = vst [vmem:[#allocation1 + $0x22] ss:$4 sm:$0xff] %v9617_v15  ;;  %v4793_v11 = vld [vmem:[%s9221_s1 + $0x3d8] sm:$0xff] }
 0x15d   : > { %1483 = vst [vmem:[#allocation1 + $0x23] ss:$4 sm:$0xff] %v9618_v62  ;;  %v6724_v62 = vpop.f32.mrf.mxu1  ;;  %2319 = vmatpush.msrb.mxu3 %v4793_v11  ;;  %v9630_v11 = vld [vmem:[#allocation51_spill] sm:$0xff] }
 0x15e   : > { %v6718_v52 = vld.sshfl [vmem:[#allocation1] sm:$0xff pattern:$0x73625140]  ;;  %v6720_v15 = vld.sshfl [vmem:[#allocation1 + $0x8] sm:$0xff pattern:$0x73625140] }
 0x15f   : > { %1732 = vmatmul.f32.gmra.mxu0 %v6417_v33  ;;  %9620 = vst [vmem:[#allocation99_spill] sm:$0xff] %v6724_v62  ;;  %v9621_v33 = vld [vmem:[#allocation44_spill] sm:$0xff] }
 0x161   : > { %1661 = vmatmul.f32.gmra.mxu3 %v6605_v25  ;;  %1824 = vmatmul.f32.gmra.mxu1 %v6420_v16  ;;  %v6713_v28 = vpop.f32.mrf.mxu0  ;;  %v6722_v25 = vld.sshfl [vmem:[#allocation1 + $0x10] sm:$0xff pattern:$0x73625140]  ;;  %v9623_v16 = vld [vmem:[#allocation46_spill] sm:$0xff] }
 0x162   : > { %9619 = vst [vmem:[#allocation98_spill] sm:$0xff] %v6713_v28  ;;  %v9624_v28 = vld [vmem:[#allocation55_spill] sm:$0xff] }
 0x163   : > { %1490 = vst [vmem:[#allocation1] ss:$4 sm:$0xff] %v9621_v33  ;;  %v9627_v33 = vld [vmem:[#allocation58_spill] sm:$0xff] }
 0x164   : > { %v6710_v1 = vpop.f32.mrf.mxu3  ;;  %1491 = vst [vmem:[#allocation1 + $0x1] ss:$4 sm:$0xff] %v9622_v36  ;;  %v6740_v36 = vld.sshfl [vmem:[#allocation1 + $0x28] sm:$0xff pattern:$0x73625140] }
 0x165   : > { %1492 = vst [vmem:[#allocation1 + $0x2] ss:$4 sm:$0xff] %v9623_v16  ;;  %v6742_v16 = vld.sshfl [vmem:[#allocation1 + $0x20] sm:$0xff pattern:$0x73625140]  ;;  %v6748_v10 = vpop.f32.mrf.mxu1 }
 0x166   : > { %1493 = vst [vmem:[#allocation1 + $0x3] ss:$4 sm:$0xff] %v9624_v28  ;;  %v9626_v28 = vld [vmem:[#allocation56_spill] sm:$0xff] }
 0x167   : > { %1735 = vmatmul.f32.gmra.mxu0 %v6430_v22  ;;  %9628 = vst [vmem:[#allocation101_spill] sm:$0xff] %v6748_v10  ;;  %v9629_v22 = vld [vmem:[#allocation57_spill] sm:$0xff] }
 0x169   : > { %1664 = vmatmul.f32.gmra.mxu3 %v6631_v60  ;;  %1827 = vmatmul.f32.gmra.mxu1 %v6434_v32  ;;  %v6738_v62 = vpop.f32.mrf.mxu0  ;;  %v6744_v60 = vld.sshfl [vmem:[#allocation1 + $0x30] sm:$0xff pattern:$0x73625140]  ;;  %v4781_v32 = vld [vmem:[%s9221_s1 + $0x378] sm:$0xff] }
 0x16a   : > { %9625 = vst [vmem:[#allocation100_spill] sm:$0xff] %v6738_v62  ;;  %v4809_v62 = vld [vmem:[%s9221_s1 + $0x458] sm:$0xff]  ;;  %2223 = vmatpush.msrb.mxu2 %v4781_v32 }
 0x16b   : > { %1494 = vst [vmem:[#allocation1 + $0x20] ss:$4 sm:$0xff] %v9626_v28  ;;  %2411 = vmatpush.msrb.mxu0 %v4809_v62  ;;  %v9634_v62 = vld [vmem:[#allocation54_spill] sm:$0xff] }
 0x16c   : > { %v6735_v0 = vpop.f32.mrf.mxu3  ;;  %1495 = vst [vmem:[#allocation1 + $0x21] ss:$4 sm:$0xff] %v9627_v33 }
 0x16d   : > { %1496 = vst [vmem:[#allocation1 + $0x22] ss:$4 sm:$0xff] %v9629_v22  ;;  %v6768_v22 = vld.sshfl [vmem:[#allocation1 + $0x8] sm:$0xff pattern:$0x73625140]  ;;  %v6780_v32 = vpop.f32.mrf.mxu1 }
 0x16e   : > { %1497 = vst [vmem:[#allocation1 + $0x23] ss:$4 sm:$0xff] %v9630_v11  ;;  %v6766_v11 = vld.sshfl [vmem:[#allocation1] sm:$0xff pattern:$0x73625140] }
 0x16f   : > { %1738 = vmatmul.f32.gmra.mxu0 %v6443_v48  ;;  %v6770_v28 = vld.sshfl [vmem:[#allocation1 + $0x10] sm:$0xff pattern:$0x73625140]  ;;  %v9633_v48 = vld [vmem:[#allocation53_spill] sm:$0xff]  ;;  %9635 = vst [vmem:[#allocation52_spill] sm:$0xff] %v6780_v32 }
 0x170   : > { %1504 = vst [vmem:[#allocation1] ss:$4 sm:$0xff] %v9632_v39 }
 0x171   : > { %1667 = vmatmul.f32.gmra.mxu3 %v6651_v42  ;;  %1830 = vmatmul.f32.gmra.mxu1 %v6447_v19  ;;  %v6761_v10 = vpop.f32.mrf.mxu0  ;;  %v4792_v42 = vld [vmem:[%s9221_s1 + $0x3d0] sm:$0xff]  ;;  %1505 = vst [vmem:[#allocation1 + $0x1] ss:$4 sm:$0xff] %v9633_v48 }
 0x172   : > { %9631 = vst [vmem:[#allocation102_spill] sm:$0xff] %v6761_v10  ;;  %2320 = vmatpush.msrb.mxu3 %v4792_v42  ;;  %v4780_v19 = vld [vmem:[%s9221_s1 + $0x370] sm:$0xff] }
 0x173   : > { %1506 = vst [vmem:[#allocation1 + $0x2] ss:$4 sm:$0xff] %v9634_v62  ;;  %2224 = vmatpush.msrb.mxu2 %v4780_v19  ;;  %v4808_v10 = vld [vmem:[%s9221_s1 + $0x450] sm:$0xff] }
 0x174   : > { %v1348_v33 = vpop.f32.mrf.mxu3  ;;  %1507 = vst [vmem:[#allocation1 + $0x3] ss:$4 sm:$0xff] %v6098_v46  ;;  %2412 = vmatpush.msrb.mxu0 %v4808_v10 }
 0x175   : > { %v6791_v62 = vld.sshfl [vmem:[#allocation1 + $0x28] sm:$0xff pattern:$0x73625140]  ;;  %v6793_v48 = vld.sshfl [vmem:[#allocation1 + $0x30] sm:$0xff pattern:$0x73625140]  ;;  %v6804_v10 = vpop.f32.mrf.mxu1 }
 0x176   : > { %9637 = vst [vmem:[#allocation104_spill] sm:$0xff] %v6804_v10  ;;  %v9639_v10 = vld [vmem:[#allocation60_spill] sm:$0xff] }
 0x177   : > { %1741 = vmatmul.f32.gmra.mxu0 %v6456_v3  ;;  %v4791_v3 = vld [vmem:[%s9221_s1 + $0x3c8] sm:$0xff] }
 0x178   : > { %2321 = vmatpush.msrb.mxu3 %v4791_v3  ;;  %v4807_v3 = vld [vmem:[%s9221_s1 + $0x448] sm:$0xff] }
 0x179   : > { %1670 = vmatmul.f32.gmra.mxu3 %v6675_v63  ;;  %1833 = vmatmul.f32.gmra.mxu1 %v6460_v13  ;;  %v6784_v42 = vpop.f32.mrf.mxu0  ;;  %v6789_v63 = vld.sshfl [vmem:[#allocation1 + $0x20] sm:$0xff pattern:$0x73625140]  ;;  %v4779_v13 = vld [vmem:[%s9221_s1 + $0x368] sm:$0xff] }
 0x17a   : > { %9636 = vst [vmem:[#allocation103_spill] sm:$0xff] %v6784_v42  ;;  %2225 = vmatpush.msrb.mxu2 %v4779_v13  ;;  %2413 = vmatpush.msrb.mxu0 %v4807_v3 }
 0x17b   : > { %1508 = vst [vmem:[#allocation1 + $0x20] ss:$4 sm:$0xff] %v6110_v61  ;;  %v6810_v42 = vld.sshfl [vmem:[#allocation1] sm:$0xff pattern:$0x73625140] }
 0x17c   : > { %v1351_v46 = vpop.f32.mrf.mxu3  ;;  %1509 = vst [vmem:[#allocation1 + $0x21] ss:$4 sm:$0xff] %v6101_v18  ;;  %v6813_v32 = vld.sshfl [vmem:[#allocation1 + $0x8] sm:$0xff pattern:$0x73625140] }
 0x17d   : > { %1510 = vst [vmem:[#allocation1 + $0x22] ss:$4 sm:$0xff] %v6103_v4 }
 0x17e   : > { %1511 = vst [vmem:[#allocation1 + $0x23] ss:$4 sm:$0xff] %v6064_v58  ;;  %v6815_v58 = vld.sshfl [vmem:[#allocation1 + $0x10] sm:$0xff pattern:$0x73625140] }
 0x17f   : > { %1744 = vmatmul.f32.gmra.mxu0 %v6492_v54  ;;  %v9638_v54 = vld [vmem:[#allocation61_spill] sm:$0xff]  ;;  %1519 = vst [vmem:[#allocation1 + $0x1] ss:$4 sm:$0xff] %v9639_v10 }
 0x180   : > { %1518 = vst [vmem:[#allocation1] ss:$4 sm:$0xff] %v9638_v54 }
 0x181   : > { %1673 = vmatmul.f32.gmra.mxu3 %v6698_v50  ;;  %1836 = vmatmul.f32.gmra.mxu1 %v6494_v53  ;;  %v1164_v19 = vpop.f32.mrf.mxu0  ;;  %v9640_v53 = vld [vmem:[#allocation62_spill] sm:$0xff]  ;;  %1521 = vst [vmem:[#allocation1 + $0x3] ss:$4 sm:$0xff] %v6166_v21 }
 0x182   : > { %v1257_v50 = vadd.f32 %v6690_v5, %v1164_v19  ;;  %1520 = vst [vmem:[#allocation1 + $0x2] ss:$4 sm:$0xff] %v9640_v53  ;;  %v4778_v5 = vld [vmem:[%s9221_s1 + $0x360] sm:$0xff] }
 0x183   : > { %2226 = vmatpush.msrb.mxu2 %v4778_v5  ;;  %v9644_v21 = vld [vmem:[#allocation70_spill] sm:$0xff] }
 0x184   : > { %v1354_v13 = vpop.f32.mrf.mxu3  ;;  %v6822_v4 = vadd.f32 %v1348_v33, %v1257_v50  ;;  %v9643_v50 = vld [vmem:[#allocation69_spill] sm:$0xff]  ;;  %v4790_v5 = vld [vmem:[%s9221_s1 + $0x3c0] sm:$0xff] }
 0x185   : > { %v6832_v53 = vld.sshfl [vmem:[#allocation1 + $0x20] sm:$0xff pattern:$0x73625140]  ;;  %2322 = vmatpush.msrb.mxu3 %v4790_v5 }
 0x186   : > { %9641 = vst [vmem:[#allocation61_spill] sm:$0xff] %v6822_v4 }
 0x187   : > { %1747 = vmatmul.f32.gmra.mxu0 %v6528_v14  ;;  %v6837_v14 = vld.sshfl [vmem:[#allocation1 + $0x28] sm:$0xff pattern:$0x73625140] }
 0x189   : > { %1676 = vmatmul.f32.gmra.mxu3 %v6718_v52  ;;  %1839 = vmatmul.f32.gmra.mxu1 %v6530_v57  ;;  %v1167_v19 = vpop.f32.mrf.mxu0  ;;  %v6834_v52 = vpop.f32.mrf.mxu1  ;;  %v6839_v57 = vld.sshfl [vmem:[#allocation1 + $0x30] sm:$0xff pattern:$0x73625140] }
 0x18a   : > { %9642 = vst [vmem:[#allocation60_spill] sm:$0xff] %v6834_v52  ;;  %v1260_v33 = vadd.f32 %v6710_v1, %v1167_v19  ;;  %v9646_v1 = vld [vmem:[#allocation66_spill] sm:$0xff]  ;;  %v4777_v19 = vld [vmem:[%s9221_s1 + $0x358] sm:$0xff] }
 0x18b   : > { %1522 = vst [vmem:[#allocation1 + $0x20] ss:$4 sm:$0xff] %v6168_v24  ;;  %v1526_v52 = vld.sshfl [vmem:[#allocation1] sm:$0xff pattern:$0x73625140]  ;;  %2227 = vmatpush.msrb.mxu2 %v4777_v19  ;;  %v1191_v19 = vadd.f32 %v6660_v6, %v6286_v41 }
 0x18c   : > { %1523 = vst [vmem:[#allocation1 + $0x21] ss:$4 sm:$0xff] %v9643_v50  ;;  %v1629_v4 = vpop.f32.mrf.mxu3  ;;  %v6848_v3 = vadd.f32 %v1351_v46, %v1260_v33  ;;  %v6857_v50 = vld.sshfl [vmem:[#allocation1 + $0x8] sm:$0xff pattern:$0x73625140] }
 0x18d   : > { %1524 = vst [vmem:[#allocation1 + $0x22] ss:$4 sm:$0xff] %v9644_v21  ;;  %v6859_v46 = vld.sshfl [vmem:[#allocation1 + $0x10] sm:$0xff pattern:$0x73625140]  ;;  %v9647_v33 = vld [vmem:[#allocation67_spill] sm:$0xff] }
 0x18e   : > { %9645 = vst [vmem:[#allocation105_spill] sm:$0xff] %v6848_v3 }
 0x18f   : > { %1525 = vst [vmem:[#allocation1 + $0x23] ss:$4 sm:$0xff] %v9646_v1  ;;  %1750 = vmatmul.f32.gmra.mxu0 %v6565_v37  ;;  %v9648_v37 = vld [vmem:[#allocation71_spill] sm:$0xff] }
 0x190   : > { %1532 = vst [vmem:[#allocation1] ss:$4 sm:$0xff] %v9647_v33 }
 0x191   : > { %1679 = vmatmul.f32.gmra.mxu3 %v6742_v16  ;;  %1842 = vmatmul.f32.gmra.mxu1 %v6567_v59  ;;  %v1170_v16 = vpop.f32.mrf.mxu0  ;;  %v6862_v3 = vpop.f32.mrf.mxu1  ;;  %1533 = vst [vmem:[#allocation1 + $0x1] ss:$4 sm:$0xff] %v9648_v37  ;;  %v4806_v59 = vld [vmem:[%s9221_s1 + $0x440] sm:$0xff] }
 0x192   : > { %v1263_v21 = vadd.f32 %v6735_v0, %v1170_v16  ;;  %2414 = vmatpush.msrb.mxu0 %v4806_v59 }
 0x194   : > { %v6869_v5 = vadd.f32 %v1354_v13, %v1263_v21  ;;  %v6872_v0 = vpop.f32.mrf.mxu3  ;;  %v4776_v21 = vld [vmem:[%s9221_s1 + $0x350] sm:$0xff] }
 0x195   : > { %2228 = vmatpush.msrb.mxu2 %v4776_v21 }
 0x196   : > { %9649 = vst [vmem:[#allocation66_spill] sm:$0xff] %v6869_v5  ;;  %v4782_v5 = vld [vmem:[%s9221_s1 + $0x380] sm:$0xff] }
 0x197   : > { %1753 = vmatmul.f32.gmra.mxu0 %v6607_v23 }
 0x199   : > { %1682 = vmatmul.f32.gmra.mxu3 %v6766_v11  ;;  %1845 = vmatmul.f32.gmra.mxu1 %v6609_v44  ;;  %v4789_v11 = vld [vmem:[%s9221_s1 + $0x3b8] sm:$0xff]  ;;  %v1282_v16 = vpop.f32.mrf.mxu0  ;;  %v6886_v59 = vpop.f32.mrf.mxu1 }
 0x19a   : > { %2323 = vmatpush.msrb.mxu3 %v4789_v11  ;;  %v1283_v13 = vadd.f32 %v1282_v16, %v1191_v19  ;;  %v4805_v44 = vld [vmem:[%s9221_s1 + $0x438] sm:$0xff]  ;;  %v4774_v19 = vld [vmem:[%s9221_s1 + $0x340] sm:$0xff] }
 0x19b   : > { %2415 = vmatpush.msrb.mxu0 %v4805_v44  ;;  %v4773_v16 = vld [vmem:[%s9221_s1 + $0x338] sm:$0xff]  ;;  %v1529_v44 = vld.sshfl [vmem:[#allocation1 + $0x20] sm:$0xff pattern:$0x73625140] }
 0x19c   : > { %v6884_v23 = vadd.f32 %v1629_v4, %v1283_v13  ;;  %v6890_v41 = vpop.f32.mrf.mxu3  ;;  %v4788_v4 = vld [vmem:[%s9221_s1 + $0x3b0] sm:$0xff] }
 0x19d   : > { %2324 = vmatpush.msrb.mxu3 %v4788_v4  ;;  %v4802_v4 = vld [vmem:[%s9221_s1 + $0x420] sm:$0xff] }
 0x19f   : > { %1756 = vmatmul.f32.gmra.mxu0 %v6633_v29 }
 0x1a1   : > { %1685 = vmatmul.f32.gmra.mxu3 %v6789_v63  ;;  %1848 = vmatmul.f32.gmra.mxu1 %v6635_v40  ;;  %v6895_v6 = vpop.f32.mrf.mxu0  ;;  %v4775_v63 = vld [vmem:[%s9221_s1 + $0x348] sm:$0xff]  ;;  %v6905_v40 = vpop.f32.mrf.mxu1 }
 0x1a2   : > { %2229 = vmatpush.msrb.mxu2 %v4775_v63  ;;  %9650 = vst [vmem:[#allocation67_spill] sm:$0xff] %v6905_v40  ;;  %v4771_v63 = vld [vmem:[%s9221_s1 + $0x328] sm:$0xff] }
 0x1a4   : > { %2230 = vmatpush.msrb.mxu2 %v4774_v19  ;;  %v6916_v11 = vpop.f32.mrf.mxu3  ;;  %v1534_v19 = vld.sshfl [vmem:[#allocation1] sm:$0xff pattern:$0x73625140] }
 0x1a6   : > { %2231 = vmatpush.msrb.mxu2 %v4773_v16 }
 0x1a7   : > { %1759 = vmatmul.f32.gmra.mxu0 %v6653_v55 }
 0x1a9   : > { %1688 = vmatmul.f32.gmra.mxu3 %v6810_v42  ;;  %1851 = vmatmul.f32.gmra.mxu1 %v6655_v34  ;;  %v6908_v29 = vpop.f32.mrf.mxu0  ;;  %v4804_v42 = vld [vmem:[%s9221_s1 + $0x430] sm:$0xff]  ;;  %v4787_v34 = vld [vmem:[%s9221_s1 + $0x3a8] sm:$0xff]  ;;  %v6929_v21 = vpop.f32.mrf.mxu1 }
 0x1aa   : > { %2416 = vmatpush.msrb.mxu0 %v4804_v42  ;;  %9651 = vst [vmem:[#allocation71_spill] sm:$0xff] %v6929_v21  ;;  %2325 = vmatpush.msrb.mxu3 %v4787_v34 }
 0x1ac   : > { %v6931_v13 = vpop.f32.mrf.mxu3 }
 0x1af   : > { %1762 = vmatmul.f32.gmra.mxu0 %v6673_v56  ;;  %v4803_v56 = vld [vmem:[%s9221_s1 + $0x428] sm:$0xff] }
 0x1b0   : > { %2417 = vmatpush.msrb.mxu0 %v4803_v56 }
 0x1b1   : > { %1691 = vmatmul.f32.gmra.mxu3 %v6832_v53  ;;  %1854 = vmatmul.f32.gmra.mxu1 %v6677_v17  ;;  %v6921_v55 = vpop.f32.mrf.mxu0  ;;  %v4772_v17 = vld [vmem:[%s9221_s1 + $0x330] sm:$0xff]  ;;  %v4786_v53 = vld [vmem:[%s9221_s1 + $0x3a0] sm:$0xff] }
 0x1b2   : > { %2232 = vmatpush.msrb.mxu2 %v4772_v17  ;;  %2326 = vmatpush.msrb.mxu3 %v4786_v53  ;;  %v6981_v17 = vpop.f32.mrf.mxu2 }
 0x1b3   : > { %2418 = vmatpush.msrb.mxu0 %v4802_v4 }
 0x1b4   : > { %2233 = vmatpush.msrb.mxu2 %v4771_v63 }
 0x1b7   : > { %1765 = vmatmul.f32.gmra.mxu0 %v6700_v49  ;;  %v6946_v49 = vpop.f32.mrf.mxu1 }
 0x1b8   : > { %9652 = vst [vmem:[#allocation106_spill] sm:$0xff] %v6946_v49 }
 0x1b9   : > { %1694 = vmatmul.f32.gmra.mxu3 %v1526_v52  ;;  %1857 = vmatmul.f32.gmra.mxu1 %v6702_v7  ;;  %v6949_v7 = vpop.f32.mrf.mxu3 }
 0x1bc   : > { %v6944_v52 = vpop.f32.mrf.mxu0 }
 0x1bf   : > { %1768 = vmatmul.f32.gmra.mxu0 %v6720_v15  ;;  %v6960_v34 = vpop.f32.mrf.mxu1 }
 0x1c0   : > { %9653 = vst [vmem:[#allocation107_spill] sm:$0xff] %v6960_v34  ;;  %v9719_v34 = vld [vmem:[#allocation33_spill] sm:$0xff] }
 0x1c1   : > { %1697 = vmatmul.f32.gmra.mxu3 %v1529_v44  ;;  %1860 = vmatmul.f32.gmra.mxu1 %v6722_v25  ;;  %v6964_v15 = vpop.f32.mrf.mxu3  ;;  %v4785_v25 = vld [vmem:[%s9221_s1 + $0x398] sm:$0xff] }
 0x1c2   : > { %2327 = vmatpush.msrb.mxu3 %v4785_v25 }
 0x1c4   : > { %v6958_v42 = vpop.f32.mrf.mxu0 }
 0x1c7   : > { %1771 = vmatmul.f32.gmra.mxu0 %v6740_v36  ;;  %v6972_v56 = vpop.f32.mrf.mxu1  ;;  %v4770_v36 = vld [vmem:[%s9221_s1 + $0x320] sm:$0xff] }
 0x1c8   : > { %9654 = vst [vmem:[#allocation108_spill] sm:$0xff] %v6972_v56  ;;  %2234 = vmatpush.msrb.mxu2 %v4770_v36  ;;  %v4783_v36 = vld [vmem:[%s9221_s1 + $0x388] sm:$0xff] }
 0x1c9   : > { %1700 = vmatmul.f32.gmra.mxu3 %v1534_v19  ;;  %1863 = vmatmul.f32.gmra.mxu1 %v6744_v60  ;;  %v4801_v60 = vld [vmem:[%s9221_s1 + $0x418] sm:$0xff]  ;;  %v6983_v53 = vpop.f32.mrf.mxu3  ;;  %v6999_v19 = vpop.f32.mrf.mxu2 }
 0x1ca   : > { %2419 = vmatpush.msrb.mxu0 %v4801_v60  ;;  %9655 = vst [vmem:[#allocation109_spill] sm:$0xff] %v6983_v53 }
 0x1cc   : > { %v6969_v16 = vpop.f32.mrf.mxu0 }
 0x1cf   : > { %1774 = vmatmul.f32.gmra.mxu0 %v6768_v22  ;;  %v4769_v22 = vld [vmem:[%s9221_s1 + $0x318] sm:$0xff]  ;;  %v6995_v63 = vpop.f32.mrf.mxu1 }
 0x1d0   : > { %9656 = vst [vmem:[#allocation110_spill] sm:$0xff] %v6995_v63  ;;  %2235 = vmatpush.msrb.mxu2 %v4769_v22  ;;  %v4767_v22 = vld [vmem:[%s9221_s1 + $0x308] sm:$0xff] }
 0x1d1   : > { %1866 = vmatmul.f32.gmra.mxu1 %v6770_v28  ;;  %v4784_v28 = vld [vmem:[%s9221_s1 + $0x390] sm:$0xff]  ;;  %v7001_v25 = vpop.f32.mrf.mxu3 }
 0x1d2   : > { %2328 = vmatpush.msrb.mxu3 %v4784_v28  ;;  %9657 = vst [vmem:[#allocation111_spill] sm:$0xff] %v7001_v25  ;;  %v9780_v25 = vld [vmem:[#allocation77_spill] sm:$0xff] }
 0x1d4   : > { %v6985_v44 = vpop.f32.mrf.mxu0  ;;  %2329 = vmatpush.msrb.mxu3 %v4783_v36 }
 0x1d6   : > { %2330 = vmatpush.msrb.mxu3 %v4782_v5  ;;  %v4798_v5 = vld [vmem:[%s9221_s1 + $0x400] sm:$0xff] }
 0x1d7   : > { %1777 = vmatmul.f32.gmra.mxu0 %v6791_v62  ;;  %v4768_v62 = vld [vmem:[%s9221_s1 + $0x310] sm:$0xff] }
 0x1d8   : > { %2236 = vmatpush.msrb.mxu2 %v4768_v62 }
 0x1d9   : > { %1869 = vmatmul.f32.gmra.mxu1 %v6793_v48  ;;  %v4800_v48 = vld [vmem:[%s9221_s1 + $0x410] sm:$0xff]  ;;  %v7021_v28 = vpop.f32.mrf.mxu3 }
 0x1da   : > { %2420 = vmatpush.msrb.mxu0 %v4800_v48  ;;  %9659 = vst [vmem:[#allocation113_spill] sm:$0xff] %v7021_v28  ;;  %v4799_v48 = vld [vmem:[%s9221_s1 + $0x408] sm:$0xff]  ;;  %2237 = vmatpush.msrb.mxu2 %v4767_v22  ;;  %v4766_v22 = vld [vmem:[%s9221_s1 + $0x300] sm:$0xff]  ;;  %v9774_v28 = vld [vmem:[#allocation73_spill] sm:$0xff] }
 0x1dc   : > { %v6997_v4 = vpop.f32.mrf.mxu0  ;;  %2421 = vmatpush.msrb.mxu0 %v4799_v48  ;;  %2238 = vmatpush.msrb.mxu2 %v4766_v22  ;;  %v1530_v48 = vld.sshfl [vmem:[#allocation1 + $0x28] sm:$0xff pattern:$0x73625140] }
 0x1de   : > { %2422 = vmatpush.msrb.mxu0 %v4798_v5 }
 0x1df   : > { %1780 = vmatmul.f32.gmra.mxu0 %v6813_v32  ;;  %v7016_v32 = vpop.f32.mrf.mxu1 }
 0x1e0   : > { %9658 = vst [vmem:[#allocation112_spill] sm:$0xff] %v7016_v32  ;;  %v1536_v32 = vld.sshfl [vmem:[#allocation1 + $0x10] sm:$0xff pattern:$0x73625140] }
 0x1e1   : > { %1872 = vmatmul.f32.gmra.mxu1 %v6815_v58  ;;  %v7018_v58 = vpop.f32.mrf.mxu2 }
 0x1e4   : > { %v7014_v60 = vpop.f32.mrf.mxu0 }
 0x1e7   : > { %1783 = vmatmul.f32.gmra.mxu0 %v6837_v14  ;;  %v7032_v36 = vpop.f32.mrf.mxu1 }
 0x1e8   : > { %9660 = vst [vmem:[#allocation114_spill] sm:$0xff] %v7032_v36  ;;  %v1531_v36 = vld.sshfl [vmem:[#allocation1 + $0x30] sm:$0xff pattern:$0x73625140] }
 0x1e9   : > { %1875 = vmatmul.f32.gmra.mxu1 %v6839_v57  ;;  %v7035_v14 = vpop.f32.mrf.mxu2  ;;  %v7038_v57 = vpop.f32.mrf.mxu3  ;;  %1976 = vst [vmem:[#allocation1 + $0x20] ss:$4 sm:$0xff] %v5345_v12 }
 0x1ea   : > { %9661 = vst [vmem:[#allocation115_spill] sm:$0xff] %v7038_v57 }
 0x1eb   : > { %1978 = vst [vmem:[#allocation1 + $0x21] ss:$4 sm:$0xff] %v5363_v26 }
 0x1ec   : > { %v7030_v62 = vpop.f32.mrf.mxu0  ;;  %1980 = vst [vmem:[#allocation1 + $0x22] ss:$4 sm:$0xff] %v5365_v27 }
 0x1ed   : > { %1982 = vst [vmem:[#allocation1 + $0x23] ss:$4 sm:$0xff] %v5390_v45 }
 0x1ef   : > { %1786 = vmatmul.f32.gmra.mxu0 %v6857_v50  ;;  %v7053_v63 = vpop.f32.mrf.mxu1 }
 0x1f0   : > { %9663 = vst [vmem:[#allocation117_spill] sm:$0xff] %v7053_v63 }
 0x1f1   : > { %1878 = vmatmul.f32.gmra.mxu1 %v6859_v46  ;;  %v1535_v46 = vld.sshfl [vmem:[#allocation1 + $0x8] sm:$0xff pattern:$0x73625140]  ;;  %v7060_v12 = vpop.f32.mrf.mxu2  ;;  %v7063_v26 = vpop.f32.mrf.mxu3 }
 0x1f2   : > { %1968 = vst [vmem:[#allocation1] ss:$4 sm:$0xff] %v5250_v20 }
 0x1f3   : > { %1970 = vst [vmem:[#allocation1 + $0x1] ss:$4 sm:$0xff] %v5288_v35 }
 0x1f4   : > { %v7046_v50 = vpop.f32.mrf.mxu0  ;;  %1972 = vst [vmem:[#allocation1 + $0x2] ss:$4 sm:$0xff] %v5316_v47 }
 0x1f5   : > { %9662 = vst [vmem:[#allocation116_spill] sm:$0xff] %v7046_v50 }
 0x1f6   : > { %9664 = vst [vmem:[#allocation118_spill] sm:$0xff] %v7060_v12 }
 0x1f7   : > { %1789 = vmatmul.f32.gmra.mxu0 %v1530_v48  ;;  %1974 = vst [vmem:[#allocation1 + $0x3] ss:$4 sm:$0xff] %v5342_v8  ;;  %v7067_v20 = vpop.f32.mrf.mxu1  ;;  %v1986_v48 = vld.sshfl [vmem:[#allocation1 + $0x20] sm:$0xff pattern:$0x73625140] }
 0x1f8   : > { %9665 = vst [vmem:[#allocation119_spill] sm:$0xff] %v7063_v26 }
 0x1f9   : > { %1881 = vmatmul.f32.gmra.mxu1 %v1531_v36  ;;  %v7071_v22 = vpop.f32.mrf.mxu2  ;;  %v7074_v8 = vpop.f32.mrf.mxu3 }
 0x1fa   : > { %9668 = vst [vmem:[#allocation122_spill] sm:$0xff] %v7071_v22  ;;  %v9775_v22 = vrot.slane %v9774_v28, 4 }
 0x1fb   : > { %9669 = vst [vmem:[#allocation123_spill] sm:$0xff] %v7074_v8 }
 0x1fc   : > { %v7065_v27 = vpop.f32.mrf.mxu0 }
 0x1fd   : > { %9666 = vst [vmem:[#allocation120_spill] sm:$0xff] %v7065_v27  ;;  %v9778_v27 = vld [vmem:[#allocation79_spill] sm:$0xff] }
 0x1fe   : > { %v1983_v35 = vld.sshfl [vmem:[#allocation1] sm:$0xff pattern:$0x73625140]  ;;  %v1984_v45 = vld.sshfl [vmem:[#allocation1 + $0x8] sm:$0xff pattern:$0x73625140] }
 0x1ff   : > { %1792 = vmatmul.f32.gmra.mxu0 %v1535_v46  ;;  %2239 = vmatmul.f32.vlgmr.msrb.gmra.mxu2 %v1983_v35  ;;  %v1985_v47 = vld.sshfl [vmem:[#allocation1 + $0x10] sm:$0xff pattern:$0x73625140] }
 0x200   : > { %2331 = vmatmul.f32.vlgmr.msrb.gmra.mxu3 %v1984_v45  ;;  %1989 = vst [vmem:[#allocation1] ss:$4 sm:$0xff] %v5392_v51  ;;  %v1988_v46 = vld.sshfl [vmem:[#allocation1 + $0x30] sm:$0xff pattern:$0x73625140]  ;;  %v9671_v51 = vld [vmem:[#allocation5_spill] sm:$0xff] }
 0x201   : > { %1884 = vmatmul.f32.gmra.mxu1 %v1536_v32  ;;  %1990 = vst [vmem:[#allocation1 + $0x1] ss:$4 sm:$0xff] %v5428_v9  ;;  %v1987_v32 = vld.sshfl [vmem:[#allocation1 + $0x28] sm:$0xff pattern:$0x73625140]  ;;  %v7085_v9 = vpop.f32.mrf.mxu2 }
 0x202   : > { %1991 = vst [vmem:[#allocation1 + $0x2] ss:$4 sm:$0xff] %v5434_v31  ;;  %v7087_v31 = vpop.f32.mrf.mxu3 }
 0x203   : > { %1992 = vst [vmem:[#allocation1 + $0x3] ss:$4 sm:$0xff] %v5454_v43 }
 0x204   : > { %v7069_v36 = vpop.f32.mrf.mxu0  ;;  %1993 = vst [vmem:[#allocation1 + $0x20] ss:$4 sm:$0xff] %v5457_v2 }
 0x205   : > { %9667 = vst [vmem:[#allocation121_spill] sm:$0xff] %v7069_v36 }
 0x206   : > { %1994 = vst [vmem:[#allocation1 + $0x21] ss:$4 sm:$0xff] %v5468_v30  ;;  %v9677_v30 = vld [vmem:[#allocation8_spill] sm:$0xff] }
 0x207   : > { %2423 = vmatmul.f32.vlgmr.msrb.gmra.mxu0 %v1985_v47  ;;  %2242 = vmatmul.f32.gmra.mxu2 %v1986_v48  ;;  %1995 = vst [vmem:[#allocation1 + $0x22] ss:$4 sm:$0xff] %v5479_v38  ;;  %v9674_v47 = vld [vmem:[#allocation6_spill] sm:$0xff]  ;;  %v9676_v48 = vld [vmem:[#allocation7_spill] sm:$0xff]  ;;  %v9678_v38 = vld [vmem:[#allocation9_spill] sm:$0xff] }
 0x208   : > { %2334 = vmatmul.f32.gmra.mxu3 %v1987_v32  ;;  %1996 = vst [vmem:[#allocation1 + $0x23] ss:$4 sm:$0xff] %v9671_v51 }
 0x209   : > { %9672 = vst [vmem:[#allocation5_spill] sm:$0xff] %v7085_v9  ;;  %v7095_v51 = vpop.f32.mrf.mxu2 }
 0x20a   : > { %9673 = vst [vmem:[#allocation125_spill] sm:$0xff] %v7087_v31  ;;  %v1997_v35 = vld.sshfl [vmem:[#allocation1] sm:$0xff pattern:$0x73625140]  ;;  %v7097_v63 = vpop.f32.mrf.mxu3 }
 0x20b   : > { %v1998_v43 = vld.sshfl [vmem:[#allocation1 + $0x8] sm:$0xff pattern:$0x73625140]  ;;  %v1999_v45 = vld.sshfl [vmem:[#allocation1 + $0x10] sm:$0xff pattern:$0x73625140] }
 0x20c   : > { %v7080_v5 = vpop.f32.mrf.mxu0  ;;  %2003 = vst [vmem:[#allocation1] ss:$4 sm:$0xff] %v9674_v47  ;;  %v9683_v47 = vld [vmem:[#allocation11_spill] sm:$0xff] }
 0x20d   : > { %9670 = vst [vmem:[#allocation124_spill] sm:$0xff] %v7080_v5 }
 0x20e   : > { %2004 = vst [vmem:[#allocation1 + $0x1] ss:$4 sm:$0xff] %v9676_v48  ;;  %v9684_v48 = vld [vmem:[#allocation12_spill] sm:$0xff] }
 0x20f   : > { %2426 = vmatmul.f32.gmra.mxu0 %v1988_v46  ;;  %2245 = vmatmul.f32.gmra.mxu2 %v1997_v35  ;;  %2005 = vst [vmem:[#allocation1 + $0x2] ss:$4 sm:$0xff] %v9677_v30  ;;  %v2000_v32 = vld.sshfl [vmem:[#allocation1 + $0x20] sm:$0xff pattern:$0x73625140] }
 0x210   : > { %2337 = vmatmul.f32.gmra.mxu3 %v1998_v43  ;;  %2006 = vst [vmem:[#allocation1 + $0x3] ss:$4 sm:$0xff] %v9678_v38  ;;  %v2001_v46 = vld.sshfl [vmem:[#allocation1 + $0x28] sm:$0xff pattern:$0x73625140]  ;;  %v9681_v35 = vld [vmem:[#allocation10_spill] sm:$0xff] }
 0x211   : > { %9679 = vst [vmem:[#allocation7_spill] sm:$0xff] %v7095_v51  ;;  %v2002_v31 = vld.sshfl [vmem:[#allocation1 + $0x30] sm:$0xff pattern:$0x73625140]  ;;  %v7105_v8 = vpop.f32.mrf.mxu2  ;;  %v9730_v51 = vld [vmem:[#allocation38_spill] sm:$0xff] }
 0x212   : > { %9680 = vst [vmem:[#allocation8_spill] sm:$0xff] %v7097_v63  ;;  %v9690_v63 = vld [vmem:[#allocation15_spill] sm:$0xff] }
 0x213   : > { %2007 = vst [vmem:[#allocation1 + $0x20] ss:$4 sm:$0xff] %v9681_v35 }
 0x214   : > { %v7090_v2 = vpop.f32.mrf.mxu0  ;;  %2008 = vst [vmem:[#allocation1 + $0x21] ss:$4 sm:$0xff] %v9683_v47  ;;  %v9691_v47 = vld [vmem:[#allocation16_spill] sm:$0xff] }
 0x215   : > { %9675 = vst [vmem:[#allocation6_spill] sm:$0xff] %v7090_v2  ;;  %v9707_v2 = vld [vmem:[#allocation26_spill] sm:$0xff] }
 0x216   : > { %2009 = vst [vmem:[#allocation1 + $0x22] ss:$4 sm:$0xff] %v9684_v48 }
 0x217   : > { %2429 = vmatmul.f32.gmra.mxu0 %v1999_v45  ;;  %2248 = vmatmul.f32.gmra.mxu2 %v2000_v32  ;;  %v9685_v45 = vld [vmem:[#allocation13_spill] sm:$0xff]  ;;  %v2011_v30 = vld.sshfl [vmem:[#allocation1] sm:$0xff pattern:$0x73625140]  ;;  %9686 = vst [vmem:[#allocation10_spill] sm:$0xff] %v7105_v8 }
 0x218   : > { %2340 = vmatmul.f32.gmra.mxu3 %v2001_v46  ;;  %2010 = vst [vmem:[#allocation1 + $0x23] ss:$4 sm:$0xff] %v9685_v45  ;;  %v2012_v38 = vld.sshfl [vmem:[#allocation1 + $0x8] sm:$0xff pattern:$0x73625140]  ;;  %v9687_v32 = vld [vmem:[#allocation14_spill] sm:$0xff]  ;;  %v7108_v46 = vpop.f32.mrf.mxu3 }
 0x219   : > { %v2013_v56 = vld.sshfl [vmem:[#allocation1 + $0x10] sm:$0xff pattern:$0x73625140]  ;;  %9688 = vst [vmem:[#allocation11_spill] sm:$0xff] %v7108_v46  ;;  %v7119_v46 = vpop.f32.mrf.mxu2 }
 0x21a   : > { %2017 = vst [vmem:[#allocation1] ss:$4 sm:$0xff] %v9687_v32  ;;  %v9695_v32 = vld [vmem:[#allocation19_spill] sm:$0xff] }
 0x21b   : > { %2018 = vst [vmem:[#allocation1 + $0x1] ss:$4 sm:$0xff] %v9690_v63 }
 0x21c   : > { %v7100_v43 = vpop.f32.mrf.mxu0  ;;  %2019 = vst [vmem:[#allocation1 + $0x2] ss:$4 sm:$0xff] %v9691_v47 }
 0x21d   : > { %9682 = vst [vmem:[#allocation9_spill] sm:$0xff] %v7100_v43 }
 0x21e   : > { %9696 = vst [vmem:[#allocation14_spill] sm:$0xff] %v7119_v46 }
 0x21f   : > { %2432 = vmatmul.f32.gmra.mxu0 %v2002_v31  ;;  %2251 = vmatmul.f32.gmra.mxu2 %v2011_v30  ;;  %v9692_v31 = vld [vmem:[#allocation17_spill] sm:$0xff]  ;;  %v2014_v48 = vld.sshfl [vmem:[#allocation1 + $0x20] sm:$0xff pattern:$0x73625140] }
 0x220   : > { %2343 = vmatmul.f32.gmra.mxu3 %v2012_v38  ;;  %2020 = vst [vmem:[#allocation1 + $0x3] ss:$4 sm:$0xff] %v9692_v31  ;;  %v2015_v45 = vld.sshfl [vmem:[#allocation1 + $0x28] sm:$0xff pattern:$0x73625140]  ;;  %v9693_v30 = vld [vmem:[#allocation18_spill] sm:$0xff]  ;;  %v7122_v63 = vpop.f32.mrf.mxu3 }
 0x221   : > { %v2016_v43 = vld.sshfl [vmem:[#allocation1 + $0x30] sm:$0xff pattern:$0x73625140]  ;;  %9698 = vst [vmem:[#allocation15_spill] sm:$0xff] %v7122_v63  ;;  %v9699_v31 = vld [vmem:[#allocation21_spill] sm:$0xff]  ;;  %v7131_v63 = vpop.f32.mrf.mxu2 }
 0x222   : > { %2021 = vst [vmem:[#allocation1 + $0x20] ss:$4 sm:$0xff] %v9693_v30  ;;  %v9702_v30 = vld [vmem:[#allocation24_spill] sm:$0xff] }
 0x223   : > { %2022 = vst [vmem:[#allocation1 + $0x21] ss:$4 sm:$0xff] %v9695_v32  ;;  %v9703_v32 = vld [vmem:[#allocation25_spill] sm:$0xff] }
 0x224   : > { %v7110_v35 = vpop.f32.mrf.mxu0  ;;  %2024 = vst [vmem:[#allocation1 + $0x23] ss:$4 sm:$0xff] %v9699_v31 }
 0x225   : > { %9689 = vst [vmem:[#allocation12_spill] sm:$0xff] %v7110_v35  ;;  %v9697_v35 = vld [vmem:[#allocation20_spill] sm:$0xff] }
 0x226   : > { %2023 = vst [vmem:[#allocation1 + $0x22] ss:$4 sm:$0xff] %v9697_v35 }
 0x227   : > { %2435 = vmatmul.f32.gmra.mxu0 %v2013_v56  ;;  %2254 = vmatmul.f32.gmra.mxu2 %v2014_v48  ;;  %v2025_v56 = vld.sshfl [vmem:[#allocation1] sm:$0xff pattern:$0x73625140]  ;;  %v2026_v47 = vld.sshfl [vmem:[#allocation1 + $0x8] sm:$0xff pattern:$0x73625140] }
 0x228   : > { %2346 = vmatmul.f32.gmra.mxu3 %v2015_v45  ;;  %v2027_v8 = vld.sshfl [vmem:[#allocation1 + $0x10] sm:$0xff pattern:$0x73625140]  ;;  %v9700_v48 = vld [vmem:[#allocation22_spill] sm:$0xff]  ;;  %v9701_v45 = vld [vmem:[#allocation23_spill] sm:$0xff]  ;;  %9705 = vst [vmem:[#allocation17_spill] sm:$0xff] %v7131_v63  ;;  %v7133_v31 = vpop.f32.mrf.mxu3 }
 0x229   : > { %2031 = vst [vmem:[#allocation1] ss:$4 sm:$0xff] %v9700_v48  ;;  %v9708_v48 = vld [vmem:[#allocation27_spill] sm:$0xff]  ;;  %v9712_v63 = vld [vmem:[#allocation34_spill] sm:$0xff] }
 0x22a   : > { %2032 = vst [vmem:[#allocation1 + $0x1] ss:$4 sm:$0xff] %v9701_v45 }
 0x22b   : > { %2033 = vst [vmem:[#allocation1 + $0x2] ss:$4 sm:$0xff] %v9702_v30 }
 0x22c   : > { %v7116_v38 = vpop.f32.mrf.mxu0  ;;  %2034 = vst [vmem:[#allocation1 + $0x3] ss:$4 sm:$0xff] %v9703_v32 }
 0x22d   : > { %9694 = vst [vmem:[#allocation13_spill] sm:$0xff] %v7116_v38  ;;  %v2028_v35 = vld.sshfl [vmem:[#allocation1 + $0x20] sm:$0xff pattern:$0x73625140] }
 0x22e   : > { %v2029_v46 = vld.sshfl [vmem:[#allocation1 + $0x28] sm:$0xff pattern:$0x73625140]  ;;  %9706 = vst [vmem:[#allocation18_spill] sm:$0xff] %v7133_v31  ;;  %v9714_v31 = vld [vmem:[#allocation32_spill] sm:$0xff] }
 0x22f   : > { %2438 = vmatmul.f32.gmra.mxu0 %v2016_v43  ;;  %2257 = vmatmul.f32.gmra.mxu2 %v2025_v56  ;;  %v2030_v43 = vld.sshfl [vmem:[#allocation1 + $0x30] sm:$0xff pattern:$0x73625140] }
 0x230   : > { %2349 = vmatmul.f32.gmra.mxu3 %v2026_v47  ;;  %2035 = vst [vmem:[#allocation1 + $0x20] ss:$4 sm:$0xff] %v9707_v2  ;;  %v9709_v56 = vld [vmem:[#allocation28_spill] sm:$0xff]  ;;  %v9715_v2 = vld [vmem:[#allocation31_spill] sm:$0xff] }
 0x231   : > { %2036 = vst [vmem:[#allocation1 + $0x21] ss:$4 sm:$0xff] %v9708_v48  ;;  %v7145_v48 = vpop.f32.mrf.mxu2 }
 0x232   : > { %2037 = vst [vmem:[#allocation1 + $0x22] ss:$4 sm:$0xff] %v9709_v56 }
 0x233   : > { %v2039_v45 = vld.sshfl [vmem:[#allocation1] sm:$0xff pattern:$0x73625140]  ;;  %v2041_v47 = vld.sshfl [vmem:[#allocation1 + $0x10] sm:$0xff pattern:$0x73625140] }
 0x234   : > { %v7129_v38 = vpop.f32.mrf.mxu0  ;;  %v2040_v32 = vld.sshfl [vmem:[#allocation1 + $0x8] sm:$0xff pattern:$0x73625140]  ;;  %9716 = vst [vmem:[#allocation20_spill] sm:$0xff] %v7145_v48  ;;  %v9722_v48 = vld [vmem:[#allocation41_spill] sm:$0xff] }
 0x235   : > { %9704 = vst [vmem:[#allocation16_spill] sm:$0xff] %v7129_v38  ;;  %v9711_v38 = vld [vmem:[#allocation29_spill] sm:$0xff] }
 0x236   : > { %2038 = vst [vmem:[#allocation1 + $0x23] ss:$4 sm:$0xff] %v9711_v38 }
 0x237   : > { %2441 = vmatmul.f32.gmra.mxu0 %v2027_v8  ;;  %2260 = vmatmul.f32.gmra.mxu2 %v2028_v35  ;;  %2045 = vst [vmem:[#allocation1] ss:$4 sm:$0xff] %v9712_v63  ;;  %v9713_v8 = vld [vmem:[#allocation30_spill] sm:$0xff]  ;;  %v9720_v63 = vld [vmem:[#allocation39_spill] sm:$0xff] }
 0x238   : > { %2352 = vmatmul.f32.gmra.mxu3 %v2029_v46  ;;  %2046 = vst [vmem:[#allocation1 + $0x1] ss:$4 sm:$0xff] %v9713_v8  ;;  %v7147_v46 = vpop.f32.mrf.mxu3 }
 0x239   : > { %2047 = vst [vmem:[#allocation1 + $0x2] ss:$4 sm:$0xff] %v9714_v31  ;;  %v9721_v31 = vld [vmem:[#allocation40_spill] sm:$0xff] }
 0x23a   : > { %2048 = vst [vmem:[#allocation1 + $0x3] ss:$4 sm:$0xff] %v9715_v2 }
 0x23b   : > { %9717 = vst [vmem:[#allocation21_spill] sm:$0xff] %v7147_v46  ;;  %v9723_v46 = vld [vmem:[#allocation42_spill] sm:$0xff] }
 0x23c   : > { %v7138_v30 = vpop.f32.mrf.mxu0 }
 0x23d   : > { %9710 = vst [vmem:[#allocation19_spill] sm:$0xff] %v7138_v30  ;;  %v2042_v35 = vld.sshfl [vmem:[#allocation1 + $0x20] sm:$0xff pattern:$0x73625140] }
 0x23e   : > { %v2043_v30 = vld.sshfl [vmem:[#allocation1 + $0x28] sm:$0xff pattern:$0x73625140]  ;;  %v2044_v38 = vld.sshfl [vmem:[#allocation1 + $0x30] sm:$0xff pattern:$0x73625140] }
 0x23f   : > { %2444 = vmatmul.f32.gmra.mxu0 %v2030_v43  ;;  %2263 = vmatmul.f32.gmra.mxu2 %v2039_v45  ;;  %2049 = vst [vmem:[#allocation1 + $0x20] ss:$4 sm:$0xff] %v9719_v34  ;;  %v7156_v45 = vpop.f32.mrf.mxu2 }
 0x240   : > { %2355 = vmatmul.f32.gmra.mxu3 %v2040_v32  ;;  %2050 = vst [vmem:[#allocation1 + $0x21] ss:$4 sm:$0xff] %v9720_v63  ;;  %v9725_v32 = vld [vmem:[#allocation35_spill] sm:$0xff]  ;;  %v9729_v63 = vld [vmem:[#allocation37_spill] sm:$0xff] }
 0x241   : > { %v2053_v43 = vld.sshfl [vmem:[#allocation1] sm:$0xff pattern:$0x73625140]  ;;  %2051 = vst [vmem:[#allocation1 + $0x22] ss:$4 sm:$0xff] %v9721_v31 }
 0x242   : > { %v2055_v8 = vld.sshfl [vmem:[#allocation1 + $0x10] sm:$0xff pattern:$0x73625140]  ;;  %v2054_v2 = vld.sshfl [vmem:[#allocation1 + $0x8] sm:$0xff pattern:$0x73625140] }
 0x243   : > { %2052 = vst [vmem:[#allocation1 + $0x23] ss:$4 sm:$0xff] %v9722_v48 }
 0x244   : > { %v7149_v56 = vpop.f32.mrf.mxu0  ;;  %2059 = vst [vmem:[#allocation1] ss:$4 sm:$0xff] %v9723_v46  ;;  %v9731_v46 = vld [vmem:[#allocation47_spill] sm:$0xff] }
 0x245   : > { %9718 = vst [vmem:[#allocation22_spill] sm:$0xff] %v7149_v56  ;;  %v7159_v56 = vpop.f32.mrf.mxu3 }
 0x246   : > { %9724 = vst [vmem:[#allocation23_spill] sm:$0xff] %v7156_v45  ;;  %v9737_v45 = vld [vmem:[#allocation50_spill] sm:$0xff] }
 0x247   : > { %2447 = vmatmul.f32.gmra.mxu0 %v2041_v47  ;;  %2266 = vmatmul.f32.gmra.mxu2 %v2042_v35  ;;  %2060 = vst [vmem:[#allocation1 + $0x1] ss:$4 sm:$0xff] %v9725_v32  ;;  %v9728_v47 = vld [vmem:[#allocation36_spill] sm:$0xff] }
 0x248   : > { %2358 = vmatmul.f32.gmra.mxu3 %v2043_v30  ;;  %9726 = vst [vmem:[#allocation24_spill] sm:$0xff] %v7159_v56  ;;  %v7169_v56 = vpop.f32.mrf.mxu2 }
 0x249   : > { %2061 = vst [vmem:[#allocation1 + $0x2] ss:$4 sm:$0xff] %v9728_v47 }
 0x24a   : > { %2062 = vst [vmem:[#allocation1 + $0x3] ss:$4 sm:$0xff] %v9729_v63  ;;  %v2056_v31 = vld.sshfl [vmem:[#allocation1 + $0x20] sm:$0xff pattern:$0x73625140] }
 0x24b   : > { %v2057_v26 = vld.sshfl [vmem:[#allocation1 + $0x28] sm:$0xff pattern:$0x73625140]  ;;  %v2058_v48 = vld.sshfl [vmem:[#allocation1 + $0x30] sm:$0xff pattern:$0x73625140] }
 0x24c   : > { %v7161_v34 = vpop.f32.mrf.mxu0  ;;  %2063 = vst [vmem:[#allocation1 + $0x20] ss:$4 sm:$0xff] %v9730_v51  ;;  %v9738_v51 = vld [vmem:[#allocation43_spill] sm:$0xff] }
 0x24d   : > { %9727 = vst [vmem:[#allocation25_spill] sm:$0xff] %v7161_v34  ;;  %v9734_v34 = vld [vmem:[#allocation48_spill] sm:$0xff]  ;;  %v7172_v63 = vpop.f32.mrf.mxu3 }
 0x24e   : > { %2064 = vst [vmem:[#allocation1 + $0x21] ss:$4 sm:$0xff] %v9731_v46 }
 0x24f   : > { %2450 = vmatmul.f32.gmra.mxu0 %v2044_v38  ;;  %2269 = vmatmul.f32.gmra.mxu2 %v2053_v43  ;;  %9733 = vst [vmem:[#allocation27_spill] sm:$0xff] %v7169_v56  ;;  %v9736_v38 = vld [vmem:[#allocation49_spill] sm:$0xff]  ;;  %v9739_v43 = vld [vmem:[#allocation44_spill] sm:$0xff] }
 0x250   : > { %2361 = vmatmul.f32.gmra.mxu3 %v2054_v2  ;;  %2065 = vst [vmem:[#allocation1 + $0x22] ss:$4 sm:$0xff] %v9734_v34  ;;  %v9740_v2 = vld [vmem:[#allocation45_spill] sm:$0xff]  ;;  %v7181_v5 = vpop.f32.mrf.mxu2 }
 0x251   : > { %v2067_v35 = vld.sshfl [vmem:[#allocation1] sm:$0xff pattern:$0x73625140]  ;;  %v2068_v32 = vld.sshfl [vmem:[#allocation1 + $0x8] sm:$0xff pattern:$0x73625140] }
 0x252   : > { %v2069_v47 = vld.sshfl [vmem:[#allocation1 + $0x10] sm:$0xff pattern:$0x73625140]  ;;  %9735 = vst [vmem:[#allocation28_spill] sm:$0xff] %v7172_v63  ;;  %v7183_v63 = vpop.f32.mrf.mxu1 }
 0x253   : > { %2066 = vst [vmem:[#allocation1 + $0x23] ss:$4 sm:$0xff] %v9736_v38  ;;  %v9745_v38 = vld [vmem:[#allocation55_spill] sm:$0xff] }
 0x254   : > { %v7167_v30 = vpop.f32.mrf.mxu0  ;;  %2073 = vst [vmem:[#allocation1] ss:$4 sm:$0xff] %v9737_v45 }
 0x255   : > { %9732 = vst [vmem:[#allocation26_spill] sm:$0xff] %v7167_v30  ;;  %v7186_v45 = vpop.f32.mrf.mxu3 }
 0x256   : > { %2074 = vst [vmem:[#allocation1 + $0x1] ss:$4 sm:$0xff] %v9738_v51 }
 0x257   : > { %2453 = vmatmul.f32.gmra.mxu0 %v2055_v8  ;;  %2075 = vst [vmem:[#allocation1 + $0x2] ss:$4 sm:$0xff] %v9739_v43  ;;  %2272 = vmatmul.f32.gmra.mxu2 %v2056_v31  ;;  %v9743_v8 = vld [vmem:[#allocation46_spill] sm:$0xff]  ;;  %v9746_v31 = vld [vmem:[#allocation56_spill] sm:$0xff] }
 0x258   : > { %2076 = vst [vmem:[#allocation1 + $0x3] ss:$4 sm:$0xff] %v9740_v2  ;;  %2364 = vmatmul.f32.gmra.mxu3 %v2057_v26  ;;  %v9747_v2 = vld [vmem:[#allocation58_spill] sm:$0xff] }
 0x259   : > { %9742 = vst [vmem:[#allocation34_spill] sm:$0xff] %v7181_v5  ;;  %v9749_v5 = vld [vmem:[#allocation57_spill] sm:$0xff] }
 0x25a   : > { %v2070_v30 = vld.sshfl [vmem:[#allocation1 + $0x20] sm:$0xff pattern:$0x73625140]  ;;  %v2071_v34 = vld.sshfl [vmem:[#allocation1 + $0x28] sm:$0xff pattern:$0x73625140] }
 0x25b   : > { %v2072_v56 = vld.sshfl [vmem:[#allocation1 + $0x30] sm:$0xff pattern:$0x73625140]  ;;  %9744 = vst [vmem:[#allocation30_spill] sm:$0xff] %v7186_v45  ;;  %v7199_v45 = vpop.f32.mrf.mxu1 }
 0x25c   : > { %v7179_v46 = vpop.f32.mrf.mxu0  ;;  %2077 = vst [vmem:[#allocation1 + $0x20] ss:$4 sm:$0xff] %v9743_v8  ;;  %v9751_v8 = vld [vmem:[#allocation53_spill] sm:$0xff] }
 0x25d   : > { %9741 = vst [vmem:[#allocation29_spill] sm:$0xff] %v7179_v46 }
 0x25e   : > { %2078 = vst [vmem:[#allocation1 + $0x21] ss:$4 sm:$0xff] %v9745_v38  ;;  %v7197_v38 = vpop.f32.mrf.mxu2 }
 0x25f   : > { %2456 = vmatmul.f32.gmra.mxu0 %v2058_v48  ;;  %v2081_v51 = vld.sshfl [vmem:[#allocation1] sm:$0xff pattern:$0x73625140]  ;;  %v2082_v43 = vld.sshfl [vmem:[#allocation1 + $0x8] sm:$0xff pattern:$0x73625140]  ;;  %2275 = vmatmul.f32.gmra.mxu2 %v2067_v35 }
 0x260   : > { %2079 = vst [vmem:[#allocation1 + $0x22] ss:$4 sm:$0xff] %v9746_v31  ;;  %v2083_v26 = vld.sshfl [vmem:[#allocation1 + $0x10] sm:$0xff pattern:$0x73625140]  ;;  %2367 = vmatmul.f32.gmra.mxu3 %v2068_v32  ;;  %v9750_v48 = vld [vmem:[#allocation51_spill] sm:$0xff]  ;;  %v7201_v31 = vpop.f32.mrf.mxu3 }
 0x261   : > { %2080 = vst [vmem:[#allocation1 + $0x23] ss:$4 sm:$0xff] %v9747_v2 }
 0x262   : > { %2087 = vst [vmem:[#allocation1] ss:$4 sm:$0xff] %v9749_v5  ;;  %v9755_v5 = vld [vmem:[#allocation54_spill] sm:$0xff] }
 0x263   : > { %2088 = vst [vmem:[#allocation1 + $0x1] ss:$4 sm:$0xff] %v9750_v48  ;;  %v9756_v48 = vld [vmem:[#allocation63_spill] sm:$0xff] }
 0x264   : > { %v7191_v46 = vpop.f32.mrf.mxu0  ;;  %2089 = vst [vmem:[#allocation1 + $0x2] ss:$4 sm:$0xff] %v9632_v39 }
 0x265   : > { %9748 = vst [vmem:[#allocation32_spill] sm:$0xff] %v7191_v46 }
 0x266   : > { %2090 = vst [vmem:[#allocation1 + $0x3] ss:$4 sm:$0xff] %v9751_v8 }
 0x267   : > { %2459 = vmatmul.f32.gmra.mxu0 %v2069_v47  ;;  %9752 = vst [vmem:[#allocation31_spill] sm:$0xff] %v7197_v38  ;;  %2278 = vmatmul.f32.gmra.mxu2 %v2070_v30  ;;  %v9758_v38 = vld [vmem:[#allocation59_spill] sm:$0xff]  ;;  %v7211_v30 = vpop.f32.mrf.mxu2 }
 0x268   : > { %9753 = vst [vmem:[#allocation33_spill] sm:$0xff] %v7201_v31  ;;  %v2084_v35 = vld.sshfl [vmem:[#allocation1 + $0x20] sm:$0xff pattern:$0x73625140]  ;;  %2370 = vmatmul.f32.gmra.mxu3 %v2071_v34  ;;  %v9757_v31 = vld [vmem:[#allocation64_spill] sm:$0xff]  ;;  %v7213_v34 = vpop.f32.mrf.mxu1 }
 0x269   : > { %v2085_v32 = vld.sshfl [vmem:[#allocation1 + $0x28] sm:$0xff pattern:$0x73625140]  ;;  %v2086_v2 = vld.sshfl [vmem:[#allocation1 + $0x30] sm:$0xff pattern:$0x73625140] }
 0x26a   : > { %2091 = vst [vmem:[#allocation1 + $0x20] ss:$4 sm:$0xff] %v9755_v5  ;;  %v4845_v5 = vld [vmem:[%s9223_s3 + $0x278] sm:$0xff] }
 0x26b   : > { %2092 = vst [vmem:[#allocation1 + $0x21] ss:$4 sm:$0xff] %v9756_v48  ;;  %3442 = vmatpush.msra.mxu2 %v4845_v5 }
 0x26c   : > { %v7203_v46 = vpop.f32.mrf.mxu0  ;;  %2093 = vst [vmem:[#allocation1 + $0x22] ss:$4 sm:$0xff] %v6110_v61 }
 0x26d   : > { %9754 = vst [vmem:[#allocation39_spill] sm:$0xff] %v7203_v46  ;;  %v2095_v39 = vld.sshfl [vmem:[#allocation1] sm:$0xff pattern:$0x73625140] }
 0x26e   : > { %v2096_v47 = vld.sshfl [vmem:[#allocation1 + $0x8] sm:$0xff pattern:$0x73625140]  ;;  %v2097_v8 = vld.sshfl [vmem:[#allocation1 + $0x10] sm:$0xff pattern:$0x73625140] }
 0x26f   : > { %2462 = vmatmul.f32.gmra.mxu0 %v2072_v56  ;;  %2094 = vst [vmem:[#allocation1 + $0x23] ss:$4 sm:$0xff] %v6101_v18  ;;  %2281 = vmatmul.f32.gmra.mxu2 %v2081_v51  ;;  %v7216_v56 = vpop.f32.mrf.mxu3  ;;  %v4829_v51 = vld [vmem:[%s9223_s3 + $0x1f8] sm:$0xff] }
 0x270   : > { %2101 = vst [vmem:[#allocation1] ss:$4 sm:$0xff] %v9757_v31  ;;  %2373 = vmatmul.f32.gmra.mxu3 %v2082_v43  ;;  %3371 = vmatpush.msra.mxu1 %v4829_v51  ;;  %v7231_v43 = vld [vmem:[%s5063_s24 + $0xf0] sm:$0xff] }
 0x271   : > { %2102 = vst [vmem:[#allocation1 + $0x1] ss:$4 sm:$0xff] %v9758_v38  ;;  %v1890_v5 = vrot.slane %v7231_v43, 1 }
 0x272   : > { %9759 = vst [vmem:[#allocation40_spill] sm:$0xff] %v7211_v30  ;;  %v7245_v30 = vpop.f32.mrf.mxu1 }
 0x273   : > { %2103 = vst [vmem:[#allocation1 + $0x2] ss:$4 sm:$0xff] %v9638_v54  ;;  %v9762_v54 = vld [vmem:[#allocation62_spill] sm:$0xff] }
 0x274   : > { %9760 = vst [vmem:[#allocation41_spill] sm:$0xff] %v7216_v56  ;;  %v7218_v61 = vpop.f32.mrf.mxu0  ;;  %v9764_v56 = vld [vmem:[#allocation68_spill] sm:$0xff] }
 0x275   : > { %9761 = vst [vmem:[#allocation42_spill] sm:$0xff] %v7218_v61 }
 0x276   : > { %2104 = vst [vmem:[#allocation1 + $0x3] ss:$4 sm:$0xff] %v9639_v10  ;;  %v2098_v18 = vld.sshfl [vmem:[#allocation1 + $0x20] sm:$0xff pattern:$0x73625140]  ;;  %v7234_v10 = vld [vmem:[%s5063_s24 + $0xf8] sm:$0xff] }
 0x277   : > { %2465 = vmatmul.f32.gmra.mxu0 %v2083_v26  ;;  %v2099_v31 = vld.sshfl [vmem:[#allocation1 + $0x28] sm:$0xff pattern:$0x73625140]  ;;  %v7221_v38 = vld.sshfl [vmem:[#allocation1 + $0x30] sm:$0xff pattern:$0x73625140]  ;;  %2284 = vmatmul.f32.gmra.mxu2 %v2084_v35  ;;  %v7250_v35 = vpop.f32.mrf.mxu2 }
 0x278   : > { %2105 = vst [vmem:[#allocation1 + $0x20] ss:$4 sm:$0xff] %v9762_v54  ;;  %2376 = vmatmul.f32.gmra.mxu3 %v2085_v32  ;;  %v1891_v51 = vrot.slane %v7234_v10, 1  ;;  %v7252_v32 = vpop.f32.mrf.mxu3  ;;  %v9767_v54 = vld [vmem:[#allocation69_spill] sm:$0xff]  ;;  %v1894_v49 = vrot.slane %v7234_v10, 2 }
 0x279   : > { %2106 = vst [vmem:[#allocation1 + $0x21] ss:$4 sm:$0xff] %v9764_v56 }
 0x27a   : > { %2107 = vst [vmem:[#allocation1 + $0x22] ss:$4 sm:$0xff] %v6168_v24  ;;  %v1892_v56 = vsel %vm285_vm0, %v1890_v5, %v1891_v51  ;;  %v1893_v24 = vrot.slane %v7231_v43, 2 }
 0x27b   : > { %9765 = vst [vmem:[#allocation36_spill] sm:$0xff] %v7250_v35  ;;  %v1896_v35 = vrot.slane %v1892_v56, 6 }
 0x27c   : > { %v7240_v61 = vpop.f32.mrf.mxu0  ;;  %9766 = vst [vmem:[#allocation37_spill] sm:$0xff] %v7252_v32 }
 0x27d   : > { %v7236_v26 = vld.sshfl [vmem:[#allocation1] sm:$0xff pattern:$0x73625140]  ;;  %v7238_v48 = vld.sshfl [vmem:[#allocation1 + $0x8] sm:$0xff pattern:$0x73625140] }
 0x27e   : > { %9763 = vst [vmem:[#allocation35_spill] sm:$0xff] %v7240_v61  ;;  %v7243_v46 = vld.sshfl [vmem:[#allocation1 + $0x10] sm:$0xff pattern:$0x73625140]  ;;  %v9768_v61 = vld [vmem:[#allocation70_spill] sm:$0xff] }
 0x27f   : > { %2108 = vst [vmem:[#allocation1 + $0x23] ss:$4 sm:$0xff] %v9767_v54  ;;  %2468 = vmatmul.f32.gmra.mxu0 %v2086_v2  ;;  %2287 = vmatmul.f32.gmra.mxu2 %v2095_v39  ;;  %v9769_v54 = vld [vmem:[#allocation78_spill] sm:$0xff]  ;;  %v9770_v2 = vld [vmem:[#allocation96_spill] sm:$0xff]  ;;  %v9771_v39 = vld [vmem:[#allocation65_spill] sm:$0xff] }
 0x280   : > { %2115 = vst [vmem:[#allocation1] ss:$4 sm:$0xff] %v9768_v61  ;;  %2379 = vmatmul.f32.gmra.mxu3 %v2096_v47  ;;  %v1194_v57 = vadd.f32 %v9770_v2, %v9769_v54  ;;  %v9772_v47 = vld [vmem:[#allocation72_spill] sm:$0xff] }
 0x281   : > { %2116 = vst [vmem:[#allocation1 + $0x1] ss:$4 sm:$0xff] %v9646_v1  ;;  %v9773_v56 = vrot.slane %v9772_v47, 2  ;;  %v4844_v2 = vld [vmem:[%s9223_s3 + $0x270] sm:$0xff]  ;;  %v1902_v47 = vsel %vm431_vm4, %v7231_v43, %v1896_v35 }
 0x282   : > { %2117 = vst [vmem:[#allocation1 + $0x2] ss:$4 sm:$0xff] %v9647_v33  ;;  %v1895_v33 = vsel %vm328_vm1, %v1893_v24, %v1894_v49  ;;  %v2240_v5 = vpop.f32.mrf.mxu2  ;;  %v1286_v21 = vadd.f32 %v6895_v6, %v1194_v57  ;;  %v1900_v6 = vsel %vm427_vm2, %v7231_v43, %v1896_v35  ;;  %3443 = vmatpush.msra.mxu2 %v4844_v2  ;;  %v1898_v2 = vrot.slane %v1891_v51, 6 }
 0x283   : > { %2118 = vst [vmem:[#allocation1 + $0x3] ss:$4 sm:$0xff] %v9648_v37  ;;  %v2332_v9 = vpop.f32.mrf.mxu3  ;;  %v7272_v37 = vpop.f32.mrf.mxu1  ;;  %v1897_v54 = vrot.slane %v1895_v33, 4  ;;  %v4828_v33 = vld [vmem:[%s9223_s3 + $0x1f0] sm:$0xff]  ;;  %v1908_v51 = vsel %vm328_vm1, %v1896_v35, %v7231_v43 }
 0x284   : > { %v2424_v32 = vpop.f32.mrf.mxu0  ;;  %3372 = vmatpush.msra.mxu1 %v4828_v33 }
 0x285   : > { %v1901_v12 = vsel %vm429_vm3, %v1900_v6, %v1897_v54 }
 0x286   : > { %v7264_v61 = vld.sshfl [vmem:[#allocation1 + $0x20] sm:$0xff pattern:$0x73625140]  ;;  %v7266_v1 = vld.sshfl [vmem:[#allocation1 + $0x28] sm:$0xff pattern:$0x73625140] }
 0x287   : > { %v7269_v36 = vld.sshfl [vmem:[#allocation1 + $0x30] sm:$0xff pattern:$0x73625140]  ;;  %2471 = vmatmul.f32.gmra.mxu0 %v2097_v8  ;;  %v9776_v8 = vld [vmem:[#allocation74_spill] sm:$0xff]  ;;  %2290 = vmatmul.f32.gmra.mxu2 %v2098_v18 }
 0x288   : > { %2119 = vst [vmem:[#allocation1 + $0x20] ss:$4 sm:$0xff] %v9771_v39  ;;  %v9777_v39 = vrot.slane %v9776_v8, 6  ;;  %2382 = vmatmul.f32.gmra.mxu3 %v2099_v31  ;;  %v9779_v8 = vld [vmem:[#allocation99_spill] sm:$0xff]  ;;  %v1903_v31 = vsel %vm433_vm5, %v1902_v47, %v1897_v54 }
 0x289   : > { %2120 = vst [vmem:[#allocation1 + $0x21] ss:$4 sm:$0xff] %v9773_v56  ;;  %v1633_v56 = vadd.f32 %v6872_v0, %v1286_v21  ;;  %v2333_v0 = vadd.f32 %v2332_v9, %v2240_v5  ;;  %v9781_v21 = vld [vmem:[#allocation75_spill] sm:$0xff]  ;;  %v1899_v9 = vrot.slane %v1894_v49, 4 }
 0x28a   : > { %v7280_v24 = vld.sshfl [vmem:[#allocation1] sm:$0xff pattern:$0x73625140]  ;;  %2121 = vst [vmem:[#allocation1 + $0x22] ss:$4 sm:$0xff] %v9775_v22  ;;  %v1905_v22 = vsel %vm436_vm6, %v7231_v43, %v1896_v35  ;;  %v9782_v18 = vrot.slane %v9781_v21, 2  ;;  %v2243_v33 = vpop.f32.mrf.mxu2  ;;  %v1913_v43 = vsel %vm431_vm4, %v7234_v10, %v1898_v2 }
 0x28b   : > { %v7286_v57 = vld.sshfl [vmem:[#allocation1 + $0x8] sm:$0xff pattern:$0x73625140]  ;;  %2122 = vst [vmem:[#allocation1 + $0x23] ss:$4 sm:$0xff] %v9777_v39  ;;  %v1197_v39 = vadd.f32 %v9779_v8, %v9778_v27  ;;  %v1725_v50 = vadd.f32 %v6958_v42, %v1633_v56  ;;  %v1722_v27 = vadd.f32 %v6944_v52, %v6884_v23  ;;  %v9783_v8 = vld [vmem:[#allocation76_spill] sm:$0xff]  ;;  %v1906_v42 = vsel %vm429_vm3, %v1897_v54, %v1905_v22  ;;  %v7323_v47 = vpop.f32.mrf.mxu1 }
 0x28c   : > { %v7296_v28 = vld.sshfl [vmem:[#allocation1 + $0x10] sm:$0xff pattern:$0x73625140]  ;;  %v2427_v40 = vpop.f32.mrf.mxu0  ;;  %v9784_v6 = vrot.slane %v9783_v8, 4  ;;  %v1904_v35 = vrot.slane %v1903_v31, 2  ;;  %v1909_v23 = vsel %vm433_vm5, %v1897_v54, %v1908_v51  ;;  %v2425_v56 = vadd.f32 %v2424_v32, %v2333_v0  ;;  %v4843_v21 = vld [vmem:[%s9223_s3 + $0x268] sm:$0xff] }
 0x28d   : > { %2129 = vst [vmem:[#allocation1] ss:$4 sm:$0xff] %v9780_v25  ;;  %v1289_v53 = vadd.f32 %v6908_v29, %v1197_v39  ;;  %v2335_v25 = vpop.f32.mrf.mxu3  ;;  %v1916_v29 = vsel %vm436_vm6, %v7234_v10, %v1898_v2  ;;  %v1817_v52 = vadd.f32 %v7183_v63, %v1725_v50  ;;  %v1907_v39 = vrot.slane %v1906_v42, 4  ;;  %v9785_v0 = vld [vmem:[#allocation80_spill] sm:$0xff]  ;;  %3444 = vmatpush.msra.mxu2 %v4843_v21 }
 0x28e   : > { %2130 = vst [vmem:[#allocation1 + $0x1] ss:$4 sm:$0xff] %v9782_v18  ;;  %v2336_v5 = vadd.f32 %v2335_v25, %v2243_v33  ;;  %v1911_v54 = vsel %vm427_vm2, %v7234_v10, %v1898_v2  ;;  %v1914_v50 = vsel %vm433_vm5, %v1913_v43, %v1899_v9  ;;  %v1917_v63 = vsel %vm429_vm3, %v1899_v9, %v1916_v29  ;;  %v9786_v18 = vld [vmem:[#allocation101_spill] sm:$0xff]  ;;  %v7348_v10 = vld [vmem:[%s9222_s2] ss:$0 sm:$0xff] }
 0x28f   : > { %2131 = vst [vmem:[#allocation1 + $0x2] ss:$4 sm:$0xff] %v9784_v6  ;;  %2474 = vmatmul.f32.gmra.mxu0 %v7221_v38  ;;  %2293 = vmatmul.f32.gmra.mxu2 %v7236_v26  ;;  %v1200_v31 = vadd.f32 %v9786_v18, %v9785_v0  ;;  %v1912_v26 = vsel %vm429_vm3, %v1911_v54, %v1899_v9 }
 0x290   : > { %2132 = vst [vmem:[#allocation1 + $0x3] ss:$4 sm:$0xff] %v1901_v12  ;;  %v2428_v22 = vadd.f32 %v2427_v40, %v2336_v5  ;;  %v1636_v12 = vadd.f32 %v6890_v41, %v1289_v53  ;;  %v1814_v40 = vadd.f32 %v7067_v20, %v1722_v27  ;;  %2385 = vmatmul.f32.gmra.mxu3 %v7238_v48  ;;  %v1910_v41 = vrot.slane %v1909_v23, 6  ;;  %v4827_v23 = vld [vmem:[%s9223_s3 + $0x1e8] sm:$0xff] }
 0x291   : > { %v1915_v48 = vrot.slane %v1914_v50, 2  ;;  %v1918_v27 = vrot.slane %v1917_v63, 4  ;;  %v1292_v42 = vadd.f32 %v6921_v55, %v1200_v31  ;;  %3373 = vmatpush.msra.mxu1 %v4827_v23 }
 0x292   : > { %v7325_v49 = vld.sshfl [vmem:[#allocation1 + $0x20] sm:$0xff pattern:$0x73625140]  ;;  %v7328_v38 = vld.sshfl [vmem:[#allocation1 + $0x28] sm:$0xff pattern:$0x73625140]  ;;  %v2500_v32 = vadd.f32 %v2428_v22, %v1817_v52  ;;  %v1728_v51 = vadd.f32 %v6969_v16, %v1636_v12  ;;  %v2499_v20 = vadd.f32 %v2425_v56, %v1814_v40  ;;  %v2246_v25 = vpop.f32.mrf.mxu2 }
 0x293   : > { %v7340_v53 = vld.sshfl [vmem:[#allocation1 + $0x30] sm:$0xff pattern:$0x73625140]  ;;  %v1639_v55 = vadd.f32 %v6916_v11, %v1292_v42  ;;  %v9787_v22 = vld [vmem:[#allocation81_spill] sm:$0xff] }
 0x294   : > { %v2430_v2 = vpop.f32.mrf.mxu0  ;;  %2133 = vst [vmem:[#allocation1 + $0x20] ss:$4 sm:$0xff] %v1904_v35  ;;  %v2529_v33 = vadd.f32 %v7348_v10, %v2500_v32  ;;  %v1820_v9 = vadd.f32 %v7199_v45, %v1728_v51  ;;  %v2528_v29 = vadd.f32 %v7348_v10, %v2499_v20  ;;  %v9790_v42 = vld [vmem:[#allocation104_spill] sm:$0xff] }
 0x295   : > { %2134 = vst [vmem:[#allocation1 + $0x21] ss:$4 sm:$0xff] %v1907_v39  ;;  %v2338_v8 = vpop.f32.mrf.mxu3  ;;  %v9788_v39 = vld [vmem:[#allocation52_spill] sm:$0xff]  ;;  %v1731_v21 = vadd.f32 %v6985_v44, %v1639_v55 }
 0x296   : > { %v2339_v5 = vadd.f32 %v2338_v8, %v2246_v25  ;;  %2135 = vst [vmem:[#allocation1 + $0x22] ss:$4 sm:$0xff] %v1910_v41  ;;  %v7365_v52 = vmax.f32 %v2529_v33, 0.0  ;;  %v1203_v12 = vadd.f32 %v9788_v39, %v9787_v22  ;;  %v2553_v54 = vmax.f32 %v2528_v29, 0.0  ;;  %v9789_v8 = vld [vmem:[#allocation82_spill] sm:$0xff] }
 0x297   : > { %v7352_v6 = vld.sshfl [vmem:[#allocation1] sm:$0xff pattern:$0x73625140]  ;;  %v7354_v16 = vld.sshfl [vmem:[#allocation1 + $0x8] sm:$0xff pattern:$0x73625140]  ;;  %2477 = vmatmul.f32.gmra.mxu0 %v7243_v46  ;;  %v7368_v46 = vpop.f32.mrf.mxu1  ;;  %2296 = vmatmul.f32.gmra.mxu2 %v7264_v61  ;;  %v1823_v18 = vadd.f32 %v7213_v34, %v1731_v21 }
 0x298   : > { %v7358_v43 = vld.sshfl [vmem:[#allocation1 + $0x10] sm:$0xff pattern:$0x73625140]  ;;  %2136 = vst [vmem:[#allocation1 + $0x23] ss:$4 sm:$0xff] %v1912_v26  ;;  %v2431_v35 = vadd.f32 %v2430_v2, %v2339_v5  ;;  %2388 = vmatmul.f32.gmra.mxu3 %v7266_v1  ;;  %v2606_v50 = vrot.slane %v7365_v52, 2  ;;  %v1295_v44 = vadd.f32 %v6981_v17, %v1203_v12  ;;  %v1206_v5 = vadd.f32 %v9790_v42, %v9789_v8 }
 0x299   : > { %2143 = vst [vmem:[#allocation1] ss:$4 sm:$0xff] %v1915_v48  ;;  %v2607_v11 = vrot.slane %v7365_v52, 4  ;;  %v2603_v31 = vrot.slane %v2553_v54, 2  ;;  %v4842_v2 = vld [vmem:[%s9223_s3 + $0x260] sm:$0xff]  ;;  %v2604_v20 = vrot.slane %v2553_v54, 4 }
 0x29a   : > { %2144 = vst [vmem:[#allocation1 + $0x1] ss:$4 sm:$0xff] %v1918_v27  ;;  %v2501_v56 = vadd.f32 %v2431_v35, %v1820_v9  ;;  %v2249_v63 = vpop.f32.mrf.mxu2  ;;  %3445 = vmatpush.msra.mxu2 %v4842_v2  ;;  %v1642_v26 = vadd.f32 %v6931_v13, %v1295_v44  ;;  %v2605_v27 = vrot.slane %v2553_v54, 6 }
 0x29c   : > { %v2433_v45 = vpop.f32.mrf.mxu0  ;;  %v2530_v32 = vadd.f32 %v7348_v10, %v2501_v56  ;;  %v1734_v9 = vadd.f32 %v6997_v4, %v1642_v26  ;;  %v1298_v56 = vadd.f32 %v6999_v19, %v1206_v5  ;;  %v9791_v19 = vld [vmem:[#allocation83_spill] sm:$0xff] }
 0x29d   : > { %v2341_v40 = vpop.f32.mrf.mxu3 }
 0x29e   : > { %v2342_v41 = vadd.f32 %v2341_v40, %v2249_v63  ;;  %v7394_v48 = vmax.f32 %v2530_v32, 0.0  ;;  %v1826_v4 = vadd.f32 %v7245_v30, %v1734_v9  ;;  %v1645_v12 = vadd.f32 %v6949_v7, %v1298_v56  ;;  %v4826_v7 = vld [vmem:[%s9223_s3 + $0x1e0] sm:$0xff]  ;;  %v9794_v56 = vld [vmem:[#allocation85_spill] sm:$0xff] }
 0x29f   : > { %2480 = vmatmul.f32.gmra.mxu0 %v7269_v36  ;;  %v7379_v61 = vld.sshfl [vmem:[#allocation1 + $0x20] sm:$0xff pattern:$0x73625140]  ;;  %v7381_v1 = vld.sshfl [vmem:[#allocation1 + $0x28] sm:$0xff pattern:$0x73625140]  ;;  %2299 = vmatmul.f32.gmra.mxu2 %v7280_v24  ;;  %v7405_v13 = vpop.f32.mrf.mxu1 }
 0x2a0   : > { %v7383_v0 = vld.sshfl [vmem:[#allocation1 + $0x30] sm:$0xff pattern:$0x73625140]  ;;  %v2434_v51 = vadd.f32 %v2433_v45, %v2342_v41  ;;  %2391 = vmatmul.f32.gmra.mxu3 %v7286_v57  ;;  %v2611_v57 = vrot.slane %v7394_v48, 6  ;;  %v1737_v63 = vadd.f32 %v7014_v60, %v1645_v12  ;;  %3374 = vmatpush.msra.mxu1 %v4826_v7  ;;  %v2610_v60 = vrot.slane %v7394_v48, 4 }
 0x2a1   : > { %2684 = vst [vmem:[#allocation1 + $0x20] ss:$4 sm:$0xff] %v7365_v52  ;;  %v7391_v36 = vld.sshfl [vmem:[#allocation1] sm:$0xff pattern:$0x73625140] }
 0x2a2   : > { %2686 = vst [vmem:[#allocation1 + $0x21] ss:$4 sm:$0xff] %v2606_v50  ;;  %v2502_v17 = vadd.f32 %v2434_v51, %v1823_v18  ;;  %v7398_v34 = vld.sshfl [vmem:[#allocation1 + $0x8] sm:$0xff pattern:$0x73625140]  ;;  %v2252_v24 = vpop.f32.mrf.mxu2  ;;  %v9792_v50 = vld [vmem:[#allocation60_spill] sm:$0xff]  ;;  %v1829_v51 = vadd.f32 %v7272_v37, %v1737_v63 }
 0x2a3   : > { %2688 = vst [vmem:[#allocation1 + $0x22] ss:$4 sm:$0xff] %v2607_v11  ;;  %v7400_v25 = vld.sshfl [vmem:[#allocation1 + $0x10] sm:$0xff pattern:$0x73625140]  ;;  %v1209_v30 = vadd.f32 %v9792_v50, %v9791_v19 }
 0x2a4   : > { %v2436_v33 = vpop.f32.mrf.mxu0  ;;  %v2531_v29 = vadd.f32 %v7348_v10, %v2502_v17  ;;  %2676 = vst [vmem:[#allocation1] ss:$4 sm:$0xff] %v2553_v54 }
 0x2a5   : > { %v2344_v35 = vpop.f32.mrf.mxu3  ;;  %2678 = vst [vmem:[#allocation1 + $0x1] ss:$4 sm:$0xff] %v2603_v31  ;;  %v1301_v31 = vadd.f32 %v7018_v58, %v1209_v30  ;;  %v4825_v58 = vld [vmem:[%s9223_s3 + $0x1d8] sm:$0xff] }
 0x2a6   : > { %v7409_v23 = vmax.f32 %v2531_v29, 0.0  ;;  %v2345_v55 = vadd.f32 %v2344_v35, %v2252_v24  ;;  %2680 = vst [vmem:[#allocation1 + $0x2] ss:$4 sm:$0xff] %v2604_v20  ;;  %3375 = vmatpush.msra.mxu1 %v4825_v58 }
 0x2a7   : > { %2483 = vmatmul.f32.gmra.mxu0 %v7296_v28  ;;  %2682 = vst [vmem:[#allocation1 + $0x3] ss:$4 sm:$0xff] %v2605_v27  ;;  %2302 = vmatmul.f32.gmra.mxu2 %v7325_v49  ;;  %v2608_v28 = vrot.slane %v7365_v52, 6  ;;  %v4841_v49 = vld [vmem:[%s9223_s3 + $0x258] sm:$0xff]  ;;  %v7431_v32 = vpop.f32.mrf.mxu1  ;;  %v1648_v17 = vadd.f32 %v6964_v15, %v1301_v31 }
 0x2a8   : > { %v2612_v45 = vrot.slane %v7409_v23, 2  ;;  %v2437_v22 = vadd.f32 %v2436_v33, %v2345_v55  ;;  %2394 = vmatmul.f32.gmra.mxu3 %v7328_v38  ;;  %v2609_v38 = vrot.slane %v7394_v48, 2  ;;  %3446 = vmatpush.msra.mxu2 %v4841_v49  ;;  %v2613_v42 = vrot.slane %v7409_v23, 4  ;;  %v4824_v55 = vld [vmem:[%s9223_s3 + $0x1d0] sm:$0xff]  ;;  %v4839_v49 = vld [vmem:[%s9223_s3 + $0x248] sm:$0xff] }
 0x2a9   : > { %v1740_v37 = vadd.f32 %v7030_v62, %v1648_v17  ;;  %v2614_v62 = vrot.slane %v7409_v23, 6  ;;  %3376 = vmatpush.msra.mxu1 %v4824_v55 }
 0x2aa   : > { %v2690_v39 = vld.sshfl [vmem:[#allocation1 + $0x20] sm:$0xff pattern:$0x73625140]  ;;  %v2503_v21 = vadd.f32 %v2437_v22, %v1826_v4  ;;  %v2255_v52 = vpop.f32.mrf.mxu2  ;;  %v1215_v4 = vadd.f32 %v6886_v59, %v9794_v56  ;;  %v9795_v22 = vld [vmem:[#allocation109_spill] sm:$0xff] }
 0x2ab   : > { %2695 = vst [vmem:[#allocation1 + $0x20] ss:$4 sm:$0xff] %v2611_v57  ;;  %v1832_v29 = vadd.f32 %v7323_v47, %v1740_v37  ;;  %v9797_v59 = vld [vmem:[#allocation118_spill] sm:$0xff] }
 0x2ac   : > { %v2439_v54 = vpop.f32.mrf.mxu0  ;;  %2696 = vst [vmem:[#allocation1 + $0x21] ss:$4 sm:$0xff] %v7409_v23  ;;  %v2532_v40 = vadd.f32 %v7348_v10, %v2503_v21 }
 0x2ad   : > { %2697 = vst [vmem:[#allocation1 + $0x22] ss:$4 sm:$0xff] %v2612_v45  ;;  %v2347_v11 = vpop.f32.mrf.mxu3 }
 0x2ae   : > { %2837 = vst [vmem:[#allocation2] sm:$0x3f] %v2690_v39  ;;  %v2557_v41 = vmax.f32 %v2532_v40, 0.0  ;;  %v2348_v44 = vadd.f32 %v2347_v11, %v2255_v52  ;;  %v2689_v18 = vld.sshfl [vmem:[#allocation1] sm:$0xff pattern:$0x73625140] }
 0x2af   : > { %2486 = vmatmul.f32.gmra.mxu0 %v7340_v53  ;;  %2691 = vst [vmem:[#allocation1] ss:$4 sm:$0xff] %v2608_v28  ;;  %2305 = vmatmul.f32.gmra.mxu2 %v7352_v6  ;;  %v9793_v6 = vld [vmem:[#allocation84_spill] sm:$0xff]  ;;  %v7454_v24 = vpop.f32.mrf.mxu1  ;;  %v9798_v52 = vld [vmem:[#allocation111_spill] sm:$0xff] }
 0x2b0   : > { %v2616_v2 = vrot.slane %v2557_v41, 4  ;;  %v2440_v20 = vadd.f32 %v2439_v54, %v2348_v44  ;;  %2692 = vst [vmem:[#allocation1 + $0x1] ss:$4 sm:$0xff] %v7394_v48  ;;  %v2617_v26 = vrot.slane %v2557_v41, 6  ;;  %2397 = vmatmul.f32.gmra.mxu3 %v7354_v16  ;;  %v1212_v16 = vadd.f32 %v6862_v3, %v9793_v6  ;;  %v4840_v3 = vld [vmem:[%s9223_s3 + $0x250] sm:$0xff]  ;;  %v9799_v44 = vld [vmem:[#allocation3_spill] sm:$0xff] }
 0x2b1   : > { %2693 = vst [vmem:[#allocation1 + $0x2] ss:$4 sm:$0xff] %v2609_v38  ;;  %v2615_v57 = vrot.slane %v2557_v41, 2  ;;  %3447 = vmatpush.msra.mxu2 %v4840_v3 }
 0x2b2   : > { %v2504_v27 = vadd.f32 %v2440_v20, %v1829_v51  ;;  %2694 = vst [vmem:[#allocation1 + $0x3] ss:$4 sm:$0xff] %v2610_v60  ;;  %v2258_v15 = vpop.f32.mrf.mxu2  ;;  %v1304_v23 = vadd.f32 %v7035_v14, %v1212_v16  ;;  %v9796_v14 = vld [vmem:[#allocation116_spill] sm:$0xff] }
 0x2b3   : > { %2836 = vst [vmem:[#allocation2 + $0xb0] sm:$0xff] %v2689_v18  ;;  %3448 = vmatpush.msra.mxu2 %v4839_v49  ;;  %v9800_v18 = vld [vmem:[#allocation67_spill] sm:$0xff]  ;;  %v9801_v20 = vld [vmem:[#allocation120_spill] sm:$0xff] }
 0x2b4   : > { %v2442_v53 = vpop.f32.mrf.mxu0  ;;  %v2699_v33 = vld.sshfl [vmem:[#allocation1 + $0x20] sm:$0xff pattern:$0x73625140]  ;;  %v2533_v48 = vadd.f32 %v7348_v10, %v2504_v27  ;;  %v1651_v39 = vadd.f32 %v9795_v22, %v1304_v23  ;;  %v1218_v31 = vadd.f32 %v9800_v18, %v9799_v44  ;;  %v9804_v16 = vld [vmem:[#allocation4_spill] sm:$0xff] }
 0x2b5   : > { %2704 = vst [vmem:[#allocation1 + $0x20] ss:$4 sm:$0xff] %v2616_v2  ;;  %v2350_v8 = vpop.f32.mrf.mxu3  ;;  %v9811_v49 = vld [vmem:[#allocation124_spill] sm:$0xff] }
 0x2b6   : > { %2705 = vst [vmem:[#allocation1 + $0x21] ss:$4 sm:$0xff] %v2617_v26  ;;  %v7449_v5 = vmax.f32 %v2533_v48, 0.0  ;;  %v2351_v9 = vadd.f32 %v2350_v8, %v2258_v15  ;;  %v1743_v54 = vadd.f32 %v9796_v14, %v1651_v39  ;;  %v4823_v15 = vld [vmem:[%s9223_s3 + $0x1c8] sm:$0xff]  ;;  %v9803_v8 = vld [vmem:[#allocation113_spill] sm:$0xff] }
 0x2b7   : > { %2839 = vst [vmem:[#allocation2 + $0x18] sm:$0x3f] %v2699_v33  ;;  %2489 = vmatmul.f32.gmra.mxu0 %v7358_v43  ;;  %2308 = vmatmul.f32.gmra.mxu2 %v7379_v61  ;;  %v7482_v60 = vpop.f32.mrf.mxu1 }
 0x2b8   : > { %v2443_v35 = vadd.f32 %v2442_v53, %v2351_v9  ;;  %2706 = vst [vmem:[#allocation1 + $0x22] ss:$4 sm:$0xff] %v7449_v5  ;;  %2400 = vmatmul.f32.gmra.mxu3 %v7381_v1  ;;  %v1307_v1 = vadd.f32 %v9797_v59, %v1215_v4  ;;  %v2618_v38 = vrot.slane %v7449_v5, 2  ;;  %v2620_v51 = vrot.slane %v7449_v5, 6  ;;  %3377 = vmatpush.msra.mxu1 %v4823_v15  ;;  %v9806_v9 = vld [vmem:[#allocation121_spill] sm:$0xff]  ;;  %v9808_v59 = vld [vmem:[#allocation115_spill] sm:$0xff] }
 0x2b9   : > { %v7463_v43 = vld.sshfl [vmem:[#allocation1] sm:$0xff pattern:$0x73625140]  ;;  %v9807_v4 = vld [vmem:[#allocation5_spill] sm:$0xff] }
 0x2ba   : > { %v2505_v47 = vadd.f32 %v2443_v35, %v1832_v29  ;;  %2700 = vst [vmem:[#allocation1] ss:$4 sm:$0xff] %v2613_v42  ;;  %v2261_v21 = vpop.f32.mrf.mxu2  ;;  %v1654_v11 = vadd.f32 %v9798_v52, %v1307_v1  ;;  %v9805_v42 = vld [vmem:[#allocation71_spill] sm:$0xff] }
 0x2bb   : > { %2701 = vst [vmem:[#allocation1 + $0x1] ss:$4 sm:$0xff] %v2614_v62 }
 0x2bc   : > { %v2445_v45 = vpop.f32.mrf.mxu0  ;;  %v2534_v12 = vadd.f32 %v7348_v10, %v2505_v47  ;;  %2702 = vst [vmem:[#allocation1 + $0x2] ss:$4 sm:$0xff] %v2557_v41  ;;  %v2619_v41 = vrot.slane %v7449_v5, 4  ;;  %v1746_v26 = vadd.f32 %v9801_v20, %v1654_v11  ;;  %v1221_v5 = vadd.f32 %v9805_v42, %v9804_v16 }
 0x2bd   : > { %v2353_v28 = vpop.f32.mrf.mxu3  ;;  %2703 = vst [vmem:[#allocation1 + $0x3] ss:$4 sm:$0xff] %v2615_v57 }
 0x2be   : > { %v2559_v61 = vmax.f32 %v2534_v12, 0.0  ;;  %v2354_v19 = vadd.f32 %v2353_v28, %v2261_v21  ;;  %2838 = vst [vmem:[#allocation2 + $0xd8] sm:$0xff] %v7463_v43  ;;  %v1838_v58 = vadd.f32 %v7405_v13, %v1746_v26 }
 0x2bf   : > { %2492 = vmatmul.f32.gmra.mxu0 %v7383_v0  ;;  %v2708_v50 = vld.sshfl [vmem:[#allocation1 + $0x20] sm:$0xff pattern:$0x73625140]  ;;  %v1835_v0 = vadd.f32 %v7368_v46, %v1743_v54  ;;  %2311 = vmatmul.f32.gmra.mxu2 %v7391_v36  ;;  %v7505_v35 = vpop.f32.mrf.mxu1 }
 0x2c0   : > { %v2621_v30 = vrot.slane %v2559_v61, 2  ;;  %v2622_v63 = vrot.slane %v2559_v61, 4  ;;  %v2623_v40 = vrot.slane %v2559_v61, 6  ;;  %2841 = vst [vmem:[#allocation2 + $0x68] sm:$0x3f] %v2708_v50  ;;  %v2446_v7 = vadd.f32 %v2445_v45, %v2354_v19  ;;  %2403 = vmatmul.f32.gmra.mxu3 %v7398_v34  ;;  %v9802_v36 = vld [vmem:[#allocation122_spill] sm:$0xff] }
 0x2c1   : > { %v1310_v34 = vadd.f32 %v9802_v36, %v1218_v31  ;;  %v1313_v45 = vadd.f32 %v9807_v4, %v1221_v5  ;;  %v4838_v54 = vld [vmem:[%s9223_s3 + $0x240] sm:$0xff]  ;;  %v9812_v31 = vld [vmem:[#allocation7_spill] sm:$0xff] }
 0x2c2   : > { %2713 = vst [vmem:[#allocation1 + $0x20] ss:$4 sm:$0xff] %v2621_v30  ;;  %v2506_v46 = vadd.f32 %v2446_v7, %v1835_v0  ;;  %v2264_v27 = vpop.f32.mrf.mxu2  ;;  %3449 = vmatpush.msra.mxu2 %v4838_v54  ;;  %v4822_v19 = vld [vmem:[%s9223_s3 + $0x1c0] sm:$0xff]  ;;  %v9818_v4 = vld [vmem:[#allocation123_spill] sm:$0xff] }
 0x2c3   : > { %2714 = vst [vmem:[#allocation1 + $0x21] ss:$4 sm:$0xff] %v2622_v63  ;;  %v1657_v6 = vadd.f32 %v9803_v8, %v1310_v34  ;;  %3378 = vmatpush.msra.mxu1 %v4822_v19  ;;  %v9809_v63 = vld [vmem:[#allocation86_spill] sm:$0xff] }
 0x2c4   : > { %v2448_v2 = vpop.f32.mrf.mxu0  ;;  %2715 = vst [vmem:[#allocation1 + $0x22] ss:$4 sm:$0xff] %v2623_v40  ;;  %v7491_v17 = vld.sshfl [vmem:[#allocation1] sm:$0xff pattern:$0x73625140]  ;;  %v2535_v37 = vadd.f32 %v7348_v10, %v2506_v46  ;;  %v4837_v46 = vld [vmem:[%s9223_s3 + $0x238] sm:$0xff] }
 0x2c5   : > { %v2356_v53 = vpop.f32.mrf.mxu3  ;;  %2709 = vst [vmem:[#allocation1] ss:$4 sm:$0xff] %v2618_v38  ;;  %v1749_v62 = vadd.f32 %v9806_v9, %v1657_v6  ;;  %v9810_v40 = vld [vmem:[#allocation106_spill] sm:$0xff]  ;;  %3450 = vmatpush.msra.mxu2 %v4837_v46  ;;  %v9826_v46 = vld [vmem:[#allocation12_spill] sm:$0xff] }
 0x2c6   : > { %v2357_v33 = vadd.f32 %v2356_v53, %v2264_v27  ;;  %2710 = vst [vmem:[#allocation1 + $0x1] ss:$4 sm:$0xff] %v2619_v41  ;;  %v2560_v3 = vmax.f32 %v2535_v37, 0.0  ;;  %v1224_v7 = vadd.f32 %v9810_v40, %v9809_v63  ;;  %v9813_v27 = vld [vmem:[#allocation119_spill] sm:$0xff]  ;;  %v9816_v8 = vld [vmem:[#allocation6_spill] sm:$0xff] }
 0x2c7   : > { %2495 = vmatmul.f32.gmra.mxu0 %v7400_v25  ;;  %2711 = vst [vmem:[#allocation1 + $0x2] ss:$4 sm:$0xff] %v2620_v51  ;;  %v1841_v22 = vadd.f32 %v7431_v32, %v1749_v62  ;;  %v1660_v32 = vadd.f32 %v9808_v59, %v1313_v45  ;;  %v7523_v41 = vpop.f32.mrf.mxu1  ;;  %v9814_v37 = vld [vmem:[#allocation87_spill] sm:$0xff]  ;;  %v9822_v63 = vld [vmem:[#allocation14_spill] sm:$0xff] }
 0x2c8   : > { %v2449_v48 = vadd.f32 %v2448_v2, %v2357_v33  ;;  %2712 = vst [vmem:[#allocation1 + $0x3] ss:$4 sm:$0xff] %v2559_v61  ;;  %v2624_v12 = vrot.slane %v2560_v3, 2  ;;  %v2625_v61 = vrot.slane %v2560_v3, 4  ;;  %v2626_v1 = vrot.slane %v2560_v3, 6 }
 0x2c9   : > { %2840 = vst [vmem:[#allocation2 + $0x50] sm:$0xff] %v7491_v17  ;;  %v1752_v38 = vadd.f32 %v9811_v49, %v1660_v32  ;;  %v1316_v51 = vadd.f32 %v9812_v31, %v1224_v7 }
 0x2ca   : > { %v2507_v25 = vadd.f32 %v2449_v48, %v1838_v58  ;;  %v2267_v55 = vpop.f32.mrf.mxu2  ;;  %v9815_v48 = vld [vmem:[#allocation107_spill] sm:$0xff] }
 0x2cb   : > { %v2717_v13 = vld.sshfl [vmem:[#allocation1 + $0x20] sm:$0xff pattern:$0x73625140]  ;;  %v1844_v2 = vadd.f32 %v7454_v24, %v1752_v38  ;;  %v1663_v53 = vadd.f32 %v9813_v27, %v1316_v51  ;;  %v1227_v15 = vadd.f32 %v9815_v48, %v9814_v37  ;;  %v4836_v38 = vld [vmem:[%s9223_s3 + $0x230] sm:$0xff]  ;;  %v9824_v51 = vld [vmem:[#allocation91_spill] sm:$0xff] }
 0x2cc   : > { %v2451_v29 = vpop.f32.mrf.mxu0  ;;  %2843 = vst [vmem:[#allocation2 + $0x48] sm:$0x3f] %v2717_v13  ;;  %v2536_v57 = vadd.f32 %v7348_v10, %v2507_v25  ;;  %3451 = vmatpush.msra.mxu2 %v4836_v38  ;;  %v9835_v38 = vld [vmem:[#allocation114_spill] sm:$0xff] }
 0x2cd   : > { %v2359_v23 = vpop.f32.mrf.mxu3  ;;  %v1755_v6 = vadd.f32 %v9816_v8, %v1663_v53 }
 0x2ce   : > { %v2561_v47 = vmax.f32 %v2536_v57, 0.0  ;;  %v2360_v56 = vadd.f32 %v2359_v23, %v2267_v55 }
 0x2cf   : > { %v7510_v39 = vld.sshfl [vmem:[#allocation1] sm:$0xff pattern:$0x73625140]  ;;  %v1847_v57 = vadd.f32 %v7482_v60, %v1755_v6  ;;  %v7539_v55 = vpop.f32.mrf.mxu1  ;;  %v9821_v60 = vld [vmem:[#allocation9_spill] sm:$0xff] }
 0x2d0   : > { %v2627_v21 = vrot.slane %v2561_v47, 2  ;;  %v2628_v28 = vrot.slane %v2561_v47, 4  ;;  %2722 = vst [vmem:[#allocation1 + $0x20] ss:$4 sm:$0xff] %v2561_v47  ;;  %v2452_v14 = vadd.f32 %v2451_v29, %v2360_v56  ;;  %v2629_v33 = vrot.slane %v2561_v47, 6  ;;  %v9817_v29 = vld [vmem:[#allocation10_spill] sm:$0xff] }
 0x2d1   : > { %2718 = vst [vmem:[#allocation1] ss:$4 sm:$0xff] %v2560_v3  ;;  %v1319_v3 = vadd.f32 %v9817_v29, %v1227_v15  ;;  %v4821_v56 = vld [vmem:[%s9223_s3 + $0x1b8] sm:$0xff] }
 0x2d2   : > { %2723 = vst [vmem:[#allocation1 + $0x21] ss:$4 sm:$0xff] %v2627_v21  ;;  %v2508_v50 = vadd.f32 %v2452_v14, %v1841_v22  ;;  %v2270_v11 = vpop.f32.mrf.mxu2  ;;  %3379 = vmatpush.msra.mxu1 %v4821_v56  ;;  %v9819_v21 = vld [vmem:[#allocation89_spill] sm:$0xff] }
 0x2d3   : > { %2724 = vst [vmem:[#allocation1 + $0x22] ss:$4 sm:$0xff] %v2628_v28  ;;  %v1666_v45 = vadd.f32 %v9818_v4, %v1319_v3  ;;  %v9820_v28 = vld [vmem:[#allocation108_spill] sm:$0xff]  ;;  %v9827_v15 = vld [vmem:[#allocation17_spill] sm:$0xff] }
 0x2d4   : > { %v2454_v30 = vpop.f32.mrf.mxu0  ;;  %v2537_v52 = vadd.f32 %v7348_v10, %v2508_v50  ;;  %2719 = vst [vmem:[#allocation1 + $0x1] ss:$4 sm:$0xff] %v2624_v12  ;;  %v1230_v14 = vadd.f32 %v9820_v28, %v9819_v21  ;;  %v9829_v29 = vld [vmem:[#allocation93_spill] sm:$0xff]  ;;  %v9830_v3 = vld [vmem:[#allocation112_spill] sm:$0xff] }
 0x2d5   : > { %v2362_v0 = vpop.f32.mrf.mxu3  ;;  %2720 = vst [vmem:[#allocation1 + $0x2] ss:$4 sm:$0xff] %v2625_v61  ;;  %v1758_v54 = vadd.f32 %v9821_v60, %v1666_v45  ;;  %v9832_v60 = vld [vmem:[#allocation20_spill] sm:$0xff] }
 0x2d6   : > { %v2562_v44 = vmax.f32 %v2537_v52, 0.0  ;;  %v2363_v18 = vadd.f32 %v2362_v0, %v2270_v11  ;;  %2721 = vst [vmem:[#allocation1 + $0x3] ss:$4 sm:$0xff] %v2626_v1  ;;  %v1322_v40 = vadd.f32 %v9822_v63, %v1230_v14  ;;  %v9823_v0 = vld [vmem:[#allocation125_spill] sm:$0xff] }
 0x2d7   : > { %v1850_v7 = vadd.f32 %v7505_v35, %v1758_v54 }
 0x2d8   : > { %v2632_v20 = vrot.slane %v2562_v44, 6  ;;  %v2455_v26 = vadd.f32 %v2454_v30, %v2363_v18  ;;  %v2630_v24 = vrot.slane %v2562_v44, 2  ;;  %v2631_v16 = vrot.slane %v2562_v44, 4  ;;  %v7557_v18 = vpop.f32.mrf.mxu1 }
 0x2da   : > { %v2509_v36 = vadd.f32 %v2455_v26, %v1844_v2  ;;  %v2726_v34 = vld.sshfl [vmem:[#allocation1 + $0x20] sm:$0xff pattern:$0x73625140]  ;;  %v2273_v42 = vpop.f32.mrf.mxu2 }
 0x2db   : > { %2731 = vst [vmem:[#allocation1 + $0x20] ss:$4 sm:$0xff] %v2632_v20  ;;  %v9825_v2 = vld [vmem:[#allocation110_spill] sm:$0xff] }
 0x2dc   : > { %v2457_v58 = vpop.f32.mrf.mxu0  ;;  %v2538_v25 = vadd.f32 %v7348_v10, %v2509_v36  ;;  %2845 = vst [vmem:[#allocation2 + $0x88] sm:$0x3f] %v2726_v34  ;;  %v1233_v20 = vadd.f32 %v9825_v2, %v9824_v51 }
 0x2dd   : > { %v2365_v5 = vpop.f32.mrf.mxu3  ;;  %v7535_v9 = vld.sshfl [vmem:[#allocation1] sm:$0xff pattern:$0x73625140] }
 0x2de   : > { %v2563_v62 = vmax.f32 %v2538_v25, 0.0  ;;  %v2366_v13 = vadd.f32 %v2365_v5, %v2273_v42  ;;  %2727 = vst [vmem:[#allocation1] ss:$4 sm:$0xff] %v2629_v33  ;;  %v1325_v8 = vadd.f32 %v9827_v15, %v1233_v20  ;;  %v4820_v25 = vld [vmem:[%s9223_s3 + $0x1b0] sm:$0xff] }
 0x2df   : > { %2728 = vst [vmem:[#allocation1 + $0x1] ss:$4 sm:$0xff] %v2562_v44  ;;  %v1669_v44 = vadd.f32 %v9823_v0, %v1322_v40  ;;  %3380 = vmatpush.msra.mxu1 %v4820_v25  ;;  %v9833_v40 = vld [vmem:[#allocation11_spill] sm:$0xff]  ;;  %v9839_v25 = vld [vmem:[#allocation97_spill] sm:$0xff] }
 0x2e0   : > { %v2633_v23 = vrot.slane %v2563_v62, 2  ;;  %v2458_v47 = vadd.f32 %v2457_v58, %v2366_v13  ;;  %2729 = vst [vmem:[#allocation1 + $0x2] ss:$4 sm:$0xff] %v2630_v24  ;;  %v2634_v32 = vrot.slane %v2563_v62, 4  ;;  %v2635_v30 = vrot.slane %v2563_v62, 6  ;;  %v7572_v4 = vpop.f32.mrf.mxu1 }
 0x2e1   : > { %2730 = vst [vmem:[#allocation1 + $0x3] ss:$4 sm:$0xff] %v2631_v16  ;;  %v1761_v27 = vadd.f32 %v9826_v46, %v1669_v44  ;;  %v9828_v16 = vld [vmem:[#allocation8_spill] sm:$0xff] }
 0x2e2   : > { %v2510_v22 = vadd.f32 %v2458_v47, %v1847_v57  ;;  %2732 = vst [vmem:[#allocation1 + $0x21] ss:$4 sm:$0xff] %v2563_v62  ;;  %v2276_v19 = vpop.f32.mrf.mxu2  ;;  %v1672_v42 = vadd.f32 %v9828_v16, %v1325_v8  ;;  %v1236_v57 = vadd.f32 %v9830_v3, %v9829_v29  ;;  %v9836_v44 = vld [vmem:[#allocation16_spill] sm:$0xff]  ;;  %v9838_v8 = vld [vmem:[#allocation15_spill] sm:$0xff]  ;;  %v9840_v16 = vld [vmem:[#allocation117_spill] sm:$0xff] }
 0x2e3   : > { %2733 = vst [vmem:[#allocation1 + $0x22] ss:$4 sm:$0xff] %v2633_v23  ;;  %v1853_v6 = vadd.f32 %v7523_v41, %v1761_v27  ;;  %v9831_v23 = vld [vmem:[#allocation13_spill] sm:$0xff]  ;;  %v9837_v27 = vld [vmem:[#allocation23_spill] sm:$0xff] }
 0x2e4   : > { %v2460_v12 = vpop.f32.mrf.mxu0  ;;  %v2539_v61 = vadd.f32 %v7348_v10, %v2510_v22  ;;  %v1764_v47 = vadd.f32 %v9831_v23, %v1672_v42  ;;  %v1328_v54 = vadd.f32 %v9832_v60, %v1236_v57  ;;  %v1242_v42 = vadd.f32 %v9840_v16, %v9839_v25  ;;  %v4818_v60 = vld [vmem:[%s9223_s3 + $0x1a0] sm:$0xff] }
 0x2e5   : > { %v2368_v59 = vpop.f32.mrf.mxu3 }
 0x2e6   : > { %v2564_v1 = vmax.f32 %v2539_v61, 0.0  ;;  %v2369_v50 = vadd.f32 %v2368_v59, %v2276_v19  ;;  %v1856_v61 = vadd.f32 %v7539_v55, %v1764_v47 }
 0x2e8   : > { %v2461_v49 = vadd.f32 %v2460_v12, %v2369_v50  ;;  %v2636_v52 = vrot.slane %v2564_v1, 2  ;;  %v7554_v11 = vld.sshfl [vmem:[#allocation1] sm:$0xff pattern:$0x73625140]  ;;  %v2637_v26 = vrot.slane %v2564_v1, 4  ;;  %v2638_v53 = vrot.slane %v2564_v1, 6 }
 0x2e9   : > { %2736 = vst [vmem:[#allocation1] ss:$4 sm:$0xff] %v2634_v32  ;;  %v4835_v50 = vld [vmem:[%s9223_s3 + $0x228] sm:$0xff] }
 0x2ea   : > { %v2511_v31 = vadd.f32 %v2461_v49, %v1850_v7  ;;  %2737 = vst [vmem:[#allocation1 + $0x1] ss:$4 sm:$0xff] %v2635_v30  ;;  %v2735_v36 = vld.sshfl [vmem:[#allocation1 + $0x20] sm:$0xff pattern:$0x73625140]  ;;  %v2279_v34 = vpop.f32.mrf.mxu2  ;;  %v4819_v30 = vld [vmem:[%s9223_s3 + $0x1a8] sm:$0xff]  ;;  %3452 = vmatpush.msra.mxu2 %v4835_v50  ;;  %v1675_v7 = vadd.f32 %v9833_v40, %v1328_v54 }
 0x2eb   : > { %2738 = vst [vmem:[#allocation1 + $0x2] ss:$4 sm:$0xff] %v2564_v1  ;;  %3381 = vmatpush.msra.mxu1 %v4819_v30  ;;  %v9834_v49 = vld [vmem:[#allocation95_spill] sm:$0xff]  ;;  %v4861_v54 = vld [vmem:[%s9223_s3 + $0x2f8] sm:$0xff]  ;;  %v9846_v30 = vld [vmem:[#allocation22_spill] sm:$0xff] }
 0x2ec   : > { %v2463_v35 = vpop.f32.mrf.mxu0  ;;  %v2540_v33 = vadd.f32 %v7348_v10, %v2511_v31  ;;  %2739 = vst [vmem:[#allocation1 + $0x3] ss:$4 sm:$0xff] %v2636_v52  ;;  %v1239_v52 = vadd.f32 %v9835_v38, %v9834_v49  ;;  %v1767_v31 = vadd.f32 %v9836_v44, %v1675_v7  ;;  %3513 = vmatpush.msra.mxu3 %v4861_v54  ;;  %v9847_v44 = vld [vmem:[#allocation34_spill] sm:$0xff]  ;;  %v9855_v54 = vld [vmem:[#allocation92_spill] sm:$0xff] }
 0x2ed   : > { %v2371_v58 = vpop.f32.mrf.mxu3  ;;  %2740 = vst [vmem:[#allocation1 + $0x20] ss:$4 sm:$0xff] %v2637_v26  ;;  %v1864_v26 = vpop.f32.mrf.mxu1  ;;  %3382 = vmatpush.msra.mxu1 %v4818_v60 }
 0x2ee   : > { %v2565_v37 = vmax.f32 %v2540_v33, 0.0  ;;  %v2372_v48 = vadd.f32 %v2371_v58, %v2279_v34  ;;  %2741 = vst [vmem:[#allocation1 + $0x21] ss:$4 sm:$0xff] %v2638_v53  ;;  %v1331_v53 = vadd.f32 %v9837_v27, %v1239_v52  ;;  %v1859_v33 = vadd.f32 %v7557_v18, %v1767_v31  ;;  %v9841_v18 = vld [vmem:[#allocation19_spill] sm:$0xff]  ;;  %v4833_v27 = vld [vmem:[%s9223_s3 + $0x218] sm:$0xff] }
 0x2ef   : > { %2847 = vst [vmem:[#allocation2 + $0x58] sm:$0x3f] %v2735_v36 }
 0x2f0   : > { %v2464_v24 = vadd.f32 %v2463_v35, %v2372_v48  ;;  %v2639_v5 = vrot.slane %v2565_v37, 2  ;;  %2742 = vst [vmem:[#allocation1 + $0x22] ss:$4 sm:$0xff] %v2565_v37  ;;  %v2640_v62 = vrot.slane %v2565_v37, 4  ;;  %v2641_v41 = vrot.slane %v2565_v37, 6  ;;  %v4834_v37 = vld [vmem:[%s9223_s3 + $0x220] sm:$0xff] }
 0x2f1   : > { %3453 = vmatpush.msra.mxu2 %v4834_v37  ;;  %v9849_v37 = vld [vmem:[#allocation100_spill] sm:$0xff] }
 0x2f2   : > { %v2512_v13 = vadd.f32 %v2464_v24, %v1853_v6  ;;  %v2282_v12 = vpop.f32.mrf.mxu2  ;;  %v1678_v6 = vadd.f32 %v9838_v8, %v1331_v53  ;;  %v4817_v53 = vld [vmem:[%s9223_s3 + $0x198] sm:$0xff] }
 0x2f3   : > { %v7575_v22 = vld.sshfl [vmem:[#allocation1] sm:$0xff pattern:$0x73625140]  ;;  %3454 = vmatpush.msra.mxu2 %v4833_v27  ;;  %3383 = vmatpush.msra.mxu1 %v4817_v53  ;;  %v4857_v27 = vld [vmem:[%s9223_s3 + $0x2d8] sm:$0xff] }
 0x2f4   : > { %v2466_v56 = vpop.f32.mrf.mxu0  ;;  %v2541_v45 = vadd.f32 %v7348_v10, %v2512_v13  ;;  %2745 = vst [vmem:[#allocation1] ss:$4 sm:$0xff] %v2639_v5 }
 0x2f5   : > { %v2374_v21 = vpop.f32.mrf.mxu3  ;;  %2746 = vst [vmem:[#allocation1 + $0x1] ss:$4 sm:$0xff] %v2640_v62  ;;  %v1770_v62 = vadd.f32 %v9841_v18, %v1678_v6  ;;  %v9851_v6 = vld [vmem:[#allocation25_spill] sm:$0xff] }
 0x2f6   : > { %v2566_v28 = vmax.f32 %v2541_v45, 0.0  ;;  %v2375_v14 = vadd.f32 %v2374_v21, %v2282_v12  ;;  %2747 = vst [vmem:[#allocation1 + $0x2] ss:$4 sm:$0xff] %v2641_v41  ;;  %v9842_v41 = vld [vmem:[#allocation27_spill] sm:$0xff]  ;;  %v1867_v12 = vpop.f32.mrf.mxu1 }
 0x2f7   : > { %v2744_v63 = vld.sshfl [vmem:[#allocation1 + $0x20] sm:$0xff pattern:$0x73625140]  ;;  %v1862_v45 = vadd.f32 %v7572_v4, %v1770_v62 }
 0x2f8   : > { %v2642_v19 = vrot.slane %v2566_v28, 2  ;;  %v2643_v59 = vrot.slane %v2566_v28, 4  ;;  %v2644_v32 = vrot.slane %v2566_v28, 6  ;;  %v2467_v1 = vadd.f32 %v2466_v56, %v2375_v14  ;;  %2748 = vst [vmem:[#allocation1 + $0x3] ss:$4 sm:$0xff] %v2566_v28  ;;  %v9844_v4 = vld [vmem:[#allocation98_spill] sm:$0xff] }
 0x2f9   : > { %2849 = vst [vmem:[#allocation2 + $0x90] sm:$0x3f] %v2744_v63  ;;  %v1334_v56 = vadd.f32 %v9842_v41, %v1242_v42 }
 0x2fa   : > { %v2513_v55 = vadd.f32 %v2467_v1, %v1856_v61  ;;  %2749 = vst [vmem:[#allocation1 + $0x20] ss:$4 sm:$0xff] %v2642_v19  ;;  %v2285_v2 = vpop.f32.mrf.mxu2  ;;  %v9843_v61 = vld [vmem:[#allocation18_spill] sm:$0xff]  ;;  %v9845_v1 = vld [vmem:[#allocation88_spill] sm:$0xff] }
 0x2fb   : > { %2750 = vst [vmem:[#allocation1 + $0x21] ss:$4 sm:$0xff] %v2643_v59  ;;  %v1681_v19 = vadd.f32 %v9843_v61, %v1334_v56  ;;  %v1245_v50 = vadd.f32 %v9845_v1, %v9844_v4  ;;  %v4860_v56 = vld [vmem:[%s9223_s3 + $0x2f0] sm:$0xff] }
 0x2fc   : > { %v2469_v0 = vpop.f32.mrf.mxu0  ;;  %v2542_v51 = vadd.f32 %v7348_v10, %v2513_v55  ;;  %2751 = vst [vmem:[#allocation1 + $0x22] ss:$4 sm:$0xff] %v2644_v32  ;;  %3514 = vmatpush.msra.mxu3 %v4860_v56 }
 0x2fd   : > { %v2377_v20 = vpop.f32.mrf.mxu3  ;;  %v1773_v63 = vadd.f32 %v9846_v30, %v1681_v19  ;;  %v1337_v31 = vadd.f32 %v9847_v44, %v1245_v50  ;;  %v9856_v19 = vld [vmem:[#allocation26_spill] sm:$0xff] }
 0x2fe   : > { %v2567_v35 = vmax.f32 %v2542_v51, 0.0  ;;  %v2378_v46 = vadd.f32 %v2377_v20, %v2285_v2 }
 0x2ff   : > { %v7595_v15 = vld.sshfl [vmem:[#allocation1] sm:$0xff pattern:$0x73625140]  ;;  %v1865_v51 = vadd.f32 %v1864_v26, %v1773_v63 }
 0x300   : > { %v2645_v36 = vrot.slane %v2567_v35, 2  ;;  %v2646_v34 = vrot.slane %v2567_v35, 4  ;;  %v2470_v58 = vadd.f32 %v2469_v0, %v2378_v46  ;;  %v2647_v48 = vrot.slane %v2567_v35, 6  ;;  %2754 = vst [vmem:[#allocation1] ss:$4 sm:$0xff] %v2567_v35 }
 0x302   : > { %v2514_v24 = vadd.f32 %v2470_v58, %v1859_v33  ;;  %2755 = vst [vmem:[#allocation1 + $0x1] ss:$4 sm:$0xff] %v2645_v36  ;;  %v2288_v3 = vpop.f32.mrf.mxu2  ;;  %v9848_v33 = vld [vmem:[#allocation21_spill] sm:$0xff] }
 0x303   : > { %2756 = vst [vmem:[#allocation1 + $0x2] ss:$4 sm:$0xff] %v2646_v34  ;;  %v2753_v29 = vld.sshfl [vmem:[#allocation1 + $0x20] sm:$0xff pattern:$0x73625140]  ;;  %v1684_v36 = vadd.f32 %v9848_v33, %v1337_v31  ;;  %v1870_v34 = vpop.f32.mrf.mxu1  ;;  %v9859_v33 = vld [vmem:[#allocation103_spill] sm:$0xff] }
 0x304   : > { %v2472_v5 = vpop.f32.mrf.mxu0  ;;  %v2543_v13 = vadd.f32 %v7348_v10, %v2514_v24  ;;  %2757 = vst [vmem:[#allocation1 + $0x3] ss:$4 sm:$0xff] %v2647_v48  ;;  %v9850_v48 = vld [vmem:[#allocation90_spill] sm:$0xff] }
 0x305   : > { %v2380_v57 = vpop.f32.mrf.mxu3  ;;  %2851 = vst [vmem:[#allocation2 + $0xb8] sm:$0x3f] %v2753_v29  ;;  %v1248_v8 = vadd.f32 %v9850_v48, %v9849_v37  ;;  %v1776_v24 = vadd.f32 %v9851_v6, %v1684_v36  ;;  %v9860_v36 = vld [vmem:[#allocation94_spill] sm:$0xff]  ;;  %v4856_v6 = vld [vmem:[%s9223_s3 + $0x2d0] sm:$0xff] }
 0x306   : > { %v2568_v23 = vmax.f32 %v2543_v13, 0.0  ;;  %v2381_v47 = vadd.f32 %v2380_v57, %v2288_v3  ;;  %v9852_v13 = vld [vmem:[#allocation31_spill] sm:$0xff]  ;;  %v7663_v48 = vld [vmem:[%s9222_s2] ss:$0 sm:$0xff] }
 0x307   : > { %v1340_v29 = vadd.f32 %v9852_v13, %v1248_v8  ;;  %v1868_v3 = vadd.f32 %v1867_v12, %v1776_v24  ;;  %v9854_v12 = vld [vmem:[#allocation102_spill] sm:$0xff] }
 0x308   : > { %v2648_v21 = vrot.slane %v2568_v23, 2  ;;  %v2649_v28 = vrot.slane %v2568_v23, 4  ;;  %v2473_v14 = vadd.f32 %v2472_v5, %v2381_v47  ;;  %v2650_v59 = vrot.slane %v2568_v23, 6  ;;  %2758 = vst [vmem:[#allocation1 + $0x20] ss:$4 sm:$0xff] %v2568_v23 }
 0x309   : > { %v1251_v61 = vadd.f32 %v9855_v54, %v9854_v12  ;;  %v4853_v12 = vld [vmem:[%s9223_s3 + $0x2b8] sm:$0xff] }
 0x30a   : > { %v2515_v32 = vadd.f32 %v2473_v14, %v1862_v45  ;;  %2759 = vst [vmem:[#allocation1 + $0x21] ss:$4 sm:$0xff] %v2648_v21  ;;  %v2291_v49 = vpop.f32.mrf.mxu2  ;;  %v4832_v45 = vld [vmem:[%s9223_s3 + $0x210] sm:$0xff] }
 0x30b   : > { %2760 = vst [vmem:[#allocation1 + $0x22] ss:$4 sm:$0xff] %v2649_v28  ;;  %v7615_v55 = vld.sshfl [vmem:[#allocation1] sm:$0xff pattern:$0x73625140]  ;;  %v9853_v21 = vld [vmem:[#allocation24_spill] sm:$0xff]  ;;  %3455 = vmatpush.msra.mxu2 %v4832_v45  ;;  %v1873_v4 = vpop.f32.mrf.mxu1 }
 0x30c   : > { %v2475_v40 = vpop.f32.mrf.mxu0  ;;  %v2544_v7 = vadd.f32 %v7348_v10, %v2515_v32  ;;  %2763 = vst [vmem:[#allocation1] ss:$4 sm:$0xff] %v2650_v59  ;;  %v1687_v28 = vadd.f32 %v9853_v21, %v1340_v29  ;;  %v4815_v45 = vld [vmem:[%s9223_s3 + $0x188] sm:$0xff]  ;;  %v9863_v21 = vld [vmem:[#allocation30_spill] sm:$0xff] }
 0x30d   : > { %v2383_v38 = vpop.f32.mrf.mxu3 }
 0x30e   : > { %v2569_v52 = vmax.f32 %v2544_v7, 0.0  ;;  %v2384_v0 = vadd.f32 %v2383_v38, %v2291_v49  ;;  %v1779_v59 = vadd.f32 %v9856_v19, %v1687_v28  ;;  %v9857_v7 = vld [vmem:[#allocation40_spill] sm:$0xff] }
 0x30f   : > { %v1343_v49 = vadd.f32 %v9857_v7, %v1251_v61  ;;  %v9864_v19 = vld [vmem:[#allocation32_spill] sm:$0xff] }
 0x310   : > { %v2651_v2 = vrot.slane %v2569_v52, 2  ;;  %v2652_v20 = vrot.slane %v2569_v52, 4  ;;  %v2653_v35 = vrot.slane %v2569_v52, 6  ;;  %v2476_v46 = vadd.f32 %v2475_v40, %v2384_v0  ;;  %2764 = vst [vmem:[#allocation1 + $0x1] ss:$4 sm:$0xff] %v2569_v52 }
 0x311   : > { %v1871_v38 = vadd.f32 %v1870_v34, %v1779_v59  ;;  %v1254_v34 = vadd.f32 %v9860_v36, %v9859_v33  ;;  %v9867_v33 = vld [vmem:[#allocation39_spill] sm:$0xff] }
 0x312   : > { %v2516_v58 = vadd.f32 %v2476_v46, %v1865_v51  ;;  %2765 = vst [vmem:[#allocation1 + $0x2] ss:$4 sm:$0xff] %v2651_v2  ;;  %v2762_v26 = vld.sshfl [vmem:[#allocation1 + $0x20] sm:$0xff pattern:$0x73625140]  ;;  %v2294_v42 = vpop.f32.mrf.mxu2  ;;  %v4859_v51 = vld [vmem:[%s9223_s3 + $0x2e8] sm:$0xff] }
 0x313   : > { %2766 = vst [vmem:[#allocation1 + $0x3] ss:$4 sm:$0xff] %v2652_v20  ;;  %v4858_v2 = vld [vmem:[%s9223_s3 + $0x2e0] sm:$0xff]  ;;  %3515 = vmatpush.msra.mxu3 %v4859_v51  ;;  %v9858_v20 = vld [vmem:[#allocation28_spill] sm:$0xff]  ;;  %v9866_v51 = vld [vmem:[#allocation33_spill] sm:$0xff] }
 0x314   : > { %v2478_v25 = vpop.f32.mrf.mxu0  ;;  %v2545_v16 = vadd.f32 %v7348_v10, %v2516_v58  ;;  %2767 = vst [vmem:[#allocation1 + $0x20] ss:$4 sm:$0xff] %v2653_v35  ;;  %v1690_v35 = vadd.f32 %v9858_v20, %v1343_v49  ;;  %v4830_v20 = vld [vmem:[%s9223_s3 + $0x200] sm:$0xff] }
 0x315   : > { %v2386_v5 = vpop.f32.mrf.mxu3  ;;  %2853 = vst [vmem:[#allocation2 + $0x28] sm:$0x3f] %v2762_v26  ;;  %3516 = vmatpush.msra.mxu3 %v4858_v2  ;;  %v9861_v26 = vld [vmem:[#allocation29_spill] sm:$0xff] }
 0x316   : > { %v2570_v18 = vmax.f32 %v2545_v16, 0.0  ;;  %v2387_v62 = vadd.f32 %v2386_v5, %v2294_v42  ;;  %v1782_v37 = vadd.f32 %v9861_v26, %v1690_v35  ;;  %v1876_v16 = vpop.f32.mrf.mxu1  ;;  %v4848_v26 = vld [vmem:[%s9223_s3 + $0x290] sm:$0xff] }
 0x317   : > { %3517 = vmatpush.msra.mxu3 %v4857_v27  ;;  %v4814_v27 = vld [vmem:[%s9223_s3 + $0x180] sm:$0xff] }
 0x318   : > { %v2654_v57 = vrot.slane %v2570_v18, 2  ;;  %v2655_v23 = vrot.slane %v2570_v18, 4  ;;  %v2656_v47 = vrot.slane %v2570_v18, 6  ;;  %v2479_v41 = vadd.f32 %v2478_v25, %v2387_v62  ;;  %2768 = vst [vmem:[#allocation1 + $0x21] ss:$4 sm:$0xff] %v2570_v18  ;;  %v9862_v18 = vld [vmem:[#allocation36_spill] sm:$0xff] }
 0x319   : > { %v1346_v62 = vadd.f32 %v9862_v18, %v1254_v34  ;;  %3518 = vmatpush.msra.mxu3 %v4856_v6  ;;  %v1874_v13 = vadd.f32 %v1873_v4, %v1782_v37  ;;  %v4852_v4 = vld [vmem:[%s9223_s3 + $0x2b0] sm:$0xff] }
 0x31a   : > { %v2517_v14 = vadd.f32 %v2479_v41, %v1868_v3  ;;  %v7637_v60 = vld.sshfl [vmem:[#allocation1] sm:$0xff pattern:$0x73625140]  ;;  %2769 = vst [vmem:[#allocation1 + $0x22] ss:$4 sm:$0xff] %v2654_v57  ;;  %v2297_v50 = vpop.f32.mrf.mxu2 }
 0x31b   : > { %2772 = vst [vmem:[#allocation1] ss:$4 sm:$0xff] %v2655_v23  ;;  %v4855_v23 = vld [vmem:[%s9223_s3 + $0x2c8] sm:$0xff]  ;;  %v4854_v41 = vld [vmem:[%s9223_s3 + $0x2c0] sm:$0xff]  ;;  %v1693_v28 = vadd.f32 %v9863_v21, %v1346_v62 }
 0x31c   : > { %v2481_v32 = vpop.f32.mrf.mxu0  ;;  %v2546_v1 = vadd.f32 %v7348_v10, %v2517_v14  ;;  %2773 = vst [vmem:[#allocation1 + $0x1] ss:$4 sm:$0xff] %v2656_v47  ;;  %v4816_v10 = vld [vmem:[%s9223_s3 + $0x190] sm:$0xff]  ;;  %v4831_v47 = vld [vmem:[%s9223_s3 + $0x208] sm:$0xff]  ;;  %3519 = vmatpush.msra.mxu3 %v4855_v23 }
 0x31d   : > { %v2389_v30 = vpop.f32.mrf.mxu3  ;;  %3384 = vmatpush.msra.mxu1 %v4816_v10  ;;  %3456 = vmatpush.msra.mxu2 %v4831_v47  ;;  %v1785_v59 = vadd.f32 %v9864_v19, %v1693_v28  ;;  %v3103_v19 = vld [vmem:[%s9223_s3 + $0xf8] sm:$0xff] }
 0x31e   : > { %v2571_v63 = vmax.f32 %v2546_v1, 0.0  ;;  %v2390_v40 = vadd.f32 %v2389_v30, %v2297_v50  ;;  %3520 = vmatpush.msra.mxu3 %v4854_v41  ;;  %v1879_v7 = vpop.f32.mrf.mxu1 }
 0x31f   : > { %3385 = vmatpush.msra.mxu1 %v4815_v45  ;;  %3457 = vmatpush.msra.mxu2 %v4830_v20 }
 0x320   : > { %v2657_v52 = vrot.slane %v2571_v63, 2  ;;  %v2658_v0 = vrot.slane %v2571_v63, 4  ;;  %v2659_v44 = vrot.slane %v2571_v63, 6  ;;  %v2482_v31 = vadd.f32 %v2481_v32, %v2390_v40  ;;  %2774 = vst [vmem:[#allocation1 + $0x2] ss:$4 sm:$0xff] %v2571_v63  ;;  %3521 = vmatpush.msra.mxu3 %v4853_v12 }
 0x321   : > { %v2771_v53 = vld.sshfl [vmem:[#allocation1 + $0x20] sm:$0xff pattern:$0x73625140]  ;;  %v1877_v40 = vadd.f32 %v1876_v16, %v1785_v59  ;;  %3386 = vmatpush.msra.mxu1 %v4814_v27  ;;  %3842 = vmatpush.msrb.mxu2 %v3103_v19 }
 0x322   : > { %v2518_v46 = vadd.f32 %v2482_v31, %v1871_v38  ;;  %2775 = vst [vmem:[#allocation1 + $0x3] ss:$4 sm:$0xff] %v2657_v52  ;;  %v2300_v24 = vpop.f32.mrf.mxu2  ;;  %3522 = vmatpush.msra.mxu3 %v4852_v4  ;;  %v9865_v31 = vld [vmem:[#allocation61_spill] sm:$0xff] }
 0x323   : > { %2776 = vst [vmem:[#allocation1 + $0x20] ss:$4 sm:$0xff] %v2658_v0  ;;  %v4851_v0 = vld [vmem:[%s9223_s3 + $0x2a8] sm:$0xff]  ;;  %v1696_v10 = vadd.f32 %v9866_v51, %v9865_v31 }
 0x324   : > { %v2484_v58 = vpop.f32.mrf.mxu0  ;;  %v2547_v8 = vadd.f32 %v7663_v48, %v2518_v46  ;;  %2777 = vst [vmem:[#allocation1 + $0x21] ss:$4 sm:$0xff] %v2659_v44  ;;  %v4850_v44 = vld [vmem:[%s9223_s3 + $0x2a0] sm:$0xff]  ;;  %3523 = vmatpush.msra.mxu3 %v4851_v0  ;;  %v4849_v46 = vld [vmem:[%s9223_s3 + $0x298] sm:$0xff] }
 0x325   : > { %v2392_v25 = vpop.f32.mrf.mxu3  ;;  %2855 = vst [vmem:[#allocation2 + $0x60] sm:$0x3f] %v2771_v53  ;;  %v1788_v36 = vadd.f32 %v9867_v33, %v1696_v10 }
 0x326   : > { %v2572_v42 = vmax.f32 %v2547_v8, 0.0  ;;  %v2393_v5 = vadd.f32 %v2392_v25, %v2300_v24  ;;  %3524 = vmatpush.msra.mxu3 %v4850_v44  ;;  %v4847_v25 = vld [vmem:[%s9223_s3 + $0x288] sm:$0xff]  ;;  %v1882_v47 = vpop.f32.mrf.mxu1 }
 0x327   : > { %v1880_v16 = vadd.f32 %v1879_v7, %v1788_v36  ;;  %v9871_v7 = vld [vmem:[#allocation66_spill] sm:$0xff]  ;;  %v9873_v44 = vld [vmem:[#allocation35_spill] sm:$0xff] }
 0x328   : > { %v2660_v29 = vrot.slane %v2572_v42, 2  ;;  %v2661_v3 = vrot.slane %v2572_v42, 4  ;;  %v2485_v57 = vadd.f32 %v2484_v58, %v2393_v5  ;;  %v2662_v56 = vrot.slane %v2572_v42, 6  ;;  %2778 = vst [vmem:[#allocation1 + $0x22] ss:$4 sm:$0xff] %v2572_v42  ;;  %3525 = vmatpush.msra.mxu3 %v4849_v46  ;;  %v4846_v42 = vld [vmem:[%s9223_s3 + $0x280] sm:$0xff] }
 0x329   : > { %v7686_v54 = vld.sshfl [vmem:[#allocation1] sm:$0xff pattern:$0x73625140] }
 0x32a   : > { %v2519_v14 = vadd.f32 %v2485_v57, %v1874_v13  ;;  %2781 = vst [vmem:[#allocation1] ss:$4 sm:$0xff] %v2660_v29  ;;  %v2303_v1 = vpop.f32.mrf.mxu2  ;;  %3526 = vmatpush.msra.mxu3 %v4848_v26  ;;  %v9869_v57 = vld [vmem:[#allocation41_spill] sm:$0xff]  ;;  %v3086_v26 = vld [vmem:[%s9223_s3 + $0x70] sm:$0xff] }
 0x32b   : > { %2782 = vst [vmem:[#allocation1 + $0x1] ss:$4 sm:$0xff] %v2661_v3  ;;  %v9868_v3 = vld [vmem:[#allocation105_spill] sm:$0xff] }
 0x32c   : > { %v2487_v61 = vpop.f32.mrf.mxu0  ;;  %v2548_v32 = vadd.f32 %v7663_v48, %v2519_v14  ;;  %2783 = vst [vmem:[#allocation1 + $0x2] ss:$4 sm:$0xff] %v2662_v56  ;;  %v1699_v23 = vadd.f32 %v9869_v57, %v9868_v3  ;;  %3527 = vmatpush.msra.mxu3 %v4847_v25  ;;  %v9870_v56 = vld [vmem:[#allocation42_spill] sm:$0xff] }
 0x32d   : > { %v2395_v50 = vpop.f32.mrf.mxu3 }
 0x32e   : > { %v2573_v30 = vmax.f32 %v2548_v32, 0.0  ;;  %v2396_v63 = vadd.f32 %v2395_v50, %v2303_v1  ;;  %v1791_v45 = vadd.f32 %v9870_v56, %v1699_v23  ;;  %3528 = vmatpush.msra.mxu3 %v4846_v42  ;;  %v3087_v1 = vld [vmem:[%s9223_s3 + $0x78] sm:$0xff]  ;;  %v1885_v10 = vpop.f32.mrf.mxu1  ;;  %v2958_v56 = vrot.slane %v7491_v17, 2 }
 0x32f   : > { %v2780_v53 = vld.sshfl [vmem:[#allocation1 + $0x20] sm:$0xff pattern:$0x73625140]  ;;  %3771 = vmatpush.msrb.mxu1 %v3087_v1  ;;  %v7790_v1 = vld [vmem:[#allocation2 + $0x48] sm:$0x3f] }
 0x330   : > { %v2663_v49 = vrot.slane %v2573_v30, 2  ;;  %v2664_v38 = vrot.slane %v2573_v30, 4  ;;  %v2488_v52 = vadd.f32 %v2487_v61, %v2396_v63  ;;  %v2665_v2 = vrot.slane %v2573_v30, 6  ;;  %2784 = vst [vmem:[#allocation1 + $0x3] ss:$4 sm:$0xff] %v2573_v30 }
 0x331   : > { %2857 = vst [vmem:[#allocation2 + $0xa8] sm:$0x3f] %v2780_v53  ;;  %v1883_v4 = vadd.f32 %v1882_v47, %v1791_v45  ;;  %3772 = vmatpush.msrb.mxu1 %v3086_v26  ;;  %v3101_v45 = vld [vmem:[%s9223_s3 + $0xe8] sm:$0xff] }
 0x332   : > { %v2520_v35 = vadd.f32 %v2488_v52, %v1877_v40  ;;  %2785 = vst [vmem:[#allocation1 + $0x20] ss:$4 sm:$0xff] %v2663_v49  ;;  %v2306_v37 = vpop.f32.mrf.mxu2  ;;  %v9872_v49 = vld [vmem:[#allocation37_spill] sm:$0xff]  ;;  %v7735_v52 = vld [vmem:[#allocation2 + $0x18] sm:$0x3f] }
 0x333   : > { %2786 = vst [vmem:[#allocation1 + $0x21] ss:$4 sm:$0xff] %v2664_v38  ;;  %v1702_v38 = vadd.f32 %v9872_v49, %v9871_v7  ;;  %v2920_v53 = vrot.slane %v7735_v52, 1  ;;  %v3100_v7 = vld [vmem:[%s9223_s3 + $0xe0] sm:$0xff] }
 0x334   : > { %v2490_v34 = vpop.f32.mrf.mxu0  ;;  %v2549_v58 = vadd.f32 %v7663_v48, %v2520_v35  ;;  %2787 = vst [vmem:[#allocation1 + $0x22] ss:$4 sm:$0xff] %v2665_v2  ;;  %v7742_v35 = vrot.slane %v7735_v52, 2  ;;  %v3084_v49 = vld [vmem:[%s9223_s3 + $0x60] sm:$0xff] }
 0x335   : > { %v2398_v8 = vpop.f32.mrf.mxu3  ;;  %v1794_v31 = vadd.f32 %v9873_v44, %v1702_v38  ;;  %v2926_v38 = vrot.slane %v7790_v1, 1  ;;  %v7811_v44 = vrot.slane %v7790_v1, 2 }
 0x336   : > { %v2574_v6 = vmax.f32 %v2549_v58, 0.0  ;;  %v2399_v24 = vadd.f32 %v2398_v8, %v2306_v37  ;;  %v3102_v58 = vld [vmem:[%s9223_s3 + $0xf0] sm:$0xff]  ;;  %v2919_v8 = vrot.slane %v7463_v43, 1 }
 0x337   : > { %v7721_v29 = vld.sshfl [vmem:[#allocation1] sm:$0xff pattern:$0x73625140]  ;;  %v1886_v37 = vadd.f32 %v1885_v10, %v1794_v31  ;;  %3843 = vmatpush.msrb.mxu2 %v3102_v58  ;;  %v7813_v31 = vld [vmem:[#allocation2 + $0x88] sm:$0x3f]  ;;  %v4974_v58 = vld [vmem:[#allocation2 + $0x50] sm:$0xff] }
 0x338   : > { %v2666_v5 = vrot.slane %v2574_v6, 2  ;;  %v2667_v18 = vrot.slane %v2574_v6, 4  ;;  %v2668_v62 = vrot.slane %v2574_v6, 6  ;;  %v2491_v13 = vadd.f32 %v2490_v34, %v2399_v24  ;;  %2790 = vst [vmem:[#allocation1] ss:$4 sm:$0xff] %v2574_v6 }
 0x339   : > { %v2955_v34 = vrot.slane %v7463_v43, 2  ;;  %v2921_v42 = vsel %vm285_vm0, %v2919_v8, %v2920_v53  ;;  %3844 = vmatpush.msrb.mxu2 %v3101_v45 }
 0x33a   : > { %v2521_v41 = vadd.f32 %v2491_v13, %v1880_v16  ;;  %2791 = vst [vmem:[#allocation1 + $0x1] ss:$4 sm:$0xff] %v2666_v5  ;;  %v2309_v12 = vpop.f32.mrf.mxu2  ;;  %v7758_v5 = vld [vmem:[#allocation2 + $0x68] sm:$0x3f]  ;;  %v2990_v57 = vrot.slane %v2921_v42, 4  ;;  %v3099_v42 = vld [vmem:[%s9223_s3 + $0xd8] sm:$0xff] }
 0x33b   : > { %2792 = vst [vmem:[#allocation1 + $0x2] ss:$4 sm:$0xff] %v2667_v18  ;;  %v2789_v14 = vld.sshfl [vmem:[#allocation1 + $0x20] sm:$0xff pattern:$0x73625140]  ;;  %v7755_v16 = vsel %vm328_vm1, %v2955_v34, %v7742_v35  ;;  %v7764_v23 = vrot.slane %v7758_v5, 2  ;;  %3845 = vmatpush.msrb.mxu2 %v3100_v7 }
 0x33c   : > { %v2493_v21 = vpop.f32.mrf.mxu0  ;;  %v2550_v28 = vadd.f32 %v7663_v48, %v2521_v41  ;;  %2793 = vst [vmem:[#allocation1 + $0x3] ss:$4 sm:$0xff] %v2668_v62  ;;  %v9371_v43 = vrot.slane %v7755_v16, 4  ;;  %v2923_v47 = vrot.slane %v7758_v5, 1 }
 0x33d   : > { %v2401_v61 = vpop.f32.mrf.mxu3  ;;  %2859 = vst [vmem:[#allocation2 + $0xa0] sm:$0x3f] %v2789_v14  ;;  %v4973_v14 = vld [vmem:[#allocation2 + $0xd8] sm:$0xff]  ;;  %3846 = vmatpush.msrb.mxu2 %v3099_v42 }
 0x33e   : > { %v2575_v59 = vmax.f32 %v2550_v28, 0.0  ;;  %v2402_v32 = vadd.f32 %v2401_v61, %v2309_v12  ;;  %v7778_v12 = vsel %vm429_vm3, %v2990_v57, %v4973_v14  ;;  %v7782_v61 = vsel %vm328_vm1, %v2958_v56, %v7764_v23 }
 0x340   : > { %v2669_v50 = vrot.slane %v2575_v59, 2  ;;  %v2670_v30 = vrot.slane %v2575_v59, 4  ;;  %v2671_v63 = vrot.slane %v2575_v59, 6  ;;  %v2494_v40 = vadd.f32 %v2493_v21, %v2402_v32  ;;  %2794 = vst [vmem:[#allocation1 + $0x20] ss:$4 sm:$0xff] %v2575_v59 }
 0x341   : > { %v2922_v21 = vrot.slane %v7491_v17, 1  ;;  %v7787_v32 = vsel %vm429_vm3, %v4973_v14, %v2990_v57 }
 0x342   : > { %v2522_v0 = vadd.f32 %v2494_v40, %v1883_v4  ;;  %2795 = vst [vmem:[#allocation1 + $0x21] ss:$4 sm:$0xff] %v2669_v50  ;;  %v2312_v46 = vpop.f32.mrf.mxu2  ;;  %v9370_v4 = vrot.slane %v7778_v12, 4  ;;  %v2991_v40 = vrot.slane %v2920_v53, 4 }
 0x343   : > { %v7738_v51 = vld.sshfl [vmem:[#allocation1] sm:$0xff pattern:$0x73625140]  ;;  %2796 = vst [vmem:[#allocation1 + $0x22] ss:$4 sm:$0xff] %v2670_v30  ;;  %v2924_v19 = vsel %vm285_vm0, %v2922_v21, %v2923_v47 }
 0x344   : > { %v2551_v2 = vadd.f32 %v7663_v48, %v2522_v0  ;;  %v2496_v20 = vpop.f32.mrf.mxu0  ;;  %2799 = vst [vmem:[#allocation1] ss:$4 sm:$0xff] %v2671_v63  ;;  %v2992_v30 = vrot.slane %v2924_v19, 4  ;;  %v7796_v63 = vrot.slane %v7782_v61, 4 }
 0x345   : > { %v2404_v27 = vpop.f32.mrf.mxu3 }
 0x346   : > { %v2576_v33 = vmax.f32 %v2551_v2, 0.0  ;;  %v2405_v36 = vadd.f32 %v2404_v27, %v2312_v46  ;;  %v3023_v0 = vsel %vm429_vm3, %v2992_v30, %v7491_v17  ;;  %v2925_v2 = vrot.slane %v7510_v39, 1 }
 0x347   : > { %v2993_v46 = vrot.slane %v2923_v47, 4  ;;  %v2961_v27 = vrot.slane %v7510_v39, 2  ;;  %v7821_v53 = vrot.slane %v3023_v0, 4  ;;  %v7827_v26 = vsel %vm429_vm3, %v4974_v58, %v2992_v30  ;;  %v7893_v0 = vld [vmem:[#allocation2 + $0x90] sm:$0x3f] }
 0x348   : > { %v2672_v6 = vrot.slane %v2576_v33, 2  ;;  %v2673_v24 = vrot.slane %v2576_v33, 4  ;;  %v2497_v25 = vadd.f32 %v2496_v20, %v2405_v36  ;;  %2800 = vst [vmem:[#allocation1 + $0x1] ss:$4 sm:$0xff] %v2576_v33  ;;  %v2674_v18 = vrot.slane %v2576_v33, 6 }
 0x349   : > { %v7818_v20 = vsel %vm429_vm3, %v7735_v52, %v2991_v40  ;;  %v2927_v17 = vsel %vm285_vm0, %v2925_v2, %v2926_v38  ;;  %v2929_v33 = vrot.slane %v7813_v31, 1  ;;  %v7831_v52 = vsel %vm328_vm1, %v2961_v27, %v7811_v44 }
 0x34a   : > { %v2523_v62 = vadd.f32 %v2497_v25, %v1886_v37  ;;  %2801 = vst [vmem:[#allocation1 + $0x2] ss:$4 sm:$0xff] %v2672_v6  ;;  %v2798_v13 = vld.sshfl [vmem:[#allocation1 + $0x20] sm:$0xff pattern:$0x73625140]  ;;  %v7836_v8 = vsel %vm429_vm3, %v7758_v5, %v2993_v46  ;;  %v2994_v6 = vrot.slane %v2927_v17, 4 }
 0x34b   : > { %2802 = vst [vmem:[#allocation1 + $0x3] ss:$4 sm:$0xff] %v2673_v24  ;;  %v2928_v24 = vrot.slane %v7535_v9, 1  ;;  %v7841_v25 = vrot.slane %v7813_v31, 2  ;;  %v2967_v30 = vrot.slane %v7554_v11, 2 }
 0x34c   : > { %v2552_v3 = vadd.f32 %v7663_v48, %v2523_v62  ;;  %3188 = vst [vmem:[#allocation1 + $0x10] ss:$2 sm:$0xff] %v7755_v16  ;;  %v3085_v48 = vld [vmem:[%s9223_s3 + $0x68] sm:$0xff]  ;;  %v7848_v62 = vrot.slane %v7831_v52, 4  ;;  %v3028_v57 = vsel %vm429_vm3, %v2994_v6, %v7510_v39  ;;  %v7872_v14 = vsel %vm429_vm3, %v7510_v39, %v2994_v6 }
 0x34d   : > { %3190 = vst [vmem:[#allocation1 + $0x11] ss:$2 sm:$0xff] %v9371_v43  ;;  %3773 = vmatpush.msrb.mxu1 %v3085_v48  ;;  %v2930_v5 = vsel %vm285_vm0, %v2928_v24, %v2929_v33  ;;  %v7874_v19 = vrot.slane %v3028_v57, 4  ;;  %v7924_v24 = vrot.slane %v7893_v0, 2 }
 0x34e   : > { %v2577_v41 = vmax.f32 %v2552_v3, 0.0  ;;  %2803 = vst [vmem:[#allocation1 + $0x20] ss:$4 sm:$0xff] %v2674_v18  ;;  %v7855_v3 = vld [vmem:[#allocation2 + $0x58] sm:$0x3f]  ;;  %v2996_v56 = vrot.slane %v2930_v5, 4 }
 0x34f   : > { %2861 = vst [vmem:[#allocation2 + $0x10] sm:$0x3f] %v2798_v13  ;;  %3774 = vmatpush.msrb.mxu1 %v3084_v49  ;;  %v2964_v13 = vrot.slane %v7535_v9, 2  ;;  %v2932_v45 = vrot.slane %v7855_v3, 1  ;;  %v7868_v48 = vrot.slane %v7855_v3, 2 }
 0x350   : > { %v2675_v28 = vrot.slane %v2577_v41, 2  ;;  %2804 = vst [vmem:[#allocation1 + $0x21] ss:$4 sm:$0xff] %v2577_v41  ;;  %v2995_v41 = vrot.slane %v2926_v38, 4  ;;  %v3098_v38 = vld [vmem:[%s9223_s3 + $0xd0] sm:$0xff]  ;;  %v7898_v2 = vsel %vm429_vm3, %v7535_v9, %v2996_v56  ;;  %v3033_v27 = vsel %vm429_vm3, %v2996_v56, %v7535_v9 }
 0x351   : > { %3198 = vst [vmem:[#allocation1 + $0x31] ss:$2 sm:$0xff] %v7782_v61  ;;  %v7863_v47 = vsel %vm328_vm1, %v2964_v13, %v7841_v25  ;;  %v7905_v46 = vsel %vm328_vm1, %v2967_v30, %v7868_v48  ;;  %3847 = vmatpush.msrb.mxu2 %v3098_v38  ;;  %v7918_v6 = vrot.slane %v3033_v27, 4  ;;  %v2934_v9 = vrot.slane %v7575_v22, 1  ;;  %v3082_v56 = vld [vmem:[%s9223_s3 + $0x50] sm:$0xff] }
 0x352   : > { %v2806_v59 = vld.sshfl [vmem:[#allocation1] sm:$0xff pattern:$0x73625140]  ;;  %2805 = vst [vmem:[#allocation1 + $0x22] ss:$4 sm:$0xff] %v2675_v28  ;;  %v7884_v39 = vsel %vm429_vm3, %v7790_v1, %v2995_v41  ;;  %v7901_v1 = vrot.slane %v7863_v47, 4 }
 0x353   : > { %2862 = vst [vmem:[#allocation2 + $0xc8] sm:$0xff] %v2806_v59  ;;  %v3083_v59 = vld [vmem:[%s9223_s3 + $0x58] sm:$0xff]  ;;  %v7915_v58 = vrot.slane %v7905_v46, 4  ;;  %v2970_v41 = vrot.slane %v7575_v22, 2  ;;  %v2999_v38 = vrot.slane %v2932_v45, 4 }
 0x354   : > { %v3201_v50 = vld.sshfl [vmem:[#allocation1 + $0x10] sm:$0xff pattern:$0x75316420]  ;;  %3184 = vst [vmem:[#allocation1] ss:$2 sm:$0xff] %v7787_v32  ;;  %3775 = vmatpush.msrb.mxu1 %v3083_v59 }
 0x355   : > { %3529 = vmatmul.f32.vlgmr.msra.gmra.mxu3 %v3201_v50  ;;  %3186 = vst [vmem:[#allocation1 + $0x1] ss:$2 sm:$0xff] %v9370_v4  ;;  %v2931_v50 = vrot.slane %v7554_v11, 1  ;;  %v7952_v30 = vsel %vm328_vm1, %v2970_v41, %v7924_v24 }
 0x356   : > { %3196 = vst [vmem:[#allocation1 + $0x30] ss:$2 sm:$0xff] %v7742_v35  ;;  %3776 = vmatpush.msrb.mxu1 %v3082_v56  ;;  %v7964_v27 = vrot.slane %v7952_v30, 4  ;;  %v2973_v56 = vrot.slane %v7595_v15, 2 }
 0x357   : > { %3207 = vst [vmem:[#allocation1 + $0x10] ss:$2 sm:$0xff] %v7796_v63  ;;  %v2933_v49 = vsel %vm285_vm0, %v2931_v50, %v2932_v45 }
 0x358   : > { %3208 = vst [vmem:[#allocation1 + $0x11] ss:$2 sm:$0xff] %v7764_v23 }
 0x359   : > { %v2807_v10 = vld.sshfl [vmem:[#allocation1 + $0x20] sm:$0xff pattern:$0x73625140]  ;;  %9874 = vst [vmem:[#allocation38_spill] sm:$0xff] %v7841_v25 }
 0x35a   : > { %2863 = vst [vmem:[#allocation2 + $0x70] sm:$0x3f] %v2807_v10 }
 0x35b   : > { %3192 = vst [vmem:[#allocation1 + $0x20] ss:$2 sm:$0xff] %v7818_v20 }
 0x35c   : > { %v3199_v36 = vld.sshfl [vmem:[#allocation1] sm:$0xff pattern:$0x75316420]  ;;  %v3200_v34 = vld.sshfl [vmem:[#allocation1 + $0x8] sm:$0xff pattern:$0x75316420] }
 0x35d   : > { %3387 = vmatmul.f32.vlgmr.msra.gmra.mxu1 %v3199_v36  ;;  %3458 = vmatmul.f32.vlgmr.msra.gmra.mxu2 %v3200_v34  ;;  %v3204_v37 = vld.sshfl [vmem:[#allocation1 + $0x30] sm:$0xff pattern:$0x75316420]  ;;  %3194 = vst [vmem:[#allocation1 + $0x21] ss:$2 sm:$0xff] %v7827_v26  ;;  %v2998_v36 = vrot.slane %v2933_v49, 4 }
 0x35e   : > { %3532 = vmatmul.f32.gmra.mxu3 %v3204_v37  ;;  %3205 = vst [vmem:[#allocation1] ss:$2 sm:$0xff] %v7821_v53  ;;  %v2997_v34 = vrot.slane %v2929_v33, 4  ;;  %v2935_v37 = vrot.slane %v7893_v0, 1  ;;  %v7926_v33 = vld [vmem:[#allocation2 + $0xb8] sm:$0x3f] }
 0x35f   : > { %3206 = vst [vmem:[#allocation1 + $0x1] ss:$2 sm:$0xff] %v7836_v8  ;;  %v3215_v18 = vld.sshfl [vmem:[#allocation1 + $0x10] sm:$0xff pattern:$0x75316420]  ;;  %v3038_v5 = vsel %vm429_vm3, %v2998_v36, %v7554_v11  ;;  %v7946_v59 = vsel %vm429_vm3, %v7554_v11, %v2998_v36  ;;  %v2937_v11 = vrot.slane %v7595_v15, 1 }
 0x360   : > { %3211 = vst [vmem:[#allocation1 + $0x30] ss:$2 sm:$0xff] %v7831_v52  ;;  %v7932_v13 = vsel %vm429_vm3, %v7813_v31, %v2997_v34  ;;  %v2936_v57 = vsel %vm285_vm0, %v2934_v9, %v2935_v37  ;;  %v7948_v50 = vrot.slane %v3038_v5, 4  ;;  %v3001_v36 = vrot.slane %v2935_v37, 4  ;;  %v3081_v5 = vld [vmem:[%s9223_s3 + $0x48] sm:$0xff]  ;;  %v3096_v37 = vld [vmem:[%s9223_s3 + $0xc0] sm:$0xff] }
 0x361   : > { %3212 = vst [vmem:[#allocation1 + $0x31] ss:$2 sm:$0xff] %v7848_v62  ;;  %v3000_v49 = vrot.slane %v2936_v57, 4  ;;  %v7969_v45 = vrot.slane %v7926_v33, 2  ;;  %3777 = vmatpush.msrb.mxu1 %v3081_v5 }
 0x362   : > { %3221 = vst [vmem:[#allocation1 + $0x10] ss:$2 sm:$0xff] %v7811_v44 }
 0x363   : > { %3222 = vst [vmem:[#allocation1 + $0x11] ss:$2 sm:$0xff] %v7863_v47  ;;  %v3043_v9 = vsel %vm429_vm3, %v3000_v49, %v7575_v22  ;;  %v7989_v41 = vsel %vm429_vm3, %v7575_v22, %v3000_v49  ;;  %v8006_v22 = vsel %vm429_vm3, %v7893_v0, %v3001_v36  ;;  %v3080_v0 = vld [vmem:[%s9223_s3 + $0x40] sm:$0xff] }
 0x364   : > { %9875 = vst [vmem:[#allocation47_spill] sm:$0xff] %v7868_v48  ;;  %v3202_v21 = vld.sshfl [vmem:[#allocation1 + $0x20] sm:$0xff pattern:$0x75316420]  ;;  %3778 = vmatpush.msrb.mxu1 %v3080_v0 }
 0x365   : > { %v3203_v28 = vld.sshfl [vmem:[#allocation1 + $0x28] sm:$0xff pattern:$0x75316420]  ;;  %3390 = vmatmul.f32.gmra.mxu1 %v3202_v21  ;;  %9876 = vst [vmem:[#allocation48_spill] sm:$0xff] %v7905_v46 }
 0x366   : > { %3461 = vmatmul.f32.gmra.mxu2 %v3203_v28  ;;  %3209 = vst [vmem:[#allocation1 + $0x20] ss:$2 sm:$0xff] %v7872_v14  ;;  %3535 = vmatmul.f32.gmra.mxu3 %v3215_v18  ;;  %v3213_v40 = vld.sshfl [vmem:[#allocation1] sm:$0xff pattern:$0x75316420]  ;;  %v3097_v21 = vld [vmem:[%s9223_s3 + $0xc8] sm:$0xff] }
 0x367   : > { %v3214_v7 = vld.sshfl [vmem:[#allocation1 + $0x8] sm:$0xff pattern:$0x75316420]  ;;  %3210 = vst [vmem:[#allocation1 + $0x21] ss:$2 sm:$0xff] %v7874_v19  ;;  %3848 = vmatpush.msrb.mxu2 %v3097_v21 }
 0x368   : > { %v3218_v10 = vld.sshfl [vmem:[#allocation1 + $0x30] sm:$0xff pattern:$0x75316420]  ;;  %3219 = vst [vmem:[#allocation1] ss:$2 sm:$0xff] %v7884_v39 }
 0x369   : > { %3220 = vst [vmem:[#allocation1 + $0x1] ss:$2 sm:$0xff] %v7898_v2  ;;  %3849 = vmatpush.msrb.mxu2 %v3096_v37  ;;  %v2976_v37 = vrot.slane %v7615_v55, 2 }
 0x36a   : > { %v3229_v17 = vld.sshfl [vmem:[#allocation1 + $0x10] sm:$0xff pattern:$0x75316420]  ;;  %3225 = vst [vmem:[#allocation1 + $0x30] ss:$2 sm:$0xff] %v7901_v1 }
 0x36b   : > { %3226 = vst [vmem:[#allocation1 + $0x31] ss:$2 sm:$0xff] %v7841_v25 }
 0x36c   : > { %9877 = vst [vmem:[#allocation49_spill] sm:$0xff] %v7915_v58 }
 0x36d   : > { %3235 = vst [vmem:[#allocation1 + $0x10] ss:$2 sm:$0xff] %v7905_v46  ;;  %3393 = vmatmul.f32.gmra.mxu1 %v3213_v40  ;;  %v2938_v40 = vrot.slane %v7926_v33, 1 }
 0x36e   : > { %3464 = vmatmul.f32.gmra.mxu2 %v3214_v7  ;;  %3236 = vst [vmem:[#allocation1 + $0x11] ss:$2 sm:$0xff] %v7915_v58  ;;  %3538 = vmatmul.f32.gmra.mxu3 %v3218_v10  ;;  %v3216_v42 = vld.sshfl [vmem:[#allocation1 + $0x20] sm:$0xff pattern:$0x75316420] }
 0x36f   : > { %9878 = vst [vmem:[#allocation50_spill] sm:$0xff] %v7924_v24  ;;  %v3217_v18 = vld.sshfl [vmem:[#allocation1 + $0x28] sm:$0xff pattern:$0x75316420]  ;;  %v2939_v34 = vsel %vm285_vm0, %v2937_v11, %v2938_v40  ;;  %v7992_v11 = vrot.slane %v3043_v9, 4  ;;  %v2940_v9 = vrot.slane %v7615_v55, 1 }
 0x370   : > { %3223 = vst [vmem:[#allocation1 + $0x20] ss:$2 sm:$0xff] %v7918_v6  ;;  %v3227_v28 = vld.sshfl [vmem:[#allocation1] sm:$0xff pattern:$0x75316420]  ;;  %v3002_v21 = vrot.slane %v2939_v34, 4 }
 0x371   : > { %3224 = vst [vmem:[#allocation1 + $0x21] ss:$2 sm:$0xff] %v7932_v13  ;;  %v3228_v31 = vld.sshfl [vmem:[#allocation1 + $0x8] sm:$0xff pattern:$0x75316420] }
 0x372   : > { %9879 = vst [vmem:[#allocation43_spill] sm:$0xff] %v7952_v30  ;;  %v3232_v7 = vld.sshfl [vmem:[#allocation1 + $0x30] sm:$0xff pattern:$0x75316420]  ;;  %v3048_v34 = vsel %vm429_vm3, %v3002_v21, %v7595_v15 }
 0x373   : > { %3233 = vst [vmem:[#allocation1] ss:$2 sm:$0xff] %v7946_v59 }
 0x374   : > { %3234 = vst [vmem:[#allocation1 + $0x1] ss:$2 sm:$0xff] %v7948_v50 }
 0x375   : > { %v7960_v10 = vld.sshfl [vmem:[#allocation1 + $0x10] sm:$0xff pattern:$0x75316420]  ;;  %3239 = vst [vmem:[#allocation1 + $0x30] ss:$2 sm:$0xff] %v7868_v48  ;;  %3396 = vmatmul.f32.gmra.mxu1 %v3216_v42 }
 0x376   : > { %9880 = vst [vmem:[#allocation44_spill] sm:$0xff] %v7964_v27  ;;  %3467 = vmatmul.f32.gmra.mxu2 %v3217_v18  ;;  %3541 = vmatmul.f32.gmra.mxu3 %v3229_v17  ;;  %v7980_v42 = vld [vmem:[#allocation2 + $0x28] sm:$0x3f]  ;;  %v7984_v17 = vsel %vm429_vm3, %v7855_v3, %v2999_v38  ;;  %v8002_v38 = vsel %vm328_vm1, %v2973_v56, %v7969_v45 }
 0x377   : > { %3240 = vst [vmem:[#allocation1 + $0x31] ss:$2 sm:$0xff] %v7952_v30  ;;  %v2941_v4 = vrot.slane %v7980_v42, 1  ;;  %v8017_v5 = vrot.slane %v8002_v38, 4  ;;  %v8026_v56 = vrot.slane %v7980_v42, 2  ;;  %v2982_v30 = vrot.slane %v7686_v54, 2 }
 0x378   : > { %9881 = vst [vmem:[#allocation45_spill] sm:$0xff] %v7969_v45  ;;  %v3230_v18 = vld.sshfl [vmem:[#allocation1 + $0x20] sm:$0xff pattern:$0x75316420] }
 0x379   : > { %3249 = vst [vmem:[#allocation1 + $0x10] ss:$2 sm:$0xff] %v7964_v27  ;;  %v3231_v57 = vld.sshfl [vmem:[#allocation1 + $0x28] sm:$0xff pattern:$0x75316420]  ;;  %v2942_v36 = vsel %vm285_vm0, %v2940_v9, %v2941_v4  ;;  %v8039_v9 = vsel %vm429_vm3, %v7595_v15, %v3002_v21  ;;  %v2943_v21 = vrot.slane %v7637_v60, 1 }
 0x37a   : > { %3237 = vst [vmem:[#allocation1 + $0x20] ss:$2 sm:$0xff] %v7984_v17  ;;  %v3004_v27 = vrot.slane %v2942_v36, 4  ;;  %v3095_v36 = vld [vmem:[%s9223_s3 + $0xb8] sm:$0xff] }
 0x37b   : > { %9882 = vst [vmem:[#allocation46_spill] sm:$0xff] %v7989_v41  ;;  %v7996_v43 = vld.sshfl [vmem:[#allocation1] sm:$0xff pattern:$0x75316420]  ;;  %3850 = vmatpush.msrb.mxu2 %v3095_v36 }
 0x37c   : > { %9883 = vst [vmem:[#allocation55_spill] sm:$0xff] %v7992_v11  ;;  %v7998_v3 = vld.sshfl [vmem:[#allocation1 + $0x8] sm:$0xff pattern:$0x75316420] }
 0x37d   : > { %3238 = vst [vmem:[#allocation1 + $0x21] ss:$2 sm:$0xff] %v7989_v41  ;;  %3399 = vmatmul.f32.gmra.mxu1 %v3227_v28  ;;  %v3003_v28 = vrot.slane %v2938_v40, 4  ;;  %v8045_v40 = vsel %vm328_vm1, %v2976_v37, %v8026_v56  ;;  %v3005_v37 = vrot.slane %v2941_v4, 4  ;;  %v3079_v4 = vld [vmem:[%s9223_s3 + $0x38] sm:$0xff] }
 0x37e   : > { %9884 = vst [vmem:[#allocation56_spill] sm:$0xff] %v8002_v38  ;;  %v8009_v49 = vld.sshfl [vmem:[#allocation1 + $0x30] sm:$0xff pattern:$0x75316420]  ;;  %3470 = vmatmul.f32.gmra.mxu2 %v3228_v31  ;;  %3544 = vmatmul.f32.gmra.mxu3 %v3232_v7  ;;  %v8028_v31 = vrot.slane %v3048_v34, 4 }
 0x37f   : > { %9885 = vst [vmem:[#allocation58_spill] sm:$0xff] %v8006_v22  ;;  %v8031_v7 = vld [vmem:[#allocation2 + $0x60] sm:$0x3f]  ;;  %3779 = vmatpush.msrb.mxu1 %v3079_v4 }
 0x380   : > { %3247 = vst [vmem:[#allocation1] ss:$2 sm:$0xff] %v7992_v11  ;;  %v2944_v34 = vrot.slane %v8031_v7, 1 }
 0x381   : > { %3248 = vst [vmem:[#allocation1 + $0x1] ss:$2 sm:$0xff] %v8006_v22  ;;  %v8054_v22 = vsel %vm429_vm3, %v7926_v33, %v3003_v28  ;;  %v8067_v33 = vrot.slane %v8045_v40, 4  ;;  %v8070_v28 = vrot.slane %v8031_v7, 2 }
 0x382   : > { %3250 = vst [vmem:[#allocation1 + $0x11] ss:$2 sm:$0xff] %v7924_v24 }
 0x383   : > { %9886 = vst [vmem:[#allocation57_spill] sm:$0xff] %v8017_v5 }
 0x384   : > { %3253 = vst [vmem:[#allocation1 + $0x30] ss:$2 sm:$0xff] %v8002_v38  ;;  %v8033_v38 = vld.sshfl [vmem:[#allocation1 + $0x20] sm:$0xff pattern:$0x75316420] }
 0x385   : > { %9887 = vst [vmem:[#allocation51_spill] sm:$0xff] %v8026_v56  ;;  %v8035_v24 = vld.sshfl [vmem:[#allocation1 + $0x28] sm:$0xff pattern:$0x75316420]  ;;  %3402 = vmatmul.f32.gmra.mxu1 %v3230_v18 }
 0x386   : > { %9888 = vst [vmem:[#allocation53_spill] sm:$0xff] %v8028_v31  ;;  %3473 = vmatmul.f32.gmra.mxu2 %v3231_v57  ;;  %3547 = vmatmul.f32.gmra.mxu3 %v7960_v10  ;;  %v8077_v57 = vsel %vm429_vm3, %v7615_v55, %v3004_v27 }
 0x387   : > { %3254 = vst [vmem:[#allocation1 + $0x31] ss:$2 sm:$0xff] %v8017_v5 }
 0x388   : > { %9889 = vst [vmem:[#allocation54_spill] sm:$0xff] %v8039_v9  ;;  %v8048_v0 = vld.sshfl [vmem:[#allocation1] sm:$0xff pattern:$0x75316420] }
 0x389   : > { %3251 = vst [vmem:[#allocation1 + $0x20] ss:$2 sm:$0xff] %v8039_v9  ;;  %v8050_v5 = vld.sshfl [vmem:[#allocation1 + $0x8] sm:$0xff pattern:$0x75316420] }
 0x38a   : > { %3252 = vst [vmem:[#allocation1 + $0x21] ss:$2 sm:$0xff] %v8028_v31  ;;  %v8056_v15 = vld.sshfl [vmem:[#allocation1 + $0x10] sm:$0xff pattern:$0x75316420]  ;;  %v3053_v31 = vsel %vm429_vm3, %v3004_v27, %v7615_v55  ;;  %v2979_v55 = vrot.slane %v7637_v60, 2 }
 0x38b   : > { %9890 = vst [vmem:[#allocation63_spill] sm:$0xff] %v8045_v40  ;;  %v8087_v10 = vrot.slane %v3053_v31, 4 }
 0x38c   : > { %9891 = vst [vmem:[#allocation64_spill] sm:$0xff] %v8054_v22 }
 0x38d   : > { %3261 = vst [vmem:[#allocation1] ss:$2 sm:$0xff] %v8054_v22  ;;  %v8085_v22 = vld [vmem:[#allocation2 + $0xa8] sm:$0x3f]  ;;  %3405 = vmatmul.f32.gmra.mxu1 %v7996_v43 }
 0x38e   : > { %3263 = vst [vmem:[#allocation1 + $0x10] ss:$2 sm:$0xff] %v7969_v45  ;;  %v8073_v18 = vld.sshfl [vmem:[#allocation1 + $0x30] sm:$0xff pattern:$0x75316420]  ;;  %v2945_v45 = vsel %vm285_vm0, %v2943_v21, %v2944_v34  ;;  %v8102_v21 = vsel %vm328_vm1, %v2979_v55, %v8070_v28  ;;  %v2947_v4 = vrot.slane %v8085_v22, 1  ;;  %3476 = vmatmul.f32.gmra.mxu2 %v7998_v3  ;;  %3550 = vmatmul.f32.gmra.mxu3 %v8009_v49 }
 0x38f   : > { %9892 = vst [vmem:[#allocation59_spill] sm:$0xff] %v8067_v33  ;;  %v3006_v31 = vrot.slane %v2945_v45, 4  ;;  %v8115_v55 = vld [vmem:[#allocation2 + $0xa0] sm:$0x3f]  ;;  %v3094_v3 = vld [vmem:[%s9223_s3 + $0xb0] sm:$0xff]  ;;  %v8133_v49 = vrot.slane %v8085_v22, 2 }
 0x390   : > { %9893 = vst [vmem:[#allocation62_spill] sm:$0xff] %v8070_v28  ;;  %3851 = vmatpush.msrb.mxu2 %v3094_v3  ;;  %v8165_v3 = vld [vmem:[#allocation2 + $0x10] sm:$0x3f] }
 0x391   : > { %9894 = vst [vmem:[#allocation68_spill] sm:$0xff] %v8077_v57  ;;  %v8091_v27 = vld.sshfl [vmem:[#allocation1 + $0x20] sm:$0xff pattern:$0x75316420]  ;;  %v8137_v9 = vsel %vm429_vm3, %v7637_v60, %v3006_v31 }
 0x392   : > { %3264 = vst [vmem:[#allocation1 + $0x11] ss:$2 sm:$0xff] %v8045_v40  ;;  %v8093_v36 = vld.sshfl [vmem:[#allocation1 + $0x28] sm:$0xff pattern:$0x75316420]  ;;  %v8097_v40 = vsel %vm429_vm3, %v7980_v42, %v3005_v37  ;;  %v8113_v37 = vrot.slane %v8102_v21, 4 }
 0x393   : > { %3262 = vst [vmem:[#allocation1 + $0x1] ss:$2 sm:$0xff] %v8077_v57  ;;  %v3007_v57 = vrot.slane %v2944_v34, 4 }
 0x394   : > { %9895 = vst [vmem:[#allocation69_spill] sm:$0xff] %v8087_v10 }
 0x395   : > { %3267 = vst [vmem:[#allocation1 + $0x30] ss:$2 sm:$0xff] %v8067_v33  ;;  %v2946_v33 = vrot.slane %v7686_v54, 1  ;;  %3408 = vmatmul.f32.gmra.mxu1 %v8033_v38  ;;  %v3077_v38 = vld [vmem:[%s9223_s3 + $0x28] sm:$0xff] }
 0x396   : > { %9896 = vst [vmem:[#allocation70_spill] sm:$0xff] %v8097_v40  ;;  %3479 = vmatmul.f32.gmra.mxu2 %v8035_v24  ;;  %3553 = vmatmul.f32.gmra.mxu3 %v8056_v15 }
 0x397   : > { %3265 = vst [vmem:[#allocation1 + $0x20] ss:$2 sm:$0xff] %v8087_v10  ;;  %v2948_v43 = vsel %vm285_vm0, %v2946_v33, %v2947_v4  ;;  %v3078_v10 = vld [vmem:[%s9223_s3 + $0x30] sm:$0xff] }
 0x398   : > { %9897 = vst [vmem:[#allocation78_spill] sm:$0xff] %v8102_v21  ;;  %3780 = vmatpush.msrb.mxu1 %v3078_v10  ;;  %v3008_v34 = vrot.slane %v2948_v43, 4  ;;  %v3009_v43 = vrot.slane %v2947_v4, 4 }
 0x399   : > { %3266 = vst [vmem:[#allocation1 + $0x21] ss:$2 sm:$0xff] %v8097_v40  ;;  %v8110_v42 = vld.sshfl [vmem:[#allocation1 + $0x10] sm:$0xff pattern:$0x75316420] }
 0x39a   : > { %3268 = vst [vmem:[#allocation1 + $0x31] ss:$2 sm:$0xff] %v8026_v56  ;;  %v8118_v45 = vld.sshfl [vmem:[#allocation1] sm:$0xff pattern:$0x75316420]  ;;  %v3058_v56 = vsel %vm429_vm3, %v3006_v31, %v7637_v60  ;;  %v8153_v60 = vsel %vm429_vm3, %v8031_v7, %v3007_v57  ;;  %v2949_v31 = vrot.slane %v7721_v29, 1  ;;  %v8179_v24 = vsel %vm429_vm3, %v7686_v54, %v3008_v34  ;;  %3781 = vmatpush.msrb.mxu1 %v3077_v38 }
 0x39b   : > { %9898 = vst [vmem:[#allocation96_spill] sm:$0xff] %v8113_v37  ;;  %v8120_v40 = vld.sshfl [vmem:[#allocation1 + $0x8] sm:$0xff pattern:$0x75316420]  ;;  %v8140_v33 = vrot.slane %v3058_v56, 4  ;;  %v8158_v56 = vsel %vm328_vm1, %v2982_v30, %v8133_v49  ;;  %v4877_v7 = vld [vmem:[%s9223_s3 + $0x378] sm:$0xff]  ;;  %v3063_v57 = vsel %vm429_vm3, %v3008_v34, %v7686_v54 }
 0x39c   : > { %3277 = vst [vmem:[#allocation1 + $0x10] ss:$2 sm:$0xff] %v8102_v21  ;;  %v2950_v21 = vrot.slane %v8115_v55, 1  ;;  %v3093_v30 = vld [vmem:[%s9223_s3 + $0xa8] sm:$0xff]  ;;  %v8184_v15 = vrot.slane %v8158_v56, 4  ;;  %4235 = vmatpush.msra.mxu0 %v4877_v7  ;;  %v8195_v54 = vrot.slane %v3063_v57, 4  ;;  %v8206_v7 = vsel %vm429_vm3, %v8085_v22, %v3009_v43 }
 0x39d   : > { %9899 = vst [vmem:[#allocation65_spill] sm:$0xff] %v8133_v49  ;;  %3852 = vmatpush.msrb.mxu2 %v3093_v30  ;;  %v2985_v34 = vrot.slane %v7721_v29, 2  ;;  %v3122_v57 = vrot.slane %v7738_v51, 1  ;;  %3411 = vmatmul.f32.gmra.mxu1 %v8048_v0 }
 0x39e   : > { %3278 = vst [vmem:[#allocation1 + $0x11] ss:$2 sm:$0xff] %v8113_v37  ;;  %v2951_v4 = vsel %vm285_vm0, %v2949_v31, %v2950_v21  ;;  %v8192_v37 = vrot.slane %v8115_v55, 2  ;;  %v3123_v31 = vrot.slane %v8165_v3, 1  ;;  %3482 = vmatmul.f32.gmra.mxu2 %v8050_v5  ;;  %3556 = vmatmul.f32.gmra.mxu3 %v8073_v18 }
 0x39f   : > { %9900 = vst [vmem:[#allocation72_spill] sm:$0xff] %v8140_v33 }
 0x3a0   : > { %3275 = vst [vmem:[#allocation1] ss:$2 sm:$0xff] %v8137_v9  ;;  %v8145_v11 = vld.sshfl [vmem:[#allocation1 + $0x20] sm:$0xff pattern:$0x75316420]  ;;  %v8211_v38 = vsel %vm328_vm1, %v2985_v34, %v8192_v37  ;;  %v3124_v43 = vsel %vm285_vm0, %v3122_v57, %v3123_v31  ;;  %v3011_v57 = vrot.slane %v2950_v21, 4 }
 0x3a1   : > { %v8147_v41 = vld.sshfl [vmem:[#allocation1 + $0x28] sm:$0xff pattern:$0x75316420]  ;;  %v8149_v10 = vld.sshfl [vmem:[#allocation1 + $0x30] sm:$0xff pattern:$0x75316420] }
 0x3a2   : > { %9901 = vst [vmem:[#allocation73_spill] sm:$0xff] %v8153_v60  ;;  %v3092_v34 = vld [vmem:[%s9223_s3 + $0xa0] sm:$0xff]  ;;  %v8232_v5 = vrot.slane %v8211_v38, 4  ;;  %v3125_v21 = vrot.slane %v7738_v51, 2 }
 0x3a3   : > { %3276 = vst [vmem:[#allocation1 + $0x1] ss:$2 sm:$0xff] %v8140_v33  ;;  %3853 = vmatpush.msrb.mxu2 %v3092_v34 }
 0x3a4   : > { %9902 = vst [vmem:[#allocation74_spill] sm:$0xff] %v8158_v56 }
 0x3a5   : > { %3279 = vst [vmem:[#allocation1 + $0x20] ss:$2 sm:$0xff] %v8153_v60  ;;  %3414 = vmatmul.f32.gmra.mxu1 %v8091_v27  ;;  %v3119_v27 = vld [vmem:[%s9223_s3 + $0x178] sm:$0xff] }
 0x3a6   : > { %3281 = vst [vmem:[#allocation1 + $0x30] ss:$2 sm:$0xff] %v8070_v28  ;;  %v8188_v28 = vld.sshfl [vmem:[#allocation1 + $0x10] sm:$0xff pattern:$0x75316420]  ;;  %3485 = vmatmul.f32.gmra.mxu2 %v8093_v36  ;;  %3559 = vmatmul.f32.gmra.mxu3 %v8110_v42  ;;  %v3091_v36 = vld [vmem:[%s9223_s3 + $0x98] sm:$0xff] }
 0x3a7   : > { %9903 = vst [vmem:[#allocation79_spill] sm:$0xff] %v8179_v24  ;;  %3913 = vmatpush.msrb.mxu3 %v3119_v27  ;;  %v3118_v42 = vld [vmem:[%s9223_s3 + $0x170] sm:$0xff]  ;;  %3854 = vmatpush.msrb.mxu2 %v3091_v36 }
 0x3a8   : > { %9904 = vst [vmem:[#allocation99_spill] sm:$0xff] %v8184_v15 }
 0x3a9   : > { %3282 = vst [vmem:[#allocation1 + $0x31] ss:$2 sm:$0xff] %v8158_v56  ;;  %v3010_v56 = vrot.slane %v2951_v4, 4  ;;  %3914 = vmatpush.msrb.mxu3 %v3118_v42 }
 0x3aa   : > { %3280 = vst [vmem:[#allocation1 + $0x21] ss:$2 sm:$0xff] %v8179_v24  ;;  %v8200_v60 = vld.sshfl [vmem:[#allocation1] sm:$0xff pattern:$0x75316420]  ;;  %v8246_v24 = vrot.slane %v8165_v3, 2 }
 0x3ab   : > { %9905 = vst [vmem:[#allocation77_spill] sm:$0xff] %v8192_v37  ;;  %v8202_v30 = vld.sshfl [vmem:[#allocation1 + $0x8] sm:$0xff pattern:$0x75316420]  ;;  %v3068_v22 = vsel %vm429_vm3, %v3010_v56, %v7721_v29  ;;  %v8239_v18 = vsel %vm429_vm3, %v7721_v29, %v3010_v56 }
 0x3ac   : > { %3291 = vst [vmem:[#allocation1 + $0x10] ss:$2 sm:$0xff] %v8184_v15 }
 0x3ad   : > { %9906 = vst [vmem:[#allocation75_spill] sm:$0xff] %v8195_v54  ;;  %3417 = vmatmul.f32.gmra.mxu1 %v8118_v45  ;;  %v4875_v45 = vld [vmem:[%s9223_s3 + $0x368] sm:$0xff] }
 0x3ae   : > { %3292 = vst [vmem:[#allocation1 + $0x11] ss:$2 sm:$0xff] %v8133_v49  ;;  %v3076_v49 = vld [vmem:[%s9223_s3 + $0x20] sm:$0xff]  ;;  %3488 = vmatmul.f32.gmra.mxu2 %v8120_v40  ;;  %3562 = vmatmul.f32.gmra.mxu3 %v8149_v10  ;;  %v3090_v40 = vld [vmem:[%s9223_s3 + $0x90] sm:$0xff] }
 0x3af   : > { %9907 = vst [vmem:[#allocation76_spill] sm:$0xff] %v8206_v7  ;;  %3782 = vmatpush.msrb.mxu1 %v3076_v49  ;;  %v8248_v49 = vld [vmem:[#allocation2] sm:$0x3f]  ;;  %3855 = vmatpush.msrb.mxu2 %v3090_v40  ;;  %v4874_v10 = vld [vmem:[%s9223_s3 + $0x360] sm:$0xff] }
 0x3b0   : > { %3289 = vst [vmem:[#allocation1] ss:$2 sm:$0xff] %v8195_v54  ;;  %v8217_v4 = vld.sshfl [vmem:[#allocation1 + $0x30] sm:$0xff pattern:$0x75316420]  ;;  %v3128_v54 = vrot.slane %v3124_v43, 4 }
 0x3b1   : > { %9908 = vst [vmem:[#allocation80_spill] sm:$0xff] %v8211_v38  ;;  %v8229_v0 = vld.sshfl [vmem:[#allocation1 + $0x20] sm:$0xff pattern:$0x75316420]  ;;  %v9919_v42 = vrot.slane %v8248_v49, 2 }
 0x3b2   : > { %3290 = vst [vmem:[#allocation1 + $0x1] ss:$2 sm:$0xff] %v8206_v7  ;;  %v8234_v15 = vld.sshfl [vmem:[#allocation1 + $0x28] sm:$0xff pattern:$0x75316420]  ;;  %v8241_v7 = vrot.slane %v3068_v22, 4  ;;  %v8260_v22 = vsel %vm429_vm3, %v8115_v55, %v3011_v57  ;;  %v8265_v43 = vsel %vm429_vm3, %v3128_v54, %v7738_v51 }
 0x3b3   : > { %9909 = vst [vmem:[#allocation101_spill] sm:$0xff] %v8232_v5  ;;  %v2917_v55 = vrot.slane %v8248_v49, 1  ;;  %v4876_v57 = vld [vmem:[%s9223_s3 + $0x370] sm:$0xff] }
 0x3b4   : > { %3295 = vst [vmem:[#allocation1 + $0x30] ss:$2 sm:$0xff] %v8211_v38  ;;  %v8274_v38 = vsel %vm328_vm1, %v3125_v21, %v8246_v24  ;;  %4236 = vmatpush.msra.mxu0 %v4876_v57  ;;  %v8293_v21 = vsel %vm429_vm3, %v7738_v51, %v3128_v54 }
 0x3b5   : > { %9910 = vst [vmem:[#allocation81_spill] sm:$0xff] %v8239_v18  ;;  %v8250_v34 = vld.sshfl [vmem:[#allocation1 + $0x10] sm:$0xff pattern:$0x75316420]  ;;  %v2989_v40 = vrot.slane %v2917_v55, 4  ;;  %3420 = vmatmul.f32.gmra.mxu1 %v8145_v11 }
 0x3b6   : > { %9911 = vst [vmem:[#allocation52_spill] sm:$0xff] %v8241_v7  ;;  %4237 = vmatpush.msra.mxu0 %v4875_v45  ;;  %3491 = vmatmul.f32.gmra.mxu2 %v8147_v41  ;;  %v4872_v11 = vld [vmem:[%s9223_s3 + $0x350] sm:$0xff] }
 0x3b7   : > { %3296 = vst [vmem:[#allocation1 + $0x31] ss:$2 sm:$0xff] %v8232_v5  ;;  %v8267_v5 = vld [vmem:[#allocation2 + $0xb0] sm:$0xff]  ;;  %3565 = vmatmul.f32.gmra.mxu3 %v8188_v28  ;;  %v3016_v41 = vsel %vm429_vm3, %v8248_v49, %v2989_v40  ;;  %v3089_v40 = vld [vmem:[%s9223_s3 + $0x88] sm:$0xff] }
 0x3b8   : > { %3293 = vst [vmem:[#allocation1 + $0x20] ss:$2 sm:$0xff] %v8239_v18  ;;  %v9918_v18 = vrot.slane %v8265_v43, 4  ;;  %v2952_v33 = vrot.slane %v8267_v5, 2  ;;  %4238 = vmatpush.msra.mxu0 %v4874_v10  ;;  %v3111_v28 = vld [vmem:[%s9223_s3 + $0x138] sm:$0xff]  ;;  %3856 = vmatpush.msrb.mxu2 %v3089_v40 }
 0x3b9   : > { %9912 = vst [vmem:[#allocation82_spill] sm:$0xff] %v8246_v24  ;;  %v8254_v29 = vld.sshfl [vmem:[#allocation1] sm:$0xff pattern:$0x75316420]  ;;  %v4865_v40 = vld [vmem:[%s9223_s3 + $0x318] sm:$0xff] }
 0x3ba   : > { %3294 = vst [vmem:[#allocation1 + $0x21] ss:$2 sm:$0xff] %v8241_v7  ;;  %v8256_v56 = vld.sshfl [vmem:[#allocation1 + $0x8] sm:$0xff pattern:$0x75316420]  ;;  %v2916_v7 = vrot.slane %v8267_v5, 1 }
 0x3bb   : > { %9913 = vst [vmem:[#allocation104_spill] sm:$0xff] %v8260_v22 }
 0x3bc   : > { %3303 = vst [vmem:[#allocation1] ss:$2 sm:$0xff] %v8260_v22  ;;  %v2918_v54 = vsel %vm285_vm0, %v2916_v7, %v2917_v55  ;;  %v9443_v22 = vrot.slane %v8274_v38, 4  ;;  %v2954_v7 = vsel %vm328_vm1, %v2952_v33, %v9919_v42  ;;  %v3115_v33 = vld [vmem:[%s9223_s3 + $0x158] sm:$0xff] }
 0x3bd   : > { %9914 = vst [vmem:[#allocation83_spill] sm:$0xff] %v8265_v43  ;;  %3423 = vmatmul.f32.gmra.mxu1 %v8200_v60  ;;  %v3073_v60 = vld [vmem:[%s9223_s3 + $0x8] sm:$0xff]  ;;  %v9930_v43 = vld [vmem:[#allocation44_spill] sm:$0xff] }
 0x3be   : > { %3305 = vst [vmem:[#allocation1 + $0x10] ss:$2 sm:$0xff] %v8192_v37  ;;  %v3129_v37 = vrot.slane %v3123_v31, 4  ;;  %v3117_v31 = vld [vmem:[%s9223_s3 + $0x168] sm:$0xff]  ;;  %3494 = vmatmul.f32.gmra.mxu2 %v8202_v30 }
 0x3bf   : > { %9915 = vst [vmem:[#allocation60_spill] sm:$0xff] %v8274_v38  ;;  %v8301_v57 = vld.sshfl [vmem:[#allocation1 + $0x30] sm:$0xff pattern:$0x75316420]  ;;  %3915 = vmatpush.msrb.mxu3 %v3117_v31  ;;  %v3015_v31 = vrot.slane %v2954_v7, 4 }
 0x3c0   : > { %3306 = vst [vmem:[#allocation1 + $0x11] ss:$2 sm:$0xff] %v8274_v38  ;;  %v8312_v36 = vsel %vm429_vm3, %v8165_v3, %v3129_v37  ;;  %v3075_v37 = vld [vmem:[%s9223_s3 + $0x18] sm:$0xff]  ;;  %v3116_v3 = vld [vmem:[%s9223_s3 + $0x160] sm:$0xff]  ;;  %3568 = vmatmul.f32.gmra.mxu3 %v8217_v4 }
 0x3c1   : > { %9916 = vst [vmem:[#allocation84_spill] sm:$0xff] %v8293_v21  ;;  %v8304_v27 = vld.sshfl [vmem:[#allocation1 + $0x20] sm:$0xff pattern:$0x75316420]  ;;  %3783 = vmatpush.msrb.mxu1 %v3075_v37  ;;  %3916 = vmatpush.msrb.mxu3 %v3116_v3 }
 0x3c2   : > { %3304 = vst [vmem:[#allocation1 + $0x1] ss:$2 sm:$0xff] %v8293_v21  ;;  %v8306_v51 = vld.sshfl [vmem:[#allocation1 + $0x28] sm:$0xff pattern:$0x75316420]  ;;  %v2988_v21 = vrot.slane %v2918_v54, 4 }
 0x3c3   : > { %9917 = vst [vmem:[#allocation85_spill] sm:$0xff] %v8312_v36  ;;  %v3114_v54 = vld [vmem:[%s9223_s3 + $0x150] sm:$0xff]  ;;  %3917 = vmatpush.msrb.mxu3 %v3115_v33  ;;  %v3113_v33 = vld [vmem:[%s9223_s3 + $0x148] sm:$0xff]  ;;  %v3108_v4 = vld [vmem:[%s9223_s3 + $0x120] sm:$0xff] }
 0x3c4   : > { %3307 = vst [vmem:[#allocation1 + $0x20] ss:$2 sm:$0xff] %v9918_v18  ;;  %v3013_v37 = vsel %vm429_vm3, %v2988_v21, %v8267_v5  ;;  %v9928_v38 = vld [vmem:[#allocation58_spill] sm:$0xff] }
 0x3c5   : > { %3308 = vst [vmem:[#allocation1 + $0x21] ss:$2 sm:$0xff] %v8312_v36  ;;  %3918 = vmatpush.msrb.mxu3 %v3114_v54  ;;  %v3014_v45 = vrot.slane %v3013_v37, 4  ;;  %v9921_v54 = vrot.slane %v7755_v16, 4  ;;  %v4871_v37 = vld [vmem:[%s9223_s3 + $0x348] sm:$0xff]  ;;  %3426 = vmatmul.f32.gmra.mxu1 %v8229_v0  ;;  %v9929_v36 = vld [vmem:[#allocation54_spill] sm:$0xff] }
 0x3c6   : > { %3309 = vst [vmem:[#allocation1 + $0x30] ss:$2 sm:$0xff] %v9443_v22  ;;  %3497 = vmatmul.f32.gmra.mxu2 %v8234_v15  ;;  %v3105_v15 = vld [vmem:[%s9223_s3 + $0x108] sm:$0xff] }
 0x3c7   : > { %v8331_v18 = vld.sshfl [vmem:[#allocation1 + $0x10] sm:$0xff pattern:$0x75316420]  ;;  %3310 = vst [vmem:[#allocation1 + $0x31] ss:$2 sm:$0xff] %v8246_v24  ;;  %3919 = vmatpush.msrb.mxu3 %v3113_v33  ;;  %v3109_v33 = vld [vmem:[%s9223_s3 + $0x128] sm:$0xff] }
 0x3c8   : > { %3588 = vst [vmem:[#allocation1 + $0x10] ss:$2 sm:$0xff] %v2954_v7  ;;  %v3012_v7 = vsel %vm429_vm3, %v8267_v5, %v2988_v21  ;;  %v3074_v5 = vld [vmem:[%s9223_s3 + $0x10] sm:$0xff]  ;;  %v4873_v21 = vld [vmem:[%s9223_s3 + $0x358] sm:$0xff]  ;;  %3571 = vmatmul.f32.gmra.mxu3 %v8250_v34  ;;  %v3072_v34 = vld [vmem:[%s9223_s3] sm:$0xff] }
 0x3c9   : > { %v8350_v42 = vld.sshfl [vmem:[#allocation1] sm:$0xff pattern:$0x75316420]  ;;  %v8354_v3 = vld.sshfl [vmem:[#allocation1 + $0x8] sm:$0xff pattern:$0x75316420]  ;;  %3784 = vmatpush.msrb.mxu1 %v3074_v5  ;;  %4239 = vmatpush.msra.mxu0 %v4873_v21 }
 0x3ca   : > { %3590 = vst [vmem:[#allocation1 + $0x11] ss:$2 sm:$0xff] %v3015_v31  ;;  %v9920_v31 = vrot.slane %v8248_v49, 2  ;;  %v3110_v49 = vld [vmem:[%s9223_s3 + $0x130] sm:$0xff]  ;;  %v4867_v21 = vld [vmem:[%s9223_s3 + $0x328] sm:$0xff] }
 0x3cb   : > { %3584 = vst [vmem:[#allocation1] ss:$2 sm:$0xff] %v3012_v7  ;;  %4240 = vmatpush.msra.mxu0 %v4872_v11  ;;  %3785 = vmatpush.msrb.mxu1 %v3073_v60  ;;  %v4866_v11 = vld [vmem:[%s9223_s3 + $0x320] sm:$0xff] }
 0x3cc   : > { %v8356_v22 = vld.sshfl [vmem:[#allocation1 + $0x20] sm:$0xff pattern:$0x75316420]  ;;  %v8358_v24 = vld.sshfl [vmem:[#allocation1 + $0x28] sm:$0xff pattern:$0x75316420] }
 0x3cd   : > { %3594 = vst [vmem:[#allocation1 + $0x21] ss:$2 sm:$0xff] %v7787_v32  ;;  %v3112_v32 = vld [vmem:[%s9223_s3 + $0x140] sm:$0xff]  ;;  %4241 = vmatpush.msra.mxu0 %v4871_v37  ;;  %v3106_v37 = vld [vmem:[%s9223_s3 + $0x110] sm:$0xff]  ;;  %3786 = vmatpush.msrb.mxu1 %v3072_v34  ;;  %v9924_v34 = vld [vmem:[#allocation55_spill] sm:$0xff] }
 0x3ce   : > { %v8368_v55 = vld.sshfl [vmem:[#allocation1 + $0x30] sm:$0xff pattern:$0x75316420]  ;;  %3586 = vst [vmem:[#allocation1 + $0x1] ss:$2 sm:$0xff] %v3014_v45  ;;  %3920 = vmatpush.msrb.mxu3 %v3112_v32  ;;  %v4869_v32 = vld [vmem:[%s9223_s3 + $0x338] sm:$0xff]  ;;  %3429 = vmatmul.f32.gmra.mxu1 %v8254_v29 }
 0x3cf   : > { %3598 = vst [vmem:[#allocation1 + $0x31] ss:$2 sm:$0xff] %v7755_v16  ;;  %v4870_v16 = vld [vmem:[%s9223_s3 + $0x340] sm:$0xff]  ;;  %3500 = vmatmul.f32.gmra.mxu2 %v8256_v56 }
 0x3d0   : > { %3592 = vst [vmem:[#allocation1 + $0x20] ss:$2 sm:$0xff] %v3016_v41  ;;  %3921 = vmatpush.msrb.mxu3 %v3111_v28  ;;  %4242 = vmatpush.msra.mxu0 %v4870_v16  ;;  %v3088_v41 = vld [vmem:[%s9223_s3 + $0x80] sm:$0xff]  ;;  %v4864_v16 = vld [vmem:[%s9223_s3 + $0x310] sm:$0xff] }
 0x3d1   : > { %v8389_v10 = vld.sshfl [vmem:[#allocation1 + $0x10] sm:$0xff pattern:$0x75316420]  ;;  %3596 = vst [vmem:[#allocation1 + $0x30] ss:$2 sm:$0xff] %v9920_v31  ;;  %3857 = vmatpush.msrb.mxu2 %v3088_v41  ;;  %v3107_v31 = vld [vmem:[%s9223_s3 + $0x118] sm:$0xff]  ;;  %3574 = vmatmul.f32.gmra.mxu3 %v8301_v57 }
 0x3d2   : > { %3607 = vst [vmem:[#allocation1 + $0x10] ss:$2 sm:$0xff] %v9921_v54  ;;  %3922 = vmatpush.msrb.mxu3 %v3110_v49  ;;  %4243 = vmatpush.msra.mxu0 %v4869_v32  ;;  %v4862_v32 = vld [vmem:[%s9223_s3 + $0x300] sm:$0xff] }
 0x3d3   : > { %3608 = vst [vmem:[#allocation1 + $0x11] ss:$2 sm:$0xff] %v7742_v35  ;;  %v9922_v35 = vrot.slane %v7778_v12, 4 }
 0x3d4   : > { %3923 = vmatpush.msrb.mxu3 %v3109_v33 }
 0x3d5   : > { %v8408_v7 = vld.sshfl [vmem:[#allocation1] sm:$0xff pattern:$0x75316420]  ;;  %v8410_v45 = vld.sshfl [vmem:[#allocation1 + $0x8] sm:$0xff pattern:$0x75316420] }
 0x3d6   : > { %3605 = vst [vmem:[#allocation1] ss:$2 sm:$0xff] %v9922_v35  ;;  %3924 = vmatpush.msrb.mxu3 %v3108_v4  ;;  %v4863_v35 = vld [vmem:[%s9223_s3 + $0x308] sm:$0xff]  ;;  %v3104_v4 = vld [vmem:[%s9223_s3 + $0x100] sm:$0xff]  ;;  %3432 = vmatmul.f32.gmra.mxu1 %v8304_v27 }
 0x3d7   : > { %3606 = vst [vmem:[#allocation1 + $0x1] ss:$2 sm:$0xff] %v7818_v20  ;;  %v8429_v30 = vld.sshfl [vmem:[#allocation1 + $0x20] sm:$0xff pattern:$0x75316420]  ;;  %v4868_v20 = vld [vmem:[%s9223_s3 + $0x330] sm:$0xff]  ;;  %3503 = vmatmul.f32.gmra.mxu2 %v8306_v51 }
 0x3d8   : > { %v8427_v12 = vld.sshfl [vmem:[#allocation1 + $0x30] sm:$0xff pattern:$0x75316420]  ;;  %v8435_v5 = vld.sshfl [vmem:[#allocation1 + $0x28] sm:$0xff pattern:$0x75316420]  ;;  %4244 = vmatpush.msra.mxu0 %v4868_v20  ;;  %3925 = vmatpush.msrb.mxu3 %v3107_v31 }
 0x3d9   : > { %3611 = vst [vmem:[#allocation1 + $0x30] ss:$2 sm:$0xff] %v7782_v61  ;;  %3577 = vmatmul.f32.gmra.mxu3 %v8331_v18  ;;  %v9923_v18 = vld [vmem:[#allocation46_spill] sm:$0xff] }
 0x3da   : > { %3612 = vst [vmem:[#allocation1 + $0x31] ss:$2 sm:$0xff] %v7796_v63  ;;  %v8452_v28 = vld.sshfl [vmem:[#allocation1 + $0x10] sm:$0xff pattern:$0x75316420]  ;;  %4245 = vmatpush.msra.mxu0 %v4867_v21  ;;  %3926 = vmatpush.msrb.mxu3 %v3106_v37 }
 0x3db   : > { %3609 = vst [vmem:[#allocation1 + $0x20] ss:$2 sm:$0xff] %v7827_v26 }
 0x3dc   : > { %3610 = vst [vmem:[#allocation1 + $0x21] ss:$2 sm:$0xff] %v7821_v53  ;;  %4246 = vmatpush.msra.mxu0 %v4866_v11  ;;  %3927 = vmatpush.msrb.mxu3 %v3105_v15 }
 0x3dd   : > { %3621 = vst [vmem:[#allocation1 + $0x10] ss:$2 sm:$0xff] %v7764_v23 }
 0x3de   : > { %v8460_v54 = vld.sshfl [vmem:[#allocation1] sm:$0xff pattern:$0x75316420]  ;;  %3622 = vst [vmem:[#allocation1 + $0x11] ss:$2 sm:$0xff] %v7831_v52  ;;  %4247 = vmatpush.msra.mxu0 %v4865_v40  ;;  %3928 = vmatpush.msrb.mxu3 %v3104_v4  ;;  %v3388_v40 = vpop.f32.mrf.mxu1 }
 0x3df   : > { %v8470_v49 = vld.sshfl [vmem:[#allocation1 + $0x8] sm:$0xff pattern:$0x75316420]  ;;  %3435 = vmatmul.f32.gmra.mxu1 %v8350_v42  ;;  %3506 = vmatmul.f32.gmra.mxu2 %v8354_v3 }
 0x3e0   : > { %3619 = vst [vmem:[#allocation1] ss:$2 sm:$0xff] %v7836_v8  ;;  %4248 = vmatpush.msra.mxu0 %v4864_v16  ;;  %v3459_v16 = vpop.f32.mrf.mxu2 }
 0x3e1   : > { %3620 = vst [vmem:[#allocation1 + $0x1] ss:$2 sm:$0xff] %v7872_v14  ;;  %v8477_v0 = vld.sshfl [vmem:[#allocation1 + $0x30] sm:$0xff pattern:$0x75316420]  ;;  %3580 = vmatmul.f32.gmra.mxu3 %v8368_v55 }
 0x3e2   : > { %3625 = vst [vmem:[#allocation1 + $0x30] ss:$2 sm:$0xff] %v7848_v62  ;;  %4249 = vmatpush.msra.mxu0 %v4863_v35  ;;  %v9925_v35 = vld [vmem:[#allocation43_spill] sm:$0xff] }
 0x3e3   : > { %v8489_v33 = vld.sshfl [vmem:[#allocation1 + $0x20] sm:$0xff pattern:$0x75316420]  ;;  %v8494_v60 = vld.sshfl [vmem:[#allocation1 + $0x28] sm:$0xff pattern:$0x75316420] }
 0x3e4   : > { %3626 = vst [vmem:[#allocation1 + $0x31] ss:$2 sm:$0xff] %v7811_v44  ;;  %4250 = vmatpush.msra.mxu0 %v4862_v32  ;;  %v8550_v32 = vadd.f32 %v3459_v16, %v3388_v40 }
 0x3e5   : > { %3623 = vst [vmem:[#allocation1 + $0x20] ss:$2 sm:$0xff] %v7874_v19  ;;  %v8501_v20 = vld.sshfl [vmem:[#allocation1 + $0x10] sm:$0xff pattern:$0x75316420] }
 0x3e6   : > { %3624 = vst [vmem:[#allocation1 + $0x21] ss:$2 sm:$0xff] %v7884_v39  ;;  %v3391_v4 = vpop.f32.mrf.mxu1 }
 0x3e7   : > { %3635 = vst [vmem:[#allocation1 + $0x10] ss:$2 sm:$0xff] %v7863_v47  ;;  %3438 = vmatmul.f32.gmra.mxu1 %v8356_v22  ;;  %3509 = vmatmul.f32.gmra.mxu2 %v8358_v24 }
 0x3e8   : > { %v8508_v21 = vld.sshfl [vmem:[#allocation1] sm:$0xff pattern:$0x75316420]  ;;  %v8510_v41 = vld.sshfl [vmem:[#allocation1 + $0x8] sm:$0xff pattern:$0x75316420] }
 0x3e9   : > { %3633 = vst [vmem:[#allocation1] ss:$2 sm:$0xff] %v7898_v2  ;;  %3929 = vmatmul.f32.vlgmr.msrb.gmra.mxu3 %v8389_v10 }
 0x3ea   : > { %3634 = vst [vmem:[#allocation1 + $0x1] ss:$2 sm:$0xff] %v7918_v6 }
 0x3eb   : > { %3636 = vst [vmem:[#allocation1 + $0x11] ss:$2 sm:$0xff] %v7901_v1  ;;  %v8515_v29 = vld.sshfl [vmem:[#allocation1 + $0x30] sm:$0xff pattern:$0x75316420] }
 0x3ec   : > { %3639 = vst [vmem:[#allocation1 + $0x30] ss:$2 sm:$0xff] %v7841_v25 }
 0x3ed   : > { %v8518_v56 = vld.sshfl [vmem:[#allocation1 + $0x20] sm:$0xff pattern:$0x75316420]  ;;  %v8520_v57 = vld.sshfl [vmem:[#allocation1 + $0x28] sm:$0xff pattern:$0x75316420] }
 0x3ee   : > { %3637 = vst [vmem:[#allocation1 + $0x20] ss:$2 sm:$0xff] %v7932_v13  ;;  %v3394_v22 = vpop.f32.mrf.mxu1 }
 0x3ef   : > { %3638 = vst [vmem:[#allocation1 + $0x21] ss:$2 sm:$0xff] %v7946_v59  ;;  %3787 = vmatmul.f32.vlgmr.msrb.gmra.mxu1 %v8408_v7  ;;  %3858 = vmatmul.f32.vlgmr.msrb.gmra.mxu2 %v8410_v45  ;;  %v4893_v7 = vld [vmem:[%s9223_s3 + $0x3f8] sm:$0xff]  ;;  %v9946_v45 = vld [vmem:[#allocation70_spill] sm:$0xff] }
 0x3f0   : > { %3640 = vst [vmem:[#allocation1 + $0x31] ss:$2 sm:$0xff] %v7905_v46  ;;  %v9935_v46 = vld [vmem:[#allocation64_spill] sm:$0xff]  ;;  %4306 = vmatpush.msra.mxu1 %v4893_v7 }
 0x3f1   : > { %v8528_v11 = vld.sshfl [vmem:[#allocation1] sm:$0xff pattern:$0x75316420]  ;;  %v8530_v31 = vld.sshfl [vmem:[#allocation1 + $0x8] sm:$0xff pattern:$0x75316420]  ;;  %3932 = vmatmul.f32.gmra.mxu3 %v8427_v12 }
 0x3f2   : > { %3647 = vst [vmem:[#allocation1] ss:$2 sm:$0xff] %v7948_v50  ;;  %v8533_v37 = vld.sshfl [vmem:[#allocation1 + $0x10] sm:$0xff pattern:$0x75316420] }
 0x3f3   : > { %3648 = vst [vmem:[#allocation1 + $0x1] ss:$2 sm:$0xff] %v7984_v17  ;;  %v4892_v7 = vld [vmem:[%s9223_s3 + $0x3f0] sm:$0xff] }
 0x3f4   : > { %3649 = vst [vmem:[#allocation1 + $0x10] ss:$2 sm:$0xff] %v7915_v58  ;;  %v3462_v58 = vpop.f32.mrf.mxu2  ;;  %4307 = vmatpush.msra.mxu1 %v4892_v7  ;;  %v4907_v7 = vld [vmem:[%s9223_s3 + $0x468] sm:$0xff] }
 0x3f5   : > { %3650 = vst [vmem:[#allocation1 + $0x11] ss:$2 sm:$0xff] %v7868_v48  ;;  %v9934_v48 = vld [vmem:[#allocation53_spill] sm:$0xff]  ;;  %v8571_v25 = vadd.f32 %v3462_v58, %v3391_v4 }
 0x3f6   : > { %v8540_v27 = vld.sshfl [vmem:[#allocation1 + $0x20] sm:$0xff pattern:$0x75316420]  ;;  %v8542_v51 = vld.sshfl [vmem:[#allocation1 + $0x28] sm:$0xff pattern:$0x75316420] }
 0x3f7   : > { %3651 = vst [vmem:[#allocation1 + $0x20] ss:$2 sm:$0xff] %v9923_v18  ;;  %v8546_v15 = vld.sshfl [vmem:[#allocation1 + $0x30] sm:$0xff pattern:$0x75316420]  ;;  %v9943_v58 = vld [vmem:[#allocation45_spill] sm:$0xff]  ;;  %3790 = vmatmul.f32.gmra.mxu1 %v8429_v30  ;;  %3861 = vmatmul.f32.gmra.mxu2 %v8435_v5 }
 0x3f8   : > { %3652 = vst [vmem:[#allocation1 + $0x21] ss:$2 sm:$0xff] %v9924_v34 }
 0x3f9   : > { %3653 = vst [vmem:[#allocation1 + $0x30] ss:$2 sm:$0xff] %v9925_v35  ;;  %v9931_v35 = vld [vmem:[#allocation50_spill] sm:$0xff]  ;;  %3935 = vmatmul.f32.gmra.mxu3 %v8452_v28  ;;  %v9958_v28 = vld [vmem:[#allocation79_spill] sm:$0xff] }
 0x3fa   : > { %v8552_v42 = vld.sshfl [vmem:[#allocation1] sm:$0xff pattern:$0x75316420]  ;;  %v8554_v3 = vld.sshfl [vmem:[#allocation1 + $0x8] sm:$0xff pattern:$0x75316420] }
 0x3fb   : > { %9926 = vst [vmem:[#allocation109_spill] sm:$0xff] %v8552_v42  ;;  %v9952_v42 = vld [vmem:[#allocation73_spill] sm:$0xff] }
 0x3fc   : > { %9927 = vst [vmem:[#allocation116_spill] sm:$0xff] %v8554_v3  ;;  %v8558_v55 = vld.sshfl [vmem:[#allocation1 + $0x10] sm:$0xff pattern:$0x75316420] }
 0x3fd   : > { %3661 = vst [vmem:[#allocation1] ss:$2 sm:$0xff] %v9928_v38 }
 0x3fe   : > { %3662 = vst [vmem:[#allocation1 + $0x1] ss:$2 sm:$0xff] %v9929_v36 }
 0x3ff   : > { %3654 = vst [vmem:[#allocation1 + $0x31] ss:$2 sm:$0xff] %v9930_v43  ;;  %v8565_v40 = vld.sshfl [vmem:[#allocation1 + $0x20] sm:$0xff pattern:$0x75316420]  ;;  %v9936_v43 = vld [vmem:[#allocation56_spill] sm:$0xff]  ;;  %3793 = vmatmul.f32.gmra.mxu1 %v8460_v54  ;;  %3864 = vmatmul.f32.gmra.mxu2 %v8470_v49 }
 0x400   : > { %3663 = vst [vmem:[#allocation1 + $0x10] ss:$2 sm:$0xff] %v9931_v35  ;;  %v8567_v16 = vld.sshfl [vmem:[#allocation1 + $0x28] sm:$0xff pattern:$0x75316420]  ;;  %v9939_v35 = vld [vmem:[#allocation68_spill] sm:$0xff] }
 0x401   : > { %9932 = vst [vmem:[#allocation118_spill] sm:$0xff] %v8565_v40  ;;  %v9941_v40 = vld [vmem:[#allocation69_spill] sm:$0xff]  ;;  %3938 = vmatmul.f32.gmra.mxu3 %v8477_v0 }
 0x402   : > { %9933 = vst [vmem:[#allocation111_spill] sm:$0xff] %v8567_v16  ;;  %v9942_v16 = vld [vmem:[#allocation57_spill] sm:$0xff] }
 0x403   : > { %3665 = vst [vmem:[#allocation1 + $0x20] ss:$2 sm:$0xff] %v9934_v48 }
 0x404   : > { %3666 = vst [vmem:[#allocation1 + $0x21] ss:$2 sm:$0xff] %v9935_v46 }
 0x405   : > { %3664 = vst [vmem:[#allocation1 + $0x11] ss:$2 sm:$0xff] %v9936_v43  ;;  %v8574_v3 = vld.sshfl [vmem:[#allocation1] sm:$0xff pattern:$0x75316420] }
 0x406   : > { %9937 = vst [vmem:[#allocation3_spill] sm:$0xff] %v8574_v3  ;;  %v8576_v24 = vld.sshfl [vmem:[#allocation1 + $0x8] sm:$0xff pattern:$0x75316420]  ;;  %v3465_v3 = vpop.f32.mrf.mxu2 }
 0x407   : > { %9938 = vst [vmem:[#allocation67_spill] sm:$0xff] %v8576_v24  ;;  %v8579_v10 = vld.sshfl [vmem:[#allocation1 + $0x30] sm:$0xff pattern:$0x75316420]  ;;  %v4909_v24 = vld [vmem:[%s9223_s3 + $0x478] sm:$0xff]  ;;  %v8598_v12 = vadd.f32 %v3465_v3, %v3394_v22  ;;  %v9954_v22 = vld [vmem:[#allocation59_spill] sm:$0xff]  ;;  %3796 = vmatmul.f32.gmra.mxu1 %v8489_v33  ;;  %3867 = vmatmul.f32.gmra.mxu2 %v8494_v60 }
 0x408   : > { %3675 = vst [vmem:[#allocation1] ss:$2 sm:$0xff] %v9939_v35  ;;  %4377 = vmatpush.msra.mxu2 %v4909_v24  ;;  %v4908_v24 = vld [vmem:[%s9223_s3 + $0x470] sm:$0xff]  ;;  %v9976_v60 = vld [vmem:[#allocation99_spill] sm:$0xff] }
 0x409   : > { %9940 = vst [vmem:[#allocation120_spill] sm:$0xff] %v8579_v10  ;;  %v9951_v10 = vld [vmem:[#allocation72_spill] sm:$0xff]  ;;  %3941 = vmatmul.f32.gmra.mxu3 %v8501_v20 }
 0x40a   : > { %3676 = vst [vmem:[#allocation1 + $0x1] ss:$2 sm:$0xff] %v9941_v40  ;;  %4378 = vmatpush.msra.mxu2 %v4908_v24 }
 0x40b   : > { %3667 = vst [vmem:[#allocation1 + $0x30] ss:$2 sm:$0xff] %v9942_v16  ;;  %v8587_v4 = vld.sshfl [vmem:[#allocation1 + $0x20] sm:$0xff pattern:$0x75316420]  ;;  %v3530_v16 = vpop.f32.mrf.mxu3 }
 0x40c   : > { %3668 = vst [vmem:[#allocation1 + $0x31] ss:$2 sm:$0xff] %v9943_v58  ;;  %v8589_v43 = vld.sshfl [vmem:[#allocation1 + $0x28] sm:$0xff pattern:$0x75316420]  ;;  %v8651_v54 = vadd.f32 %v3530_v16, %v8550_v32  ;;  %4379 = vmatpush.msra.mxu2 %v4907_v7  ;;  %v9972_v32 = vld [vmem:[#allocation74_spill] sm:$0xff] }
 0x40d   : > { %9944 = vst [vmem:[#allocation122_spill] sm:$0xff] %v8587_v4  ;;  %v8601_v58 = vld.sshfl [vmem:[#allocation1 + $0x10] sm:$0xff pattern:$0x75316420]  ;;  %v9948_v4 = vld [vmem:[#allocation63_spill] sm:$0xff] }
 0x40e   : > { %9945 = vst [vmem:[#allocation113_spill] sm:$0xff] %v8589_v43  ;;  %v3397_v43 = vpop.f32.mrf.mxu1  ;;  %v3468_v5 = vpop.f32.mrf.mxu2 }
 0x40f   : > { %3679 = vst [vmem:[#allocation1 + $0x20] ss:$2 sm:$0xff] %v9946_v45  ;;  %3799 = vmatmul.f32.gmra.mxu1 %v8508_v21  ;;  %3870 = vmatmul.f32.gmra.mxu2 %v8510_v41 }
 0x410   : > { %3680 = vst [vmem:[#allocation1 + $0x21] ss:$2 sm:$0xff] %v8137_v9 }
 0x411   : > { %9947 = vst [vmem:[#allocation4_spill] sm:$0xff] %v8601_v58  ;;  %v8604_v40 = vld.sshfl [vmem:[#allocation1] sm:$0xff pattern:$0x75316420]  ;;  %3944 = vmatmul.f32.gmra.mxu3 %v8515_v29  ;;  %v9980_v29 = vld [vmem:[#allocation101_spill] sm:$0xff] }
 0x412   : > { %3677 = vst [vmem:[#allocation1 + $0x10] ss:$2 sm:$0xff] %v9948_v4  ;;  %v8606_v35 = vld.sshfl [vmem:[#allocation1 + $0x8] sm:$0xff pattern:$0x75316420] }
 0x413   : > { %9949 = vst [vmem:[#allocation71_spill] sm:$0xff] %v8604_v40  ;;  %v8612_v3 = vld.sshfl [vmem:[#allocation1 + $0x30] sm:$0xff pattern:$0x75316420]  ;;  %v9959_v4 = vld [vmem:[#allocation75_spill] sm:$0xff] }
 0x414   : > { %9950 = vst [vmem:[#allocation121_spill] sm:$0xff] %v8606_v35  ;;  %v9955_v35 = vld [vmem:[#allocation51_spill] sm:$0xff] }
 0x415   : > { %3689 = vst [vmem:[#allocation1] ss:$2 sm:$0xff] %v9951_v10  ;;  %v9960_v10 = vld [vmem:[#allocation78_spill] sm:$0xff] }
 0x416   : > { %3690 = vst [vmem:[#allocation1 + $0x1] ss:$2 sm:$0xff] %v9952_v42  ;;  %v3533_v42 = vpop.f32.mrf.mxu3  ;;  %v3471_v49 = vpop.f32.mrf.mxu2 }
 0x417   : > { %9953 = vst [vmem:[#allocation5_spill] sm:$0xff] %v8612_v3  ;;  %v8623_v40 = vld.sshfl [vmem:[#allocation1 + $0x20] sm:$0xff pattern:$0x75316420]  ;;  %v3400_v3 = vpop.f32.mrf.mxu1  ;;  %3802 = vmatmul.f32.gmra.mxu1 %v8518_v56  ;;  %3873 = vmatmul.f32.gmra.mxu2 %v8520_v57 }
 0x418   : > { %3678 = vst [vmem:[#allocation1 + $0x11] ss:$2 sm:$0xff] %v9954_v22  ;;  %v8625_v30 = vld.sshfl [vmem:[#allocation1 + $0x28] sm:$0xff pattern:$0x75316420]  ;;  %v8628_v22 = vadd.f32 %v3468_v5, %v3397_v43  ;;  %v9965_v43 = vld [vmem:[#allocation81_spill] sm:$0xff] }
 0x419   : > { %3681 = vst [vmem:[#allocation1 + $0x30] ss:$2 sm:$0xff] %v9955_v35  ;;  %v4891_v5 = vld [vmem:[%s9223_s3 + $0x3e8] sm:$0xff]  ;;  %3947 = vmatmul.f32.gmra.mxu3 %v8533_v37 }
 0x41a   : > { %9956 = vst [vmem:[#allocation115_spill] sm:$0xff] %v8623_v40  ;;  %v9963_v40 = vld [vmem:[#allocation76_spill] sm:$0xff]  ;;  %4308 = vmatpush.msra.mxu1 %v4891_v5 }
 0x41b   : > { %9957 = vst [vmem:[#allocation86_spill] sm:$0xff] %v8625_v30  ;;  %v8658_v30 = vadd.f32 %v3471_v49, %v3400_v3  ;;  %v4906_v3 = vld [vmem:[%s9223_s3 + $0x460] sm:$0xff] }
 0x41c   : > { %3693 = vst [vmem:[#allocation1 + $0x20] ss:$2 sm:$0xff] %v9958_v28  ;;  %v4890_v49 = vld [vmem:[%s9223_s3 + $0x3e0] sm:$0xff]  ;;  %4380 = vmatpush.msra.mxu2 %v4906_v3 }
 0x41d   : > { %3694 = vst [vmem:[#allocation1 + $0x21] ss:$2 sm:$0xff] %v9959_v4  ;;  %v8632_v58 = vld.sshfl [vmem:[#allocation1] sm:$0xff pattern:$0x75316420]  ;;  %4309 = vmatpush.msra.mxu1 %v4890_v49 }
 0x41e   : > { %3682 = vst [vmem:[#allocation1 + $0x31] ss:$2 sm:$0xff] %v9960_v10  ;;  %v8634_v35 = vld.sshfl [vmem:[#allocation1 + $0x8] sm:$0xff pattern:$0x75316420]  ;;  %v3536_v16 = vpop.f32.mrf.mxu3  ;;  %v3474_v33 = vpop.f32.mrf.mxu2 }
 0x41f   : > { %9961 = vst [vmem:[#allocation106_spill] sm:$0xff] %v8632_v58  ;;  %v8639_v24 = vld.sshfl [vmem:[#allocation1 + $0x10] sm:$0xff pattern:$0x75316420]  ;;  %v9968_v58 = vld [vmem:[#allocation62_spill] sm:$0xff]  ;;  %v8708_v21 = vadd.f32 %v3536_v16, %v8598_v12  ;;  %3805 = vmatmul.f32.gmra.mxu1 %v8528_v11  ;;  %3876 = vmatmul.f32.gmra.mxu2 %v8530_v31 }
 0x420   : > { %9962 = vst [vmem:[#allocation124_spill] sm:$0xff] %v8634_v35  ;;  %v9966_v35 = vld [vmem:[#allocation96_spill] sm:$0xff] }
 0x421   : > { %3703 = vst [vmem:[#allocation1] ss:$2 sm:$0xff] %v9963_v40  ;;  %3950 = vmatmul.f32.gmra.mxu3 %v8546_v15 }
 0x422   : > { %9964 = vst [vmem:[#allocation7_spill] sm:$0xff] %v8639_v24  ;;  %v9970_v24 = vld [vmem:[#allocation52_spill] sm:$0xff] }
 0x423   : > { %3704 = vst [vmem:[#allocation1 + $0x1] ss:$2 sm:$0xff] %v9965_v43  ;;  %v3403_v43 = vpop.f32.mrf.mxu1 }
 0x424   : > { %3691 = vst [vmem:[#allocation1 + $0x10] ss:$2 sm:$0xff] %v9966_v35  ;;  %v8654_v10 = vld.sshfl [vmem:[#allocation1 + $0x20] sm:$0xff pattern:$0x75316420]  ;;  %v9971_v35 = vld [vmem:[#allocation104_spill] sm:$0xff]  ;;  %v8686_v20 = vadd.f32 %v3474_v33, %v3403_v43 }
 0x425   : > { %9967 = vst [vmem:[#allocation119_spill] sm:$0xff] %v8651_v54  ;;  %v8656_v0 = vld.sshfl [vmem:[#allocation1 + $0x28] sm:$0xff pattern:$0x75316420]  ;;  %v8681_v54 = vadd.f32 %v3533_v42, %v8571_v25  ;;  %v9978_v25 = vld [vmem:[#allocation80_spill] sm:$0xff] }
 0x426   : > { %3692 = vst [vmem:[#allocation1 + $0x11] ss:$2 sm:$0xff] %v9968_v58  ;;  %v8661_v40 = vld.sshfl [vmem:[#allocation1 + $0x30] sm:$0xff pattern:$0x75316420]  ;;  %v3539_v3 = vpop.f32.mrf.mxu3  ;;  %v3477_v41 = vpop.f32.mrf.mxu2 }
 0x427   : > { %9969 = vst [vmem:[#allocation87_spill] sm:$0xff] %v8656_v0  ;;  %3808 = vmatmul.f32.gmra.mxu1 %v8540_v27  ;;  %3879 = vmatmul.f32.gmra.mxu2 %v8542_v51 }
 0x428   : > { %3707 = vst [vmem:[#allocation1 + $0x20] ss:$2 sm:$0xff] %v9970_v24 }
 0x429   : > { %3708 = vst [vmem:[#allocation1 + $0x21] ss:$2 sm:$0xff] %v9971_v35  ;;  %3953 = vmatmul.f32.gmra.mxu3 %v8558_v55 }
 0x42a   : > { %3695 = vst [vmem:[#allocation1 + $0x30] ss:$2 sm:$0xff] %v9972_v32  ;;  %v8665_v7 = vld.sshfl [vmem:[#allocation1] sm:$0xff pattern:$0x75316420] }
 0x42b   : > { %9973 = vst [vmem:[#allocation107_spill] sm:$0xff] %v8665_v7  ;;  %v8667_v5 = vld.sshfl [vmem:[#allocation1 + $0x8] sm:$0xff pattern:$0x75316420]  ;;  %v3406_v0 = vpop.f32.mrf.mxu1 }
 0x42c   : > { %9974 = vst [vmem:[#allocation6_spill] sm:$0xff] %v8667_v5  ;;  %v8711_v49 = vadd.f32 %v3477_v41, %v3406_v0 }
 0x42d   : > { %4048 = vst [vmem:[#allocation1] ss:$2 sm:$0xff] %v7827_v26  ;;  %v8684_v26 = vld.sshfl [vmem:[#allocation1 + $0x10] sm:$0xff pattern:$0x75316420] }
 0x42e   : > { %4050 = vst [vmem:[#allocation1 + $0x1] ss:$2 sm:$0xff] %v7821_v53  ;;  %v9977_v53 = vld [vmem:[#allocation65_spill] sm:$0xff]  ;;  %v3480_v0 = vpop.f32.mrf.mxu2  ;;  %v3542_v56 = vpop.f32.mrf.mxu3 }
 0x42f   : > { %9975 = vst [vmem:[#allocation10_spill] sm:$0xff] %v8681_v54  ;;  %v8766_v15 = vadd.f32 %v3542_v56, %v8658_v30 }
 0x430   : > { %3696 = vst [vmem:[#allocation1 + $0x31] ss:$2 sm:$0xff] %v9976_v60  ;;  %v8689_v5 = vld.sshfl [vmem:[#allocation1 + $0x20] sm:$0xff pattern:$0x75316420] }
 0x431   : > { %3705 = vst [vmem:[#allocation1 + $0x10] ss:$2 sm:$0xff] %v9977_v53  ;;  %v8691_v7 = vld.sshfl [vmem:[#allocation1 + $0x28] sm:$0xff pattern:$0x75316420] }
 0x432   : > { %4056 = vst [vmem:[#allocation1 + $0x20] ss:$2 sm:$0xff] %v7836_v8  ;;  %v4905_v8 = vld [vmem:[%s9223_s3 + $0x458] sm:$0xff] }
 0x433   : > { %4058 = vst [vmem:[#allocation1 + $0x21] ss:$2 sm:$0xff] %v7872_v14  ;;  %4381 = vmatpush.msra.mxu2 %v4905_v8  ;;  %v3409_v33 = vpop.f32.mrf.mxu1 }
 0x434   : > { %3706 = vst [vmem:[#allocation1 + $0x11] ss:$2 sm:$0xff] %v9978_v25 }
 0x435   : > { %v4063_v42 = vld.sshfl [vmem:[#allocation1] sm:$0xff pattern:$0x75316420]  ;;  %v8698_v43 = vld.sshfl [vmem:[#allocation1 + $0x8] sm:$0xff pattern:$0x75316420] }
 0x436   : > { %9979 = vst [vmem:[#allocation123_spill] sm:$0xff] %v8698_v43  ;;  %4251 = vmatmul.f32.vlgmr.msra.gmra.mxu0 %v4063_v42  ;;  %v3483_v11 = vpop.f32.mrf.mxu2 }
 0x437   : > { %4069 = vst [vmem:[#allocation1] ss:$2 sm:$0xff] %v7874_v19  ;;  %v8705_v14 = vld.sshfl [vmem:[#allocation1 + $0x30] sm:$0xff pattern:$0x75316420]  ;;  %v9981_v19 = vld [vmem:[#allocation77_spill] sm:$0xff] }
 0x438   : > { %4070 = vst [vmem:[#allocation1 + $0x1] ss:$2 sm:$0xff] %v7884_v39 }
 0x439   : > { %3709 = vst [vmem:[#allocation1 + $0x30] ss:$2 sm:$0xff] %v9980_v29 }
 0x43a   : > { %3710 = vst [vmem:[#allocation1 + $0x31] ss:$2 sm:$0xff] %v9981_v19  ;;  %v4066_v42 = vld.sshfl [vmem:[#allocation1 + $0x20] sm:$0xff pattern:$0x75316420] }
 0x43b   : > { %v8715_v43 = vld.sshfl [vmem:[#allocation1 + $0x28] sm:$0xff pattern:$0x75316420]  ;;  %v8718_v54 = vld.sshfl [vmem:[#allocation1 + $0x10] sm:$0xff pattern:$0x75316420]  ;;  %v3412_v37 = vpop.f32.mrf.mxu1 }
 0x43c   : > { %4073 = vst [vmem:[#allocation1 + $0x20] ss:$2 sm:$0xff] %v7898_v2  ;;  %v4889_v2 = vld [vmem:[%s9223_s3 + $0x3d8] sm:$0xff] }
 0x43d   : > { %4074 = vst [vmem:[#allocation1 + $0x21] ss:$2 sm:$0xff] %v7918_v6  ;;  %v4904_v6 = vld [vmem:[%s9223_s3 + $0x450] sm:$0xff]  ;;  %4310 = vmatpush.msra.mxu1 %v4889_v2 }
 0x43e   : > { %4052 = vst [vmem:[#allocation1 + $0x10] ss:$2 sm:$0xff] %v7782_v61  ;;  %4254 = vmatmul.f32.gmra.mxu0 %v4066_v42  ;;  %v8735_v61 = vadd.f32 %v3480_v0, %v3409_v33  ;;  %4382 = vmatpush.msra.mxu2 %v4904_v6  ;;  %v3486_v27 = vpop.f32.mrf.mxu2  ;;  %v9982_v33 = vld [vmem:[#allocation109_spill] sm:$0xff]  ;;  %v9983_v42 = vld [vmem:[#allocation116_spill] sm:$0xff] }
 0x43f   : > { %v4077_v39 = vld.sshfl [vmem:[#allocation1] sm:$0xff pattern:$0x75316420]  ;;  %v8725_v12 = vld.sshfl [vmem:[#allocation1 + $0x8] sm:$0xff pattern:$0x75316420]  ;;  %3811 = vmatmul.f32.gmra.mxu1 %v9982_v33  ;;  %3882 = vmatmul.f32.gmra.mxu2 %v9983_v42 }
 0x440   : > { %4083 = vst [vmem:[#allocation1] ss:$2 sm:$0xff] %v7932_v13  ;;  %v8740_v13 = vadd.f32 %v3539_v3, %v8628_v22  ;;  %v3545_v3 = vpop.f32.mrf.mxu3  ;;  %v9986_v0 = vld [vmem:[#allocation120_spill] sm:$0xff]  ;;  %v9988_v6 = vld [vmem:[#allocation69_spill] sm:$0xff] }
 0x441   : > { %4084 = vst [vmem:[#allocation1 + $0x1] ss:$2 sm:$0xff] %v7946_v59  ;;  %v8737_v57 = vld.sshfl [vmem:[#allocation1 + $0x30] sm:$0xff pattern:$0x75316420]  ;;  %3956 = vmatmul.f32.gmra.mxu3 %v9986_v0  ;;  %v4901_v42 = vld [vmem:[%s9223_s3 + $0x438] sm:$0xff] }
 0x442   : > { %4054 = vst [vmem:[#allocation1 + $0x11] ss:$2 sm:$0xff] %v7796_v63  ;;  %v4888_v63 = vld [vmem:[%s9223_s3 + $0x3d0] sm:$0xff]  ;;  %v4885_v0 = vld [vmem:[%s9223_s3 + $0x3b8] sm:$0xff] }
 0x443   : > { %4060 = vst [vmem:[#allocation1 + $0x30] ss:$2 sm:$0xff] %v7764_v23  ;;  %v4903_v23 = vld [vmem:[%s9223_s3 + $0x448] sm:$0xff]  ;;  %4311 = vmatpush.msra.mxu1 %v4888_v63  ;;  %v3415_v22 = vpop.f32.mrf.mxu1 }
 0x444   : > { %v4080_v16 = vld.sshfl [vmem:[#allocation1 + $0x20] sm:$0xff pattern:$0x75316420]  ;;  %v8744_v8 = vld.sshfl [vmem:[#allocation1 + $0x28] sm:$0xff pattern:$0x75316420]  ;;  %4383 = vmatpush.msra.mxu2 %v4903_v23 }
 0x445   : > { %4087 = vst [vmem:[#allocation1 + $0x20] ss:$2 sm:$0xff] %v7948_v50 }
 0x446   : > { %4088 = vst [vmem:[#allocation1 + $0x21] ss:$2 sm:$0xff] %v7984_v17  ;;  %4257 = vmatmul.f32.gmra.mxu0 %v4077_v39  ;;  %v8761_v17 = vadd.f32 %v3483_v11, %v3412_v37  ;;  %v3489_v56 = vpop.f32.mrf.mxu2  ;;  %v9991_v11 = vld [vmem:[#allocation118_spill] sm:$0xff] }
 0x447   : > { %4062 = vst [vmem:[#allocation1 + $0x31] ss:$2 sm:$0xff] %v7831_v52  ;;  %3814 = vmatmul.f32.gmra.mxu1 %v9991_v11  ;;  %v10002_v11 = vld [vmem:[#allocation67_spill] sm:$0xff] }
 0x448   : > { %v4091_v59 = vld.sshfl [vmem:[#allocation1] sm:$0xff pattern:$0x75316420]  ;;  %v8758_v50 = vld.sshfl [vmem:[#allocation1 + $0x8] sm:$0xff pattern:$0x75316420]  ;;  %v3548_v30 = vpop.f32.mrf.mxu3 }
 0x449   : > { %4097 = vst [vmem:[#allocation1] ss:$2 sm:$0xff] %v9923_v18  ;;  %v8763_v31 = vld.sshfl [vmem:[#allocation1 + $0x10] sm:$0xff pattern:$0x75316420] }
 0x44a   : > { %4098 = vst [vmem:[#allocation1 + $0x1] ss:$2 sm:$0xff] %v9924_v34  ;;  %v8789_v34 = vadd.f32 %v3486_v27, %v3415_v22  ;;  %v9992_v22 = vld [vmem:[#allocation111_spill] sm:$0xff]  ;;  %v8829_v27 = vadd.f32 %v3548_v30, %v8711_v49 }
 0x44b   : > { %4071 = vst [vmem:[#allocation1 + $0x10] ss:$2 sm:$0xff] %v7848_v62  ;;  %v4902_v62 = vld [vmem:[%s9223_s3 + $0x440] sm:$0xff]  ;;  %3885 = vmatmul.f32.gmra.mxu2 %v9992_v22  ;;  %v10003_v22 = vld [vmem:[#allocation5_spill] sm:$0xff] }
 0x44c   : > { %4072 = vst [vmem:[#allocation1 + $0x11] ss:$2 sm:$0xff] %v7811_v44  ;;  %v4887_v44 = vld [vmem:[%s9223_s3 + $0x3c8] sm:$0xff]  ;;  %4384 = vmatpush.msra.mxu2 %v4902_v62 }
 0x44d   : > { %v4094_v52 = vld.sshfl [vmem:[#allocation1 + $0x20] sm:$0xff pattern:$0x75316420]  ;;  %v8771_v41 = vld.sshfl [vmem:[#allocation1 + $0x28] sm:$0xff pattern:$0x75316420]  ;;  %4312 = vmatpush.msra.mxu1 %v4887_v44 }
 0x44e   : > { %4101 = vst [vmem:[#allocation1 + $0x20] ss:$2 sm:$0xff] %v9928_v38  ;;  %v8777_v18 = vld.sshfl [vmem:[#allocation1 + $0x30] sm:$0xff pattern:$0x75316420]  ;;  %4260 = vmatmul.f32.gmra.mxu0 %v4080_v16  ;;  %v9995_v62 = vld [vmem:[#allocation47_spill] sm:$0xff]  ;;  %4385 = vmatpush.msra.mxu2 %v4901_v42 }
 0x44f   : > { %4102 = vst [vmem:[#allocation1 + $0x21] ss:$2 sm:$0xff] %v9929_v36  ;;  %v3418_v36 = vpop.f32.mrf.mxu1  ;;  %v9989_v16 = vld [vmem:[#allocation48_spill] sm:$0xff] }
 0x450   : > { %4075 = vst [vmem:[#allocation1 + $0x30] ss:$2 sm:$0xff] %v7863_v47  ;;  %v9984_v47 = vld [vmem:[#allocation38_spill] sm:$0xff]  ;;  %v8812_v37 = vadd.f32 %v3489_v56, %v3418_v36  ;;  %v9994_v44 = vld [vmem:[#allocation4_spill] sm:$0xff]  ;;  %v3551_v36 = vpop.f32.mrf.mxu3 }
 0x451   : > { %v4105_v38 = vld.sshfl [vmem:[#allocation1] sm:$0xff pattern:$0x75316420]  ;;  %v8787_v51 = vld.sshfl [vmem:[#allocation1 + $0x8] sm:$0xff pattern:$0x75316420]  ;;  %3959 = vmatmul.f32.gmra.mxu3 %v9994_v44 }
 0x452   : > { %4111 = vst [vmem:[#allocation1] ss:$2 sm:$0xff] %v9934_v48  ;;  %v8805_v48 = vadd.f32 %v3545_v3, %v8686_v20  ;;  %v9993_v3 = vld [vmem:[#allocation49_spill] sm:$0xff]  ;;  %v4900_v44 = vld [vmem:[%s9223_s3 + $0x430] sm:$0xff] }
 0x453   : > { %4112 = vst [vmem:[#allocation1 + $0x1] ss:$2 sm:$0xff] %v9935_v46  ;;  %v8793_v55 = vld.sshfl [vmem:[#allocation1 + $0x10] sm:$0xff pattern:$0x75316420]  ;;  %3888 = vmatmul.f32.gmra.mxu2 %v10002_v11 }
 0x454   : > { %4076 = vst [vmem:[#allocation1 + $0x31] ss:$2 sm:$0xff] %v7901_v1  ;;  %v9987_v46 = vld [vmem:[#allocation68_spill] sm:$0xff]  ;;  %v4886_v1 = vld [vmem:[%s9223_s3 + $0x3c0] sm:$0xff]  ;;  %4386 = vmatpush.msra.mxu2 %v4900_v44 }
 0x455   : > { %4085 = vst [vmem:[#allocation1 + $0x10] ss:$2 sm:$0xff] %v9984_v47  ;;  %4313 = vmatpush.msra.mxu1 %v4886_v1  ;;  %v3492_v47 = vpop.f32.mrf.mxu2  ;;  %v9999_v1 = vld [vmem:[#allocation43_spill] sm:$0xff]  ;;  %v8877_v11 = vld [vmem:[#allocation2 + $0xc8] sm:$0xff] }
 0x456   : > { %v8799_v39 = vld.sshfl [vmem:[#allocation1 + $0x20] sm:$0xff pattern:$0x75316420]  ;;  %v8801_v2 = vld.sshfl [vmem:[#allocation1 + $0x28] sm:$0xff pattern:$0x75316420]  ;;  %4263 = vmatmul.f32.gmra.mxu0 %v4091_v59 }
 0x457   : > { %9985 = vst [vmem:[#allocation89_spill] sm:$0xff] %v8801_v2  ;;  %v3421_v20 = vpop.f32.mrf.mxu1  ;;  %4314 = vmatpush.msra.mxu1 %v4885_v0  ;;  %v10009_v44 = vld [vmem:[#allocation56_spill] sm:$0xff]  ;;  %v10019_v2 = vld [vmem:[#allocation83_spill] sm:$0xff] }
 0x458   : > { %4115 = vst [vmem:[#allocation1 + $0x20] ss:$2 sm:$0xff] %v9987_v46  ;;  %v9998_v46 = vld [vmem:[#allocation73_spill] sm:$0xff]  ;;  %v8843_v49 = vadd.f32 %v3492_v47, %v3421_v20 }
 0x459   : > { %4116 = vst [vmem:[#allocation1 + $0x21] ss:$2 sm:$0xff] %v9988_v6  ;;  %3962 = vmatmul.f32.gmra.mxu3 %v10003_v22 }
 0x45a   : > { %4086 = vst [vmem:[#allocation1 + $0x11] ss:$2 sm:$0xff] %v9989_v16  ;;  %v8815_v63 = vld.sshfl [vmem:[#allocation1] sm:$0xff pattern:$0x75316420]  ;;  %v10001_v16 = vld [vmem:[#allocation3_spill] sm:$0xff] }
 0x45b   : > { %v8817_v23 = vld.sshfl [vmem:[#allocation1 + $0x8] sm:$0xff pattern:$0x75316420]  ;;  %v8820_v59 = vld.sshfl [vmem:[#allocation1 + $0x30] sm:$0xff pattern:$0x75316420]  ;;  %3817 = vmatmul.f32.gmra.mxu1 %v10001_v16 }
 0x45c   : > { %9990 = vst [vmem:[#allocation108_spill] sm:$0xff] %v8817_v23  ;;  %v10008_v16 = vld [vmem:[#allocation81_spill] sm:$0xff] }
 0x45d   : > { %4125 = vst [vmem:[#allocation1] ss:$2 sm:$0xff] %v9946_v45 }
 0x45e   : > { %4126 = vst [vmem:[#allocation1 + $0x1] ss:$2 sm:$0xff] %v8137_v9  ;;  %4266 = vmatmul.f32.gmra.mxu0 %v4094_v52  ;;  %v9997_v9 = vld [vmem:[#allocation72_spill] sm:$0xff] }
 0x45f   : > { %4089 = vst [vmem:[#allocation1 + $0x30] ss:$2 sm:$0xff] %v9993_v3  ;;  %v3424_v30 = vpop.f32.mrf.mxu1  ;;  %v10004_v3 = vld [vmem:[#allocation44_spill] sm:$0xff] }
 0x460   : > { %4090 = vst [vmem:[#allocation1 + $0x31] ss:$2 sm:$0xff] %v9995_v62  ;;  %v8831_v45 = vld.sshfl [vmem:[#allocation1 + $0x20] sm:$0xff pattern:$0x75316420] }
 0x461   : > { %v8833_v33 = vld.sshfl [vmem:[#allocation1 + $0x28] sm:$0xff pattern:$0x75316420]  ;;  %v8845_v52 = vld.sshfl [vmem:[#allocation1 + $0x10] sm:$0xff pattern:$0x75316420] }
 0x462   : > { %9996 = vst [vmem:[#allocation9_spill] sm:$0xff] %v8833_v33  ;;  %v8866_v62 = vld [vmem:[#allocation2 + $0x70] sm:$0x3f] }
 0x463   : > { %4129 = vst [vmem:[#allocation1 + $0x20] ss:$2 sm:$0xff] %v9997_v9  ;;  %v10005_v9 = vld [vmem:[#allocation50_spill] sm:$0xff]  ;;  %v3987_v22 = vrot.slane %v8866_v62, 1 }
 0x464   : > { %4130 = vst [vmem:[#allocation1 + $0x21] ss:$2 sm:$0xff] %v9998_v46  ;;  %v10007_v46 = vld [vmem:[#allocation76_spill] sm:$0xff] }
 0x465   : > { %4099 = vst [vmem:[#allocation1 + $0x10] ss:$2 sm:$0xff] %v9999_v1  ;;  %v8848_v6 = vld.sshfl [vmem:[#allocation1] sm:$0xff pattern:$0x75316420] }
 0x466   : > { %v8850_v56 = vld.sshfl [vmem:[#allocation1 + $0x8] sm:$0xff pattern:$0x75316420]  ;;  %4100 = vst [vmem:[#allocation1 + $0x11] ss:$2 sm:$0xff] %v10004_v3  ;;  %4269 = vmatmul.f32.gmra.mxu0 %v4105_v38  ;;  %v3554_v38 = vpop.f32.mrf.mxu3  ;;  %v8881_v3 = vadd.f32 %v3551_v36, %v8735_v61 }
 0x467   : > { %10000 = vst [vmem:[#allocation14_spill] sm:$0xff] %v8850_v56  ;;  %v8856_v20 = vld.sshfl [vmem:[#allocation1 + $0x30] sm:$0xff pattern:$0x75316420]  ;;  %v3427_v1 = vpop.f32.mrf.mxu1  ;;  %v4899_v61 = vld [vmem:[%s9223_s3 + $0x428] sm:$0xff] }
 0x468   : > { %4139 = vst [vmem:[#allocation1] ss:$2 sm:$0xff] %v9958_v28  ;;  %v4884_v28 = vld [vmem:[%s9223_s3 + $0x3b0] sm:$0xff]  ;;  %v4883_v36 = vld [vmem:[%s9223_s3 + $0x3a8] sm:$0xff]  ;;  %4387 = vmatpush.msra.mxu2 %v4899_v61  ;;  %v8918_v61 = vadd.f32 %v3554_v38, %v8761_v17  ;;  %v10025_v17 = vld [vmem:[#allocation85_spill] sm:$0xff] }
 0x469   : > { %4140 = vst [vmem:[#allocation1 + $0x1] ss:$2 sm:$0xff] %v9959_v4  ;;  %v3495_v4 = vpop.f32.mrf.mxu2  ;;  %4315 = vmatpush.msra.mxu1 %v4884_v28  ;;  %v10017_v56 = vld [vmem:[#allocation84_spill] sm:$0xff]  ;;  %v4898_v38 = vld [vmem:[%s9223_s3 + $0x420] sm:$0xff] }
 0x46a   : > { %4103 = vst [vmem:[#allocation1 + $0x30] ss:$2 sm:$0xff] %v10005_v9  ;;  %v8873_v0 = vadd.f32 %v3495_v4, %v3424_v30  ;;  %v10011_v30 = vld [vmem:[#allocation122_spill] sm:$0xff]  ;;  %v10012_v4 = vld [vmem:[#allocation113_spill] sm:$0xff]  ;;  %4388 = vmatpush.msra.mxu2 %v4898_v38  ;;  %v10028_v38 = vld [vmem:[#allocation115_spill] sm:$0xff] }
 0x46b   : > { %v8869_v42 = vld.sshfl [vmem:[#allocation1 + $0x20] sm:$0xff pattern:$0x75316420]  ;;  %v8871_v47 = vld.sshfl [vmem:[#allocation1 + $0x28] sm:$0xff pattern:$0x75316420]  ;;  %3820 = vmatmul.f32.gmra.mxu1 %v10011_v30  ;;  %3891 = vmatmul.f32.gmra.mxu2 %v10012_v4 }
 0x46c   : > { %10006 = vst [vmem:[#allocation125_spill] sm:$0xff] %v8871_v47  ;;  %v10013_v47 = vld [vmem:[#allocation7_spill] sm:$0xff]  ;;  %4316 = vmatpush.msra.mxu1 %v4883_v36 }
 0x46d   : > { %4143 = vst [vmem:[#allocation1 + $0x20] ss:$2 sm:$0xff] %v10007_v46  ;;  %v3986_v46 = vrot.slane %v8877_v11, 1  ;;  %3965 = vmatmul.f32.gmra.mxu3 %v10013_v47  ;;  %v10015_v47 = vld [vmem:[#allocation45_spill] sm:$0xff]  ;;  %v10021_v36 = vld [vmem:[#allocation63_spill] sm:$0xff] }
 0x46e   : > { %4144 = vst [vmem:[#allocation1 + $0x21] ss:$2 sm:$0xff] %v10008_v16  ;;  %v8892_v16 = vld.sshfl [vmem:[#allocation1 + $0x10] sm:$0xff pattern:$0x75316420]  ;;  %4272 = vmatmul.f32.gmra.mxu0 %v8799_v39 }
 0x46f   : > { %4104 = vst [vmem:[#allocation1 + $0x31] ss:$2 sm:$0xff] %v10009_v44  ;;  %v10014_v44 = vld [vmem:[#allocation57_spill] sm:$0xff] }
 0x470   : > { %v8884_v28 = vld.sshfl [vmem:[#allocation1 + $0x8] sm:$0xff pattern:$0x75316420]  ;;  %v8886_v9 = vld.sshfl [vmem:[#allocation1] sm:$0xff pattern:$0x75316420] }
 0x471   : > { %10010 = vst [vmem:[#allocation91_spill] sm:$0xff] %v8884_v28  ;;  %v3498_v30 = vpop.f32.mrf.mxu2  ;;  %v3430_v28 = vpop.f32.mrf.mxu1 }
 0x472   : > { %4153 = vst [vmem:[#allocation1] ss:$2 sm:$0xff] %v9970_v24  ;;  %v3988_v24 = vsel %vm285_vm0, %v3986_v46, %v3987_v22  ;;  %v8908_v39 = vadd.f32 %v3498_v30, %v3427_v1  ;;  %v3557_v46 = vpop.f32.mrf.mxu3  ;;  %v10023_v1 = vld [vmem:[#allocation121_spill] sm:$0xff] }
 0x473   : > { %4154 = vst [vmem:[#allocation1 + $0x1] ss:$2 sm:$0xff] %v9971_v35  ;;  %v3992_v33 = vrot.slane %v3988_v24, 4  ;;  %3894 = vmatmul.f32.gmra.mxu2 %v10023_v1  ;;  %v4882_v24 = vld [vmem:[%s9223_s3 + $0x3a0] sm:$0xff]  ;;  %v10027_v1 = vld [vmem:[#allocation51_spill] sm:$0xff] }
 0x474   : > { %4113 = vst [vmem:[#allocation1 + $0x10] ss:$2 sm:$0xff] %v10014_v44  ;;  %v10020_v44 = vrot.slane %v10019_v2, 4  ;;  %4317 = vmatpush.msra.mxu1 %v4882_v24  ;;  %v10029_v24 = vld [vmem:[#allocation86_spill] sm:$0xff] }
 0x475   : > { %4114 = vst [vmem:[#allocation1 + $0x11] ss:$2 sm:$0xff] %v10015_v47  ;;  %v8906_v35 = vld.sshfl [vmem:[#allocation1 + $0x28] sm:$0xff pattern:$0x75316420]  ;;  %3968 = vmatmul.f32.gmra.mxu3 %v8661_v40  ;;  %v3995_v2 = vsel %vm429_vm3, %v3992_v33, %v8877_v11  ;;  %v3993_v40 = vrot.slane %v3987_v22, 4 }
 0x476   : > { %10016 = vst [vmem:[#allocation110_spill] sm:$0xff] %v8906_v35  ;;  %v8910_v4 = vld.sshfl [vmem:[#allocation1 + $0x20] sm:$0xff pattern:$0x75316420]  ;;  %v10022_v47 = vld [vmem:[#allocation71_spill] sm:$0xff]  ;;  %4275 = vmatmul.f32.gmra.mxu0 %v8815_v63  ;;  %v3996_v63 = vrot.slane %v3995_v2, 4 }
 0x477   : > { %4157 = vst [vmem:[#allocation1 + $0x20] ss:$2 sm:$0xff] %v10017_v56  ;;  %v8913_v23 = vld.sshfl [vmem:[#allocation1 + $0x30] sm:$0xff pattern:$0x75316420]  ;;  %3823 = vmatmul.f32.gmra.mxu1 %v10022_v47  ;;  %v3994_v56 = vsel %vm429_vm3, %v8877_v11, %v3992_v33  ;;  %v3998_v22 = vsel %vm429_vm3, %v8866_v62, %v3993_v40  ;;  %v10030_v2 = vld [vmem:[#allocation78_spill] sm:$0xff] }
 0x478   : > { %10018 = vst [vmem:[#allocation12_spill] sm:$0xff] %v8913_v23  ;;  %v4897_v40 = vld [vmem:[%s9223_s3 + $0x418] sm:$0xff] }
 0x479   : > { %4158 = vst [vmem:[#allocation1 + $0x21] ss:$2 sm:$0xff] %v10020_v44  ;;  %v3501_v44 = vpop.f32.mrf.mxu2  ;;  %4389 = vmatpush.msra.mxu2 %v4897_v40 }
 0x47a   : > { %4117 = vst [vmem:[#allocation1 + $0x30] ss:$2 sm:$0xff] %v10021_v36  ;;  %v8923_v30 = vld.sshfl [vmem:[#allocation1] sm:$0xff pattern:$0x75316420]  ;;  %v10026_v36 = vld [vmem:[#allocation59_spill] sm:$0xff]  ;;  %v8943_v47 = vadd.f32 %v3501_v44, %v3430_v28  ;;  %v8955_v28 = vadd.f32 %v3557_v46, %v8789_v34 }
 0x47b   : > { %v8925_v35 = vld.sshfl [vmem:[#allocation1 + $0x8] sm:$0xff pattern:$0x75316420]  ;;  %4118 = vst [vmem:[#allocation1 + $0x31] ss:$2 sm:$0xff] %v10026_v36  ;;  %3897 = vmatmul.f32.gmra.mxu2 %v10029_v24  ;;  %v4880_v24 = vld [vmem:[%s9223_s3 + $0x390] sm:$0xff] }
 0x47c   : > { %10024 = vst [vmem:[#allocation17_spill] sm:$0xff] %v8925_v35  ;;  %v8941_v33 = vld.sshfl [vmem:[#allocation1 + $0x10] sm:$0xff pattern:$0x75316420] }
 0x47d   : > { %4167 = vst [vmem:[#allocation1] ss:$2 sm:$0xff] %v10025_v17  ;;  %v3433_v17 = vpop.f32.mrf.mxu1  ;;  %3971 = vmatmul.f32.gmra.mxu3 %v8684_v26  ;;  %v10032_v26 = vld [vmem:[#allocation106_spill] sm:$0xff] }
 0x47e   : > { %4168 = vst [vmem:[#allocation1 + $0x1] ss:$2 sm:$0xff] %v3994_v56  ;;  %v3560_v56 = vpop.f32.mrf.mxu3  ;;  %4278 = vmatmul.f32.gmra.mxu0 %v8831_v45  ;;  %v10033_v45 = vld [vmem:[#allocation124_spill] sm:$0xff] }
 0x47f   : > { %4127 = vst [vmem:[#allocation1 + $0x10] ss:$2 sm:$0xff] %v10027_v1  ;;  %3826 = vmatmul.f32.gmra.mxu1 %v10028_v38  ;;  %v4896_v38 = vld [vmem:[%s9223_s3 + $0x410] sm:$0xff] }
 0x480   : > { %v8946_v35 = vld.sshfl [vmem:[#allocation1 + $0x20] sm:$0xff pattern:$0x75316420]  ;;  %v8948_v23 = vld.sshfl [vmem:[#allocation1 + $0x28] sm:$0xff pattern:$0x75316420]  ;;  %4390 = vmatpush.msra.mxu2 %v4896_v38 }
 0x481   : > { %4171 = vst [vmem:[#allocation1 + $0x20] ss:$2 sm:$0xff] %v3996_v63  ;;  %v3504_v36 = vpop.f32.mrf.mxu2  ;;  %v10031_v63 = vld [vmem:[#allocation96_spill] sm:$0xff] }
 0x482   : > { %4172 = vst [vmem:[#allocation1 + $0x21] ss:$2 sm:$0xff] %v3998_v22  ;;  %v8963_v44 = vld.sshfl [vmem:[#allocation1 + $0x30] sm:$0xff pattern:$0x75316420]  ;;  %v8966_v1 = vadd.f32 %v3504_v36, %v3433_v17  ;;  %v8974_v22 = vadd.f32 %v3560_v56, %v8812_v37 }
 0x483   : > { %4128 = vst [vmem:[#allocation1 + $0x11] ss:$2 sm:$0xff] %v10030_v2  ;;  %3900 = vmatmul.f32.gmra.mxu2 %v10033_v45  ;;  %v10039_v45 = vld [vmem:[#allocation119_spill] sm:$0xff] }
 0x484   : > { %4131 = vst [vmem:[#allocation1 + $0x30] ss:$2 sm:$0xff] %v10031_v63  ;;  %v3989_v63 = vrot.slane %v8877_v11, 2  ;;  %v10040_v11 = vld [vmem:[#allocation82_spill] sm:$0xff] }
 0x485   : > { %4132 = vst [vmem:[#allocation1 + $0x31] ss:$2 sm:$0xff] %v9968_v58  ;;  %v3436_v34 = vpop.f32.mrf.mxu1  ;;  %3974 = vmatmul.f32.gmra.mxu3 %v8705_v14  ;;  %v4881_v58 = vld [vmem:[%s9223_s3 + $0x398] sm:$0xff]  ;;  %v10034_v14 = vld [vmem:[#allocation87_spill] sm:$0xff] }
 0x486   : > { %v3563_v17 = vpop.f32.mrf.mxu3  ;;  %4281 = vmatmul.f32.gmra.mxu0 %v8848_v6  ;;  %4318 = vmatpush.msra.mxu1 %v4881_v58  ;;  %v4879_v58 = vld [vmem:[%s9223_s3 + $0x388] sm:$0xff] }
 0x487   : > { %3829 = vmatmul.f32.gmra.mxu1 %v10032_v26  ;;  %v10038_v26 = vld [vmem:[#allocation6_spill] sm:$0xff] }
 0x488   : > { %4319 = vmatpush.msra.mxu1 %v4880_v24 }
 0x489   : > { %v3507_v37 = vpop.f32.mrf.mxu2 }
 0x48a   : > { %v8969_v46 = vld.sshfl [vmem:[#allocation1 + $0x10] sm:$0xff pattern:$0x75316420]  ;;  %4320 = vmatpush.msra.mxu1 %v4879_v58 }
 0x48b   : > { %4141 = vst [vmem:[#allocation1 + $0x10] ss:$2 sm:$0xff] %v9972_v32  ;;  %v8988_v32 = vadd.f32 %v3507_v37, %v3436_v34  ;;  %3903 = vmatmul.f32.gmra.mxu2 %v10034_v14  ;;  %v10037_v34 = vld [vmem:[#allocation107_spill] sm:$0xff] }
 0x48c   : > { %4142 = vst [vmem:[#allocation1 + $0x11] ss:$2 sm:$0xff] %v9976_v60  ;;  %v8986_v56 = vld.sshfl [vmem:[#allocation1 + $0x30] sm:$0xff pattern:$0x75316420] }
 0x48d   : > { %4145 = vst [vmem:[#allocation1 + $0x30] ss:$2 sm:$0xff] %v9977_v53  ;;  %v3439_v60 = vpop.f32.mrf.mxu1  ;;  %3977 = vmatmul.f32.gmra.mxu3 %v8718_v54  ;;  %v9008_v54 = vadd.f32 %v3563_v17, %v8843_v49 }
 0x48e   : > { %4146 = vst [vmem:[#allocation1 + $0x31] ss:$2 sm:$0xff] %v9978_v25  ;;  %4284 = vmatmul.f32.gmra.mxu0 %v8869_v42  ;;  %v3566_v25 = vpop.f32.mrf.mxu3  ;;  %v3990_v42 = vrot.slane %v8866_v62, 2 }
 0x48f   : > { %3832 = vmatmul.f32.gmra.mxu1 %v8654_v10  ;;  %v9033_v14 = vadd.f32 %v3566_v25, %v8873_v0  ;;  %v4878_v0 = vld [vmem:[%s9223_s3 + $0x380] sm:$0xff] }
 0x490   : > { %v3991_v62 = vsel %vm328_vm1, %v3989_v63, %v3990_v42  ;;  %4321 = vmatpush.msra.mxu1 %v4878_v0  ;;  %v10043_v0 = vld [vmem:[#allocation89_spill] sm:$0xff] }
 0x491   : > { %v3510_v53 = vpop.f32.mrf.mxu2 }
 0x492   : > { %v9003_v10 = vadd.f32 %v3510_v53, %v3439_v60  ;;  %v4894_v53 = vld [vmem:[%s9223_s3 + $0x400] sm:$0xff] }
 0x493   : > { %v8994_v6 = vld.sshfl [vmem:[#allocation1 + $0x10] sm:$0xff pattern:$0x75316420]  ;;  %3906 = vmatmul.f32.gmra.mxu2 %v10038_v26 }
 0x494   : > { %4155 = vst [vmem:[#allocation1 + $0x10] ss:$2 sm:$0xff] %v9980_v29  ;;  %v10035_v29 = vld [vmem:[#allocation60_spill] sm:$0xff] }
 0x495   : > { %4156 = vst [vmem:[#allocation1 + $0x11] ss:$2 sm:$0xff] %v9981_v19  ;;  %v9005_v2 = vld.sshfl [vmem:[#allocation1 + $0x30] sm:$0xff pattern:$0x75316420]  ;;  %v3788_v40 = vpop.f32.mrf.mxu1  ;;  %v10036_v36 = vrot.slane %v10035_v29, 4  ;;  %3980 = vmatmul.f32.gmra.mxu3 %v8737_v57 }
 0x496   : > { %4159 = vst [vmem:[#allocation1 + $0x30] ss:$2 sm:$0xff] %v10035_v29  ;;  %v4895_v19 = vld [vmem:[%s9223_s3 + $0x408] sm:$0xff]  ;;  %4287 = vmatmul.f32.gmra.mxu0 %v8886_v9  ;;  %v3789_v17 = vadd.f32 %v3788_v40, %v10039_v45  ;;  %v3997_v57 = vrot.slane %v3991_v62, 4  ;;  %v3569_v9 = vpop.f32.mrf.mxu3  ;;  %v10041_v40 = vld [vmem:[#allocation10_spill] sm:$0xff] }
 0x497   : > { %4160 = vst [vmem:[#allocation1 + $0x31] ss:$2 sm:$0xff] %v10036_v36  ;;  %4391 = vmatpush.msra.mxu2 %v4895_v19  ;;  %3835 = vmatmul.f32.gmra.mxu1 %v10037_v34 }
 0x499   : > { %v3859_v38 = vpop.f32.mrf.mxu2  ;;  %4392 = vmatpush.msra.mxu2 %v4894_v53 }
 0x49a   : > { %v9030_v37 = vadd.f32 %v3859_v38, %v3789_v17 }
 0x49b   : > { %3909 = vmatmul.f32.gmra.mxu2 %v8691_v7 }
 0x49c   : > { %v9021_v49 = vld.sshfl [vmem:[#allocation1 + $0x10] sm:$0xff pattern:$0x75316420] }
 0x49d   : > { %4169 = vst [vmem:[#allocation1 + $0x10] ss:$2 sm:$0xff] %v10040_v11  ;;  %v3791_v60 = vpop.f32.mrf.mxu1 }
 0x49e   : > { %4170 = vst [vmem:[#allocation1 + $0x11] ss:$2 sm:$0xff] %v3991_v62  ;;  %v9035_v24 = vld.sshfl [vmem:[#allocation1 + $0x30] sm:$0xff pattern:$0x75316420]  ;;  %4290 = vmatmul.f32.gmra.mxu0 %v8910_v4  ;;  %v3792_v29 = vadd.f32 %v3791_v60, %v10041_v40  ;;  %v3572_v63 = vpop.f32.mrf.mxu3 }
 0x49f   : > { %4173 = vst [vmem:[#allocation1 + $0x30] ss:$2 sm:$0xff] %v3997_v57  ;;  %3838 = vmatmul.f32.gmra.mxu1 %v8689_v5  ;;  %v10042_v5 = vld [vmem:[#allocation123_spill] sm:$0xff]  ;;  %v9059_v62 = vadd.f32 %v3572_v63, %v8943_v47  ;;  %v4175_v47 = vld.sshfl [vmem:[#allocation1] sm:$0xff pattern:$0x75316420] }
 0x4a0   : > { %4174 = vst [vmem:[#allocation1 + $0x31] ss:$2 sm:$0xff] %v3990_v42  ;;  %v9050_v42 = vadd.f32 %v3569_v9, %v8908_v39  ;;  %v10045_v63 = vld [vmem:[#allocation108_spill] sm:$0xff] }
 0x4a1   : > { %v3862_v25 = vpop.f32.mrf.mxu2 }
 0x4a2   : > { %v9047_v36 = vadd.f32 %v3862_v25, %v3792_v29 }
 0x4a3   : > { %4393 = vmatmul.f32.vlgmr.msra.gmra.mxu2 %v8763_v31 }
 0x4a5   : > { %v3794_v19 = vpop.f32.mrf.mxu1 }
 0x4a6   : > { %4293 = vmatmul.f32.gmra.mxu0 %v8923_v30  ;;  %v3795_v7 = vadd.f32 %v3794_v19, %v8708_v21  ;;  %v3575_v39 = vpop.f32.mrf.mxu3 }
 0x4a7   : > { %4322 = vmatmul.f32.vlgmr.msra.gmra.mxu1 %v10042_v5  ;;  %v9068_v17 = vadd.f32 %v3575_v39, %v8966_v1  ;;  %v4178_v1 = vld.sshfl [vmem:[#allocation1 + $0x20] sm:$0xff pattern:$0x75316420] }
 0x4a9   : > { %v3865_v4 = vpop.f32.mrf.mxu2 }
 0x4aa   : > { %v9056_v34 = vadd.f32 %v3865_v4, %v3795_v7  ;;  %v10046_v7 = vld [vmem:[#allocation9_spill] sm:$0xff] }
 0x4ab   : > { %4396 = vmatmul.f32.gmra.mxu2 %v8777_v18 }
 0x4ad   : > { %v3797_v26 = vpop.f32.mrf.mxu1 }
 0x4ae   : > { %4296 = vmatmul.f32.gmra.mxu0 %v8946_v35  ;;  %v3798_v31 = vadd.f32 %v3797_v26, %v8740_v13  ;;  %v3578_v58 = vpop.f32.mrf.mxu3 }
 0x4af   : > { %4325 = vmatmul.f32.gmra.mxu1 %v8715_v43  ;;  %v9076_v11 = vadd.f32 %v3578_v58, %v8988_v32 }
 0x4b1   : > { %v3868_v45 = vpop.f32.mrf.mxu2 }
 0x4b2   : > { %v9065_v30 = vadd.f32 %v3868_v45, %v3798_v31  ;;  %v10047_v45 = vld [vmem:[#allocation14_spill] sm:$0xff] }
 0x4b3   : > { %4399 = vmatmul.f32.gmra.mxu2 %v8793_v55  ;;  %v4252_v58 = vpop.f32.mrf.mxu0 }
 0x4b5   : > { %v3800_v21 = vpop.f32.mrf.mxu1 }
 0x4b6   : > { %4299 = vmatmul.f32.gmra.mxu0 %v4175_v47  ;;  %v3801_v43 = vadd.f32 %v3800_v21, %v8766_v15  ;;  %v3581_v57 = vpop.f32.mrf.mxu3 }
 0x4b7   : > { %4328 = vmatmul.f32.gmra.mxu1 %v8725_v12  ;;  %v9084_v60 = vadd.f32 %v3581_v57, %v9003_v10 }
 0x4b9   : > { %v3871_v18 = vpop.f32.mrf.mxu2 }
 0x4ba   : > { %v9073_v35 = vadd.f32 %v3871_v18, %v3801_v43  ;;  %v10048_v43 = vld [vmem:[#allocation125_spill] sm:$0xff] }
 0x4bb   : > { %4402 = vmatmul.f32.gmra.mxu2 %v8820_v59 }
 0x4bd   : > { %v3803_v13 = vpop.f32.mrf.mxu1 }
 0x4be   : > { %4302 = vmatmul.f32.gmra.mxu0 %v4178_v1  ;;  %v3804_v12 = vadd.f32 %v3803_v13, %v8805_v48  ;;  %v10049_v13 = vld [vmem:[#allocation91_spill] sm:$0xff] }
 0x4bf   : > { %4331 = vmatmul.f32.gmra.mxu1 %v8744_v8 }
 0x4c1   : > { %v3874_v55 = vpop.f32.mrf.mxu2 }
 0x4c2   : > { %v9081_v38 = vadd.f32 %v3874_v55, %v3804_v12 }
 0x4c3   : > { %4405 = vmatmul.f32.gmra.mxu2 %v8845_v52 }
 0x4c5   : > { %v3806_v15 = vpop.f32.mrf.mxu1 }
 0x4c6   : > { %v3807_v8 = vadd.f32 %v3806_v15, %v8829_v27  ;;  %v10050_v15 = vld [vmem:[#allocation110_spill] sm:$0xff] }
 0x4c7   : > { %4334 = vmatmul.f32.gmra.mxu1 %v8758_v50 }
 0x4c9   : > { %v3877_v32 = vpop.f32.mrf.mxu2 }
 0x4ca   : > { %v9089_v9 = vadd.f32 %v3877_v32, %v3807_v8 }
 0x4cb   : > { %4408 = vmatmul.f32.gmra.mxu2 %v8856_v20 }
 0x4cd   : > { %v3809_v59 = vpop.f32.mrf.mxu1 }
 0x4ce   : > { %v3810_v48 = vadd.f32 %v3809_v59, %v8881_v3 }
 0x4cf   : > { %4337 = vmatmul.f32.gmra.mxu1 %v8771_v41  ;;  %v10044_v41 = vld [vmem:[#allocation12_spill] sm:$0xff] }
 0x4d1   : > { %v3880_v53 = vpop.f32.mrf.mxu2 }
 0x4d2   : > { %v9094_v40 = vadd.f32 %v3880_v53, %v3810_v48 }
 0x4d3   : > { %4411 = vmatmul.f32.gmra.mxu2 %v8892_v16 }
 0x4d5   : > { %v3812_v10 = vpop.f32.mrf.mxu1 }
 0x4d6   : > { %v3813_v50 = vadd.f32 %v3812_v10, %v8918_v61 }
 0x4d7   : > { %4340 = vmatmul.f32.gmra.mxu1 %v8787_v51 }
 0x4d9   : > { %v3883_v27 = vpop.f32.mrf.mxu2 }
 0x4da   : > { %v9099_v52 = vadd.f32 %v3883_v27, %v3813_v50 }
 0x4db   : > { %4414 = vmatmul.f32.gmra.mxu2 %v10044_v41  ;;  %v4176_v41 = vld.sshfl [vmem:[#allocation1 + $0x8] sm:$0xff pattern:$0x75316420] }
 0x4dd   : > { %v3815_v29 = vpop.f32.mrf.mxu1 }
 0x4de   : > { %v3816_v20 = vadd.f32 %v3815_v29, %v8955_v28 }
 0x4df   : > { %4343 = vmatmul.f32.gmra.mxu1 %v10043_v0 }
 0x4e1   : > { %v3886_v3 = vpop.f32.mrf.mxu2 }
 0x4e2   : > { %v9104_v25 = vadd.f32 %v3886_v3, %v3816_v20 }
 0x4e3   : > { %4417 = vmatmul.f32.gmra.mxu2 %v8941_v33 }
 0x4e5   : > { %v3818_v19 = vpop.f32.mrf.mxu1 }
 0x4e6   : > { %v3819_v51 = vadd.f32 %v3818_v19, %v8974_v22 }
 0x4e7   : > { %4346 = vmatmul.f32.gmra.mxu1 %v10045_v63 }
 0x4e9   : > { %v3889_v16 = vpop.f32.mrf.mxu2 }
 0x4ea   : > { %v9109_v61 = vadd.f32 %v3889_v16, %v3819_v51  ;;  %v4179_v16 = vld.sshfl [vmem:[#allocation1 + $0x28] sm:$0xff pattern:$0x75316420] }
 0x4eb   : > { %4420 = vmatmul.f32.gmra.mxu2 %v8963_v44 }
 0x4ed   : > { %v3821_v5 = vpop.f32.mrf.mxu1 }
 0x4ee   : > { %v3822_v28 = vadd.f32 %v3821_v5, %v9008_v54 }
 0x4ef   : > { %4349 = vmatmul.f32.gmra.mxu1 %v10046_v7  ;;  %v4180_v7 = vld.sshfl [vmem:[#allocation1 + $0x30] sm:$0xff pattern:$0x75316420] }
 0x4f1   : > { %v3892_v4 = vpop.f32.mrf.mxu2 }
 0x4f2   : > { %v9114_v26 = vadd.f32 %v3892_v4, %v3822_v28 }
 0x4f3   : > { %4423 = vmatmul.f32.gmra.mxu2 %v8969_v46  ;;  %v3930_v46 = vpop.f32.mrf.mxu3 }
 0x4f4   : > { %v3931_v63 = vadd.f32 %v3930_v46, %v9030_v37 }
 0x4f5   : > { %v3824_v39 = vpop.f32.mrf.mxu1 }
 0x4f6   : > { %v3825_v31 = vadd.f32 %v3824_v39, %v9033_v14 }
 0x4f7   : > { %4352 = vmatmul.f32.gmra.mxu1 %v10047_v45 }
 0x4f9   : > { %v3895_v33 = vpop.f32.mrf.mxu2 }
 0x4fa   : > { %v9119_v22 = vadd.f32 %v3895_v33, %v3825_v31 }
 0x4fb   : > { %4426 = vmatmul.f32.gmra.mxu2 %v8986_v56  ;;  %v4255_v56 = vpop.f32.mrf.mxu0  ;;  %v3933_v8 = vpop.f32.mrf.mxu3 }
 0x4fc   : > { %v3934_v45 = vadd.f32 %v3933_v8, %v9047_v36 }
 0x4fd   : > { %v3827_v21 = vpop.f32.mrf.mxu1 }
 0x4fe   : > { %v3828_v47 = vadd.f32 %v3827_v21, %v9050_v42 }
 0x4ff   : > { %4355 = vmatmul.f32.gmra.mxu1 %v10048_v43 }
 0x501   : > { %v3898_v44 = vpop.f32.mrf.mxu2 }
 0x502   : > { %v9124_v54 = vadd.f32 %v3898_v44, %v3828_v47 }
 0x503   : > { %4429 = vmatmul.f32.gmra.mxu2 %v8994_v6  ;;  %v10051_v6 = vld [vmem:[#allocation17_spill] sm:$0xff]  ;;  %v4258_v48 = vpop.f32.mrf.mxu0  ;;  %v3936_v50 = vpop.f32.mrf.mxu3 }
 0x505   : > { %v3830_v18 = vpop.f32.mrf.mxu1 }
 0x506   : > { %v3831_v14 = vadd.f32 %v3830_v18, %v9059_v62 }
 0x507   : > { %4358 = vmatmul.f32.gmra.mxu1 %v10049_v13 }
 0x509   : > { %v3901_v1 = vpop.f32.mrf.mxu2 }
 0x50a   : > { %v9129_v12 = vadd.f32 %v3901_v1, %v3831_v14  ;;  %v3937_v1 = vadd.f32 %v3936_v50, %v9056_v34 }
 0x50b   : > { %4432 = vmatmul.f32.gmra.mxu2 %v9005_v2  ;;  %v4261_v0 = vpop.f32.mrf.mxu0  ;;  %v3939_v20 = vpop.f32.mrf.mxu3 }
 0x50d   : > { %v3833_v42 = vpop.f32.mrf.mxu1 }
 0x50e   : > { %v3834_v55 = vadd.f32 %v3833_v42, %v9068_v17 }
 0x50f   : > { %4361 = vmatmul.f32.gmra.mxu1 %v10050_v15 }
 0x511   : > { %v3904_v57 = vpop.f32.mrf.mxu2 }
 0x512   : > { %v9134_v62 = vadd.f32 %v3904_v57, %v3834_v55 }
 0x513   : > { %4435 = vmatmul.f32.gmra.mxu2 %v9021_v49  ;;  %v4177_v49 = vld.sshfl [vmem:[#allocation1 + $0x10] sm:$0xff pattern:$0x75316420]  ;;  %v4264_v5 = vpop.f32.mrf.mxu0  ;;  %v3942_v4 = vpop.f32.mrf.mxu3 }
 0x515   : > { %v3836_v32 = vpop.f32.mrf.mxu1 }
 0x516   : > { %v3837_v59 = vadd.f32 %v3836_v32, %v9076_v11 }
 0x517   : > { %4364 = vmatmul.f32.gmra.mxu1 %v10051_v6 }
 0x519   : > { %v3907_v53 = vpop.f32.mrf.mxu2 }
 0x51a   : > { %v9139_v10 = vadd.f32 %v3907_v53, %v3837_v59 }
 0x51b   : > { %4438 = vmatmul.f32.gmra.mxu2 %v9035_v24  ;;  %v4267_v18 = vpop.f32.mrf.mxu0  ;;  %v3945_v13 = vpop.f32.mrf.mxu3 }
 0x51d   : > { %v3839_v17 = vpop.f32.mrf.mxu1 }
 0x51e   : > { %v3840_v2 = vadd.f32 %v3839_v17, %v9084_v60 }
 0x51f   : > { %4367 = vmatmul.f32.gmra.mxu1 %v8948_v23  ;;  %v9150_v23 = vld [vmem:[%s9224_s4] ss:$0 sm:$0xff] }
 0x521   : > { %v3910_v27 = vpop.f32.mrf.mxu2 }
 0x522   : > { %v9144_v29 = vadd.f32 %v3910_v27, %v3840_v2 }
 0x523   : > { %4441 = vmatmul.f32.gmra.mxu2 %v4177_v49  ;;  %v4270_v34 = vpop.f32.mrf.mxu0  ;;  %v3948_v2 = vpop.f32.mrf.mxu3 }
 0x525   : > { %v4323_v11 = vpop.f32.mrf.mxu1 }
 0x526   : > { %v4324_v3 = vadd.f32 %v4323_v11, %v4252_v58 }
 0x527   : > { %4370 = vmatmul.f32.gmra.mxu1 %v4176_v41 }
 0x529   : > { %v4394_v19 = vpop.f32.mrf.mxu2 }
 0x52a   : > { %v4395_v51 = vadd.f32 %v4394_v19, %v4324_v3  ;;  %v3943_v19 = vadd.f32 %v3942_v4, %v9073_v35 }
 0x52b   : > { %4444 = vmatmul.f32.gmra.mxu2 %v4180_v7 }
 0x52c   : > { %v4448_v60 = vadd.f32 %v4395_v51, %v3931_v63  ;;  %v4273_v51 = vpop.f32.mrf.mxu0 }
 0x52d   : > { %v4326_v24 = vpop.f32.mrf.mxu1 }
 0x52e   : > { %v4470_v28 = vadd.f32 %v9150_v23, %v4448_v60  ;;  %v4327_v31 = vadd.f32 %v4326_v24, %v4255_v56 }
 0x52f   : > { %4373 = vmatmul.f32.gmra.mxu1 %v4179_v16  ;;  %v3951_v16 = vpop.f32.mrf.mxu3 }
 0x530   : > { %v4488_v39 = vmax.f32 %v4470_v28, 0.0 }
 0x531   : > { %v4397_v37 = vpop.f32.mrf.mxu2 }
 0x532   : > { %v4524_v33 = vrot.slane %v4488_v39, 4  ;;  %4542 = vst [vmem:[#allocation1] ss:$2 sm:$0xff] %v4488_v39  ;;  %v4398_v21 = vadd.f32 %v4397_v37, %v4327_v31  ;;  %v3946_v31 = vadd.f32 %v3945_v13, %v9081_v38 }
 0x534   : > { %4544 = vst [vmem:[#allocation1 + $0x1] ss:$2 sm:$0xff] %v4524_v33  ;;  %v4449_v43 = vadd.f32 %v4398_v21, %v3934_v45  ;;  %v4276_v21 = vpop.f32.mrf.mxu0 }
 0x535   : > { %v4329_v47 = vpop.f32.mrf.mxu1 }
 0x536   : > { %v4471_v44 = vadd.f32 %v9150_v23, %v4449_v43  ;;  %v4330_v58 = vadd.f32 %v4329_v47, %v4258_v48  ;;  %v3940_v48 = vadd.f32 %v3939_v20, %v9065_v30 }
 0x537   : > { %v3954_v43 = vpop.f32.mrf.mxu3 }
 0x538   : > { %v4489_v14 = vmax.f32 %v4471_v44, 0.0 }
 0x539   : > { %v4400_v46 = vpop.f32.mrf.mxu2 }
 0x53a   : > { %v4525_v42 = vrot.slane %v4489_v14, 4  ;;  %4546 = vst [vmem:[#allocation1 + $0x10] ss:$2 sm:$0xff] %v4489_v14  ;;  %v4401_v36 = vadd.f32 %v4400_v46, %v4330_v58  ;;  %v3949_v46 = vadd.f32 %v3948_v2, %v9089_v9 }
 0x53b   : > { %v4547_v15 = vld.sshfl [vmem:[#allocation1] sm:$0xff pattern:$0x75316420] }
 0x53c   : > { %4550 = vst [vmem:[#allocation1 + $0x20] ss:$2 sm:$0xff] %v4525_v42  ;;  %v4450_v56 = vadd.f32 %v4401_v36, %v3937_v1 }
 0x53d   : > { %v4332_v55 = vpop.f32.mrf.mxu1  ;;  %4631 = vst [vmem:[%s9160_s22] sm:$0xff] %v4547_v15 }
 0x53e   : > { %v4472_v57 = vadd.f32 %v9150_v23, %v4450_v56  ;;  %v4333_v32 = vadd.f32 %v4332_v55, %v4261_v0  ;;  %v4279_v55 = vpop.f32.mrf.mxu0 }
 0x540   : > { %v4490_v8 = vmax.f32 %v4472_v57, 0.0  ;;  %v3957_v57 = vpop.f32.mrf.mxu3 }
 0x541   : > { %v4548_v59 = vld.sshfl [vmem:[#allocation1 + $0x10] sm:$0xff pattern:$0x75316420]  ;;  %v4403_v6 = vpop.f32.mrf.mxu2 }
 0x542   : > { %v4526_v53 = vrot.slane %v4490_v8, 4  ;;  %4552 = vst [vmem:[#allocation1 + $0x21] ss:$2 sm:$0xff] %v4490_v8  ;;  %v4404_v17 = vadd.f32 %v4403_v6, %v4333_v32  ;;  %v3952_v32 = vadd.f32 %v3951_v16, %v9094_v40  ;;  %v3958_v16 = vadd.f32 %v3957_v57, %v9104_v25 }
 0x543   : > { %4632 = vst [vmem:[%s9160_s22 + $0x8] sm:$0xf] %v4548_v59 }
 0x544   : > { %4554 = vst [vmem:[#allocation1 + $0x30] ss:$2 sm:$0xff] %v4526_v53  ;;  %v4451_v27 = vadd.f32 %v4404_v17, %v3940_v48 }
 0x545   : > { %v4335_v50 = vpop.f32.mrf.mxu1 }
 0x546   : > { %v4473_v11 = vadd.f32 %v9150_v23, %v4451_v27  ;;  %v4336_v49 = vadd.f32 %v4335_v50, %v4264_v5  ;;  %v4282_v27 = vpop.f32.mrf.mxu0 }
 0x548   : > { %v4491_v41 = vmax.f32 %v4473_v11, 0.0 }
 0x549   : > { %v4555_v0 = vld.sshfl [vmem:[#allocation1 + $0x20] sm:$0xff pattern:$0x75316420]  ;;  %v4406_v3 = vpop.f32.mrf.mxu2 }
 0x54a   : > { %4633 = vst [vmem:[%s9160_s22 + $0x10] sm:$0xff] %v4555_v0  ;;  %v4527_v63 = vrot.slane %v4491_v41, 4  ;;  %v4407_v30 = vadd.f32 %v4406_v3, %v4336_v49  ;;  %v3960_v3 = vpop.f32.mrf.mxu3 }
 0x54b   : > { %v4556_v24 = vld.sshfl [vmem:[#allocation1 + $0x30] sm:$0xff pattern:$0x75316420]  ;;  %4557 = vst [vmem:[#allocation1] ss:$2 sm:$0xff] %v4491_v41  ;;  %v3955_v41 = vadd.f32 %v3954_v43, %v9099_v52 }
 0x54c   : > { %4634 = vst [vmem:[%s9160_s22 + $0x18] sm:$0xf] %v4556_v24  ;;  %v4452_v60 = vadd.f32 %v4407_v30, %v3943_v19 }
 0x54d   : > { %v4338_v20 = vpop.f32.mrf.mxu1  ;;  %4558 = vst [vmem:[#allocation1 + $0x1] ss:$2 sm:$0xff] %v4527_v63 }
 0x54e   : > { %v4474_v7 = vadd.f32 %v9150_v23, %v4452_v60  ;;  %v4339_v5 = vadd.f32 %v4338_v20, %v4267_v18 }
 0x550   : > { %v4492_v28 = vmax.f32 %v4474_v7, 0.0 }
 0x551   : > { %v4409_v39 = vpop.f32.mrf.mxu2 }
 0x552   : > { %v4528_v35 = vrot.slane %v4492_v28, 4  ;;  %4559 = vst [vmem:[#allocation1 + $0x10] ss:$2 sm:$0xff] %v4492_v28  ;;  %v4410_v4 = vadd.f32 %v4409_v39, %v4339_v5  ;;  %v4285_v5 = vpop.f32.mrf.mxu0 }
 0x554   : > { %v4560_v45 = vld.sshfl [vmem:[#allocation1] sm:$0xff pattern:$0x75316420]  ;;  %4562 = vst [vmem:[#allocation1 + $0x20] ss:$2 sm:$0xff] %v4528_v35  ;;  %v4453_v33 = vadd.f32 %v4410_v4, %v3946_v31  ;;  %v3963_v31 = vpop.f32.mrf.mxu3 }
 0x555   : > { %v4341_v37 = vpop.f32.mrf.mxu1  ;;  %4635 = vst [vmem:[%s9160_s22 + $0x20] sm:$0xff] %v4560_v45 }
 0x556   : > { %v4475_v47 = vadd.f32 %v9150_v23, %v4453_v33  ;;  %v4342_v14 = vadd.f32 %v4341_v37, %v4270_v34  ;;  %v3961_v33 = vadd.f32 %v3960_v3, %v9109_v61  ;;  %v3964_v61 = vadd.f32 %v3963_v31, %v9114_v26 }
 0x558   : > { %v4493_v44 = vmax.f32 %v4475_v47, 0.0 }
 0x559   : > { %v4561_v58 = vld.sshfl [vmem:[#allocation1 + $0x10] sm:$0xff pattern:$0x75316420]  ;;  %v4412_v18 = vpop.f32.mrf.mxu2 }
 0x55a   : > { %4636 = vst [vmem:[%s9160_s22 + $0x28] sm:$0xf] %v4561_v58  ;;  %v4529_v38 = vrot.slane %v4493_v44, 4  ;;  %v4413_v13 = vadd.f32 %v4412_v18, %v4342_v14  ;;  %v4288_v58 = vpop.f32.mrf.mxu0 }
 0x55b   : > { %4563 = vst [vmem:[#allocation1 + $0x21] ss:$2 sm:$0xff] %v4493_v44 }
 0x55c   : > { %4564 = vst [vmem:[#allocation1 + $0x30] ss:$2 sm:$0xff] %v4529_v38  ;;  %v4454_v42 = vadd.f32 %v4413_v13, %v3949_v46  ;;  %v3966_v46 = vpop.f32.mrf.mxu3 }
 0x55d   : > { %v4344_v1 = vpop.f32.mrf.mxu1 }
 0x55e   : > { %v4476_v36 = vadd.f32 %v9150_v23, %v4454_v42  ;;  %v4345_v56 = vadd.f32 %v4344_v1, %v4273_v51 }
 0x560   : > { %v4494_v15 = vmax.f32 %v4476_v36, 0.0 }
 0x561   : > { %v4415_v8 = vpop.f32.mrf.mxu2 }
 0x562   : > { %v4565_v34 = vld.sshfl [vmem:[#allocation1 + $0x20] sm:$0xff pattern:$0x75316420]  ;;  %v4530_v9 = vrot.slane %v4494_v15, 4  ;;  %4567 = vst [vmem:[#allocation1] ss:$2 sm:$0xff] %v4494_v15  ;;  %v4416_v59 = vadd.f32 %v4415_v8, %v4345_v56  ;;  %v4291_v8 = vpop.f32.mrf.mxu0 }
 0x563   : > { %v4566_v48 = vld.sshfl [vmem:[#allocation1 + $0x30] sm:$0xff pattern:$0x75316420]  ;;  %4637 = vst [vmem:[%s9160_s22 + $0x30] sm:$0xff] %v4565_v34 }
 0x564   : > { %4638 = vst [vmem:[%s9160_s22 + $0x38] sm:$0xf] %v4566_v48  ;;  %v4455_v53 = vadd.f32 %v4416_v59, %v3952_v32  ;;  %v3967_v48 = vadd.f32 %v3966_v46, %v9119_v22 }
 0x565   : > { %v4347_v6 = vpop.f32.mrf.mxu1  ;;  %4568 = vst [vmem:[#allocation1 + $0x1] ss:$2 sm:$0xff] %v4530_v9  ;;  %v3969_v9 = vpop.f32.mrf.mxu3 }
 0x566   : > { %v4477_v17 = vadd.f32 %v9150_v23, %v4455_v53  ;;  %v4348_v2 = vadd.f32 %v4347_v6, %v4276_v21 }
 0x568   : > { %v4495_v50 = vmax.f32 %v4477_v17, 0.0 }
 0x569   : > { %v4418_v11 = vpop.f32.mrf.mxu2 }
 0x56a   : > { %v4531_v40 = vrot.slane %v4495_v50, 4  ;;  %4569 = vst [vmem:[#allocation1 + $0x10] ss:$2 sm:$0xff] %v4495_v50  ;;  %v4419_v49 = vadd.f32 %v4418_v11, %v4348_v2 }
 0x56c   : > { %v4570_v19 = vld.sshfl [vmem:[#allocation1] sm:$0xff pattern:$0x75316420]  ;;  %4572 = vst [vmem:[#allocation1 + $0x20] ss:$2 sm:$0xff] %v4531_v40  ;;  %v4456_v63 = vadd.f32 %v4419_v49, %v3955_v41  ;;  %v4294_v41 = vpop.f32.mrf.mxu0  ;;  %v3970_v49 = vadd.f32 %v3969_v9, %v9124_v54 }
 0x56d   : > { %v4350_v0 = vpop.f32.mrf.mxu1  ;;  %4639 = vst [vmem:[%s9160_s22 + $0x40] sm:$0xff] %v4570_v19 }
 0x56e   : > { %v4478_v30 = vadd.f32 %v9150_v23, %v4456_v63  ;;  %v4351_v51 = vadd.f32 %v4350_v0, %v4279_v55  ;;  %v3972_v63 = vpop.f32.mrf.mxu3 }
 0x570   : > { %v4496_v20 = vmax.f32 %v4478_v30, 0.0 }
 0x571   : > { %v4571_v24 = vld.sshfl [vmem:[#allocation1 + $0x10] sm:$0xff pattern:$0x75316420]  ;;  %v4421_v60 = vpop.f32.mrf.mxu2 }
 0x572   : > { %4640 = vst [vmem:[%s9160_s22 + $0x48] sm:$0xf] %v4571_v24  ;;  %v4532_v52 = vrot.slane %v4496_v20, 4  ;;  %v4422_v7 = vadd.f32 %v4421_v60, %v4351_v51 }
 0x573   : > { %4573 = vst [vmem:[#allocation1 + $0x21] ss:$2 sm:$0xff] %v4496_v20 }
 0x574   : > { %4574 = vst [vmem:[#allocation1 + $0x30] ss:$2 sm:$0xff] %v4532_v52  ;;  %v4457_v39 = vadd.f32 %v4422_v7, %v3958_v16  ;;  %v3973_v52 = vadd.f32 %v3972_v63, %v9129_v12 }
 0x575   : > { %v4353_v28 = vpop.f32.mrf.mxu1 }
 0x576   : > { %v4479_v35 = vadd.f32 %v9150_v23, %v4457_v39  ;;  %v4354_v37 = vadd.f32 %v4353_v28, %v4282_v27 }
 0x578   : > { %v4497_v4 = vmax.f32 %v4479_v35, 0.0  ;;  %v3975_v35 = vpop.f32.mrf.mxu3 }
 0x579   : > { %v4424_v45 = vpop.f32.mrf.mxu2 }
 0x57a   : > { %v4575_v21 = vld.sshfl [vmem:[#allocation1 + $0x20] sm:$0xff pattern:$0x75316420]  ;;  %v4533_v25 = vrot.slane %v4497_v4, 4  ;;  %4577 = vst [vmem:[#allocation1] ss:$2 sm:$0xff] %v4497_v4  ;;  %v4425_v47 = vadd.f32 %v4424_v45, %v4354_v37 }
 0x57b   : > { %v4576_v44 = vld.sshfl [vmem:[#allocation1 + $0x30] sm:$0xff pattern:$0x75316420]  ;;  %4641 = vst [vmem:[%s9160_s22 + $0x50] sm:$0xff] %v4575_v21 }
 0x57c   : > { %4642 = vst [vmem:[%s9160_s22 + $0x58] sm:$0xf] %v4576_v44  ;;  %v4458_v14 = vadd.f32 %v4425_v47, %v3961_v33 }
 0x57d   : > { %v4356_v43 = vpop.f32.mrf.mxu1  ;;  %4578 = vst [vmem:[#allocation1 + $0x1] ss:$2 sm:$0xff] %v4533_v25  ;;  %v3976_v25 = vadd.f32 %v3975_v35, %v9134_v62 }
 0x57e   : > { %v4480_v18 = vadd.f32 %v9150_v23, %v4458_v14  ;;  %v4357_v13 = vadd.f32 %v4356_v43, %v4285_v5  ;;  %v4297_v5 = vpop.f32.mrf.mxu0 }
 0x580   : > { %v4498_v38 = vmax.f32 %v4480_v18, 0.0  ;;  %v3978_v18 = vpop.f32.mrf.mxu3 }
 0x581   : > { %v4427_v1 = vpop.f32.mrf.mxu2 }
 0x582   : > { %v4534_v42 = vrot.slane %v4498_v38, 4  ;;  %4579 = vst [vmem:[#allocation1 + $0x10] ss:$2 sm:$0xff] %v4498_v38  ;;  %v4428_v36 = vadd.f32 %v4427_v1, %v4357_v13  ;;  %v3979_v1 = vadd.f32 %v3978_v18, %v9139_v10 }
 0x584   : > { %v4580_v15 = vld.sshfl [vmem:[#allocation1] sm:$0xff pattern:$0x75316420]  ;;  %4582 = vst [vmem:[#allocation1 + $0x20] ss:$2 sm:$0xff] %v4534_v42  ;;  %v4459_v56 = vadd.f32 %v4428_v36, %v3964_v61 }
 0x585   : > { %v4359_v55 = vpop.f32.mrf.mxu1  ;;  %4643 = vst [vmem:[%s9160_s22 + $0x60] sm:$0xff] %v4580_v15 }
 0x586   : > { %v4481_v57 = vadd.f32 %v9150_v23, %v4459_v56  ;;  %v4360_v34 = vadd.f32 %v4359_v55, %v4288_v58  ;;  %v4300_v14 = vpop.f32.mrf.mxu0 }
 0x588   : > { %v4499_v32 = vmax.f32 %v4481_v57, 0.0 }
 0x589   : > { %v4581_v59 = vld.sshfl [vmem:[#allocation1 + $0x10] sm:$0xff pattern:$0x75316420]  ;;  %v4430_v6 = vpop.f32.mrf.mxu2 }
 0x58a   : > { %4644 = vst [vmem:[%s9160_s22 + $0x68] sm:$0xf] %v4581_v59  ;;  %v4535_v26 = vrot.slane %v4499_v32, 4  ;;  %v4431_v53 = vadd.f32 %v4430_v6, %v4360_v34  ;;  %v3981_v34 = vpop.f32.mrf.mxu3 }
 0x58b   : > { %4583 = vst [vmem:[#allocation1 + $0x21] ss:$2 sm:$0xff] %v4499_v32  ;;  %v3982_v10 = vadd.f32 %v3981_v34, %v9144_v29 }
 0x58c   : > { %4584 = vst [vmem:[#allocation1 + $0x30] ss:$2 sm:$0xff] %v4535_v26  ;;  %v4460_v50 = vadd.f32 %v4431_v53, %v3967_v48 }
 0x58d   : > { %v4362_v17 = vpop.f32.mrf.mxu1 }
 0x58e   : > { %v4482_v2 = vadd.f32 %v9150_v23, %v4460_v50  ;;  %v4363_v11 = vadd.f32 %v4362_v17, %v4291_v8  ;;  %v4303_v57 = vpop.f32.mrf.mxu0 }
 0x590   : > { %v4500_v27 = vmax.f32 %v4482_v2, 0.0 }
 0x591   : > { %v4433_v40 = vpop.f32.mrf.mxu2 }
 0x592   : > { %v4585_v0 = vld.sshfl [vmem:[#allocation1 + $0x20] sm:$0xff pattern:$0x75316420]  ;;  %v4536_v3 = vrot.slane %v4500_v27, 4  ;;  %4587 = vst [vmem:[#allocation1] ss:$2 sm:$0xff] %v4500_v27  ;;  %v4434_v22 = vadd.f32 %v4433_v40, %v4363_v11 }
 0x593   : > { %v4586_v30 = vld.sshfl [vmem:[#allocation1 + $0x30] sm:$0xff pattern:$0x75316420]  ;;  %4645 = vst [vmem:[%s9160_s22 + $0x70] sm:$0xff] %v4585_v0 }
 0x594   : > { %4646 = vst [vmem:[%s9160_s22 + $0x78] sm:$0xf] %v4586_v30  ;;  %v4461_v20 = vadd.f32 %v4434_v22, %v3970_v49 }
 0x595   : > { %v4365_v19 = vpop.f32.mrf.mxu1  ;;  %4588 = vst [vmem:[#allocation1 + $0x1] ss:$2 sm:$0xff] %v4536_v3 }
 0x596   : > { %v4483_v51 = vadd.f32 %v9150_v23, %v4461_v20  ;;  %v4366_v60 = vadd.f32 %v4365_v19, %v4294_v41 }
 0x598   : > { %v4501_v24 = vmax.f32 %v4483_v51, 0.0 }
 0x599   : > { %v4436_v16 = vpop.f32.mrf.mxu2 }
 0x59a   : > { %v4537_v54 = vrot.slane %v4501_v24, 4  ;;  %4589 = vst [vmem:[#allocation1 + $0x10] ss:$2 sm:$0xff] %v4501_v24  ;;  %v4437_v7 = vadd.f32 %v4436_v16, %v4366_v60 }
 0x59c   : > { %v4590_v39 = vld.sshfl [vmem:[#allocation1] sm:$0xff pattern:$0x75316420]  ;;  %4592 = vst [vmem:[#allocation1 + $0x20] ss:$2 sm:$0xff] %v4537_v54  ;;  %v4462_v31 = vadd.f32 %v4437_v7, %v3973_v52 }
 0x59d   : > { %v4368_v28 = vpop.f32.mrf.mxu1  ;;  %4647 = vst [vmem:[%s9160_s22 + $0x80] sm:$0xff] %v4590_v39 }
 0x59e   : > { %v4484_v4 = vadd.f32 %v9150_v23, %v4462_v31  ;;  %v4369_v45 = vadd.f32 %v4368_v28, %v4297_v5 }
 0x5a0   : > { %v4502_v37 = vmax.f32 %v4484_v4, 0.0 }
 0x5a1   : > { %v4591_v33 = vld.sshfl [vmem:[#allocation1 + $0x10] sm:$0xff pattern:$0x75316420]  ;;  %v4439_v21 = vpop.f32.mrf.mxu2 }
 0x5a2   : > { %4648 = vst [vmem:[%s9160_s22 + $0x88] sm:$0xf] %v4591_v33  ;;  %v4538_v12 = vrot.slane %v4502_v37, 4  ;;  %v4440_v47 = vadd.f32 %v4439_v21, %v4369_v45 }
 0x5a3   : > { %4593 = vst [vmem:[#allocation1 + $0x21] ss:$2 sm:$0xff] %v4502_v37 }
 0x5a4   : > { %4594 = vst [vmem:[#allocation1 + $0x30] ss:$2 sm:$0xff] %v4538_v12  ;;  %v4463_v44 = vadd.f32 %v4440_v47, %v3976_v25 }
 0x5a5   : > { %v4371_v43 = vpop.f32.mrf.mxu1 }
 0x5a6   : > { %v4485_v58 = vadd.f32 %v9150_v23, %v4463_v44  ;;  %v4372_v38 = vadd.f32 %v4371_v43, %v4300_v14 }
 0x5a8   : > { %v4503_v46 = vmax.f32 %v4485_v58, 0.0 }
 0x5a9   : > { %v4442_v13 = vpop.f32.mrf.mxu2 }
 0x5aa   : > { %v4595_v61 = vld.sshfl [vmem:[#allocation1 + $0x20] sm:$0xff pattern:$0x75316420]  ;;  %v4539_v62 = vrot.slane %v4503_v46, 4  ;;  %4597 = vst [vmem:[#allocation1] ss:$2 sm:$0xff] %v4503_v46  ;;  %v4443_v42 = vadd.f32 %v4442_v13, %v4372_v38 }
 0x5ab   : > { %v4596_v36 = vld.sshfl [vmem:[#allocation1 + $0x30] sm:$0xff pattern:$0x75316420]  ;;  %4649 = vst [vmem:[%s9160_s22 + $0x90] sm:$0xff] %v4595_v61 }
 0x5ac   : > { %4650 = vst [vmem:[%s9160_s22 + $0x98] sm:$0xf] %v4596_v36  ;;  %v4464_v55 = vadd.f32 %v4443_v42, %v3979_v1 }
 0x5ad   : > { %4598 = vst [vmem:[#allocation1 + $0x1] ss:$2 sm:$0xff] %v4539_v62  ;;  %v4374_v15 = vpop.f32.mrf.mxu1 }
 0x5ae   : > { %v4486_v56 = vadd.f32 %v9150_v23, %v4464_v55  ;;  %v4375_v32 = vadd.f32 %v4374_v15, %v4303_v57 }
 0x5b0   : > { %v4504_v8 = vmax.f32 %v4486_v56, 0.0 }
 0x5b1   : > { %v4445_v9 = vpop.f32.mrf.mxu2 }
 0x5b2   : > { %v4540_v59 = vrot.slane %v4504_v8, 4  ;;  %4599 = vst [vmem:[#allocation1 + $0x10] ss:$2 sm:$0xff] %v4504_v8  ;;  %v4446_v6 = vadd.f32 %v4445_v9, %v4375_v32 }
 0x5b4   : > { %v4600_v48 = vld.sshfl [vmem:[#allocation1] sm:$0xff pattern:$0x75316420]  ;;  %4602 = vst [vmem:[#allocation1 + $0x20] ss:$2 sm:$0xff] %v4540_v59  ;;  %v4465_v26 = vadd.f32 %v4446_v6, %v3982_v10 }
 0x5b5   : > { %4651 = vst [vmem:[%s9160_s22 + $0xa0] sm:$0xff] %v4600_v48 }
 0x5b6   : > { %v4487_v53 = vadd.f32 %v9150_v23, %v4465_v26 }
 0x5b8   : > { %v4505_v17 = vmax.f32 %v4487_v53, 0.0 }
 0x5b9   : > { %v4601_v50 = vld.sshfl [vmem:[#allocation1 + $0x10] sm:$0xff pattern:$0x75316420] }
 0x5ba   : > { %4652 = vst [vmem:[%s9160_s22 + $0xa8] sm:$0xf] %v4601_v50  ;;  %v4541_v2 = vrot.slane %v4505_v17, 4 }
 0x5bb   : > { %4603 = vst [vmem:[#allocation1 + $0x21] ss:$2 sm:$0xff] %v4505_v17 }
 0x5bc   : > { %4604 = vst [vmem:[#allocation1 + $0x30] ss:$2 sm:$0xff] %v4541_v2 }
 0x5c2   : > { %v4605_v27 = vld.sshfl [vmem:[#allocation1 + $0x20] sm:$0xff pattern:$0x75316420] }
 0x5c3   : > { %v4606_v11 = vld.sshfl [vmem:[#allocation1 + $0x30] sm:$0xff pattern:$0x75316420]  ;;  %4653 = vst [vmem:[%s9160_s22 + $0xb0] sm:$0xff] %v4605_v27 }
 0x5c4   : > { %4654 = vst [vmem:[%s9160_s22 + $0xb8] sm:$0xf] %v4606_v11 }
 0x5c5 PF: > { %s15_s18 = sadd.s32 1, %s4981_s18  }
 0x5c6   : > { %p12_p4 = scmp.ge.s32.totalorder %s15_s18, 4  }
 0x5c8   :  { %14 = sbr.rel (!%p12_p4) target bundleno = 1 (0x1), region = 127 }

</bundles_post_ra>
